<compile_context>
chip_gen: v7x
topology: tpu7x:2x2x1
jax: 0.10.0
libtpu: 0.0.40
codegen_flags: <defaults>
</compile_context>

<pallas_src>
import math
import numpy as np
import jax
import jax.numpy as jnp
from jax.experimental import pallas as pl
from jax.experimental.pallas import tpu as pltpu

# ---------------- configuration (small synthetic shapes) ----------------
B = 2                 # batch
C_IN = 3              # RGB
H = W = 64            # input spatial size; /8 stand-in backbone -> 8x8 map
KS = 8                # stand-in backbone conv kernel == stride
HO, WO = H // KS, W // KS
NUM_FEATURES = 128    # stand-in for ResNet's 2048
NUM_CLASSES = 20      # VOC
C_PAD = 128           # class dim padded to a full 128-lane width inside kernels
TOPN = 4
THRESHOLD = 0.5
CKK = C_IN * KS * KS  # 192


# ---------------- kernel 1: global stream + CAM upsample + axis max ----------------
def _global_cam_kernel(p_ref, wf_ref, bf_ref, wc_ref, bc_ref, ih_ref, iw_ref,
                       gs_ref, cam_ref, wmax_ref, hmax_ref):
    """Per image: feature matmul+ReLU -> shared class logits -> pooled global
    sigmoid score + sigmoid CAM -> separable bilinear upsample -> axis maxes.
    Matmul inputs are bf16, everything after the logits is f32."""
    act = jnp.maximum(
        jnp.dot(p_ref[...], wf_ref[...], preferred_element_type=jnp.float32)
        + bf_ref[...], 0.0)                                        # [Ho*Wo, F] f32
    logits = jnp.dot(act.astype(jnp.bfloat16), wc_ref[...],
                     preferred_element_type=jnp.float32) + bc_ref[...]  # [Ho*Wo, C_PAD]
    # avg-pool commutes with the 1x1 conv -> mean of logits gives global score
    gs_ref[0] = jax.nn.sigmoid(jnp.mean(logits, axis=0, keepdims=True))
    # sigmoid BEFORE upsample, exactly like the reference
    cam = jax.nn.sigmoid(logits)                                   # [Ho*Wo, C_PAD] f32
    cam3 = cam.reshape(HO, WO, C_PAD)                              # [p, q, c]
    # separable align_corners bilinear upsample: two batched matmuls
    iw_b = jnp.broadcast_to(iw_ref[...][None, :, :], (HO, W, WO))  # [p, j, q]
    t = jnp.einsum('pjq,pqc->pjc', iw_b, cam3,
                   preferred_element_type=jnp.float32)             # [p, j, c]
    t = jnp.transpose(t, (1, 0, 2))                                # [j, p, c]
    ih_b = jnp.broadcast_to(ih_ref[...][None, :, :], (W, H, HO))   # [j, i, p]
    big = jnp.einsum('jip,jpc->jic', ih_b, t,
                     preferred_element_type=jnp.float32)           # [j, i, c] = [W, H, C]
    cam_ref[0] = big.reshape(W * H, C_PAD)
    wmax_ref[0] = jnp.max(big, axis=1)   # max over height i -> [W, C_PAD] (wscore)
    hmax_ref[0] = jnp.max(big, axis=0)   # max over width  j -> [H, C_PAD] (hscore)


def global_cam_fused(patches, w_feat, b_feat, w_cls_p, b_cls_p, ih, iw, n_img):
    rows = HO * WO
    return pl.pallas_call(
        _global_cam_kernel,
        out_shape=(jax.ShapeDtypeStruct((n_img, 1, C_PAD), jnp.float32),
                   jax.ShapeDtypeStruct((n_img, W * H, C_PAD), jnp.float32),
                   jax.ShapeDtypeStruct((n_img, W, C_PAD), jnp.float32),
                   jax.ShapeDtypeStruct((n_img, H, C_PAD), jnp.float32)),
        grid=(n_img,),
        in_specs=[pl.BlockSpec((rows, CKK), lambda i: (i, 0)),
                  pl.BlockSpec((CKK, NUM_FEATURES), lambda i: (0, 0)),
                  pl.BlockSpec((1, NUM_FEATURES), lambda i: (0, 0)),
                  pl.BlockSpec((NUM_FEATURES, C_PAD), lambda i: (0, 0)),
                  pl.BlockSpec((1, C_PAD), lambda i: (0, 0)),
                  pl.BlockSpec((H, HO), lambda i: (0, 0)),
                  pl.BlockSpec((W, WO), lambda i: (0, 0))],
        out_specs=[pl.BlockSpec((1, 1, C_PAD), lambda i: (i, 0, 0)),
                   pl.BlockSpec((1, W * H, C_PAD), lambda i: (i, 0, 0)),
                   pl.BlockSpec((1, W, C_PAD), lambda i: (i, 0, 0)),
                   pl.BlockSpec((1, H, C_PAD), lambda i: (i, 0, 0))],
        compiler_params=pltpu.CompilerParams(
            dimension_semantics=("parallel",),
            vmem_limit_bytes=32 * 1024 * 1024),
    )(patches, w_feat, b_feat, w_cls_p, b_cls_p, ih, iw)


# ---------------- kernel 2: crop + bilinear resize (per region) ----------------
def _crop_resize_kernel(x_ref, ry_ref, rxt_ref, o_ref):
    """Per region: crop + align_corners bilinear resize with per-region [H,H]
    row and [W,W] column interp matrices applied per channel; output is
    emitted directly in NCHW layout (the returned linputs layout)."""
    ry = ry_ref[0]                                   # [H, H]   (yo, yi) bf16
    rxt = rxt_ref[0]                                 # [W, W]   (xi, xo) bf16
    for c in range(C_IN):
        t = jnp.dot(x_ref[0, c], rxt,
                    preferred_element_type=jnp.float32)            # [H(yi), W(xo)]
        o_ref[0, c] = jnp.dot(ry, t.astype(jnp.bfloat16),
                              preferred_element_type=jnp.float32)  # [H(yo), W(xo)]


def crop_resize(x_sel, ry_all, rxt_all):
    n_reg = x_sel.shape[0]
    return pl.pallas_call(
        _crop_resize_kernel,
        out_shape=jax.ShapeDtypeStruct((n_reg, C_IN, H, W), jnp.float32),
        grid=(n_reg,),
        in_specs=[pl.BlockSpec((1, C_IN, H, W), lambda r: (r, 0, 0, 0)),
                  pl.BlockSpec((1, H, H), lambda r: (r, 0, 0)),
                  pl.BlockSpec((1, W, W), lambda r: (r, 0, 0))],
        out_specs=pl.BlockSpec((1, C_IN, H, W), lambda r: (r, 0, 0, 0)),
        compiler_params=pltpu.CompilerParams(dimension_semantics=("parallel",)),
    )(x_sel, ry_all, rxt_all)


# ---------------- kernel 3: local stream (per image, topN regions) ----------------
def _local_stream_kernel(p_ref, wf_ref, bf_ref, wc_ref, bc_ref, out_ref):
    """Per image: features on topN regions -> logits -> per-region avg ->
    sigmoid -> max over regions.  No intermediates hit HBM."""
    act = jnp.maximum(
        jnp.dot(p_ref[...], wf_ref[...], preferred_element_type=jnp.float32)
        + bf_ref[...], 0.0)                                        # [topN*Ho*Wo, F]
    logits = jnp.dot(act.astype(jnp.bfloat16), wc_ref[...],
                     preferred_element_type=jnp.float32) + bc_ref[...]
    pooled = jnp.mean(logits.reshape(TOPN, HO * WO, C_PAD), axis=1)  # [topN, C_PAD]
    out_ref[0] = jnp.max(jax.nn.sigmoid(pooled), axis=0, keepdims=True)


def local_stream_fused(patches, w_feat, b_feat, w_cls_p, b_cls_p, n_img):
    rows = TOPN * HO * WO
    return pl.pallas_call(
        _local_stream_kernel,
        out_shape=jax.ShapeDtypeStruct((n_img, 1, C_PAD), jnp.float32),
        grid=(n_img,),
        in_specs=[pl.BlockSpec((rows, CKK), lambda i: (i, 0)),
                  pl.BlockSpec((CKK, NUM_FEATURES), lambda i: (0, 0)),
                  pl.BlockSpec((1, NUM_FEATURES), lambda i: (0, 0)),
                  pl.BlockSpec((NUM_FEATURES, C_PAD), lambda i: (0, 0)),
                  pl.BlockSpec((1, C_PAD), lambda i: (0, 0))],
        out_specs=pl.BlockSpec((1, 1, C_PAD), lambda i: (i, 0, 0)),
        compiler_params=pltpu.CompilerParams(dimension_semantics=("parallel",)),
    )(patches, w_feat, b_feat, w_cls_p, b_cls_p)


# ---------------- host-side glue ----------------
def extract_patches(x_nchw):
    """NCHW -> [n*Ho*Wo, Cin*kh*kw] patches for the stride-8 stand-in conv."""
    n = x_nchw.shape[0]
    p = x_nchw.reshape(n, C_IN, HO, KS, WO, KS)
    p = p.transpose(0, 2, 4, 1, 3, 5)          # [n, Ho, Wo, Cin, kh, kw]
    return p.reshape(n * HO * WO, CKK)


_BILINEAR_CACHE = {}
_CROP_MATRIX_CACHE = {}


def _bilinear_weights(out_size, in_size):
    """align_corners=True bilinear interpolation weights [out, in] (cached)."""
    key = (out_size, in_size)
    m = _BILINEAR_CACHE.get(key)
    if m is None:
        m = np.zeros((out_size, in_size), dtype=np.float32)
        for o in range(out_size):
            src = 0.0 if in_size == 1 else o * (in_size - 1) / (out_size - 1)
            i0 = int(np.floor(src))
            i1 = min(i0 + 1, in_size - 1)
            f = src - i0
            m[o, i0] += 1.0 - f
            m[o, i1] += f
        _BILINEAR_CACHE[key] = m
    return m


def bilinear_matrix(out_size, in_size, offset=0, full_size=None):
    """Interp matrix for a crop [offset, offset+in_size) embedded in a row of
    length `full_size` (crop + resize in one matmul).  Cached per key."""
    full = in_size if full_size is None else full_size
    key = (out_size, in_size, offset, full)
    m = _CROP_MATRIX_CACHE.get(key)
    if m is None:
        m = np.zeros((out_size, full), dtype=np.float32)
        m[:, offset:offset + in_size] = _bilinear_weights(out_size, in_size)
        _CROP_MATRIX_CACHE[key] = m
    return m


def obj_loc(score, threshold):
    """Faithful numpy translation of the reference obj_loc (scalar host logic).
    zmin/zmax pre-initialized to the no-crossing defaults to guard the
    UnboundLocalError edge case present in the original."""
    smax, sdis, sdim = 0, 0, score.shape[0]
    minsize = int(math.ceil(sdim * 0.125))
    zmin, zmax = int(math.ceil(sdim * 0.125)), int(math.ceil(sdim * 0.875))
    snorm = np.sign(score - threshold)
    snormdiff = np.abs(snorm[1:] - snorm[:-1])
    szero = np.nonzero(snormdiff == 2)[0]
    if len(szero) == 0:
        return zmin, zmax
    if szero[0] > 0:
        lzmin, lzmax = 0, int(szero[0])
        lzdis = lzmax - lzmin
        lsmax = score[lzmin:lzmax].max()
        if lsmax > smax:
            smax, zmin, zmax, sdis = lsmax, lzmin, lzmax, lzdis
        if lsmax == smax:
            if lzdis > sdis:
                smax, zmin, zmax, sdis = lsmax, lzmin, lzmax, lzdis
    if szero[-1] < sdim:
        lzmin, lzmax = int(szero[-1]), sdim
        lzdis = lzmax - lzmin
        lsmax = score[lzmin:lzmax].max()
        if lsmax > smax:
            smax, zmin, zmax, sdis = lsmax, lzmin, lzmax, lzdis
        if lsmax == smax:
            if lzdis > sdis:
                smax, zmin, zmax, sdis = lsmax, lzmin, lzmax, lzdis
    if len(szero) >= 2:
        for i in range(len(szero) - 1):
            lzmin, lzmax = int(szero[i]), int(szero[i + 1])
            lzdis = lzmax - lzmin
            lsmax = score[lzmin:lzmax].max()
            if lsmax > smax:
                smax, zmin, zmax, sdis = lsmax, lzmin, lzmax, lzdis
            if lsmax == smax:
                if lzdis > sdis:
                    smax, zmin, zmax, sdis = lsmax, lzmin, lzmax, lzdis
    if zmax - zmin <= minsize:
        pad = minsize - (zmax - zmin)
        if zmin > int(math.ceil(pad / 2.0)) and sdim - zmax > pad:
            zmin = zmin - int(math.ceil(pad / 2.0)) + 1
            zmax = zmax + int(math.ceil(pad / 2.0))
        if zmin < int(math.ceil(pad / 2.0)):
            zmin = 0
            zmax = minsize
        if sdim - zmax < int(math.ceil(pad / 2.0)):
            zmin = sdim - minsize + 1
            zmax = sdim
    return int(zmin), int(zmax)


def _pad_classifier(w_cls, b_cls):
    w_cls_p = jnp.pad(w_cls, ((0, 0), (0, C_PAD - NUM_CLASSES)))
    b_cls_p = jnp.pad(b_cls, ((0, 0), (0, C_PAD - NUM_CLASSES)))
    return w_cls_p, b_cls_p


# ---------------- jitted device phases ----------------
@jax.jit
def _phase1(x, w_feat, b_feat, w_cls, b_cls):
    b = x.shape[0]
    w_cls_p, b_cls_p = _pad_classifier(w_cls, b_cls)
    patches = extract_patches(x).astype(jnp.bfloat16)
    ih = jnp.asarray(_bilinear_weights(H, HO))        # [H, HO] f32 (tiny constants)
    iw = jnp.asarray(_bilinear_weights(W, WO))        # [W, WO] f32

    gs_full, cam_big, wmax, hmax = global_cam_fused(
        patches, w_feat.astype(jnp.bfloat16), b_feat,
        w_cls_p.astype(jnp.bfloat16), b_cls_p, ih, iw, b)

    global_stream = gs_full[:, 0, :NUM_CLASSES]                     # [b, 20]
    camscore = cam_big.reshape(b, W, H, C_PAD)[..., :NUM_CLASSES]   # [b, W, H, 20]
    camscore = camscore.transpose(0, 3, 2, 1)                       # [b, 20, H, W]
    wscore = wmax[..., :NUM_CLASSES].transpose(0, 2, 1)             # [b, 20, W]
    hscore = hmax[..., :NUM_CLASSES].transpose(0, 2, 1)             # [b, 20, H]
    return global_stream, camscore, wscore, hscore


@jax.jit
def _phase2(x, img_idx, ry_all, rxt_all, w_feat, b_feat, w_cls, b_cls):
    b = x.shape[0]
    w_cls_p, b_cls_p = _pad_classifier(w_cls, b_cls)

    # crop + resize topN regions; output directly in NCHW (= returned linputs)
    x_sel = x[img_idx].astype(jnp.bfloat16)                         # [R, C, H, W]
    linputs = crop_resize(x_sel, ry_all.astype(jnp.bfloat16),
                          rxt_all.astype(jnp.bfloat16))             # [R, C, H, W] f32

    # local stream fused (features -> logits -> avg -> sigmoid -> topN max)
    patches = extract_patches(linputs).astype(jnp.bfloat16)
    local_full = local_stream_fused(
        patches, w_feat.astype(jnp.bfloat16), b_feat,
        w_cls_p.astype(jnp.bfloat16), b_cls_p, b)
    local_stream = local_full[:, 0, :NUM_CLASSES]
    return linputs, local_stream


# ---------------- full MCAR forward ----------------
def mcar_forward(x, params):
    w_feat, b_feat, w_cls, b_cls = params
    b = x.shape[0]

    global_stream, camscore, wscore, hscore = _phase1(
        x, w_feat, b_feat, w_cls, b_cls)

    # topN region selection: data-dependent scalar logic on host, single sync.
    # Only small [64,64] interp matrices (cached, no kron) cross the sync.
    gs_np, ws_np, hs_np = jax.device_get((global_stream, wscore, hscore))
    img_idx, ry_list, rxt_list = [], [], []
    for i in range(b):
        order = np.argsort(-gs_np[i], kind="stable")
        for j in range(TOPN):
            cls = int(order[j])
            xs = ws_np[i, cls].astype(np.float64)
            ys = hs_np[i, cls].astype(np.float64)
            xs = xs / xs.max() if xs.max() == xs.min() else (xs - xs.min()) / (xs.max() - xs.min())
            ys = ys / ys.max() if ys.max() == ys.min() else (ys - ys.min()) / (ys.max() - ys.min())
            x1, x2 = obj_loc(xs, THRESHOLD)
            y1, y2 = obj_loc(ys, THRESHOLD)
            ry_list.append(bilinear_matrix(H, y2 - y1, offset=y1, full_size=H))
            rxt_list.append(bilinear_matrix(W, x2 - x1, offset=x1, full_size=W).T)
            img_idx.append(i)

    linputs, local_stream = _phase2(
        x, jnp.asarray(np.asarray(img_idx, dtype=np.int32)),
        jnp.asarray(np.stack(ry_list)), jnp.asarray(np.stack(rxt_list)),
        w_feat, b_feat, w_cls, b_cls)

    return global_stream, local_stream, camscore, wscore, hscore, linputs


if __name__ == "__main__":
    key = jax.random.PRNGKey(0)
    k1, k2, k3, k4, kx = jax.random.split(key, 5)
    # deterministic synthetic parameters (stand-in backbone + convclass)
    w_feat = jax.random.normal(k1, (CKK, NUM_FEATURES), jnp.float32) * 0.05
    b_feat = jax.random.normal(k2, (1, NUM_FEATURES), jnp.float32) * 0.05
    w_cls = jax.random.normal(k3, (NUM_FEATURES, NUM_CLASSES), jnp.float32) * 0.05
    b_cls = jax.random.normal(k4, (1, NUM_CLASSES), jnp.float32) * 0.05
    x = jax.random.normal(kx, (B, C_IN, H, W), jnp.float32)

    outs = mcar_forward(x, (w_feat, b_feat, w_cls, b_cls))
    jax.block_until_ready(outs)

    gs, ls, cam, ws, hs, li = outs
    assert gs.shape == (B, NUM_CLASSES)
    assert ls.shape == (B, NUM_CLASSES)
    assert cam.shape == (B, NUM_CLASSES, H, W)
    assert ws.shape == (B, NUM_CLASSES, W)
    assert hs.shape == (B, NUM_CLASSES, H)
    assert li.shape == (B * TOPN, C_IN, H, W)
    print("KERNEL_OK")
</pallas_src>

<mosaic_0001>
module attributes {stable_mosaic.version = 11 : i64} {
  func.func @_global_cam_kernel(%arg0: i32, %arg1: memref<64x192xbf16, #tpu.memory_space<vmem>>, %arg2: memref<192x128xbf16, #tpu.memory_space<vmem>>, %arg3: memref<1x128xf32, #tpu.memory_space<vmem>>, %arg4: memref<128x128xbf16, #tpu.memory_space<vmem>>, %arg5: memref<1x128xf32, #tpu.memory_space<vmem>>, %arg6: memref<64x8xf32, #tpu.memory_space<vmem>>, %arg7: memref<64x8xf32, #tpu.memory_space<vmem>>, %arg8: memref<1x1x128xf32, #tpu.memory_space<vmem>>, %arg9: memref<1x4096x128xf32, #tpu.memory_space<vmem>>, %arg10: memref<1x64x128xf32, #tpu.memory_space<vmem>>, %arg11: memref<1x64x128xf32, #tpu.memory_space<vmem>>) attributes {dimension_semantics = [#tpu.dimension_semantics<parallel>], iteration_bounds = array<i64: 2>, scalar_prefetch = 0 : i64, scratch_operands = 0 : i64, tpu.core_type = #tpu.core_type<tc>, window_params = [{transform_indices = @transform_0, window_bounds = array<i64: 64, 192>}, {pipeline_mode = #tpu.pipeline_mode<synchronous>, transform_indices = @transform_1, window_bounds = array<i64: 192, 128>}, {pipeline_mode = #tpu.pipeline_mode<synchronous>, transform_indices = @transform_2, window_bounds = array<i64: 1, 128>}, {pipeline_mode = #tpu.pipeline_mode<synchronous>, transform_indices = @transform_3, window_bounds = array<i64: 128, 128>}, {pipeline_mode = #tpu.pipeline_mode<synchronous>, transform_indices = @transform_4, window_bounds = array<i64: 1, 128>}, {pipeline_mode = #tpu.pipeline_mode<synchronous>, transform_indices = @transform_5, window_bounds = array<i64: 64, 8>}, {pipeline_mode = #tpu.pipeline_mode<synchronous>, transform_indices = @transform_6, window_bounds = array<i64: 64, 8>}, {transform_indices = @transform_7, window_bounds = array<i64: 1, 1, 128>}, {transform_indices = @transform_8, window_bounds = array<i64: 1, 4096, 128>}, {transform_indices = @transform_9, window_bounds = array<i64: 1, 64, 128>}, {transform_indices = @transform_10, window_bounds = array<i64: 1, 64, 128>}]} {
    %c0 = arith.constant 0 : index
    %c0_0 = arith.constant 0 : index
    %0 = vector.load %arg1[%c0, %c0_0] : memref<64x192xbf16, #tpu.memory_space<vmem>>, vector<64x192xbf16>
    %c0_1 = arith.constant 0 : index
    %c0_2 = arith.constant 0 : index
    %1 = vector.load %arg2[%c0_1, %c0_2] : memref<192x128xbf16, #tpu.memory_space<vmem>>, vector<192x128xbf16>
    %cst = arith.constant dense<0.000000e+00> : vector<64x128xf32>
    %2 = tpu.matmul %0, %1, %cst {dimension_numbers = #tpu.dot_dimension_numbers<[1], [0], [0], [1], [0, 0, 1, 1], [], []>} : vector<64x192xbf16>, vector<192x128xbf16>, vector<64x128xf32> -> vector<64x128xf32>
    %c0_3 = arith.constant 0 : index
    %c0_4 = arith.constant 0 : index
    %3 = vector.load %arg3[%c0_3, %c0_4] : memref<1x128xf32, #tpu.memory_space<vmem>>, vector<1x128xf32>
    %4 = vector.broadcast %3 : vector<1x128xf32> to vector<64x128xf32>
    %5 = arith.addf %2, %4 : vector<64x128xf32>
    %cst_5 = arith.constant 0.000000e+00 : f32
    %6 = vector.broadcast %cst_5 : f32 to vector<64x128xf32>
    %7 = arith.maximumf %5, %6 : vector<64x128xf32>
    %8 = arith.truncf %7 : vector<64x128xf32> to vector<64x128xbf16>
    %c0_6 = arith.constant 0 : index
    %c0_7 = arith.constant 0 : index
    %9 = vector.load %arg4[%c0_6, %c0_7] : memref<128x128xbf16, #tpu.memory_space<vmem>>, vector<128x128xbf16>
    %cst_8 = arith.constant dense<0.000000e+00> : vector<64x128xf32>
    %10 = tpu.matmul %8, %9, %cst_8 {dimension_numbers = #tpu.dot_dimension_numbers<[1], [0], [0], [1], [0, 0, 1, 1], [], []>} : vector<64x128xbf16>, vector<128x128xbf16>, vector<64x128xf32> -> vector<64x128xf32>
    %c0_9 = arith.constant 0 : index
    %c0_10 = arith.constant 0 : index
    %11 = vector.load %arg5[%c0_9, %c0_10] : memref<1x128xf32, #tpu.memory_space<vmem>>, vector<1x128xf32>
    %12 = vector.broadcast %11 : vector<1x128xf32> to vector<64x128xf32>
    %13 = arith.addf %10, %12 : vector<64x128xf32>
    %cst_11 = arith.constant dense<0.000000e+00> : vector<128xf32>
    %14 = vector.multi_reduction <add>, %13, %cst_11 [0] : vector<64x128xf32> to vector<128xf32>
    %15 = vector.shape_cast %14 : vector<128xf32> to vector<1x128xf32>
    %cst_12 = arith.constant 6.400000e+01 : f32
    %16 = vector.broadcast %cst_12 : f32 to vector<1x128xf32>
    %17 = arith.divf %15, %16 : vector<1x128xf32>
    %18 = arith.negf %17 : vector<1x128xf32>
    %19 = math.exp %18 : vector<1x128xf32>
    %cst_13 = arith.constant 1.000000e+00 : f32
    %20 = vector.broadcast %cst_13 : f32 to vector<1x128xf32>
    %21 = arith.addf %20, %19 : vector<1x128xf32>
    %22 = arith.divf %20, %21 : vector<1x128xf32>
    %c0_14 = arith.constant 0 : index
    %c0_15 = arith.constant 0 : index
    %c0_16 = arith.constant 0 : index
    %23 = vector.load %arg8[%c0_14, %c0_15, %c0_16] : memref<1x1x128xf32, #tpu.memory_space<vmem>>, vector<1x1x128xf32>
    %24 = vector.shape_cast %23 : vector<1x1x128xf32> to vector<1x128xf32>
    %25 = vector.shape_cast %22 : vector<1x128xf32> to vector<1x1x128xf32>
    tpu.vector_store %arg8[%c0_14, %c0_15, %c0_16], %25 {strides = array<i32>} : memref<1x1x128xf32, #tpu.memory_space<vmem>>, vector<1x1x128xf32>,
    %26 = arith.negf %13 : vector<64x128xf32>
    %27 = math.exp %26 : vector<64x128xf32>
    %cst_17 = arith.constant 1.000000e+00 : f32
    %28 = vector.broadcast %cst_17 : f32 to vector<64x128xf32>
    %29 = arith.addf %28, %27 : vector<64x128xf32>
    %30 = arith.divf %28, %29 : vector<64x128xf32>
    %31 = vector.shape_cast %30 : vector<64x128xf32> to vector<8x8x128xf32>
    %c0_18 = arith.constant 0 : index
    %c0_19 = arith.constant 0 : index
    %32 = vector.load %arg7[%c0_18, %c0_19] : memref<64x8xf32, #tpu.memory_space<vmem>>, vector<64x8xf32>
    %33 = vector.shape_cast %32 : vector<64x8xf32> to vector<1x64x8xf32>
    %34 = vector.shape_cast %33 : vector<1x64x8xf32> to vector<1x64x8xf32>
    %35 = vector.broadcast %34 : vector<1x64x8xf32> to vector<8x64x8xf32>
    "tpu.trace_start"() <{level = 10 : i32, message = "pjq,pqc->pjc"}> : () -> ()
    %cst_20 = arith.constant dense<0.000000e+00> : vector<8x64x128xf32>
    %36 = tpu.matmul %35, %31, %cst_20 {dimension_numbers = #tpu.dot_dimension_numbers<[2], [1], [1], [2], [0, 0, 0, 1, 1, 2], [0], [0]>} : vector<8x64x8xf32>, vector<8x8x128xf32>, vector<8x64x128xf32> -> vector<8x64x128xf32>
    "tpu.trace_stop"() : () -> ()
    %37 = tpu.transpose %36, [1, 0, 2] : vector<8x64x128xf32> -> vector<64x8x128xf32>
    %c0_21 = arith.constant 0 : index
    %c0_22 = arith.constant 0 : index
    %38 = vector.load %arg6[%c0_21, %c0_22] : memref<64x8xf32, #tpu.memory_space<vmem>>, vector<64x8xf32>
    %39 = vector.shape_cast %38 : vector<64x8xf32> to vector<1x64x8xf32>
    %40 = vector.shape_cast %39 : vector<1x64x8xf32> to vector<1x64x8xf32>
    %41 = vector.broadcast %40 : vector<1x64x8xf32> to vector<64x64x8xf32>
    "tpu.trace_start"() <{level = 10 : i32, message = "jip,jpc->jic"}> : () -> ()
    %cst_23 = arith.constant dense<0.000000e+00> : vector<64x64x128xf32>
    %42 = tpu.matmul %41, %37, %cst_23 {dimension_numbers = #tpu.dot_dimension_numbers<[2], [1], [1], [2], [0, 0, 0, 1, 1, 2], [0], [0]>} : vector<64x64x8xf32>, vector<64x8x128xf32>, vector<64x64x128xf32> -> vector<64x64x128xf32>
    "tpu.trace_stop"() : () -> ()
    %43 = vector.shape_cast %42 : vector<64x64x128xf32> to vector<4096x128xf32>
    %c0_24 = arith.constant 0 : index
    %c0_25 = arith.constant 0 : index
    %c0_26 = arith.constant 0 : index
    %44 = vector.load %arg9[%c0_24, %c0_25, %c0_26] : memref<1x4096x128xf32, #tpu.memory_space<vmem>>, vector<1x4096x128xf32>
    %45 = vector.shape_cast %44 : vector<1x4096x128xf32> to vector<4096x128xf32>
    %46 = vector.shape_cast %43 : vector<4096x128xf32> to vector<1x4096x128xf32>
    tpu.vector_store %arg9[%c0_24, %c0_25, %c0_26], %46 {strides = array<i32>} : memref<1x4096x128xf32, #tpu.memory_space<vmem>>, vector<1x4096x128xf32>,
    %cst_27 = arith.constant dense<0xFF800000> : vector<64x128xf32>
    %47 = vector.multi_reduction <maximumf>, %42, %cst_27 [1] : vector<64x64x128xf32> to vector<64x128xf32>
    %c0_28 = arith.constant 0 : index
    %c0_29 = arith.constant 0 : index
    %c0_30 = arith.constant 0 : index
    %48 = vector.load %arg10[%c0_28, %c0_29, %c0_30] : memref<1x64x128xf32, #tpu.memory_space<vmem>>, vector<1x64x128xf32>
    %49 = vector.shape_cast %48 : vector<1x64x128xf32> to vector<64x128xf32>
    %50 = vector.shape_cast %47 : vector<64x128xf32> to vector<1x64x128xf32>
    tpu.vector_store %arg10[%c0_28, %c0_29, %c0_30], %50 {strides = array<i32>} : memref<1x64x128xf32, #tpu.memory_space<vmem>>, vector<1x64x128xf32>,
    %cst_31 = arith.constant dense<0xFF800000> : vector<64x128xf32>
    %51 = vector.multi_reduction <maximumf>, %42, %cst_31 [0] : vector<64x64x128xf32> to vector<64x128xf32>
    %c0_32 = arith.constant 0 : index
    %c0_33 = arith.constant 0 : index
    %c0_34 = arith.constant 0 : index
    %52 = vector.load %arg11[%c0_32, %c0_33, %c0_34] : memref<1x64x128xf32, #tpu.memory_space<vmem>>, vector<1x64x128xf32>
    %53 = vector.shape_cast %52 : vector<1x64x128xf32> to vector<64x128xf32>
    %54 = vector.shape_cast %51 : vector<64x128xf32> to vector<1x64x128xf32>
    tpu.vector_store %arg11[%c0_32, %c0_33, %c0_34], %54 {strides = array<i32>} : memref<1x64x128xf32, #tpu.memory_space<vmem>>, vector<1x64x128xf32>,
    return
  }
  func.func @transform_0(%arg0: i32) -> (i32, i32) {
    %c0_i32 = arith.constant 0 : i32
    %c0_i32_0 = arith.constant 0 : i32
    return %arg0, %c0_i32 : i32, i32
  }
  func.func @transform_1(%arg0: i32) -> (i32, i32) {
    %c0_i32 = arith.constant 0 : i32
    %c0_i32_0 = arith.constant 0 : i32
    %c0_i32_1 = arith.constant 0 : i32
    return %c0_i32, %c0_i32_0 : i32, i32
  }
  func.func @transform_2(%arg0: i32) -> (i32, i32) {
    %c0_i32 = arith.constant 0 : i32
    %c0_i32_0 = arith.constant 0 : i32
    %c0_i32_1 = arith.constant 0 : i32
    return %c0_i32, %c0_i32_0 : i32, i32
  }
  func.func @transform_3(%arg0: i32) -> (i32, i32) {
    %c0_i32 = arith.constant 0 : i32
    %c0_i32_0 = arith.constant 0 : i32
    %c0_i32_1 = arith.constant 0 : i32
    return %c0_i32, %c0_i32_0 : i32, i32
  }
  func.func @transform_4(%arg0: i32) -> (i32, i32) {
    %c0_i32 = arith.constant 0 : i32
    %c0_i32_0 = arith.constant 0 : i32
    %c0_i32_1 = arith.constant 0 : i32
    return %c0_i32, %c0_i32_0 : i32, i32
  }
  func.func @transform_5(%arg0: i32) -> (i32, i32) {
    %c0_i32 = arith.constant 0 : i32
    %c0_i32_0 = arith.constant 0 : i32
    %c0_i32_1 = arith.constant 0 : i32
    return %c0_i32, %c0_i32_0 : i32, i32
  }
  func.func @transform_6(%arg0: i32) -> (i32, i32) {
    %c0_i32 = arith.constant 0 : i32
    %c0_i32_0 = arith.constant 0 : i32
    %c0_i32_1 = arith.constant 0 : i32
    return %c0_i32, %c0_i32_0 : i32, i32
  }
  func.func @transform_7(%arg0: i32) -> (i32, i32, i32) {
    %c0_i32 = arith.constant 0 : i32
    %c0_i32_0 = arith.constant 0 : i32
    %c0_i32_1 = arith.constant 0 : i32
    return %arg0, %c0_i32, %c0_i32_0 : i32, i32, i32
  }
  func.func @transform_8(%arg0: i32) -> (i32, i32, i32) {
    %c0_i32 = arith.constant 0 : i32
    %c0_i32_0 = arith.constant 0 : i32
    %c0_i32_1 = arith.constant 0 : i32
    return %arg0, %c0_i32, %c0_i32_0 : i32, i32, i32
  }
  func.func @transform_9(%arg0: i32) -> (i32, i32, i32) {
    %c0_i32 = arith.constant 0 : i32
    %c0_i32_0 = arith.constant 0 : i32
    %c0_i32_1 = arith.constant 0 : i32
    return %arg0, %c0_i32, %c0_i32_0 : i32, i32, i32
  }
  func.func @transform_10(%arg0: i32) -> (i32, i32, i32) {
    %c0_i32 = arith.constant 0 : i32
    %c0_i32_0 = arith.constant 0 : i32
    %c0_i32_1 = arith.constant 0 : i32
    return %arg0, %c0_i32, %c0_i32_0 : i32, i32, i32
  }
}

</mosaic_0001>

<bundles_post_ra>
// kernel: _phase1.1
= control target key start
LH: loop header
LB: loop body
LE: loop exit
PB: predicated region body
PF: predicated region fallthrough
CT: control target
= control target key end

     0   :  { %16 = vsyncpa [#allocation3], 0  ;;  %s20290_s0 = inlined_call_operand.vmem [shape: bf16[128,192], index: 0, kind: input, shape index: {}]   ;;  %s20291_s1 = inlined_call_operand.vmem [shape: bf16[192,128], index: 1, kind: input, shape index: {}]   ;;  %s20292_s2 = inlined_call_operand.hbm [shape: f32[1,128], index: 2, kind: input, shape index: {}]   ;;  %s20293_s3 = inlined_call_operand.vmem [shape: bf16[128,128], index: 3, kind: input, shape index: {}]   ;;  %s20294_s4 = inlined_call_operand.vmem [shape: f32[1,128], index: 4, kind: input, shape index: {}]   ;;  %s20295_s5 = inlined_call_operand.hbm [shape: f32[64,8], index: 5, kind: input, shape index: {}, may-alias: {5,6}]   ;;  %s20296_s6 = inlined_call_operand.hbm [shape: f32[64,8], index: 6, kind: input, shape index: {}, may-alias: {5,6}]   ;;  %s20297_s7 = inlined_call_operand.hbm [shape: f32[2,1,128], index: 7, kind: output, shape index: {0}]   ;;  %s20298_s8 = inlined_call_operand.vmem [shape: f32[2,4096,128], index: 8, kind: output, shape index: {1}]   ;;  %s20299_s9 = inlined_call_operand.vmem [shape: f32[2,64,128], index: 9, kind: output, shape index: {2}]   ;;  %s20300_s10 = inlined_call_operand.vmem [shape: f32[2,64,128], index: 10, kind: output, shape index: {3}]  }
   0x1   :  { %17 = vsyncpa [#allocation6], 0 }
   0x2   :  { %18 = vsyncpa [#allocation4], 0 }
   0x3   :  { %20 = vsyncpa [#allocation4 + $0x1], 0  ;;  %s14520_s13 = smov 0   ;;  %s14522_s14 = smov 0  }
   0x4   :  { %s14524_s15 = smov 0   ;;  %s14526_s16 = smov 0  }
   0x5 LB: > { %20332 = sst [smem:[#allocation12_spill]] %s14442_s13  ;;  %s14541_s17 = sadd.s32 4294967295, %s14454_s16   ;;  %s14454_s16 = sphi %s14526_s16, %s20417_s16   ;;  %s14450_s15 = sphi %s14524_s15, %s20419_s15   ;;  %s14446_s14 = sphi %s14522_s14, %s20421_s14   ;;  %s14442_s13 = sphi %s14520_s13, %s20420_s13  }
   0x6   : > { %20333 = sst [smem:[#allocation13_spill]] %s14450_s15  ;;  %s11795_s18 = sadd.s32 4294967294, %s14454_s16  }
   0x7   : > { %20334 = sst [smem:[#allocation14_spill]] %s14454_s16  ;;  %s14545_s19 = sadd.s32 1, %s14454_s16  }
   0x8   : > { %20335 = sst [smem:[#allocation15_spill]] %s14545_s19  ;;  %s185_s20 = sadd.s32 1, %s14450_s15 }
   0x9   : > { %s182_s21 = ssub.s32 %s14454_s16, %s14545_s19  ;;  %p195_p0 = scmp.ne.s32.totalorder %s14450_s15, %s14446_s14 }
   0xa   : > { %p183_p1 = scmp.eq.s32.totalorder %s182_s21, 0  ;;  %p196_p2 = scmp.eq.s32.totalorder %s14541_s17, 1 }
   0xb   : > { %p201_p3 = scmp.ne.s32.totalorder %s14446_s14, %s14442_s13  ;;  %p202_p4 = scmp.eq.s32.totalorder %s11795_s18, 1 }
   0xc   : > { %s14556_s22 = scalar_select %p183_p1, %s14450_s15, %s185_s20  }
   0xd   : > { %p14558_p5 = por %p196_p2, %p195_p0  ;;  %p14562_p6 = por %p202_p4, %p201_p3 }
   0xe   : > { %20336 = sst [smem:[#allocation16_spill]] %s14556_s22  ;;  %p11796_p7 = scmp.ge.s32.totalorder %s14454_s16, 1 }
   0xf   : > { %s20337_s23 = scalar_select %p14558_p5, 1, 0 }
  0x10   : > { %s20338_s24 = scalar_select %p14562_p6, 1, 0 }
  0x11   : > { %p287_p8 = scmp.lt.s32.totalorder %s14454_s16, 3  ;;  %p20302_p9 = scmp.eq.s32.totalorder %s14541_s17, 0 }
  0x12   : > { %20339 = sst [smem:[#allocation17_spill]] %s20338_s24  ;;  %s14456_s26 = smov [#allocation5]  }
  0x13   : > { %p14569_p10 = pnand %p11796_p7, %p287_p8  ;;  %s319_s27 = sshll.u32 %s14456_s26, 4  ;;  %s14575_s27 = int_to_ptr.vmem [resolvable:$true] %s319_s27 }
  0x14   : > { %s14457_s29 = smov [#allocation2]   ;;  %s14458_s11 = smov [#allocation7]  }
  0x15   : > { %s20340_s25 = scalar_select %p14569_p10, 1, 0 }
  0x16   : > { %p14146_p11 = pneg %p14569_p10  ;;  %s303_s30 = sshll.u32 %s14457_s29, 4  ;;  %s14583_s30 = int_to_ptr.vmem [resolvable:$true] %s303_s30 }
  0x17   : > { %s14585_s12 = sshll.u32 %s14458_s11, 4  ;;  %s14300_s21 = scalar_lea.hbm %s20295_s5, 1024  ;;  %s333_s12 = int_to_ptr.vmem [resolvable:$true] %s14585_s12 }
  0x18   : > { %p14579_p12 = pnand %p20302_p9, %p14146_p11  ;;  %p14301_p13 = scmp.ne.s32.totalorder %s20295_s5, %s14300_s21 }
  0x19   : > { %p14307_p3 = scmp.lt.u32.totalorder %s14300_s21, %s20295_s5 }
  0x1a   : > { %p14595_p0 = pneg %p14579_p12 }
  0x1c   : > { %p14303_p1 = pnand %p14595_p0, %p14301_p13 }
  0x1e   : > { %p14304_p2 = pneg %p14303_p1 }
  0x20   : > { %p14309_p4 = pnand %p14307_p3, %p14304_p2 }
  0x22   : > { %14312 = shalt.err (!%p14309_p4)
}
  0x23   : > { %s14313_s22 = scalar_lea.vmem %s14575_s27, 1024  ;;  %p14321_p9 = scmp.lt.s32.totalorder %s14575_s27, %s14575_s27 }
  0x24   : > { %p14314_p7 = scmp.ne.s32.totalorder %s14575_s27, %s14313_s22  ;;  %p14322_p6 = scmp.lt.s32.totalorder %s14313_s22, %s14313_s22 }
  0x26   : > { %p14316_p8 = pnand %p14314_p7, %p14595_p0  ;;  %p14323_p13 = por %p14322_p6, %p14321_p9 }
  0x28   : > { %p14317_p11 = pneg %p14316_p8 }
  0x2a   : > { %p14324_p1 = pnand %p14323_p13, %p14317_p11 }
  0x2c   : > { %14327 = shalt.err (!%p14324_p1)
}
  0x2d   : > { %s14459_s18 = smov 128   ;;  %s14460_s20 = smov 8  }
  0x2e   : > { %14152 = dma.hbm_to_vmem [thread:$0]  (!%p14579_p12), %s20295_s5, 1024, %s14575_s27, [#allocation6], %s14459_s18, %s14459_s18, %s14460_s20  }
  0x2f   : > { %s14328_s22 = scalar_lea.hbm %s20292_s2, 16 }
  0x30   : > { %p14329_p6 = scmp.ne.s32.totalorder %s20292_s2, %s14328_s22  ;;  %p14335_p3 = scmp.lt.u32.totalorder %s14328_s22, %s20292_s2 }
  0x32   : > { %p14331_p9 = pnand %p14329_p6, %p14595_p0 }
  0x34   : > { %p14332_p2 = pneg %p14331_p9 }
  0x36   : > { %p14337_p4 = pnand %p14335_p3, %p14332_p2 }
  0x38   : > { %14340 = shalt.err (!%p14337_p4)
}
  0x39   : > { %s14341_s27 = scalar_lea.vmem %s14583_s30, 16  ;;  %s14348_s19 = scalar_lea.vmem %s14583_s30, 32 }
  0x3a   : > { %p14342_p7 = scmp.ne.s32.totalorder %s14583_s30, %s14341_s27  ;;  %p14349_p13 = scmp.lt.s32.totalorder %s14583_s30, %s14583_s30 }
  0x3b   : > { %p14350_p1 = scmp.lt.s32.totalorder %s14348_s19, %s14341_s27 }
  0x3c   : > { %p14344_p8 = pnand %p14342_p7, %p14595_p0 }
  0x3d   : > { %p14351_p6 = por %p14350_p1, %p14349_p13 }
  0x3e   : > { %p14345_p11 = pneg %p14344_p8 }
  0x40   : > { %p14352_p9 = pnand %p14351_p6, %p14345_p11 }
  0x42   : > { %14355 = shalt.err (!%p14352_p9)
}
  0x43   : > { %14149 = dma.hbm_to_vmem [thread:$0]  (!%p14579_p12), %s20292_s2, 16, %s14583_s30, [#allocation3]  }
  0x44   : > { %s14356_s26 = scalar_lea.hbm %s20296_s6, 1024 }
  0x45   : > { %p14357_p2 = scmp.ne.s32.totalorder %s20296_s6, %s14356_s26  ;;  %p14363_p7 = scmp.lt.u32.totalorder %s14356_s26, %s20296_s6 }
  0x47   : > { %p14359_p3 = pnand %p14357_p2, %p14595_p0 }
  0x49   : > { %p14360_p4 = pneg %p14359_p3 }
  0x4b   : > { %p14365_p8 = pnand %p14363_p7, %p14360_p4 }
  0x4d   : > { %14368 = shalt.err (!%p14365_p8)
}
  0x4e   : > { %s14369_s19 = scalar_lea.vmem %s333_s12, 1024  ;;  %p14377_p6 = scmp.lt.s32.totalorder %s333_s12, %s333_s12 }
  0x4f   : > { %p14370_p11 = scmp.ne.s32.totalorder %s333_s12, %s14369_s19  ;;  %p14378_p9 = scmp.lt.s32.totalorder %s14369_s19, %s14369_s19 }
  0x51   : > { %p14372_p13 = pnand %p14370_p11, %p14595_p0  ;;  %p14379_p5 = por %p14378_p9, %p14377_p6 }
  0x53   : > { %p14373_p1 = pneg %p14372_p13 }
  0x55   : > { %p14380_p10 = pnand %p14379_p5, %p14373_p1 }
  0x57   : > { %14383 = shalt.err (!%p14380_p10)
}
  0x58   : > { %14155 = dma.hbm_to_vmem [thread:$0]  (!%p14579_p12), %s20296_s6, 1024, %s333_s12, [#allocation6], %s14459_s18, %s14459_s18, %s14460_s20  }
  0x59   : > { %p20343_p2 = scmp.ne.s32.totalorder %s20340_s25, 0 }
  0x5b   : > { %358 = sbr.rel (%p20343_p2) target bundleno = 1656 (0x678), region = 48 }
  0x62   : > { %p20344_p0 = scmp.eq.s32.totalorder %s14541_s17, 0 }
  0x64   : > { %14429 = dma.done.wait (%p20344_p0), [#allocation3], 16   ;;  %p20345_p3 = pmov %p20344_p0 }
  0x65   : > { %p20346_p5 = pmov %p20344_p0 }
  0x66   : > { %14431 = vsyncadd (%p20345_p3), [#allocation3], 4294967280 }
  0x67   : > { %14433 = dma.done.wait (%p20346_p5), [#allocation6], 2048   ;;  %p20347_p10 = pmov %p20344_p0 }
  0x68   : > { %v14461_v0 = vmov 0   ;;  %s11805_s15 = sshll.u32 %s14541_s17, 3  ;;  %v14207_v1 = vld [vmem:[%s20291_s1] sm:$0xff]   ;;  %v14208_v2 = vld [vmem:[%s20291_s1 + $0x8] sm:$0xff]   ;;  %v14209_v3 = vld [vmem:[%s20291_s1 + $0x10] sm:$0xff]   ;;  %vm589_vm0 = vcmask 523264  }
  0x69   : > { %14435 = vsyncadd (%p20347_p10), [#allocation6], 4294965248  ;;  %602 = vmatprep.subr.bf16.mxu0 %v14461_v0  ;;  %p420_p12 = scmp.lt.s32.totalorder %s11805_s15, 15  ;;  %v14210_v4 = vld [vmem:[%s20291_s1 + $0x18] sm:$0xff]   ;;  %v14211_v6 = vld [vmem:[%s20291_s1 + $0x20] sm:$0xff]   ;;  %vm893_vm1 = vcmask 64512  }
  0x6a   : > { %603 = vmatpush1.bf16.msra.mxu0 %v14207_v1  ;;  %v14212_v7 = vld [vmem:[%s20291_s1 + $0x28] sm:$0xff]   ;;  %v14231_v8 = vld [vmem:[%s20293_s3] sm:$0xff]   ;;  %v14213_v10 = vld [vmem:[%s20291_s1 + $0x30] sm:$0xff]   ;;  %s396_s19 = sand.u32 1, %s14446_s14   ;;  %p426_p4 = scmp.lt.s32.totalorder %s14541_s17, 1  ;;  %vm11006_vm2 = vcmask 1041409  }
  0x6b   : > { %604 = vmatprep.subr.bf16.mxu0 %v14461_v0  ;;  %s20423_s15 = smov (!%p420_p12, %s11805_s15), 15  ;;  %v14232_v9 = vld [vmem:[%s20293_s3 + $0x8] sm:$0xff]   ;;  %13100 = vmatprep.subr.bf16.mxu1 %v14231_v8  ;;  %v14233_v11 = vld [vmem:[%s20293_s3 + $0x10] sm:$0xff]   ;;  %v14214_v12 = vld [vmem:[%s20291_s1 + $0x38] sm:$0xff]   ;;  %s14853_s30 = scalar_lea.vmem [#allocation8], %s396_s19  ;;  %vm11008_vm3 = vcmask 1042434  }
  0x6c   : > { %s12436_s24 = sshll.u32 %s20423_s15, 3  ;;  %13101 = vmatpush3.bf16.msra.mxu1 %v14231_v8  ;;  %v14234_v13 = vld [vmem:[%s20293_s3 + $0x18] sm:$0xff]   ;;  %v14215_v14 = vld [vmem:[%s20291_s1 + $0x40] sm:$0xff]   ;;  %v14216_v15 = vld [vmem:[%s20291_s1 + $0x48] sm:$0xff]   ;;  %vm11010_vm4 = vcmask 1043459   ;;  %vm11012_vm5 = vcmask 1044484  }
  0x6d   : > { %s14691_s22 = scalar_lea.vmem %s20290_s0, %s12436_s24  ;;  %13102 = vmatprep.subr.bf16.mxu1 %v14232_v9  ;;  %v14217_v16 = vld [vmem:[%s20291_s1 + $0x50] sm:$0xff]   ;;  %v14218_v17 = vld [vmem:[%s20291_s1 + $0x58] sm:$0xff]   ;;  %v14235_v25 = vld [vmem:[%s20293_s3 + $0x20] sm:$0xff]   ;;  %vm11014_vm6 = vcmask 1045509   ;;  %vm11016_vm7 = vcmask 1046534   ;;  %vm11018_vm8 = vcmask 1047559  }
  0x6e   : > { %605 = vmatpush1.bf16.msra.mxu0 %v14208_v2  ;;  %v14221_v5 = vld [vmem:[%s14691_s22 + $0x4] ss:$8 sps:$4 sm:$0xff]   ;;  %v14219_v18 = vld [vmem:[%s14691_s22] ss:$8 sps:$4 sm:$0xff]   ;;  %v14222_v19 = vld [vmem:[%s14691_s22 + $0x14] ss:$8 sps:$4 sm:$0xff]  }
  0x6f   : > { %606 = vmatprep.subr.bf16.mxu0 %v14461_v0  ;;  %11835 = vmatprep.mubr.msk.bf16.mxu0 %vm589_vm0, %v14221_v5  ;;  %v14224_v20 = vld [vmem:[%s14691_s22 + $0x10] ss:$8 sps:$4 sm:$0xff]   ;;  %v14225_v21 = vld [vmem:[%s14691_s22 + $0x24] ss:$8 sps:$4 sm:$0xff]   ;;  %v14227_v22 = vld [vmem:[%s14691_s22 + $0x20] ss:$8 sps:$4 sm:$0xff]  }
  0x70   : > { %13103 = vmatpush3.bf16.msra.mxu1 %v14232_v9  ;;  %v14228_v23 = vld [vmem:[%s14691_s22 + $0x34] ss:$8 sps:$4 sm:$0xff]   ;;  %v14230_v24 = vld [vmem:[%s14691_s22 + $0x30] ss:$8 sps:$4 sm:$0xff]   ;;  %v14236_v26 = vld [vmem:[%s20293_s3 + $0x28] sm:$0xff]   ;;  %s16100_s13 = scalar_select %p426_p4, %s14541_s17, 1 }
  0x71   : > { %13104 = vmatprep.subr.bf16.mxu1 %v14233_v11  ;;  %v14237_v27 = vld [vmem:[%s20293_s3 + $0x30] sm:$0xff]   ;;  %v14238_v28 = vld [vmem:[%s20293_s3 + $0x38] sm:$0xff]   ;;  %v11814_v29 = vld [vmem:[#allocation2] ss:$0 sm:$0xff]  ;;  %s12433_s21 = sshll.u32 %s14541_s17, 4  ;;  %s11625_s17 = sshll.u32 %s14853_s30, 4  ;;  %s19566_s17 = int_to_ptr.vmem [resolvable:$true] %s11625_s17 }
  0x72   : > { %607 = vmatpush1.bf16.msra.mxu0 %v14209_v3  ;;  %v14753_v2 = vld [vmem:[#allocation7] sm:$0xff]  ;;  %v11839_v3 = vld [vmem:[%s20294_s4] ss:$0 sm:$0xff]  ;;  %s12437_s15 = sshll.u32 %s16100_s13, 12  ;;  %s12438_s18 = sshll.u32 %s16100_s13, 6 }
  0x73   : > { %608 = vmatprep.subr.bf16.mxu0 %v14461_v0  ;;  %s16118_s12 = scalar_lea.vmem %s20298_s8, %s12437_s15  ;;  %s16819_s24 = scalar_lea.vmem %s20299_s9, %s12438_s18 }
  0x74   : > { %13105 = vmatpush3.bf16.msra.mxu1 %v14233_v11  ;;  %s19553_s29 = scalar_lea.hbm %s20297_s7, %s12433_s21  ;;  %s11598_s11 = scalar_lea.sflag [#allocation4], %s396_s19 }
  0x75   : > { %13106 = vmatprep.subr.bf16.mxu1 %v14234_v13  ;;  %s14384_s27 = scalar_lea.vmem %s19566_s17, 16  ;;  %p20412_p8 = scmp.ne.s32.totalorder %s20337_s23, 0 }
  0x76   : > { %609 = vmatpush1.bf16.msra.mxu0 %v14210_v4  ;;  %p14385_p7 = scmp.ne.s32.totalorder %s19566_s17, %s14384_s27 }
  0x77   : > { %610 = vmatprep.subr.bf16.mxu0 %v14461_v0 }
  0x78   : > { %13107 = vmatpush3.bf16.msra.mxu1 %v14234_v13  ;;  %p14386_p11 = pnand %p14385_p7, %p20412_p8 }
  0x79   : > { %13108 = vmatprep.subr.bf16.mxu1 %v14235_v25 }
  0x7a   : > { %611 = vmatpush1.bf16.msra.mxu0 %v14211_v6  ;;  %p14387_p13 = pneg %p14386_p11 }
  0x7b   : > { %612 = vmatprep.subr.bf16.mxu0 %v14461_v0 }
  0x7c   : > { %13109 = vmatpush3.bf16.msra.mxu1 %v14235_v25 }
  0x7d   : > { %13110 = vmatprep.subr.bf16.mxu1 %v14236_v26 }
  0x7e   : > { %613 = vmatpush1.bf16.msra.mxu0 %v14212_v7 }
  0x7f   : > { %614 = vmatprep.subr.bf16.mxu0 %v14461_v0 }
  0x80   : > { %13111 = vmatpush3.bf16.msra.mxu1 %v14236_v26 }
  0x81   : > { %13112 = vmatprep.subr.bf16.mxu1 %v14237_v27 }
  0x82   : > { %615 = vmatpush1.bf16.msra.mxu0 %v14213_v10 }
  0x83   : > { %616 = vmatprep.subr.bf16.mxu0 %v14461_v0 }
  0x84   : > { %13113 = vmatpush3.bf16.msra.mxu1 %v14237_v27 }
  0x85   : > { %13114 = vmatprep.subr.bf16.mxu1 %v14238_v28 }
  0x86   : > { %617 = vmatpush1.bf16.msra.mxu0 %v14214_v12 }
  0x87   : > { %618 = vmatprep.subr.bf16.mxu0 %v14461_v0 }
  0x88   : > { %13115 = vmatpush3.bf16.msra.mxu1 %v14238_v28 }
  0x8a   : > { %619 = vmatpush1.bf16.msra.mxu0 %v14215_v14 }
  0x8b   : > { %620 = vmatprep.subr.bf16.mxu0 %v14461_v0 }
  0x8e   : > { %621 = vmatpush1.bf16.msra.mxu0 %v14216_v15 }
  0x8f   : > { %622 = vmatprep.subr.bf16.mxu0 %v14461_v0 }
  0x92   : > { %623 = vmatpush1.bf16.msra.mxu0 %v14217_v16 }
  0x93   : > { %624 = vmatprep.subr.bf16.mxu0 %v14461_v0 }
  0x96   : > { %625 = vmatpush1.bf16.msra.mxu0 %v14218_v17 }
  0x99   : > { %635 = vmatmul.mubr.bf16.vlgmr.msra.gmra.mrb[0].mxu0 %v14219_v18 }
  0x9a   : > { %11836 = vmatprep.mubr.msk.bf16.mxu0 %vm589_vm0, %v14222_v19 }
  0xa1   : > { %643 = vmatmul.mubr.bf16.gmra.mrb[4].mxu0 %v14224_v20 }
  0xa2   : > { %11837 = vmatprep.mubr.msk.bf16.mxu0 %vm589_vm0, %v14225_v21 }
  0xa9   : > { %651 = vmatmul.mubr.bf16.gmra.mrb[8].mxu0 %v14227_v22 }
  0xaa   : > { %11838 = vmatprep.mubr.msk.bf16.mxu0 %vm589_vm0, %v14228_v23 }
  0xb1   : > { %659 = vmatmul.mubr.bf16.gmra.mrb[12].mxu0 %v14230_v24 }
  0xb2   : > { %13154 = vmatprep.mubr.msk.f32.mxu0 %vm893_vm1, %v14753_v2 }
 0x16c   : > { %v636_v30 = vpop.f32.mrb[0].mxu0 }
 0x16d   : > { %v638_v31 = vpop.f32.mrb[1].mxu0  ;;  %v637_v32 = vadd.f32 %v11814_v29, %v636_v30 }
 0x16e   : > { %v639_v33 = vpop.f32.mrb[2].mxu0 }
 0x16f   : > { %v641_v34 = vpop.f32.mrb[3].mxu0  ;;  %v640_v35 = vadd.f32 %v11814_v29, %v639_v33  ;;  %v667_v36 = vmax.f32 %v637_v32, 0.0 }
 0x171   : > { %v668_v37 = vmax.f32 %v640_v35, 0.0 }
 0x173   : > { %v675_v38 = vpack.c.bf16 %v668_v37, %v667_v36 }
 0x174   : > { %v644_v39 = vpop.f32.mrb[4].mxu0 }
 0x175   : > { %v645_v40 = vadd.f32 %v11814_v29, %v644_v39  ;;  %v646_v41 = vpop.f32.mrb[5].mxu0  ;;  %13116 = vmatprep.mubr.bf16.mxu1 %v675_v38 }
 0x176   : > { %v647_v42 = vpop.f32.mrb[6].mxu0 }
 0x177   : > { %v648_v43 = vadd.f32 %v11814_v29, %v647_v42  ;;  %v649_v44 = vpop.f32.mrb[7].mxu0  ;;  %v669_v45 = vmax.f32 %v645_v40, 0.0 }
 0x178   : > { %v14762_v44 = vld [vmem:[#allocation7 + $0x8] sm:$0xff] }
 0x179   : > { %v670_v46 = vmax.f32 %v648_v43, 0.0 }
 0x17b   : > { %v676_v47 = vpack.c.bf16 %v670_v46, %v669_v45 }
 0x17c   : > { %v652_v48 = vpop.f32.mrb[8].mxu0 }
 0x17d   : > { %13117 = vmatmul.mubr.bf16.vlgmr.msra.gmra.mrb[0].mxu1 %v676_v47  ;;  %v653_v49 = vadd.f32 %v11814_v29, %v652_v48  ;;  %v654_v50 = vpop.f32.mrb[9].mxu0  ;;  %v14764_v48 = vld [vmem:[#allocation7 + $0x10] sm:$0xff] }
 0x17e   : > { %v655_v51 = vpop.f32.mrb[10].mxu0 }
 0x17f   : > { %v671_v52 = vmax.f32 %v653_v49, 0.0  ;;  %v656_v53 = vadd.f32 %v11814_v29, %v655_v51  ;;  %v657_v54 = vpop.f32.mrb[11].mxu0 }
 0x181   : > { %v672_v55 = vmax.f32 %v656_v53, 0.0  ;;  %v14770_v53 = vld [vmem:[#allocation7 + $0x18] sm:$0xff] }
 0x183   : > { %v677_v56 = vpack.c.bf16 %v672_v55, %v671_v52 }
 0x184   : > { %v660_v57 = vpop.f32.mrb[12].mxu0 }
 0x185   : > { %v661_v58 = vadd.f32 %v11814_v29, %v660_v57  ;;  %v662_v59 = vpop.f32.mrb[13].mxu0  ;;  %13120 = vmatprep.mubr.bf16.mxu1 %v677_v56  ;;  %v14774_v56 = vld [vmem:[#allocation7 + $0x20] sm:$0xff] }
 0x186   : > { %v663_v60 = vpop.f32.mrb[14].mxu0 }
 0x187   : > { %v673_v61 = vmax.f32 %v661_v58, 0.0  ;;  %v664_v62 = vadd.f32 %v11814_v29, %v663_v60  ;;  %v665_v63 = vpop.f32.mrb[15].mxu0 }
 0x188   : > { %v14788_v63 = vld [vmem:[#allocation7 + $0x30] sm:$0xff] }
 0x189   : > { %v674_v0 = vmax.f32 %v664_v62, 0.0  ;;  %v14784_v62 = vld [vmem:[#allocation7 + $0x28] sm:$0xff] }
 0x18b   : > { %v678_v1 = vpack.c.bf16 %v674_v0, %v673_v61 }
 0x18d   : > { %13121 = vmatmul.mubr.bf16.gmra.mrb[4].mxu1 %v678_v1 }
 0x18e   : > { %13126 = vmatprep.mubr.msk.f32.mxu1 %vm893_vm1, %v14753_v2 }
 0x250   : > { %v13118_v4 = vpop.f32.mrb[0].mxu1 }
 0x251   : > { %v793_v5 = vadd.f32 %v13118_v4, %v11839_v3  ;;  %v784_v6 = vpop.f32.mrb[1].mxu1 }
 0x252   : > { %v785_v7 = vadd.f32 %v11839_v3, %v784_v6  ;;  %v13119_v8 = vpop.f32.mrb[2].mxu1 }
 0x253   : > { %v11851_v9 = vmul.f32 -1.442695, %v793_v5  ;;  %v796_v10 = vadd.f32 %v13119_v8, %v11839_v3  ;;  %v787_v11 = vpop.f32.mrb[3].mxu1 }
 0x254   : > { %v11849_v12 = vmul.f32 -1.442695, %v785_v7  ;;  %v788_v13 = vadd.f32 %v11839_v3, %v787_v11 }
 0x255   : > { %14239 = vpow2.f32 %v11851_v9  ;;  %v11852_v14 = vmul.f32 -1.442695, %v796_v10 }
 0x256   : > { %14241 = vpow2.f32 %v11849_v12  ;;  %v815_v15 = vadd.f32 %v788_v13, %v785_v7  ;;  %v11850_v16 = vmul.f32 -1.442695, %v788_v13 }
 0x257   : > { %14243 = vpow2.f32 %v11852_v14 }
 0x258   : > { %v816_v17 = vadd.f32 %v815_v15, %v793_v5  ;;  %14245 = vpow2.f32 %v11850_v16 }
 0x25a   : > { %v817_v18 = vadd.f32 %v816_v17, %v796_v10 }
 0x25f   : > { %v14240_v19 = vpop.eup %14239 }
 0x260   : > { %v14242_v20 = vpop.eup %14241  ;;  %v863_v21 = vadd.f32 1.0, %v14240_v19  ;;  %v13122_v22 = vpop.f32.mrb[4].mxu1 }
 0x261   : > { %v14244_v23 = vpop.eup %14243  ;;  %v861_v24 = vadd.f32 1.0, %v14242_v20  ;;  %v809_v25 = vadd.f32 %v13122_v22, %v11839_v3  ;;  %v800_v26 = vpop.f32.mrb[5].mxu1 }
 0x262   : > { %v14246_v27 = vpop.eup %14245  ;;  %14247 = vrcp.f32 %v863_v21  ;;  %v864_v28 = vadd.f32 1.0, %v14244_v23  ;;  %v801_v29 = vadd.f32 %v11839_v3, %v800_v26  ;;  %v13123_v30 = vpop.f32.mrb[6].mxu1 }
 0x263   : > { %14249 = vrcp.f32 %v861_v24  ;;  %v862_v31 = vadd.f32 1.0, %v14246_v27  ;;  %v11855_v32 = vmul.f32 -1.442695, %v809_v25  ;;  %v803_v33 = vpop.f32.mrb[7].mxu1  ;;  %v812_v37 = vadd.f32 %v13123_v30, %v11839_v3 }
 0x264   : > { %14251 = vrcp.f32 %v864_v28  ;;  %v818_v34 = vadd.f32 %v817_v18, %v801_v29  ;;  %v11853_v35 = vmul.f32 -1.442695, %v801_v29  ;;  %v804_v36 = vadd.f32 %v11839_v3, %v803_v33  ;;  %v14796_v3 = vld [vmem:[#allocation7 + $0x38] sm:$0xff] }
 0x265   : > { %14253 = vrcp.f32 %v862_v31  ;;  %v11856_v50 = vmul.f32 -1.442695, %v812_v37 }
 0x266   : > { %14255 = vpow2.f32 %v11855_v32  ;;  %v819_v38 = vadd.f32 %v818_v34, %v804_v36  ;;  %v11854_v39 = vmul.f32 -1.442695, %v804_v36 }
 0x267   : > { %14257 = vpow2.f32 %v11853_v35 }
 0x268   : > { %v820_v40 = vadd.f32 %v819_v38, %v809_v25  ;;  %14259 = vpow2.f32 %v11854_v39 }
 0x269   : > { %14261 = vpow2.f32 %v11856_v50 }
 0x26a   : > { %v821_v41 = vadd.f32 %v820_v40, %v812_v37 }
 0x26c   : > { %v14248_v42 = vpop.eup %14247  ;;  %v822_v43 = vrot.slane %v821_v41, 4 }
 0x26d   : > { %v14250_v45 = vpop.eup %14249  ;;  %13152 = vmatprep.subr.mxu0 %v14248_v42 }
 0x26e   : > { %v14252_v46 = vpop.eup %14251  ;;  %v823_v47 = vadd.f32 %v822_v43, %v821_v41  ;;  %13124 = vmatprep.subr.mxu1 %v14250_v45  ;;  %13153 = vmatpush3.msra.mxu0 %v14248_v42 }
 0x26f   : > { %v14254_v49 = vpop.eup %14253  ;;  %13125 = vmatpush3.msra.mxu1 %v14250_v45  ;;  %13155 = vmatmul.mubr.msk.f32.vlgmr.msra.gmra.mrb[16].mxu0 %vm893_vm1, %v14762_v44 }
 0x270   : > { %v14256_v51 = vpop.eup %14255  ;;  %v824_v52 = vrot.slane %v823_v47, 2  ;;  %13127 = vmatmul.mubr.msk.f32.vlgmr.msra.gmra.mrb[8].mxu1 %vm893_vm1, %v14762_v44  ;;  %13138 = vmatprep.subr.mxu1 %v14254_v49 }
 0x271   : > { %v14258_v54 = vpop.eup %14257  ;;  %v867_v55 = vadd.f32 1.0, %v14256_v51  ;;  %13139 = vmatpush3.msra.mxu1 %v14254_v49  ;;  %13129 = vmatprep.mubr.msk.f32.mxu1 %vm893_vm1, %v14764_v48  ;;  %v14462_v49 = vmov 1983009808   ;;  %v1763_v51 = vlaneseq }
 0x272   : > { %v865_v57 = vadd.f32 1.0, %v14258_v54  ;;  %v825_v58 = vadd.f32 %v824_v52, %v823_v47  ;;  %13166 = vmatprep.subr.mxu1 %v14252_v46  ;;  %13157 = vmatprep.mubr.msk.f32.mxu0 %vm893_vm1, %v14764_v48  ;;  %v14260_v59 = vpop.eup %14259  ;;  %v1761_v50 = vunpack.c.l.s4 %v14462_v49 }
 0x273   : > { %13158 = vmatmul.mubr.msk.f32.gmra.mrb[18].mxu0 %vm893_vm1, %v14770_v53  ;;  %v866_v61 = vadd.f32 1.0, %v14260_v59  ;;  %v14262_v5 = vpop.eup %14261  ;;  %v1764_v59 = vshrl.u32 %v1763_v51, 7 }
 0x274   : > { %14263 = vrcp.f32 %v865_v57  ;;  %v826_v60 = vrot.slane %v825_v58, 1  ;;  %13130 = vmatmul.mubr.msk.f32.gmra.mrb[10].mxu1 %vm893_vm1, %v14770_v53  ;;  %13160 = vmatprep.mubr.msk.f32.mxu0 %vm893_vm1, %v14774_v56  ;;  %v868_v9 = vadd.f32 1.0, %v14262_v5 }
 0x275   : > { %14265 = vrcp.f32 %v867_v55  ;;  %13132 = vmatprep.mubr.msk.f32.mxu1 %vm893_vm1, %v14774_v56 }
 0x276   : > { %v827_v0 = vadd.f32 %v826_v60, %v825_v58  ;;  %14267 = vrcp.f32 %v866_v61  ;;  %v1762_v58 = vunpack.c.0.s8 %v1761_v50 }
 0x277   : > { %13161 = vmatmul.mubr.msk.f32.gmra.mrb[20].mxu0 %vm893_vm1, %v14784_v62 }
 0x278   : > { %v11848_v1 = vmul.f32 -0.015625, %v827_v0  ;;  %13133 = vmatmul.mubr.msk.f32.gmra.mrb[12].mxu1 %vm893_vm1, %v14784_v62  ;;  %13163 = vmatprep.mubr.msk.f32.mxu0 %vm893_vm1, %v14788_v63 }
 0x279   : > { %13135 = vmatprep.mubr.msk.f32.mxu1 %vm893_vm1, %v14788_v63 }
 0x27a   : > { %v831_v4 = vmul.f32 1.442695, %v11848_v1  ;;  %v14930_v1 = vsub.s32 %v1762_v58, %v1764_v59 }
 0x27b   : > { %13164 = vmatmul.mubr.msk.f32.gmra.mrb[22].mxu0 %vm893_vm1, %v14796_v3 }
 0x27c   : > { %14269 = vpow2.f32 %v831_v4  ;;  %13136 = vmatmul.mubr.msk.f32.gmra.mrb[14].mxu1 %vm893_vm1, %v14796_v3  ;;  %13182 = vmatprep.mubr.msk.f32.mxu0 %vm893_vm1, %v14753_v2 }
 0x27d   : > { %13140 = vmatprep.mubr.msk.f32.mxu1 %vm893_vm1, %v14753_v2  ;;  %14271 = vrcp.f32 %v868_v9 }
 0x27e   : > { %v14264_v6 = vpop.eup %14263 }
 0x27f   : > { %v14266_v7 = vpop.eup %14265  ;;  %13180 = vmatprep.subr.mxu0 %v14264_v6 }
 0x280   : > { %v14268_v8 = vpop.eup %14267  ;;  %13141 = vmatmul.mubr.msk.f32.vlgmr.msra.gmra.mrb[16].mxu1 %vm893_vm1, %v14762_v44  ;;  %13181 = vmatpush3.msra.mxu0 %v14264_v6 }
 0x281   : > { %13167 = vmatpush3.msra.mxu1 %v14252_v46  ;;  %13143 = vmatprep.mubr.msk.f32.mxu1 %vm893_vm1, %v14764_v48 }
 0x282   : > { %13183 = vmatmul.mubr.msk.f32.vlgmr.msra.gmra.mrb[24].mxu0 %vm893_vm1, %v14762_v44  ;;  %13194 = vmatprep.subr.mxu1 %v14268_v8 }
 0x283   : > { %13185 = vmatprep.mubr.msk.f32.mxu0 %vm893_vm1, %v14764_v48  ;;  %13208 = vmatprep.subr.mxu0 %v14266_v7 }
 0x284   : > { %13144 = vmatmul.mubr.msk.f32.gmra.mrb[18].mxu1 %vm893_vm1, %v14770_v53  ;;  %13209 = vmatpush3.msra.mxu0 %v14266_v7 }
 0x285   : > { %13146 = vmatprep.mubr.msk.f32.mxu1 %vm893_vm1, %v14774_v56 }
 0x286   : > { %v14270_v10 = vpop.eup %14269  ;;  %13186 = vmatmul.mubr.msk.f32.gmra.mrb[26].mxu0 %vm893_vm1, %v14770_v53 }
 0x287   : > { %v833_v11 = vadd.f32 1.0, %v14270_v10  ;;  %13188 = vmatprep.mubr.msk.f32.mxu0 %vm893_vm1, %v14774_v56  ;;  %v14272_v12 = vpop.eup %14271 }
 0x288   : > { %13147 = vmatmul.mubr.msk.f32.gmra.mrb[20].mxu1 %vm893_vm1, %v14784_v62 }
 0x289   : > { %14273 = vrcp.f32 %v833_v11  ;;  %13149 = vmatprep.mubr.msk.f32.mxu1 %vm893_vm1, %v14788_v63 }
 0x28a   : > { %13189 = vmatmul.mubr.msk.f32.gmra.mrb[28].mxu0 %vm893_vm1, %v14784_v62 }
 0x28b   : > { %13191 = vmatprep.mubr.msk.f32.mxu0 %vm893_vm1, %v14788_v63 }
 0x28c   : > { %13150 = vmatmul.mubr.msk.f32.gmra.mrb[22].mxu1 %vm893_vm1, %v14796_v3 }
 0x28d   : > { %13168 = vmatprep.mubr.msk.f32.mxu1 %vm893_vm1, %v14753_v2 }
 0x28e   : > { %13192 = vmatmul.mubr.msk.f32.gmra.mrb[30].mxu0 %vm893_vm1, %v14796_v3 }
 0x28f   : > { %13210 = vmatprep.mubr.msk.f32.mxu0 %vm893_vm1, %v14753_v2 }
 0x290   : > { %13169 = vmatmul.mubr.msk.f32.vlgmr.msra.gmra.mrb[24].mxu1 %vm893_vm1, %v14762_v44 }
 0x291   : > { %13171 = vmatprep.mubr.msk.f32.mxu1 %vm893_vm1, %v14764_v48  ;;  %13195 = vmatpush3.msra.mxu1 %v14268_v8 }
 0x292   : > { %13222 = vmatprep.subr.mxu1 %v14272_v12  ;;  %13211 = vmatmul.mubr.msk.f32.vlgmr.msra.gmra.mrb[32].mxu0 %vm893_vm1, %v14762_v44 }
 0x293   : > { %v14274_v13 = vpop.eup %14273  ;;  %13213 = vmatprep.mubr.msk.f32.mxu0 %vm893_vm1, %v14764_v48 }
 0x294   : > { %13172 = vmatmul.mubr.msk.f32.gmra.mrb[26].mxu1 %vm893_vm1, %v14770_v53  ;;  %836 = vst [vmem:[%s14853_s30] sm:$0x1] %v14274_v13  ;;  %s14464_s30 = smov [#allocation8]  }
 0x295   : > { %13174 = vmatprep.mubr.msk.f32.mxu1 %vm893_vm1, %v14774_v56  ;;  %s14388_s15 = sshll.u32 %s14464_s30, 4  ;;  %s14389_s15 = int_to_ptr.vmem [resolvable:$false] %s14388_s15 }
 0x296   : > { %13214 = vmatmul.mubr.msk.f32.gmra.mrb[34].mxu0 %vm893_vm1, %v14770_v53  ;;  %s14390_s28 = scalar_lea.vmem %s14389_s15, 32  ;;  %p14391_p1 = scmp.lt.s32.totalorder %s19566_s17, %s14389_s15 }
 0x297   : > { %13216 = vmatprep.mubr.msk.f32.mxu0 %vm893_vm1, %v14774_v56  ;;  %p14392_p6 = scmp.lt.s32.totalorder %s14390_s28, %s14384_s27 }
 0x298   : > { %13175 = vmatmul.mubr.msk.f32.gmra.mrb[28].mxu1 %vm893_vm1, %v14784_v62 }
 0x299   : > { %13177 = vmatprep.mubr.msk.f32.mxu1 %vm893_vm1, %v14788_v63  ;;  %p14393_p9 = por %p14392_p6, %p14391_p1 }
 0x29a   : > { %13217 = vmatmul.mubr.msk.f32.gmra.mrb[36].mxu0 %vm893_vm1, %v14784_v62 }
 0x29b   : > { %13219 = vmatprep.mubr.msk.f32.mxu0 %vm893_vm1, %v14788_v63  ;;  %p14394_p2 = pnand %p14393_p9, %p14387_p13 }
 0x29c   : > { %13178 = vmatmul.mubr.msk.f32.gmra.mrb[30].mxu1 %vm893_vm1, %v14796_v3 }
 0x29d   : > { %13196 = vmatprep.mubr.msk.f32.mxu1 %vm893_vm1, %v14753_v2 }
 0x29e   : > { %13220 = vmatmul.mubr.msk.f32.gmra.mrb[38].mxu0 %vm893_vm1, %v14796_v3 }
 0x2a0   : > { %13197 = vmatmul.mubr.msk.f32.vlgmr.msra.gmra.mrb[32].mxu1 %vm893_vm1, %v14762_v44 }
 0x2a1   : > { %13223 = vmatpush3.msra.mxu1 %v14272_v12  ;;  %13199 = vmatprep.mubr.msk.f32.mxu1 %vm893_vm1, %v14764_v48 }
 0x2a4   : > { %13200 = vmatmul.mubr.msk.f32.gmra.mrb[34].mxu1 %vm893_vm1, %v14770_v53 }
 0x2a5   : > { %13202 = vmatprep.mubr.msk.f32.mxu1 %vm893_vm1, %v14774_v56 }
 0x2a8   : > { %13203 = vmatmul.mubr.msk.f32.gmra.mrb[36].mxu1 %vm893_vm1, %v14784_v62 }
 0x2a9   : > { %13205 = vmatprep.mubr.msk.f32.mxu1 %vm893_vm1, %v14788_v63 }
 0x2ac   : > { %13206 = vmatmul.mubr.msk.f32.gmra.mrb[38].mxu1 %vm893_vm1, %v14796_v3 }
 0x2ad   : > { %13224 = vmatprep.mubr.msk.f32.mxu1 %vm893_vm1, %v14753_v2  ;;  %v14906_v2 = vld [vmem:[#allocation5] sm:$0xff] }
 0x2ae   : > { %13238 = vmatprep.mubr.msk.f32.mxu0 %vm893_vm1, %v14906_v2 }
 0x2b0   : > { %13225 = vmatmul.mubr.msk.f32.vlgmr.msra.gmra.mrb[40].mxu1 %vm893_vm1, %v14762_v44 }
 0x2b1   : > { %13227 = vmatprep.mubr.msk.f32.mxu1 %vm893_vm1, %v14764_v48 }
 0x2b4   : > { %13228 = vmatmul.mubr.msk.f32.gmra.mrb[42].mxu1 %vm893_vm1, %v14770_v53 }
 0x2b5   : > { %13230 = vmatprep.mubr.msk.f32.mxu1 %vm893_vm1, %v14774_v56  ;;  %v14463_v56 = vmov 1934713408  }
 0x2b6   : > { %v1825_v57 = vunpack.c.l.s4 %v14463_v56 }
 0x2b8   : > { %13231 = vmatmul.mubr.msk.f32.gmra.mrb[44].mxu1 %vm893_vm1, %v14784_v62  ;;  %v1826_v0 = vunpack.c.0.s8 %v1825_v57 }
 0x2b9   : > { %13233 = vmatprep.mubr.msk.f32.mxu1 %vm893_vm1, %v14788_v63 }
 0x2ba   : > { %v14940_v7 = vsub.s32 %v1826_v0, %v1764_v59 }
 0x2bc   : > { %13234 = vmatmul.mubr.msk.f32.gmra.mrb[46].mxu1 %vm893_vm1, %v14796_v3 }
 0x2bd   : > { %13252 = vmatprep.mubr.msk.f32.mxu1 %vm893_vm1, %v14906_v2 }
 0x342   : > { %v13156_v14 = vpop.f32.mrb[16].mxu0 }
 0x343   : > { %v13128_v15 = vpop.f32.mrb[8].mxu1  ;;  %v1194_v16 = vpop.f32.mrb[17].mxu0 }
 0x344   : > { %v1894_v17 = vcombine.low %v13128_v15, %v13156_v14  ;;  %v1895_v18 = vcombine.high %v13128_v15, %v13156_v14  ;;  %v984_v19 = vpop.f32.mrb[9].mxu1 }
 0x345   : > { %v1758_v20 = vcombine.low %v984_v19, %v1194_v16  ;;  %v1759_v21 = vcombine.high %v984_v19, %v1194_v16 }
 0x346   : > { %v13159_v22 = vpop.f32.mrb[18].mxu0  ;;  %v14943_v8 = vrot.slane %v1894_v17, %v14930_v1  ;;  %v14946_v9 = vrot.slane %v1895_v18, %v14930_v1 }
 0x347   : > { %v13131_v23 = vpop.f32.mrb[10].mxu1  ;;  %v1204_v24 = vpop.f32.mrb[19].mxu0  ;;  %v14949_v10 = vrot.slane %v1758_v20, %v14930_v1  ;;  %v14952_v11 = vrot.slane %v1759_v21, %v14930_v1 }
 0x348   : > { %v2166_v25 = vcombine.low %v13131_v23, %v13159_v22  ;;  %v2167_v26 = vcombine.high %v13131_v23, %v13159_v22  ;;  %v994_v27 = vpop.f32.mrb[11].mxu1 }
 0x349   : > { %v2030_v28 = vcombine.low %v994_v27, %v1204_v24  ;;  %v2031_v29 = vcombine.high %v994_v27, %v1204_v24 }
 0x34a   : > { %v13162_v30 = vpop.f32.mrb[20].mxu0  ;;  %v14957_v13 = vrot.slane %v2166_v25, %v14930_v1  ;;  %v14960_v14 = vrot.slane %v2167_v26, %v14930_v1 }
 0x34b   : > { %v13134_v31 = vpop.f32.mrb[12].mxu1  ;;  %v1214_v32 = vpop.f32.mrb[21].mxu0  ;;  %v14963_v15 = vrot.slane %v2030_v28, %v14930_v1  ;;  %v14966_v16 = vrot.slane %v2031_v29, %v14930_v1 }
 0x34c   : > { %v2438_v33 = vcombine.low %v13134_v31, %v13162_v30  ;;  %v2439_v34 = vcombine.high %v13134_v31, %v13162_v30  ;;  %v1004_v35 = vpop.f32.mrb[13].mxu1 }
 0x34d   : > { %v2302_v36 = vcombine.low %v1004_v35, %v1214_v32  ;;  %v2303_v37 = vcombine.high %v1004_v35, %v1214_v32 }
 0x34e   : > { %v13165_v38 = vpop.f32.mrb[22].mxu0  ;;  %v14969_v18 = vrot.slane %v2438_v33, %v14930_v1  ;;  %v14972_v19 = vrot.slane %v2439_v34, %v14930_v1 }
 0x34f   : > { %v13137_v39 = vpop.f32.mrb[14].mxu1  ;;  %v1224_v40 = vpop.f32.mrb[23].mxu0  ;;  %v14975_v23 = vrot.slane %v2302_v36, %v14930_v1  ;;  %v14978_v24 = vrot.slane %v2303_v37, %v14930_v1 }
 0x350   : > { %v2710_v41 = vcombine.low %v13137_v39, %v13165_v38  ;;  %v2711_v42 = vcombine.high %v13137_v39, %v13165_v38  ;;  %v1014_v43 = vpop.f32.mrb[15].mxu1 }
 0x351   : > { %v2574_v44 = vcombine.low %v1014_v43, %v1224_v40  ;;  %v2575_v45 = vcombine.high %v1014_v43, %v1224_v40 }
 0x352   : > { %v14981_v28 = vrot.slane %v2710_v41, %v14930_v1  ;;  %v14984_v29 = vrot.slane %v2711_v42, %v14930_v1 }
 0x353   : > { %v13142_v46 = vpop.f32.mrb[16].mxu1  ;;  %v14989_v33 = vrot.slane %v2574_v44, %v14930_v1  ;;  %v14992_v34 = vrot.slane %v2575_v45, %v14930_v1 }
 0x354   : > { %v1089_v47 = vpop.f32.mrb[17].mxu1 }
 0x355   : > { %v14912_v48 = vpop.f32.mrb[24].mxu0 }
 0x356   : > { %v14914_v52 = vpop.f32.mrb[25].mxu0 }
 0x357   : > { %v14916_v53 = vpop.f32.mrb[18].mxu1 }
 0x358   : > { %v14918_v54 = vpop.f32.mrb[19].mxu1 }
 0x359   : > { %v14920_v55 = vpop.f32.mrb[26].mxu0 }
 0x35a   : > { %v14922_v60 = vpop.f32.mrb[27].mxu0 }
 0x35b   : > { %v14924_v61 = vpop.f32.mrb[20].mxu1 }
 0x35c   : > { %v14926_v62 = vpop.f32.mrb[21].mxu1 }
 0x35d   : > { %v14928_v63 = vpop.f32.mrb[28].mxu0 }
 0x35e   : > { %v14932_v3 = vpop.f32.mrb[29].mxu0 }
 0x35f   : > { %v14934_v4 = vpop.f32.mrb[22].mxu1 }
 0x360   : > { %v14936_v5 = vpop.f32.mrb[23].mxu1 }
 0x361   : > { %v14938_v6 = vpop.f32.mrb[30].mxu0 }
 0x362   : > { %v14954_v12 = vpop.f32.mrb[31].mxu0 }
 0x363   : > { %v13170_v17 = vpop.f32.mrb[24].mxu1 }
 0x364   : > { %v1910_v20 = vcombine.low %v13142_v46, %v13170_v17  ;;  %v1911_v21 = vcombine.high %v13142_v46, %v13170_v17  ;;  %v1299_v22 = vpop.f32.mrb[25].mxu1 }
 0x365   : > { %v1774_v25 = vcombine.low %v1089_v47, %v1299_v22  ;;  %v1775_v26 = vcombine.high %v1089_v47, %v1299_v22  ;;  %v13212_v27 = vpop.f32.mrb[32].mxu0 }
 0x366   : > { %v1926_v30 = vcombine.low %v14912_v48, %v13212_v27  ;;  %v1927_v31 = vcombine.high %v14912_v48, %v13212_v27  ;;  %v1614_v32 = vpop.f32.mrb[33].mxu0  ;;  %v14997_v38 = vrot.slane %v1910_v20, %v14930_v1  ;;  %v15000_v39 = vrot.slane %v1911_v21, %v14930_v1 }
 0x367   : > { %v13173_v35 = vpop.f32.mrb[26].mxu1  ;;  %v1790_v36 = vcombine.low %v14914_v52, %v1614_v32  ;;  %v1791_v37 = vcombine.high %v14914_v52, %v1614_v32  ;;  %v15005_v43 = vrot.slane %v1774_v25, %v14930_v1  ;;  %v15008_v44 = vrot.slane %v1775_v26, %v14930_v1 }
 0x368   : > { %v2182_v40 = vcombine.low %v14916_v53, %v13173_v35  ;;  %v2183_v41 = vcombine.high %v14916_v53, %v13173_v35  ;;  %v1309_v42 = vpop.f32.mrb[27].mxu1  ;;  %v15013_v48 = vrot.slane %v1926_v30, %v14930_v1  ;;  %v15016_v49 = vrot.slane %v1927_v31, %v14930_v1 }
 0x369   : > { %v2046_v45 = vcombine.low %v14918_v54, %v1309_v42  ;;  %v2047_v46 = vcombine.high %v14918_v54, %v1309_v42  ;;  %v13215_v47 = vpop.f32.mrb[34].mxu0  ;;  %v15021_v56 = vrot.slane %v1790_v36, %v14930_v1  ;;  %v15024_v57 = vrot.slane %v1791_v37, %v14930_v1 }
 0x36a   : > { %v2198_v50 = vcombine.low %v14920_v55, %v13215_v47  ;;  %v2199_v51 = vcombine.high %v14920_v55, %v13215_v47  ;;  %v1624_v52 = vpop.f32.mrb[35].mxu0  ;;  %v15029_v59 = vrot.slane %v2182_v40, %v14930_v1  ;;  %v15032_v0 = vrot.slane %v2183_v41, %v14930_v1 }
 0x36b   : > { %v13176_v53 = vpop.f32.mrb[28].mxu1  ;;  %v2062_v54 = vcombine.low %v14922_v60, %v1624_v52  ;;  %v2063_v58 = vcombine.high %v14922_v60, %v1624_v52  ;;  %v15037_v21 = vrot.slane %v2046_v45, %v14930_v1  ;;  %v15040_v22 = vrot.slane %v2047_v46, %v14930_v1 }
 0x36c   : > { %v2454_v55 = vcombine.low %v14924_v61, %v13176_v53  ;;  %v2455_v17 = vcombine.high %v14924_v61, %v13176_v53  ;;  %v1319_v20 = vpop.f32.mrb[29].mxu1  ;;  %v15045_v27 = vrot.slane %v2198_v50, %v14930_v1  ;;  %v15048_v30 = vrot.slane %v2199_v51, %v14930_v1 }
 0x36d   : > { %v2318_v25 = vcombine.low %v14926_v62, %v1319_v20  ;;  %v2319_v60 = vcombine.high %v14926_v62, %v1319_v20  ;;  %v13218_v26 = vpop.f32.mrb[36].mxu0  ;;  %v15053_v36 = vrot.slane %v2062_v54, %v14930_v1  ;;  %v15056_v37 = vrot.slane %v2063_v58, %v14930_v1 }
 0x36e   : > { %v2470_v61 = vcombine.low %v14928_v63, %v13218_v26  ;;  %v2471_v31 = vcombine.high %v14928_v63, %v13218_v26  ;;  %v1634_v32 = vpop.f32.mrb[37].mxu0  ;;  %v15061_v41 = vrot.slane %v2454_v55, %v14930_v1  ;;  %v15064_v42 = vrot.slane %v2455_v17, %v14930_v1 }
 0x36f   : > { %v13179_v35 = vpop.f32.mrb[30].mxu1  ;;  %v2334_v62 = vcombine.low %v14932_v3, %v1634_v32  ;;  %v2335_v40 = vcombine.high %v14932_v3, %v1634_v32  ;;  %v2326_v47 = vrot.slane %v2318_v25, %v14930_v1  ;;  %v15070_v50 = vrot.slane %v2319_v60, %v14930_v1 }
 0x370   : > { %v2726_v63 = vcombine.low %v14934_v4, %v13179_v35  ;;  %v2727_v45 = vcombine.high %v14934_v4, %v13179_v35  ;;  %v1329_v46 = vpop.f32.mrb[31].mxu1  ;;  %v15075_v53 = vrot.slane %v2470_v61, %v14930_v1  ;;  %v15078_v54 = vrot.slane %v2471_v31, %v14930_v1 }
 0x371   : > { %v2590_v51 = vcombine.low %v14936_v5, %v1329_v46  ;;  %v2591_v3 = vcombine.high %v14936_v5, %v1329_v46  ;;  %v13221_v52 = vpop.f32.mrb[38].mxu0  ;;  %v15085_v20 = vrot.slane %v2334_v62, %v14930_v1  ;;  %v15088_v25 = vrot.slane %v2335_v40, %v14930_v1 }
 0x372   : > { %v2742_v58 = vcombine.low %v14938_v6, %v13221_v52  ;;  %v2743_v4 = vcombine.high %v14938_v6, %v13221_v52  ;;  %v1644_v55 = vpop.f32.mrb[39].mxu0  ;;  %v15093_v26 = vrot.slane %v2726_v63, %v14930_v1  ;;  %v15096_v61 = vrot.slane %v2727_v45, %v14930_v1 }
 0x373   : > { %v15082_v17 = vpop.f32.mrb[32].mxu1  ;;  %v2606_v5 = vcombine.low %v14954_v12, %v1644_v55  ;;  %v2607_v60 = vcombine.high %v14954_v12, %v1644_v55  ;;  %v1822_v31 = vcombine.low %v14949_v10, %v15005_v43  ;;  %v1823_v32 = vcombine.high %v14949_v10, %v15005_v43 }
 0x374   : > { %v15098_v6 = vpop.f32.mrb[33].mxu1  ;;  %v2598_v35 = vrot.slane %v2590_v51, %v14930_v1  ;;  %v15106_v62 = vrot.slane %v2591_v3, %v14930_v1  ;;  %v15113_v63 = vrot.slane %v2742_v58, %v14930_v1  ;;  %v15116_v45 = vrot.slane %v2743_v4, %v14930_v1 }
 0x375   : > { %v15125_v51 = vrot.slane %v2606_v5, %v14930_v1  ;;  %v15128_v3 = vrot.slane %v2607_v60, %v14930_v1  ;;  %v1974_v52 = vcombine.low %v14946_v9, %v15000_v39  ;;  %v1975_v58 = vcombine.high %v14946_v9, %v15000_v39 }
 0x376   : > { %20348 = vst [vmem:[#allocation18_spill] sm:$0xff] %v15113_v63  ;;  %20349 = vst [vmem:[#allocation19_spill] sm:$0xff] %v15116_v45  ;;  %v15137_v55 = vrot.slane %v1822_v31, %v14940_v7  ;;  %v15140_v43 = vrot.slane %v1823_v32, %v14940_v7  ;;  %v2094_v5 = vcombine.low %v14963_v15, %v15037_v21 }
 0x377   : > { %v15122_v46 = vpop.f32.mrb[34].mxu1  ;;  %20350 = vst [vmem:[#allocation20_spill] sm:$0xff] %v15128_v3  ;;  %v2095_v60 = vcombine.high %v14963_v15, %v15037_v21  ;;  %v15147_v10 = vrot.slane %v1974_v52, %v14940_v7  ;;  %v15150_v40 = vrot.slane %v1975_v58, %v14940_v7  ;;  %v2110_v9 = vcombine.low %v14966_v16, %v15040_v22 }
 0x378   : > { %v15134_v4 = vpop.f32.mrb[35].mxu1  ;;  %v2111_v39 = vcombine.high %v14966_v16, %v15040_v22  ;;  %v15157_v31 = vrot.slane %v2094_v5, %v14940_v7  ;;  %v2230_v15 = vcombine.low %v14957_v13, %v15029_v59  ;;  %v2231_v21 = vcombine.high %v14957_v13, %v15029_v59 }
 0x379   : > { %v15160_v32 = vrot.slane %v2095_v60, %v14940_v7  ;;  %v15169_v58 = vrot.slane %v2110_v9, %v14940_v7  ;;  %v2246_v16 = vcombine.low %v14960_v14, %v15032_v0  ;;  %v2247_v22 = vcombine.high %v14960_v14, %v15032_v0 }
 0x37a   : > { %v15172_v12 = vrot.slane %v2111_v39, %v14940_v7  ;;  %v15181_v60 = vrot.slane %v2230_v15, %v14940_v7  ;;  %v15184_v13 = vrot.slane %v2231_v21, %v14940_v7  ;;  %v2366_v59 = vcombine.low %v14975_v23, %v2326_v47 }
 0x37b   : > { %v15166_v52 = vpop.f32.mrb[36].mxu1  ;;  %v2367_v9 = vcombine.high %v14975_v23, %v2326_v47  ;;  %v15189_v39 = vrot.slane %v2246_v16, %v14940_v7  ;;  %v15192_v45 = vrot.slane %v2247_v22, %v14940_v7  ;;  %v2382_v14 = vcombine.low %v14978_v24, %v15070_v50 }
 0x37c   : > { %v15178_v5 = vpop.f32.mrb[37].mxu1  ;;  %v2383_v0 = vcombine.high %v14978_v24, %v15070_v50  ;;  %v15199_v15 = vrot.slane %v2366_v59, %v14940_v7  ;;  %v2502_v23 = vcombine.low %v14969_v18, %v15061_v41  ;;  %v2503_v47 = vcombine.high %v14969_v18, %v15061_v41 }
 0x37d   : > { %v15202_v21 = vrot.slane %v2367_v9, %v14940_v7  ;;  %v15211_v22 = vrot.slane %v2382_v14, %v14940_v7  ;;  %v2518_v24 = vcombine.low %v14972_v19, %v15064_v42  ;;  %v2519_v50 = vcombine.high %v14972_v19, %v15064_v42 }
 0x37e   : > { %v15214_v63 = vrot.slane %v2383_v0, %v14940_v7  ;;  %v15223_v9 = vrot.slane %v2502_v23, %v14940_v7  ;;  %v15226_v18 = vrot.slane %v2503_v47, %v14940_v7  ;;  %v2638_v41 = vcombine.low %v14989_v33, %v2598_v35 }
 0x37f   : > { %v15208_v16 = vpop.f32.mrb[38].mxu1  ;;  %v2639_v14 = vcombine.high %v14989_v33, %v2598_v35  ;;  %v15231_v0 = vrot.slane %v2518_v24, %v14940_v7  ;;  %v15234_v3 = vrot.slane %v2519_v50, %v14940_v7  ;;  %v2654_v19 = vcombine.low %v14992_v34, %v15106_v62 }
 0x380   : > { %v15220_v59 = vpop.f32.mrb[39].mxu1  ;;  %v2655_v42 = vcombine.high %v14992_v34, %v15106_v62  ;;  %v15241_v23 = vrot.slane %v2638_v41, %v14940_v7  ;;  %v2774_v33 = vcombine.low %v14981_v28, %v15093_v26  ;;  %v2775_v35 = vcombine.high %v14981_v28, %v15093_v26 }
 0x381   : > { %20351 = vst [vmem:[#allocation21_spill] sm:$0xff] %v15234_v3  ;;  %v15244_v47 = vrot.slane %v2639_v14, %v14940_v7  ;;  %v15251_v50 = vrot.slane %v2654_v19, %v14940_v7  ;;  %v2790_v34 = vcombine.low %v14984_v29, %v15096_v61  ;;  %v2791_v62 = vcombine.high %v14984_v29, %v15096_v61 }
 0x382   : > { %20352 = vst [vmem:[#allocation22_spill] sm:$0xff] %v15241_v23  ;;  %v15254_v3 = vrot.slane %v2655_v42, %v14940_v7  ;;  %v15263_v28 = vrot.slane %v2774_v33, %v14940_v7  ;;  %v15266_v26 = vrot.slane %v2775_v35, %v14940_v7  ;;  %v20361_v35 = vcombine.high %v14952_v11, %v15008_v44 }
 0x383   : > { %20353 = vst [vmem:[#allocation23_spill] sm:$0xff] %v15244_v47  ;;  %v13226_v24 = vpop.f32.mrb[40].mxu1  ;;  %20354 = vst [vmem:[#allocation24_spill] sm:$0xff] %v15251_v50  ;;  %v15274_v29 = vrot.slane %v2791_v62, %v14940_v7 }
 0x384   : > { %20355 = vst [vmem:[#allocation25_spill] sm:$0xff] %v15254_v3  ;;  %v1942_v41 = vcombine.low %v15082_v17, %v13226_v24  ;;  %v1943_v14 = vcombine.high %v15082_v17, %v13226_v24  ;;  %v1719_v47 = vpop.f32.mrb[41].mxu1  ;;  %20356 = vst [vmem:[#allocation26_spill] sm:$0xff] %v15263_v28  ;;  %v15271_v3 = vrot.slane %v2790_v34, %v14940_v7 }
 0x385   : > { %20357 = vst [vmem:[#allocation27_spill] sm:$0xff] %v15266_v26  ;;  %v1806_v19 = vcombine.low %v15098_v6, %v1719_v47  ;;  %v1807_v42 = vcombine.high %v15098_v6, %v1719_v47  ;;  %20359 = vst [vmem:[#allocation29_spill] sm:$0xff] %v15274_v29  ;;  %v20360_v17 = vcombine.low %v14952_v11, %v15008_v44 }
 0x386   : > { %20358 = vst [vmem:[#allocation28_spill] sm:$0xff] %v15271_v3  ;;  %v15277_v61 = vrot.slane %v1942_v41, %v14930_v1  ;;  %v1853_v24 = vrot.slane %v20361_v35, %v14940_v7  ;;  %v20362_v6 = vcombine.low %v14943_v8, %v14997_v38  ;;  %v15294_v34 = vrot.slane %v1943_v14, %v14930_v1 }
 0x387   : > { %v1846_v33 = vrot.slane %v20360_v17, %v14940_v7  ;;  %v1814_v62 = vrot.slane %v1806_v19, %v14930_v1  ;;  %v1821_v41 = vrot.slane %v1807_v42, %v14930_v1  ;;  %v13229_v29 = vpop.f32.mrb[42].mxu1  ;;  %v20363_v17 = vcombine.high %v14943_v8, %v14997_v38 }
 0x388   : > { %v15291_v47 = vrot.slane %v20362_v6, %v14940_v7  ;;  %v2214_v44 = vcombine.low %v15122_v46, %v13229_v29  ;;  %v2215_v35 = vcombine.high %v15122_v46, %v13229_v29  ;;  %v1729_v6 = vpop.f32.mrb[43].mxu1  ;;  %v1990_v14 = vcombine.low %v15013_v48, %v15277_v61 }
 0x389   : > { %v15302_v11 = vrot.slane %v20363_v17, %v14940_v7  ;;  %v1991_v19 = vcombine.high %v15013_v48, %v15277_v61  ;;  %v2078_v42 = vcombine.low %v15134_v4, %v1729_v6  ;;  %v2079_v3 = vcombine.high %v15134_v4, %v1729_v6 }
 0x38a   : > { %v1854_v26 = vcombine.low %v15021_v56, %v1814_v62  ;;  %v1855_v8 = vcombine.high %v15021_v56, %v1814_v62  ;;  %v15315_v38 = vrot.slane %v2214_v44, %v14930_v1  ;;  %v15318_v46 = vrot.slane %v2215_v35, %v14930_v1 }
 0x38b   : > { %v1870_v29 = vcombine.low %v15024_v57, %v1821_v41  ;;  %v1871_v17 = vcombine.high %v15024_v57, %v1821_v41  ;;  %v15323_v48 = vrot.slane %v2078_v42, %v14930_v1  ;;  %v15326_v61 = vrot.slane %v2079_v3, %v14930_v1  ;;  %v13232_v4 = vpop.f32.mrb[44].mxu1 }
 0x38c   : > { %v1862_v6 = vrot.slane %v1854_v26, %v14940_v7  ;;  %v1869_v56 = vrot.slane %v1855_v8, %v14940_v7  ;;  %v2486_v62 = vcombine.low %v15166_v52, %v13232_v4  ;;  %v2487_v44 = vcombine.high %v15166_v52, %v13232_v4  ;;  %v1739_v35 = vpop.f32.mrb[45].mxu1  ;;  %v15344_v52 = vld [vmem:[#allocation5 + $0x8] sm:$0xff] }
 0x38d   : > { %v1878_v28 = vrot.slane %v1870_v29, %v14940_v7  ;;  %v1885_v57 = vrot.slane %v1871_v17, %v14940_v7  ;;  %v2350_v41 = vcombine.low %v15178_v5, %v1739_v35  ;;  %v2351_v42 = vcombine.high %v15178_v5, %v1739_v35 }
 0x38e   : > { %v1886_v3 = vcombine.low %v15137_v55, %v1862_v6  ;;  %v1887_v50 = vcombine.high %v15137_v55, %v1862_v6  ;;  %v15339_v26 = vrot.slane %v2486_v62, %v14930_v1  ;;  %v15342_v8 = vrot.slane %v2487_v44, %v14930_v1 }
 0x38f   : > { %v1888_v29 = vcombine.low %v15140_v43, %v1869_v56  ;;  %v1889_v17 = vcombine.high %v15140_v43, %v1869_v56  ;;  %v15349_v4 = vrot.slane %v2350_v41, %v14930_v1  ;;  %v15352_v5 = vrot.slane %v2351_v42, %v14930_v1  ;;  %v13235_v35 = vpop.f32.mrb[46].mxu1 }
 0x390   : > { %13236 = vmatprep.subr.mxu0 %v1886_v3  ;;  %13250 = vmatprep.subr.mxu1 %v1887_v50  ;;  %v15354_v55 = vcombine.low %v1846_v33, %v1878_v28  ;;  %v2758_v6 = vcombine.low %v15208_v16, %v13235_v35  ;;  %v2759_v62 = vcombine.high %v15208_v16, %v13235_v35  ;;  %v1749_v44 = vpop.f32.mrb[47].mxu1 }
 0x391   : > { %13237 = vmatpush3.msra.mxu0 %v1886_v3  ;;  %13251 = vmatpush3.msra.mxu1 %v1887_v50  ;;  %v15358_v23 = vcombine.high %v1846_v33, %v1878_v28  ;;  %v2622_v43 = vcombine.low %v15220_v59, %v1749_v44  ;;  %v2623_v56 = vcombine.high %v15220_v59, %v1749_v44  ;;  %v15374_v50 = vld [vmem:[#allocation5 + $0x10] sm:$0xff]  ;;  %v15384_v3 = vld [vmem:[#allocation5 + $0x18] sm:$0xff] }
 0x392   : > { %13239 = vmatmul.mubr.msk.f32.vlgmr.msra.gmra.mrb[40].mxu0 %vm893_vm1, %v15344_v52  ;;  %13253 = vmatmul.mubr.msk.f32.vlgmr.msra.gmra.mrb[48].mxu1 %vm893_vm1, %v15344_v52  ;;  %v15366_v41 = vcombine.low %v1853_v24, %v1885_v57  ;;  %v15369_v42 = vrot.slane %v2758_v6, %v14930_v1  ;;  %v15372_v16 = vrot.slane %v2759_v62, %v14930_v1  ;;  %v15389_v6 = vld [vmem:[#allocation5 + $0x20] sm:$0xff] }
 0x393   : > { %13264 = vmatprep.subr.mxu0 %v1888_v29  ;;  %13278 = vmatprep.subr.mxu1 %v1889_v17  ;;  %v15376_v28 = vcombine.high %v1853_v24, %v1885_v57  ;;  %v15379_v59 = vrot.slane %v2622_v43, %v14930_v1  ;;  %v15382_v33 = vrot.slane %v2623_v56, %v14930_v1  ;;  %v15429_v56 = vld [vmem:[#allocation5 + $0x30] sm:$0xff] }
 0x394   : > { %13265 = vmatpush3.msra.mxu0 %v1888_v29  ;;  %13279 = vmatpush3.msra.mxu1 %v1889_v17  ;;  %v1998_v35 = vrot.slane %v1990_v14, %v14940_v7  ;;  %v2005_v24 = vrot.slane %v1991_v19, %v14940_v7  ;;  %v2006_v57 = vcombine.low %v15016_v49, %v15294_v34 }
 0x395   : > { %13292 = vmatprep.subr.mxu0 %v15354_v55  ;;  %13306 = vmatprep.subr.mxu1 %v15358_v23  ;;  %v2007_v1 = vcombine.high %v15016_v49, %v15294_v34  ;;  %v2126_v19 = vcombine.low %v15053_v36, %v15323_v48  ;;  %v2127_v43 = vcombine.high %v15053_v36, %v15323_v48 }
 0x396   : > { %13241 = vmatprep.mubr.msk.f32.mxu0 %vm893_vm1, %v15374_v50  ;;  %13255 = vmatprep.mubr.msk.f32.mxu1 %vm893_vm1, %v15374_v50  ;;  %v15401_v14 = vcombine.low %v15291_v47, %v1998_v35  ;;  %v15404_v29 = vcombine.high %v15291_v47, %v1998_v35  ;;  %v15413_v49 = vcombine.low %v15302_v11, %v2005_v24  ;;  %v15423_v47 = vld [vmem:[#allocation5 + $0x28] sm:$0xff] }
 0x397   : > { %13242 = vmatmul.mubr.msk.f32.gmra.mrb[42].mxu0 %vm893_vm1, %v15384_v3  ;;  %13256 = vmatmul.mubr.msk.f32.gmra.mrb[50].mxu1 %vm893_vm1, %v15384_v3  ;;  %v15416_v34 = vcombine.high %v15302_v11, %v2005_v24  ;;  %v2014_v17 = vrot.slane %v2006_v57, %v14940_v7  ;;  %v2021_v62 = vrot.slane %v2007_v1, %v14940_v7 }
 0x398   : > { %13244 = vmatprep.mubr.msk.f32.mxu0 %vm893_vm1, %v15389_v6  ;;  %13258 = vmatprep.mubr.msk.f32.mxu1 %vm893_vm1, %v15389_v6  ;;  %v2134_v44 = vrot.slane %v2126_v19, %v14940_v7  ;;  %v2142_v24 = vcombine.low %v15056_v37, %v15326_v61  ;;  %v2143_v57 = vcombine.high %v15056_v37, %v15326_v61 }
 0x399   : > { %v15432_v11 = vcombine.low %v15147_v10, %v2014_v17  ;;  %v15435_v35 = vcombine.high %v15147_v10, %v2014_v17  ;;  %v15442_v1 = vcombine.low %v15150_v40, %v2021_v62  ;;  %v15445_v19 = vcombine.high %v15150_v40, %v2021_v62  ;;  %v15464_v40 = vld [vmem:[#allocation5 + $0x38] sm:$0xff] }
 0x39a   : > { %v15448_v36 = vcombine.low %v15157_v31, %v2134_v44  ;;  %v15451_v48 = vcombine.high %v15157_v31, %v2134_v44  ;;  %v2141_v37 = vrot.slane %v2127_v43, %v14940_v7  ;;  %v2150_v10 = vrot.slane %v2142_v24, %v14940_v7 }
 0x39b   : > { %13245 = vmatmul.mubr.msk.f32.gmra.mrb[44].mxu0 %vm893_vm1, %v15423_v47  ;;  %13259 = vmatmul.mubr.msk.f32.gmra.mrb[52].mxu1 %vm893_vm1, %v15423_v47  ;;  %v2157_v61 = vrot.slane %v2143_v57, %v14940_v7  ;;  %v2262_v31 = vcombine.low %v15045_v27, %v15315_v38  ;;  %v2263_v17 = vcombine.high %v15045_v27, %v15315_v38 }
 0x39c   : > { %20364 = vst [vmem:[#allocation30_spill] sm:$0xff] %v15448_v36  ;;  %20365 = vst [vmem:[#allocation31_spill] sm:$0xff] %v15451_v48  ;;  %13247 = vmatprep.mubr.msk.f32.mxu0 %vm893_vm1, %v15429_v56  ;;  %13261 = vmatprep.mubr.msk.f32.mxu1 %vm893_vm1, %v15429_v56  ;;  %v2278_v62 = vcombine.low %v15048_v30, %v15318_v46  ;;  %v15473_v44 = vcombine.low %v15160_v32, %v2141_v37 }
 0x39d   : > { %v15476_v43 = vcombine.high %v15160_v32, %v2141_v37  ;;  %v15479_v24 = vcombine.low %v15169_v58, %v2150_v10  ;;  %v15482_v57 = vcombine.high %v15169_v58, %v2150_v10  ;;  %v15485_v48 = vcombine.low %v15172_v12, %v2157_v61 }
 0x39e   : > { %v15488_v27 = vcombine.high %v15172_v12, %v2157_v61  ;;  %v2270_v38 = vrot.slane %v2262_v31, %v14940_v7  ;;  %v2277_v36 = vrot.slane %v2263_v17, %v14940_v7  ;;  %v2286_v32 = vrot.slane %v2278_v62, %v14940_v7 }
 0x39f   : > { %13248 = vmatmul.mubr.msk.f32.gmra.mrb[46].mxu0 %vm893_vm1, %v15464_v40  ;;  %13262 = vmatmul.mubr.msk.f32.gmra.mrb[54].mxu1 %vm893_vm1, %v15464_v40  ;;  %v2279_v58 = vcombine.high %v15048_v30, %v15318_v46  ;;  %v2398_v37 = vcombine.low %v15085_v20, %v15349_v4 }
 0x3a0   : > { %13266 = vmatprep.mubr.msk.f32.mxu0 %vm893_vm1, %v14906_v2  ;;  %13280 = vmatprep.mubr.msk.f32.mxu1 %vm893_vm1, %v14906_v2  ;;  %v15506_v12 = vcombine.low %v15181_v60, %v2270_v38  ;;  %v15509_v10 = vcombine.high %v15181_v60, %v2270_v38  ;;  %v15512_v61 = vcombine.low %v15184_v13, %v2277_v36 }
 0x3a1   : > { %v15515_v30 = vcombine.high %v15184_v13, %v2277_v36  ;;  %v15518_v46 = vcombine.low %v15189_v39, %v2286_v32  ;;  %v15521_v31 = vcombine.high %v15189_v39, %v2286_v32  ;;  %v2293_v17 = vrot.slane %v2279_v58, %v14940_v7 }
 0x3a2   : > { %v2406_v62 = vrot.slane %v2398_v37, %v14940_v7  ;;  %v2399_v60 = vcombine.high %v15085_v20, %v15349_v4  ;;  %v2414_v38 = vcombine.low %v15088_v25, %v15352_v5  ;;  %v2415_v13 = vcombine.high %v15088_v25, %v15352_v5 }
 0x3a3   : > { %13267 = vmatmul.mubr.msk.f32.vlgmr.msra.gmra.mrb[48].mxu0 %vm893_vm1, %v15344_v52  ;;  %13281 = vmatmul.mubr.msk.f32.vlgmr.msra.gmra.mrb[56].mxu1 %vm893_vm1, %v15344_v52  ;;  %v15536_v39 = vcombine.low %v15192_v45, %v2293_v17  ;;  %v15539_v36 = vcombine.high %v15192_v45, %v2293_v17  ;;  %v2534_v20 = vcombine.low %v15075_v53, %v15339_v26 }
 0x3a4   : > { %13293 = vmatpush3.msra.mxu0 %v15354_v55  ;;  %13307 = vmatpush3.msra.mxu1 %v15358_v23  ;;  %v15546_v25 = vcombine.low %v15199_v15, %v2406_v62  ;;  %v15549_v4 = vcombine.high %v15199_v15, %v2406_v62  ;;  %v2413_v5 = vrot.slane %v2399_v60, %v14940_v7 }
 0x3a5   : > { %13320 = vmatprep.subr.mxu0 %v15366_v41  ;;  %13334 = vmatprep.subr.mxu1 %v15376_v28  ;;  %v2422_v45 = vrot.slane %v2414_v38, %v14940_v7  ;;  %v2429_v32 = vrot.slane %v2415_v13, %v14940_v7  ;;  %v2542_v55 = vrot.slane %v2534_v20, %v14940_v7  ;;  %v20366_v20 = vld [vmem:[#allocation20_spill] sm:$0xff] }
 0x3a6   : > { %13269 = vmatprep.mubr.msk.f32.mxu0 %vm893_vm1, %v15374_v50  ;;  %13283 = vmatprep.mubr.msk.f32.mxu1 %vm893_vm1, %v15374_v50  ;;  %v15562_v15 = vcombine.low %v15202_v21, %v2413_v5  ;;  %v15565_v23 = vcombine.high %v15202_v21, %v2413_v5  ;;  %v2535_v58 = vcombine.high %v15075_v53, %v15339_v26 }
 0x3a7   : > { %13270 = vmatmul.mubr.msk.f32.gmra.mrb[50].mxu0 %vm893_vm1, %v15384_v3  ;;  %13284 = vmatmul.mubr.msk.f32.gmra.mrb[58].mxu1 %vm893_vm1, %v15384_v3  ;;  %v15574_v37 = vcombine.low %v15211_v22, %v2422_v45  ;;  %v15577_v17 = vcombine.high %v15211_v22, %v2422_v45  ;;  %v15580_v62 = vcombine.low %v15214_v63, %v2429_v32  ;;  %v20367_v45 = vld [vmem:[#allocation18_spill] sm:$0xff] }
 0x3a8   : > { %13272 = vmatprep.mubr.msk.f32.mxu0 %vm893_vm1, %v15389_v6  ;;  %13286 = vmatprep.mubr.msk.f32.mxu1 %vm893_vm1, %v15389_v6  ;;  %v15587_v53 = vcombine.high %v15214_v63, %v2429_v32  ;;  %v15590_v21 = vcombine.low %v15223_v9, %v2542_v55  ;;  %v15593_v26 = vcombine.high %v15223_v9, %v2542_v55 }
 0x3a9   : > { %v2549_v22 = vrot.slane %v2535_v58, %v14940_v7  ;;  %v2550_v60 = vcombine.low %v15078_v54, %v15342_v8  ;;  %v2551_v38 = vcombine.high %v15078_v54, %v15342_v8  ;;  %v2670_v13 = vcombine.low %v15125_v51, %v15379_v59 }
 0x3aa   : > { %v2671_v63 = vcombine.high %v15125_v51, %v15379_v59  ;;  %v2686_v5 = vcombine.low %v20366_v20, %v15382_v33  ;;  %v2687_v9 = vcombine.high %v20366_v20, %v15382_v33  ;;  %v2806_v32 = vcombine.low %v20367_v45, %v15369_v42  ;;  %v20370_v20 = vld [vmem:[#allocation21_spill] sm:$0xff] }
 0x3ab   : > { %13273 = vmatmul.mubr.msk.f32.gmra.mrb[52].mxu0 %vm893_vm1, %v15423_v47  ;;  %13287 = vmatmul.mubr.msk.f32.gmra.mrb[60].mxu1 %vm893_vm1, %v15423_v47  ;;  %v15615_v54 = vcombine.low %v15226_v18, %v2549_v22  ;;  %v15618_v51 = vcombine.high %v15226_v18, %v2549_v22  ;;  %v2558_v8 = vrot.slane %v2550_v60, %v14940_v7 }
 0x3ac   : > { %13275 = vmatprep.mubr.msk.f32.mxu0 %vm893_vm1, %v15429_v56  ;;  %13289 = vmatprep.mubr.msk.f32.mxu1 %vm893_vm1, %v15429_v56  ;;  %v2565_v59 = vrot.slane %v2551_v38, %v14940_v7  ;;  %v2678_v33 = vrot.slane %v2670_v13, %v14940_v7  ;;  %v2685_v55 = vrot.slane %v2671_v63, %v14940_v7  ;;  %v20371_v38 = vld [vmem:[#allocation22_spill] sm:$0xff] }
 0x3ad   : > { %20368 = vst [vmem:[#allocation20_spill] sm:$0xff] %v15615_v54  ;;  %20369 = vst [vmem:[#allocation18_spill] sm:$0xff] %v15618_v51  ;;  %v15629_v58 = vcombine.low %v15231_v0, %v2558_v8  ;;  %v15632_v18 = vcombine.high %v15231_v0, %v2558_v8  ;;  %v2694_v22 = vrot.slane %v2686_v5, %v14940_v7  ;;  %v20373_v0 = vld [vmem:[#allocation23_spill] sm:$0xff]  ;;  %v20376_v8 = vld [vmem:[#allocation24_spill] sm:$0xff] }
 0x3ae   : > { %v2701_v60 = vrot.slane %v2687_v9, %v14940_v7  ;;  %v15637_v51 = vcombine.low %v20370_v20, %v2565_v59  ;;  %v15640_v54 = vcombine.high %v20370_v20, %v2565_v59  ;;  %v15643_v13 = vcombine.low %v20371_v38, %v2678_v33  ;;  %v20378_v20 = vld [vmem:[#allocation25_spill] sm:$0xff] }
 0x3af   : > { %v15646_v63 = vcombine.high %v20371_v38, %v2678_v33  ;;  %13276 = vmatmul.mubr.msk.f32.gmra.mrb[54].mxu0 %vm893_vm1, %v15464_v40  ;;  %13290 = vmatmul.mubr.msk.f32.gmra.mrb[62].mxu1 %vm893_vm1, %v15464_v40  ;;  %v15653_v5 = vcombine.low %v20373_v0, %v2685_v55  ;;  %v15656_v9 = vcombine.high %v20373_v0, %v2685_v55 }
 0x3b0   : > { %v15659_v59 = vcombine.low %v20376_v8, %v2694_v22  ;;  %13294 = vmatprep.mubr.msk.f32.mxu0 %vm893_vm1, %v14906_v2  ;;  %13308 = vmatprep.mubr.msk.f32.mxu1 %vm893_vm1, %v14906_v2  ;;  %v15666_v33 = vcombine.high %v20376_v8, %v2694_v22  ;;  %v15669_v38 = vcombine.low %v20378_v20, %v2701_v60  ;;  %v20380_v22 = vld [vmem:[#allocation26_spill] sm:$0xff]  ;;  %v20381_v8 = vld [vmem:[#allocation27_spill] sm:$0xff] }
 0x3b1   : > { %20372 = vst [vmem:[#allocation21_spill] sm:$0xff] %v15646_v63  ;;  %20374 = vst [vmem:[#allocation22_spill] sm:$0xff] %v15653_v5  ;;  %v15672_v5 = vcombine.high %v20378_v20, %v2701_v60  ;;  %v2814_v55 = vrot.slane %v2806_v32, %v14940_v7  ;;  %v2807_v0 = vcombine.high %v20367_v45, %v15369_v42 }
 0x3b2   : > { %20375 = vst [vmem:[#allocation23_spill] sm:$0xff] %v15656_v9  ;;  %20377 = vst [vmem:[#allocation24_spill] sm:$0xff] %v15659_v59  ;;  %v20379_v59 = vld [vmem:[#allocation19_spill] sm:$0xff] }
 0x3b3   : > { %v2822_v9 = vcombine.low %v20379_v59, %v15372_v16  ;;  %v2823_v63 = vcombine.high %v20379_v59, %v15372_v16  ;;  %13295 = vmatmul.mubr.msk.f32.vlgmr.msra.gmra.mrb[56].mxu0 %vm893_vm1, %v15344_v52  ;;  %13309 = vmatmul.mubr.msk.f32.vlgmr.msra.gmra.mrb[64].mxu1 %vm893_vm1, %v15344_v52  ;;  %v15686_v60 = vcombine.low %v20380_v22, %v2814_v55 }
 0x3b4   : > { %v15689_v32 = vcombine.high %v20380_v22, %v2814_v55  ;;  %v2821_v42 = vrot.slane %v2807_v0, %v14940_v7  ;;  %13321 = vmatpush3.msra.mxu0 %v15366_v41  ;;  %13335 = vmatpush3.msra.mxu1 %v15376_v28  ;;  %v20382_v41 = vld [vmem:[#allocation28_spill] sm:$0xff] }
 0x3b5   : > { %v2830_v16 = vrot.slane %v2822_v9, %v14940_v7  ;;  %v2837_v45 = vrot.slane %v2823_v63, %v14940_v7  ;;  %13348 = vmatprep.subr.mxu0 %v15401_v14  ;;  %13362 = vmatprep.subr.mxu1 %v15404_v29  ;;  %v20383_v63 = vld [vmem:[#allocation29_spill] sm:$0xff] }
 0x3b6   : > { %v15699_v59 = vcombine.low %v20381_v8, %v2821_v42  ;;  %v15702_v20 = vcombine.high %v20381_v8, %v2821_v42  ;;  %13297 = vmatprep.mubr.msk.f32.mxu0 %vm893_vm1, %v15374_v50  ;;  %13311 = vmatprep.mubr.msk.f32.mxu1 %vm893_vm1, %v15374_v50 }
 0x3b7   : > { %v15709_v28 = vcombine.low %v20382_v41, %v2830_v16  ;;  %v15712_v7 = vcombine.high %v20382_v41, %v2830_v16  ;;  %v15715_v9 = vcombine.low %v20383_v63, %v2837_v45  ;;  %13298 = vmatmul.mubr.msk.f32.gmra.mrb[58].mxu0 %vm893_vm1, %v15384_v3  ;;  %13312 = vmatmul.mubr.msk.f32.gmra.mrb[66].mxu1 %vm893_vm1, %v15384_v3 }
 0x3b8   : > { %v15722_v55 = vcombine.high %v20383_v63, %v2837_v45  ;;  %13300 = vmatprep.mubr.msk.f32.mxu0 %vm893_vm1, %v15389_v6  ;;  %13314 = vmatprep.mubr.msk.f32.mxu1 %vm893_vm1, %v15389_v6 }
 0x3b9   : > { %20384 = vst [vmem:[#allocation25_spill] sm:$0xff] %v15715_v9 }
 0x3ba   : > { %20385 = vst [vmem:[#allocation19_spill] sm:$0xff] %v15722_v55 }
 0x3bb   : > { %13301 = vmatmul.mubr.msk.f32.gmra.mrb[60].mxu0 %vm893_vm1, %v15423_v47  ;;  %13315 = vmatmul.mubr.msk.f32.gmra.mrb[68].mxu1 %vm893_vm1, %v15423_v47 }
 0x3bc   : > { %13303 = vmatprep.mubr.msk.f32.mxu0 %vm893_vm1, %v15429_v56  ;;  %13317 = vmatprep.mubr.msk.f32.mxu1 %vm893_vm1, %v15429_v56 }
 0x3bf   : > { %13304 = vmatmul.mubr.msk.f32.gmra.mrb[62].mxu0 %vm893_vm1, %v15464_v40  ;;  %13318 = vmatmul.mubr.msk.f32.gmra.mrb[70].mxu1 %vm893_vm1, %v15464_v40 }
 0x3c0   : > { %13322 = vmatprep.mubr.msk.f32.mxu0 %vm893_vm1, %v14906_v2  ;;  %13336 = vmatprep.mubr.msk.f32.mxu1 %vm893_vm1, %v14906_v2 }
 0x3c3   : > { %13323 = vmatmul.mubr.msk.f32.vlgmr.msra.gmra.mrb[64].mxu0 %vm893_vm1, %v15344_v52  ;;  %13337 = vmatmul.mubr.msk.f32.vlgmr.msra.gmra.mrb[72].mxu1 %vm893_vm1, %v15344_v52 }
 0x3c4   : > { %13349 = vmatpush3.msra.mxu0 %v15401_v14  ;;  %13363 = vmatpush3.msra.mxu1 %v15404_v29  ;;  %v20386_v14 = vld [vmem:[#allocation30_spill] sm:$0xff]  ;;  %v20387_v29 = vld [vmem:[#allocation31_spill] sm:$0xff] }
 0x3c5   : > { %13376 = vmatprep.subr.mxu0 %v15413_v49  ;;  %13390 = vmatprep.subr.mxu1 %v15416_v34 }
 0x3c6   : > { %13325 = vmatprep.mubr.msk.f32.mxu0 %vm893_vm1, %v15374_v50  ;;  %13339 = vmatprep.mubr.msk.f32.mxu1 %vm893_vm1, %v15374_v50 }
 0x3c7   : > { %13326 = vmatmul.mubr.msk.f32.gmra.mrb[66].mxu0 %vm893_vm1, %v15384_v3  ;;  %13340 = vmatmul.mubr.msk.f32.gmra.mrb[74].mxu1 %vm893_vm1, %v15384_v3 }
 0x3c8   : > { %13328 = vmatprep.mubr.msk.f32.mxu0 %vm893_vm1, %v15389_v6  ;;  %13342 = vmatprep.mubr.msk.f32.mxu1 %vm893_vm1, %v15389_v6 }
 0x3cb   : > { %13329 = vmatmul.mubr.msk.f32.gmra.mrb[68].mxu0 %vm893_vm1, %v15423_v47  ;;  %13343 = vmatmul.mubr.msk.f32.gmra.mrb[76].mxu1 %vm893_vm1, %v15423_v47 }
 0x3cc   : > { %13331 = vmatprep.mubr.msk.f32.mxu0 %vm893_vm1, %v15429_v56  ;;  %13345 = vmatprep.mubr.msk.f32.mxu1 %vm893_vm1, %v15429_v56 }
 0x3cf   : > { %13332 = vmatmul.mubr.msk.f32.gmra.mrb[70].mxu0 %vm893_vm1, %v15464_v40  ;;  %13346 = vmatmul.mubr.msk.f32.gmra.mrb[78].mxu1 %vm893_vm1, %v15464_v40 }
 0x3d0   : > { %13350 = vmatprep.mubr.msk.f32.mxu0 %vm893_vm1, %v14906_v2  ;;  %13364 = vmatprep.mubr.msk.f32.mxu1 %vm893_vm1, %v14906_v2 }
 0x3d3   : > { %13351 = vmatmul.mubr.msk.f32.vlgmr.msra.gmra.mrb[72].mxu0 %vm893_vm1, %v15344_v52  ;;  %13365 = vmatmul.mubr.msk.f32.vlgmr.msra.gmra.mrb[80].mxu1 %vm893_vm1, %v15344_v52 }
 0x3d4   : > { %13377 = vmatpush3.msra.mxu0 %v15413_v49  ;;  %13391 = vmatpush3.msra.mxu1 %v15416_v34 }
 0x3d5   : > { %13404 = vmatprep.subr.mxu0 %v15432_v11  ;;  %13418 = vmatprep.subr.mxu1 %v15435_v35 }
 0x3d6   : > { %13353 = vmatprep.mubr.msk.f32.mxu0 %vm893_vm1, %v15374_v50  ;;  %13367 = vmatprep.mubr.msk.f32.mxu1 %vm893_vm1, %v15374_v50 }
 0x3d7   : > { %13354 = vmatmul.mubr.msk.f32.gmra.mrb[74].mxu0 %vm893_vm1, %v15384_v3  ;;  %13368 = vmatmul.mubr.msk.f32.gmra.mrb[82].mxu1 %vm893_vm1, %v15384_v3 }
 0x3d8   : > { %13356 = vmatprep.mubr.msk.f32.mxu0 %vm893_vm1, %v15389_v6  ;;  %13370 = vmatprep.mubr.msk.f32.mxu1 %vm893_vm1, %v15389_v6 }
 0x3db   : > { %13357 = vmatmul.mubr.msk.f32.gmra.mrb[76].mxu0 %vm893_vm1, %v15423_v47  ;;  %13371 = vmatmul.mubr.msk.f32.gmra.mrb[84].mxu1 %vm893_vm1, %v15423_v47 }
 0x3dc   : > { %13359 = vmatprep.mubr.msk.f32.mxu0 %vm893_vm1, %v15429_v56  ;;  %13373 = vmatprep.mubr.msk.f32.mxu1 %vm893_vm1, %v15429_v56 }
 0x3df   : > { %13360 = vmatmul.mubr.msk.f32.gmra.mrb[78].mxu0 %vm893_vm1, %v15464_v40  ;;  %13374 = vmatmul.mubr.msk.f32.gmra.mrb[86].mxu1 %vm893_vm1, %v15464_v40 }
 0x3e0   : > { %13378 = vmatprep.mubr.msk.f32.mxu0 %vm893_vm1, %v14906_v2  ;;  %13392 = vmatprep.mubr.msk.f32.mxu1 %vm893_vm1, %v14906_v2  ;;  %v15848_v2 = vld [vmem:[#allocation5] sm:$0xff] }
 0x3e3   : > { %13379 = vmatmul.mubr.msk.f32.vlgmr.msra.gmra.mrb[80].mxu0 %vm893_vm1, %v15344_v52  ;;  %13393 = vmatmul.mubr.msk.f32.vlgmr.msra.gmra.mrb[88].mxu1 %vm893_vm1, %v15344_v52 }
 0x3e4   : > { %13405 = vmatpush3.msra.mxu0 %v15432_v11  ;;  %13419 = vmatpush3.msra.mxu1 %v15435_v35 }
 0x3e5   : > { %13432 = vmatprep.subr.mxu0 %v15442_v1  ;;  %13446 = vmatprep.subr.mxu1 %v15445_v19 }
 0x3e6   : > { %13381 = vmatprep.mubr.msk.f32.mxu0 %vm893_vm1, %v15374_v50  ;;  %13395 = vmatprep.mubr.msk.f32.mxu1 %vm893_vm1, %v15374_v50 }
 0x3e7   : > { %13382 = vmatmul.mubr.msk.f32.gmra.mrb[82].mxu0 %vm893_vm1, %v15384_v3  ;;  %13396 = vmatmul.mubr.msk.f32.gmra.mrb[90].mxu1 %vm893_vm1, %v15384_v3 }
 0x3e8   : > { %13384 = vmatprep.mubr.msk.f32.mxu0 %vm893_vm1, %v15389_v6  ;;  %13398 = vmatprep.mubr.msk.f32.mxu1 %vm893_vm1, %v15389_v6 }
 0x3eb   : > { %13385 = vmatmul.mubr.msk.f32.gmra.mrb[84].mxu0 %vm893_vm1, %v15423_v47  ;;  %13399 = vmatmul.mubr.msk.f32.gmra.mrb[92].mxu1 %vm893_vm1, %v15423_v47 }
 0x3ec   : > { %13387 = vmatprep.mubr.msk.f32.mxu0 %vm893_vm1, %v15429_v56  ;;  %13401 = vmatprep.mubr.msk.f32.mxu1 %vm893_vm1, %v15429_v56 }
 0x3ef   : > { %13388 = vmatmul.mubr.msk.f32.gmra.mrb[86].mxu0 %vm893_vm1, %v15464_v40  ;;  %13402 = vmatmul.mubr.msk.f32.gmra.mrb[94].mxu1 %vm893_vm1, %v15464_v40 }
 0x3f0   : > { %13406 = vmatprep.mubr.msk.f32.mxu0 %vm893_vm1, %v15848_v2  ;;  %13420 = vmatprep.mubr.msk.f32.mxu1 %vm893_vm1, %v15848_v2 }
 0x3f3   : > { %13407 = vmatmul.mubr.msk.f32.vlgmr.msra.gmra.mrb[88].mxu0 %vm893_vm1, %v15344_v52  ;;  %13421 = vmatmul.mubr.msk.f32.vlgmr.msra.gmra.mrb[96].mxu1 %vm893_vm1, %v15344_v52 }
 0x3f4   : > { %13433 = vmatpush3.msra.mxu0 %v15442_v1  ;;  %13447 = vmatpush3.msra.mxu1 %v15445_v19 }
 0x3f5   : > { %13460 = vmatprep.subr.mxu0 %v20386_v14  ;;  %13474 = vmatprep.subr.mxu1 %v20387_v29 }
 0x3f6   : > { %13409 = vmatprep.mubr.msk.f32.mxu0 %vm893_vm1, %v15374_v50  ;;  %13423 = vmatprep.mubr.msk.f32.mxu1 %vm893_vm1, %v15374_v50 }
 0x3f7   : > { %13410 = vmatmul.mubr.msk.f32.gmra.mrb[90].mxu0 %vm893_vm1, %v15384_v3  ;;  %13424 = vmatmul.mubr.msk.f32.gmra.mrb[98].mxu1 %vm893_vm1, %v15384_v3 }
 0x3f8   : > { %13412 = vmatprep.mubr.msk.f32.mxu0 %vm893_vm1, %v15389_v6  ;;  %13426 = vmatprep.mubr.msk.f32.mxu1 %vm893_vm1, %v15389_v6 }
 0x3fb   : > { %13413 = vmatmul.mubr.msk.f32.gmra.mrb[92].mxu0 %vm893_vm1, %v15423_v47  ;;  %13427 = vmatmul.mubr.msk.f32.gmra.mrb[100].mxu1 %vm893_vm1, %v15423_v47 }
 0x3fc   : > { %13415 = vmatprep.mubr.msk.f32.mxu0 %vm893_vm1, %v15429_v56  ;;  %13429 = vmatprep.mubr.msk.f32.mxu1 %vm893_vm1, %v15429_v56 }
 0x3ff   : > { %13416 = vmatmul.mubr.msk.f32.gmra.mrb[94].mxu0 %vm893_vm1, %v15464_v40  ;;  %13430 = vmatmul.mubr.msk.f32.gmra.mrb[102].mxu1 %vm893_vm1, %v15464_v40 }
 0x400   : > { %13434 = vmatprep.mubr.msk.f32.mxu0 %vm893_vm1, %v15848_v2  ;;  %13448 = vmatprep.mubr.msk.f32.mxu1 %vm893_vm1, %v15848_v2 }
 0x403   : > { %13435 = vmatmul.mubr.msk.f32.vlgmr.msra.gmra.mrb[96].mxu0 %vm893_vm1, %v15344_v52  ;;  %13449 = vmatmul.mubr.msk.f32.vlgmr.msra.gmra.mrb[104].mxu1 %vm893_vm1, %v15344_v52 }
 0x404   : > { %13461 = vmatpush3.msra.mxu0 %v20386_v14  ;;  %13475 = vmatpush3.msra.mxu1 %v20387_v29 }
 0x405   : > { %13488 = vmatprep.subr.mxu0 %v15473_v44  ;;  %13502 = vmatprep.subr.mxu1 %v15476_v43 }
 0x406   : > { %13437 = vmatprep.mubr.msk.f32.mxu0 %vm893_vm1, %v15374_v50  ;;  %13451 = vmatprep.mubr.msk.f32.mxu1 %vm893_vm1, %v15374_v50 }
 0x407   : > { %13438 = vmatmul.mubr.msk.f32.gmra.mrb[98].mxu0 %vm893_vm1, %v15384_v3  ;;  %13452 = vmatmul.mubr.msk.f32.gmra.mrb[106].mxu1 %vm893_vm1, %v15384_v3 }
 0x408   : > { %13440 = vmatprep.mubr.msk.f32.mxu0 %vm893_vm1, %v15389_v6  ;;  %13454 = vmatprep.mubr.msk.f32.mxu1 %vm893_vm1, %v15389_v6 }
 0x40b   : > { %13441 = vmatmul.mubr.msk.f32.gmra.mrb[100].mxu0 %vm893_vm1, %v15423_v47  ;;  %13455 = vmatmul.mubr.msk.f32.gmra.mrb[108].mxu1 %vm893_vm1, %v15423_v47 }
 0x40c   : > { %13443 = vmatprep.mubr.msk.f32.mxu0 %vm893_vm1, %v15429_v56  ;;  %13457 = vmatprep.mubr.msk.f32.mxu1 %vm893_vm1, %v15429_v56 }
 0x40f   : > { %13444 = vmatmul.mubr.msk.f32.gmra.mrb[102].mxu0 %vm893_vm1, %v15464_v40  ;;  %13458 = vmatmul.mubr.msk.f32.gmra.mrb[110].mxu1 %vm893_vm1, %v15464_v40 }
 0x410   : > { %13462 = vmatprep.mubr.msk.f32.mxu0 %vm893_vm1, %v15848_v2  ;;  %13476 = vmatprep.mubr.msk.f32.mxu1 %vm893_vm1, %v15848_v2 }
 0x413   : > { %13463 = vmatmul.mubr.msk.f32.vlgmr.msra.gmra.mrb[104].mxu0 %vm893_vm1, %v15344_v52  ;;  %13477 = vmatmul.mubr.msk.f32.vlgmr.msra.gmra.mrb[112].mxu1 %vm893_vm1, %v15344_v52 }
 0x414   : > { %13489 = vmatpush3.msra.mxu0 %v15473_v44  ;;  %13503 = vmatpush3.msra.mxu1 %v15476_v43 }
 0x415   : > { %13516 = vmatprep.subr.mxu0 %v15479_v24  ;;  %13530 = vmatprep.subr.mxu1 %v15482_v57 }
 0x416   : > { %13465 = vmatprep.mubr.msk.f32.mxu0 %vm893_vm1, %v15374_v50  ;;  %13479 = vmatprep.mubr.msk.f32.mxu1 %vm893_vm1, %v15374_v50 }
 0x417   : > { %13466 = vmatmul.mubr.msk.f32.gmra.mrb[106].mxu0 %vm893_vm1, %v15384_v3  ;;  %13480 = vmatmul.mubr.msk.f32.gmra.mrb[114].mxu1 %vm893_vm1, %v15384_v3 }
 0x418   : > { %13468 = vmatprep.mubr.msk.f32.mxu0 %vm893_vm1, %v15389_v6  ;;  %13482 = vmatprep.mubr.msk.f32.mxu1 %vm893_vm1, %v15389_v6 }
 0x41b   : > { %13469 = vmatmul.mubr.msk.f32.gmra.mrb[108].mxu0 %vm893_vm1, %v15423_v47  ;;  %13483 = vmatmul.mubr.msk.f32.gmra.mrb[116].mxu1 %vm893_vm1, %v15423_v47 }
 0x41c   : > { %13471 = vmatprep.mubr.msk.f32.mxu0 %vm893_vm1, %v15429_v56  ;;  %13485 = vmatprep.mubr.msk.f32.mxu1 %vm893_vm1, %v15429_v56 }
 0x41f   : > { %13472 = vmatmul.mubr.msk.f32.gmra.mrb[110].mxu0 %vm893_vm1, %v15464_v40  ;;  %13486 = vmatmul.mubr.msk.f32.gmra.mrb[118].mxu1 %vm893_vm1, %v15464_v40 }
 0x420   : > { %13490 = vmatprep.mubr.msk.f32.mxu0 %vm893_vm1, %v15848_v2  ;;  %13504 = vmatprep.mubr.msk.f32.mxu1 %vm893_vm1, %v15848_v2 }
 0x423   : > { %13491 = vmatmul.mubr.msk.f32.vlgmr.msra.gmra.mrb[112].mxu0 %vm893_vm1, %v15344_v52  ;;  %13505 = vmatmul.mubr.msk.f32.vlgmr.msra.gmra.mrb[120].mxu1 %vm893_vm1, %v15344_v52 }
 0x424   : > { %13517 = vmatpush3.msra.mxu0 %v15479_v24  ;;  %13531 = vmatpush3.msra.mxu1 %v15482_v57 }
 0x425   : > { %13544 = vmatprep.subr.mxu0 %v15485_v48  ;;  %13558 = vmatprep.subr.mxu1 %v15488_v27 }
 0x426   : > { %13493 = vmatprep.mubr.msk.f32.mxu0 %vm893_vm1, %v15374_v50  ;;  %13507 = vmatprep.mubr.msk.f32.mxu1 %vm893_vm1, %v15374_v50 }
 0x427   : > { %13494 = vmatmul.mubr.msk.f32.gmra.mrb[114].mxu0 %vm893_vm1, %v15384_v3  ;;  %13508 = vmatmul.mubr.msk.f32.gmra.mrb[122].mxu1 %vm893_vm1, %v15384_v3 }
 0x428   : > { %13496 = vmatprep.mubr.msk.f32.mxu0 %vm893_vm1, %v15389_v6  ;;  %13510 = vmatprep.mubr.msk.f32.mxu1 %vm893_vm1, %v15389_v6 }
 0x42b   : > { %13497 = vmatmul.mubr.msk.f32.gmra.mrb[116].mxu0 %vm893_vm1, %v15423_v47  ;;  %13511 = vmatmul.mubr.msk.f32.gmra.mrb[124].mxu1 %vm893_vm1, %v15423_v47 }
 0x42c   : > { %13499 = vmatprep.mubr.msk.f32.mxu0 %vm893_vm1, %v15429_v56  ;;  %13513 = vmatprep.mubr.msk.f32.mxu1 %vm893_vm1, %v15429_v56 }
 0x42f   : > { %13500 = vmatmul.mubr.msk.f32.gmra.mrb[118].mxu0 %vm893_vm1, %v15464_v40  ;;  %13514 = vmatmul.mubr.msk.f32.gmra.mrb[126].mxu1 %vm893_vm1, %v15464_v40 }
 0x430   : > { %13518 = vmatprep.mubr.msk.f32.mxu0 %vm893_vm1, %v15848_v2  ;;  %13532 = vmatprep.mubr.msk.f32.mxu1 %vm893_vm1, %v15848_v2 }
 0x433   : > { %13519 = vmatmul.mubr.msk.f32.vlgmr.msra.gmra.mrb[120].mxu0 %vm893_vm1, %v15344_v52  ;;  %13533 = vmatmul.mubr.msk.f32.vlgmr.msra.gmra.mrb[128].mxu1 %vm893_vm1, %v15344_v52 }
 0x434   : > { %13545 = vmatpush3.msra.mxu0 %v15485_v48  ;;  %13559 = vmatpush3.msra.mxu1 %v15488_v27 }
 0x435   : > { %13572 = vmatprep.subr.mxu0 %v15506_v12  ;;  %13586 = vmatprep.subr.mxu1 %v15509_v10 }
 0x436   : > { %13521 = vmatprep.mubr.msk.f32.mxu0 %vm893_vm1, %v15374_v50  ;;  %13535 = vmatprep.mubr.msk.f32.mxu1 %vm893_vm1, %v15374_v50 }
 0x437   : > { %13522 = vmatmul.mubr.msk.f32.gmra.mrb[122].mxu0 %vm893_vm1, %v15384_v3  ;;  %13536 = vmatmul.mubr.msk.f32.gmra.mrb[130].mxu1 %vm893_vm1, %v15384_v3 }
 0x438   : > { %13524 = vmatprep.mubr.msk.f32.mxu0 %vm893_vm1, %v15389_v6  ;;  %13538 = vmatprep.mubr.msk.f32.mxu1 %vm893_vm1, %v15389_v6 }
 0x43b   : > { %13525 = vmatmul.mubr.msk.f32.gmra.mrb[124].mxu0 %vm893_vm1, %v15423_v47  ;;  %13539 = vmatmul.mubr.msk.f32.gmra.mrb[132].mxu1 %vm893_vm1, %v15423_v47 }
 0x43c   : > { %13527 = vmatprep.mubr.msk.f32.mxu0 %vm893_vm1, %v15429_v56  ;;  %13541 = vmatprep.mubr.msk.f32.mxu1 %vm893_vm1, %v15429_v56 }
 0x43f   : > { %13528 = vmatmul.mubr.msk.f32.gmra.mrb[126].mxu0 %vm893_vm1, %v15464_v40  ;;  %13542 = vmatmul.mubr.msk.f32.gmra.mrb[134].mxu1 %vm893_vm1, %v15464_v40 }
 0x440   : > { %13546 = vmatprep.mubr.msk.f32.mxu0 %vm893_vm1, %v15848_v2  ;;  %13560 = vmatprep.mubr.msk.f32.mxu1 %vm893_vm1, %v15848_v2 }
 0x443   : > { %13547 = vmatmul.mubr.msk.f32.vlgmr.msra.gmra.mrb[128].mxu0 %vm893_vm1, %v15344_v52  ;;  %13561 = vmatmul.mubr.msk.f32.vlgmr.msra.gmra.mrb[136].mxu1 %vm893_vm1, %v15344_v52 }
 0x444   : > { %13573 = vmatpush3.msra.mxu0 %v15506_v12  ;;  %13587 = vmatpush3.msra.mxu1 %v15509_v10 }
 0x445   : > { %13600 = vmatprep.subr.mxu0 %v15512_v61  ;;  %13614 = vmatprep.subr.mxu1 %v15515_v30 }
 0x446   : > { %13549 = vmatprep.mubr.msk.f32.mxu0 %vm893_vm1, %v15374_v50  ;;  %13563 = vmatprep.mubr.msk.f32.mxu1 %vm893_vm1, %v15374_v50 }
 0x447   : > { %13550 = vmatmul.mubr.msk.f32.gmra.mrb[130].mxu0 %vm893_vm1, %v15384_v3  ;;  %13564 = vmatmul.mubr.msk.f32.gmra.mrb[138].mxu1 %vm893_vm1, %v15384_v3 }
 0x448   : > { %13552 = vmatprep.mubr.msk.f32.mxu0 %vm893_vm1, %v15389_v6  ;;  %13566 = vmatprep.mubr.msk.f32.mxu1 %vm893_vm1, %v15389_v6 }
 0x44b   : > { %13553 = vmatmul.mubr.msk.f32.gmra.mrb[132].mxu0 %vm893_vm1, %v15423_v47  ;;  %13567 = vmatmul.mubr.msk.f32.gmra.mrb[140].mxu1 %vm893_vm1, %v15423_v47 }
 0x44c   : > { %13555 = vmatprep.mubr.msk.f32.mxu0 %vm893_vm1, %v15429_v56  ;;  %13569 = vmatprep.mubr.msk.f32.mxu1 %vm893_vm1, %v15429_v56 }
 0x44f   : > { %13556 = vmatmul.mubr.msk.f32.gmra.mrb[134].mxu0 %vm893_vm1, %v15464_v40  ;;  %13570 = vmatmul.mubr.msk.f32.gmra.mrb[142].mxu1 %vm893_vm1, %v15464_v40 }
 0x450   : > { %13574 = vmatprep.mubr.msk.f32.mxu0 %vm893_vm1, %v15848_v2  ;;  %13588 = vmatprep.mubr.msk.f32.mxu1 %vm893_vm1, %v15848_v2 }
 0x453   : > { %13575 = vmatmul.mubr.msk.f32.vlgmr.msra.gmra.mrb[136].mxu0 %vm893_vm1, %v15344_v52  ;;  %13589 = vmatmul.mubr.msk.f32.vlgmr.msra.gmra.mrb[144].mxu1 %vm893_vm1, %v15344_v52 }
 0x454   : > { %13601 = vmatpush3.msra.mxu0 %v15512_v61  ;;  %13615 = vmatpush3.msra.mxu1 %v15515_v30 }
 0x455   : > { %13628 = vmatprep.subr.mxu0 %v15518_v46  ;;  %13642 = vmatprep.subr.mxu1 %v15521_v31 }
 0x456   : > { %13577 = vmatprep.mubr.msk.f32.mxu0 %vm893_vm1, %v15374_v50  ;;  %13591 = vmatprep.mubr.msk.f32.mxu1 %vm893_vm1, %v15374_v50 }
 0x457   : > { %13578 = vmatmul.mubr.msk.f32.gmra.mrb[138].mxu0 %vm893_vm1, %v15384_v3  ;;  %13592 = vmatmul.mubr.msk.f32.gmra.mrb[146].mxu1 %vm893_vm1, %v15384_v3 }
 0x458   : > { %13580 = vmatprep.mubr.msk.f32.mxu0 %vm893_vm1, %v15389_v6  ;;  %13594 = vmatprep.mubr.msk.f32.mxu1 %vm893_vm1, %v15389_v6 }
 0x45b   : > { %13581 = vmatmul.mubr.msk.f32.gmra.mrb[140].mxu0 %vm893_vm1, %v15423_v47  ;;  %13595 = vmatmul.mubr.msk.f32.gmra.mrb[148].mxu1 %vm893_vm1, %v15423_v47 }
 0x45c   : > { %13583 = vmatprep.mubr.msk.f32.mxu0 %vm893_vm1, %v15429_v56  ;;  %13597 = vmatprep.mubr.msk.f32.mxu1 %vm893_vm1, %v15429_v56 }
 0x45f   : > { %13584 = vmatmul.mubr.msk.f32.gmra.mrb[142].mxu0 %vm893_vm1, %v15464_v40  ;;  %13598 = vmatmul.mubr.msk.f32.gmra.mrb[150].mxu1 %vm893_vm1, %v15464_v40 }
 0x460   : > { %13602 = vmatprep.mubr.msk.f32.mxu0 %vm893_vm1, %v15848_v2  ;;  %13616 = vmatprep.mubr.msk.f32.mxu1 %vm893_vm1, %v15848_v2 }
 0x463   : > { %13603 = vmatmul.mubr.msk.f32.vlgmr.msra.gmra.mrb[144].mxu0 %vm893_vm1, %v15344_v52  ;;  %13617 = vmatmul.mubr.msk.f32.vlgmr.msra.gmra.mrb[152].mxu1 %vm893_vm1, %v15344_v52 }
 0x464   : > { %13629 = vmatpush3.msra.mxu0 %v15518_v46  ;;  %13643 = vmatpush3.msra.mxu1 %v15521_v31 }
 0x465   : > { %13656 = vmatprep.subr.mxu0 %v15536_v39  ;;  %13670 = vmatprep.subr.mxu1 %v15539_v36  ;;  %v16124_v49 = vpop.f32.mrb[40].mxu0  ;;  %v16126_v34 = vpop.f32.mrb[48].mxu1 }
 0x466   : > { %13605 = vmatprep.mubr.msk.f32.mxu0 %vm893_vm1, %v15374_v50  ;;  %13619 = vmatprep.mubr.msk.f32.mxu1 %vm893_vm1, %v15374_v50  ;;  %9599 = vst [vmem:[%s16118_s12 + $0x8] sm:$0xff] %v16124_v49  ;;  %9607 = vst [vmem:[%s16118_s12 + $0x48] sm:$0xff] %v16126_v34  ;;  %v11148_v11 = vmax.f32 %v16124_v49, %v16126_v34  ;;  %v16138_v35 = vpop.f32.mrb[41].mxu0  ;;  %v16140_v1 = vpop.f32.mrb[49].mxu1 }
 0x467   : > { %13606 = vmatmul.mubr.msk.f32.gmra.mrb[146].mxu0 %vm893_vm1, %v15384_v3  ;;  %13620 = vmatmul.mubr.msk.f32.gmra.mrb[154].mxu1 %vm893_vm1, %v15384_v3  ;;  %9598 = vst [vmem:[%s16118_s12] sm:$0xff] %v16138_v35  ;;  %v10110_v19 = vmax.f32 %v16138_v35, %v16124_v49  ;;  %9606 = vst [vmem:[%s16118_s12 + $0x40] sm:$0xff] %v16140_v1  ;;  %v10123_v48 = vmax.f32 %v16140_v1, %v16126_v34 }
 0x468   : > { %v11085_v44 = vmax.f32 %v16138_v35, %v16140_v1  ;;  %13608 = vmatprep.mubr.msk.f32.mxu0 %vm893_vm1, %v15389_v6  ;;  %13622 = vmatprep.mubr.msk.f32.mxu1 %vm893_vm1, %v15389_v6 }
 0x46a   : > { %v16160_v43 = vpop.f32.mrb[42].mxu0  ;;  %v16162_v24 = vpop.f32.mrb[50].mxu1 }
 0x46b   : > { %13609 = vmatmul.mubr.msk.f32.gmra.mrb[148].mxu0 %vm893_vm1, %v15423_v47  ;;  %13623 = vmatmul.mubr.msk.f32.gmra.mrb[156].mxu1 %vm893_vm1, %v15423_v47  ;;  %9601 = vst [vmem:[%s16118_s12 + $0x18] sm:$0xff] %v16160_v43  ;;  %9609 = vst [vmem:[%s16118_s12 + $0x58] sm:$0xff] %v16162_v24  ;;  %v11274_v57 = vmax.f32 %v16160_v43, %v16162_v24  ;;  %v16174_v27 = vpop.f32.mrb[43].mxu0  ;;  %v16176_v12 = vpop.f32.mrb[51].mxu1 }
 0x46c   : > { %13611 = vmatprep.mubr.msk.f32.mxu0 %vm893_vm1, %v15429_v56  ;;  %13625 = vmatprep.mubr.msk.f32.mxu1 %vm893_vm1, %v15429_v56  ;;  %9600 = vst [vmem:[%s16118_s12 + $0x10] sm:$0xff] %v16174_v27  ;;  %v10111_v10 = vmax.f32 %v10110_v19, %v16174_v27  ;;  %9608 = vst [vmem:[%s16118_s12 + $0x50] sm:$0xff] %v16176_v12  ;;  %v10124_v61 = vmax.f32 %v10123_v48, %v16176_v12 }
 0x46d   : > { %v11211_v30 = vmax.f32 %v16174_v27, %v16176_v12 }
 0x46e   : > { %v16190_v46 = vpop.f32.mrb[44].mxu0  ;;  %v10112_v31 = vmax.f32 %v10111_v10, %v16160_v43  ;;  %v16193_v0 = vpop.f32.mrb[52].mxu1  ;;  %v10125_v22 = vmax.f32 %v10124_v61, %v16162_v24 }
 0x46f   : > { %13612 = vmatmul.mubr.msk.f32.gmra.mrb[150].mxu0 %vm893_vm1, %v15464_v40  ;;  %13626 = vmatmul.mubr.msk.f32.gmra.mrb[158].mxu1 %vm893_vm1, %v15464_v40  ;;  %9603 = vst [vmem:[%s16118_s12 + $0x28] sm:$0xff] %v16190_v46  ;;  %v16202_v42 = vpop.f32.mrb[45].mxu0  ;;  %9611 = vst [vmem:[%s16118_s12 + $0x68] sm:$0xff] %v16193_v0  ;;  %v11400_v16 = vmax.f32 %v16190_v46, %v16193_v0  ;;  %v16208_v45 = vpop.f32.mrb[53].mxu1 }
 0x470   : > { %13630 = vmatprep.mubr.msk.f32.mxu0 %vm893_vm1, %v15848_v2  ;;  %13644 = vmatprep.mubr.msk.f32.mxu1 %vm893_vm1, %v15848_v2  ;;  %9602 = vst [vmem:[%s16118_s12 + $0x20] sm:$0xff] %v16202_v42  ;;  %v10113_v8 = vmax.f32 %v10112_v31, %v16202_v42  ;;  %9610 = vst [vmem:[%s16118_s12 + $0x60] sm:$0xff] %v16208_v45  ;;  %v10126_v41 = vmax.f32 %v10125_v22, %v16208_v45 }
 0x471   : > { %v11337_v63 = vmax.f32 %v16202_v42, %v16208_v45 }
 0x472   : > { %v16222_v14 = vpop.f32.mrb[46].mxu0  ;;  %v10114_v29 = vmax.f32 %v10113_v8, %v16190_v46  ;;  %v16225_v19 = vpop.f32.mrb[54].mxu1  ;;  %v10127_v48 = vmax.f32 %v10126_v41, %v16193_v0 }
 0x473   : > { %13631 = vmatmul.mubr.msk.f32.vlgmr.msra.gmra.mrb[152].mxu0 %vm893_vm1, %v15344_v52  ;;  %13645 = vmatmul.mubr.msk.f32.vlgmr.msra.gmra.mrb[160].mxu1 %vm893_vm1, %v15344_v52  ;;  %9605 = vst [vmem:[%s16118_s12 + $0x38] sm:$0xff] %v16222_v14  ;;  %v16234_v10 = vpop.f32.mrb[47].mxu0  ;;  %9613 = vst [vmem:[%s16118_s12 + $0x78] sm:$0xff] %v16225_v19  ;;  %v11526_v61 = vmax.f32 %v16222_v14, %v16225_v19  ;;  %v16240_v31 = vpop.f32.mrb[55].mxu1 }
 0x474   : > { %13657 = vmatpush3.msra.mxu0 %v15536_v39  ;;  %13671 = vmatpush3.msra.mxu1 %v15539_v36  ;;  %9604 = vst [vmem:[%s16118_s12 + $0x30] sm:$0xff] %v16234_v10  ;;  %v10115_v52 = vmax.f32 %v10114_v29, %v16234_v10  ;;  %9612 = vst [vmem:[%s16118_s12 + $0x70] sm:$0xff] %v16240_v31  ;;  %v10128_v22 = vmax.f32 %v10127_v48, %v16240_v31 }
 0x475   : > { %13684 = vmatprep.subr.mxu0 %v15546_v25  ;;  %13698 = vmatprep.subr.mxu1 %v15549_v4 }
 0x476   : > { %v10116_v39 = vmax.f32 %v10115_v52, %v16222_v14  ;;  %v13268_v36 = vpop.f32.mrb[48].mxu0  ;;  %13633 = vmatprep.mubr.msk.f32.mxu0 %vm893_vm1, %v15374_v50  ;;  %13647 = vmatprep.mubr.msk.f32.mxu1 %vm893_vm1, %v15374_v50  ;;  %v10129_v41 = vmax.f32 %v10128_v22, %v16225_v19  ;;  %v16260_v29 = vpop.f32.mrb[56].mxu1 }
 0x477   : > { %v16265_v48 = vmax.f32 %v11148_v11, %v13268_v36  ;;  %9615 = vst [vmem:[%s16118_s12 + $0x88] sm:$0xff] %v13268_v36  ;;  %v3154_v52 = vpop.f32.mrb[49].mxu0  ;;  %13634 = vmatmul.mubr.msk.f32.gmra.mrb[154].mxu0 %vm893_vm1, %v15384_v3  ;;  %13648 = vmatmul.mubr.msk.f32.gmra.mrb[162].mxu1 %vm893_vm1, %v15384_v3  ;;  %9623 = vst [vmem:[%s16118_s12 + $0xc8] sm:$0xff] %v16260_v29  ;;  %v16274_v50 = vpop.f32.mrb[57].mxu1 }
 0x478   : > { %v10117_v22 = vrot.slane %v10116_v39, 4  ;;  %v10130_v8 = vrot.slane %v10129_v41, 4  ;;  %v16279_v49 = vmax.f32 %v11085_v44, %v3154_v52  ;;  %9614 = vst [vmem:[%s16118_s12 + $0x80] sm:$0xff] %v3154_v52  ;;  %v10136_v34 = vmax.f32 %v3154_v52, %v13268_v36  ;;  %9622 = vst [vmem:[%s16118_s12 + $0xc0] sm:$0xff] %v16274_v50  ;;  %13636 = vmatprep.mubr.msk.f32.mxu0 %vm893_vm1, %v15389_v6 }
 0x479   : > { %13650 = vmatprep.mubr.msk.f32.mxu1 %vm893_vm1, %v15389_v6  ;;  %v10149_v11 = vmax.f32 %v16274_v50, %v16260_v29 }
 0x47a   : > { %v10118_v35 = vmax.f32 %v10116_v39, %v10117_v22  ;;  %v10131_v1 = vmax.f32 %v10129_v41, %v10130_v8  ;;  %v11087_v44 = vmax.f32 %v16279_v49, %v16274_v50  ;;  %v13271_v36 = vpop.f32.mrb[50].mxu0  ;;  %v16294_v52 = vpop.f32.mrb[58].mxu1  ;;  %v16455_v49 = vld [vmem:[#allocation5 + $0x28] sm:$0xff] }
 0x47b   : > { %v16299_v6 = vmax.f32 %v11274_v57, %v13271_v36  ;;  %9617 = vst [vmem:[%s16118_s12 + $0x98] sm:$0xff] %v13271_v36  ;;  %v3164_v3 = vpop.f32.mrb[51].mxu0  ;;  %9625 = vst [vmem:[%s16118_s12 + $0xd8] sm:$0xff] %v16294_v52  ;;  %13637 = vmatmul.mubr.msk.f32.gmra.mrb[156].mxu0 %vm893_vm1, %v15423_v47  ;;  %13651 = vmatmul.mubr.msk.f32.gmra.mrb[164].mxu1 %vm893_vm1, %v15423_v47  ;;  %v16308_v8 = vpop.f32.mrb[59].mxu1 }
 0x47c   : > { %v10119_v39 = vrot.slane %v10118_v35, 2  ;;  %v10132_v41 = vrot.slane %v10131_v1, 2  ;;  %v16313_v43 = vmax.f32 %v11211_v30, %v3164_v3  ;;  %9616 = vst [vmem:[%s16118_s12 + $0x90] sm:$0xff] %v3164_v3  ;;  %v10137_v24 = vmax.f32 %v10136_v34, %v3164_v3  ;;  %9624 = vst [vmem:[%s16118_s12 + $0xd0] sm:$0xff] %v16308_v8  ;;  %13639 = vmatprep.mubr.msk.f32.mxu0 %vm893_vm1, %v15429_v56 }
 0x47d   : > { %13653 = vmatprep.mubr.msk.f32.mxu1 %vm893_vm1, %v15429_v56  ;;  %v10150_v57 = vmax.f32 %v10149_v11, %v16308_v8 }
 0x47e   : > { %v10120_v27 = vmax.f32 %v10118_v35, %v10119_v39  ;;  %v10133_v12 = vmax.f32 %v10131_v1, %v10132_v41  ;;  %v11213_v30 = vmax.f32 %v16313_v43, %v16308_v8  ;;  %v13274_v22 = vpop.f32.mrb[52].mxu0  ;;  %v10138_v34 = vmax.f32 %v10137_v24, %v13271_v36  ;;  %v16327_v3 = vpop.f32.mrb[60].mxu1 }
 0x47f   : > { %v16332_v56 = vmax.f32 %v11400_v16, %v13274_v22  ;;  %9619 = vst [vmem:[%s16118_s12 + $0xa8] sm:$0xff] %v13274_v22  ;;  %v3174_v47 = vpop.f32.mrb[53].mxu0  ;;  %9627 = vst [vmem:[%s16118_s12 + $0xe8] sm:$0xff] %v16327_v3  ;;  %13640 = vmatmul.mubr.msk.f32.gmra.mrb[158].mxu0 %vm893_vm1, %v15464_v40  ;;  %13654 = vmatmul.mubr.msk.f32.gmra.mrb[166].mxu1 %vm893_vm1, %v15464_v40  ;;  %v16341_v11 = vpop.f32.mrb[61].mxu1  ;;  %v10151_v35 = vmax.f32 %v10150_v57, %v16294_v52 }
 0x480   : > { %v10121_v1 = vrot.slane %v10120_v27, 1  ;;  %v10134_v36 = vrot.slane %v10133_v12, 1  ;;  %9618 = vst [vmem:[%s16118_s12 + $0xa0] sm:$0xff] %v3174_v47  ;;  %v10139_v46 = vmax.f32 %v10138_v34, %v3174_v47  ;;  %v16348_v0 = vmax.f32 %v11337_v63, %v3174_v47  ;;  %9626 = vst [vmem:[%s16118_s12 + $0xe0] sm:$0xff] %v16341_v11  ;;  %13658 = vmatprep.mubr.msk.f32.mxu0 %vm893_vm1, %v15848_v2 }
 0x481   : > { %13672 = vmatprep.mubr.msk.f32.mxu1 %vm893_vm1, %v15848_v2  ;;  %v11402_v40 = vmax.f32 %v16332_v56, %v16327_v3  ;;  %v10152_v16 = vmax.f32 %v10151_v35, %v16341_v11 }
 0x482   : > { %v10122_v39 = vmax.f32 %v10120_v27, %v10121_v1  ;;  %v10135_v42 = vmax.f32 %v10133_v12, %v10134_v36  ;;  %v13277_v63 = vpop.f32.mrb[54].mxu0  ;;  %v10140_v41 = vmax.f32 %v10139_v46, %v13274_v22  ;;  %v16361_v24 = vpop.f32.mrb[62].mxu1  ;;  %v16371_v27 = vld [vmem:[#allocation5 + $0x8] sm:$0xff]  ;;  %v16400_v36 = vld [vmem:[#allocation5 + $0x10] sm:$0xff] }
 0x483   : > { %v16366_v47 = vmax.f32 %v11526_v61, %v13277_v63  ;;  %9621 = vst [vmem:[%s16118_s12 + $0xb8] sm:$0xff] %v13277_v63  ;;  %v3184_v57 = vpop.f32.mrb[55].mxu0  ;;  %9629 = vst [vmem:[%s16118_s12 + $0xf8] sm:$0xff] %v16361_v24  ;;  %13659 = vmatmul.mubr.msk.f32.vlgmr.msra.gmra.mrb[160].mxu0 %vm893_vm1, %v16371_v27  ;;  %13673 = vmatmul.mubr.msk.f32.vlgmr.msra.gmra.mrb[168].mxu1 %vm893_vm1, %v16371_v27  ;;  %v16377_v12 = vpop.f32.mrb[63].mxu1  ;;  %v10153_v22 = vmax.f32 %v10152_v16, %v16327_v3 }
 0x484   : > { %v16381_v14 = vsel %vm11006_vm2, %v10135_v42, %v10122_v39  ;;  %9620 = vst [vmem:[%s16118_s12 + $0xb0] sm:$0xff] %v3184_v57  ;;  %v10141_v19 = vmax.f32 %v10140_v41, %v3184_v57  ;;  %v20388_v61 = vmax.f32 %v16234_v10, %v16240_v31  ;;  %13685 = vmatpush3.msra.mxu0 %v15546_v25  ;;  %9628 = vst [vmem:[%s16118_s12 + $0xf0] sm:$0xff] %v16377_v12 }
 0x485   : > { %13699 = vmatpush3.msra.mxu1 %v15549_v4  ;;  %v10154_v1 = vmax.f32 %v10153_v22, %v16377_v12  ;;  %13712 = vmatprep.subr.mxu0 %v15562_v15  ;;  %v20389_v16 = vmax.f32 %v16265_v48, %v16260_v29  ;;  %v20391_v3 = vmax.f32 %v16348_v0, %v16341_v11 }
 0x486   : > { %v16387_v34 = vmax.f32 %v20388_v61, %v3184_v57  ;;  %13726 = vmatprep.subr.mxu1 %v15565_v23  ;;  %v10142_v10 = vmax.f32 %v10141_v19, %v13277_v63  ;;  %v13296_v25 = vpop.f32.mrb[56].mxu0  ;;  %13661 = vmatprep.mubr.msk.f32.mxu0 %vm893_vm1, %v16400_v36  ;;  %v16406_v4 = vpop.f32.mrb[64].mxu1  ;;  %v16415_v63 = vld [vmem:[#allocation5 + $0x18] sm:$0xff]  ;;  %v16435_v19 = vld [vmem:[#allocation5 + $0x20] sm:$0xff] }
 0x487   : > { %13675 = vmatprep.mubr.msk.f32.mxu1 %vm893_vm1, %v16400_v36  ;;  %v10155_v46 = vmax.f32 %v10154_v1, %v16361_v24  ;;  %v16412_v39 = vmax.f32 %v20389_v16, %v13296_v25  ;;  %9631 = vst [vmem:[%s16118_s12 + $0x108] sm:$0xff] %v13296_v25  ;;  %v3364_v42 = vpop.f32.mrb[57].mxu0  ;;  %13662 = vmatmul.mubr.msk.f32.gmra.mrb[162].mxu0 %vm893_vm1, %v16415_v63  ;;  %9639 = vst [vmem:[%s16118_s12 + $0x148] sm:$0xff] %v16406_v4  ;;  %v16423_v41 = vpop.f32.mrb[65].mxu1 }
 0x488   : > { %13676 = vmatmul.mubr.msk.f32.gmra.mrb[170].mxu1 %vm893_vm1, %v16415_v63  ;;  %v10143_v57 = vrot.slane %v10142_v10, 4  ;;  %v16428_v29 = vmax.f32 %v11087_v44, %v3364_v42  ;;  %9630 = vst [vmem:[%s16118_s12 + $0x100] sm:$0xff] %v3364_v42  ;;  %v10162_v48 = vmax.f32 %v3364_v42, %v13296_v25  ;;  %9638 = vst [vmem:[%s16118_s12 + $0x140] sm:$0xff] %v16423_v41  ;;  %13664 = vmatprep.mubr.msk.f32.mxu0 %vm893_vm1, %v16435_v19 }
 0x489   : > { %v10175_v22 = vmax.f32 %v16423_v41, %v16406_v4  ;;  %13678 = vmatprep.mubr.msk.f32.mxu1 %vm893_vm1, %v16435_v19  ;;  %v10156_v50 = vrot.slane %v10155_v46, 4  ;;  %v20390_v42 = vmax.f32 %v16299_v6, %v16294_v52 }
 0x48a   : > { %v10144_v44 = vmax.f32 %v10142_v10, %v10143_v57  ;;  %v13299_v1 = vpop.f32.mrb[58].mxu0  ;;  %v16445_v25 = vpop.f32.mrb[66].mxu1 }
 0x48b   : > { %v10157_v16 = vmax.f32 %v10155_v46, %v10156_v50  ;;  %v16450_v31 = vmax.f32 %v20390_v42, %v13299_v1  ;;  %9633 = vst [vmem:[%s16118_s12 + $0x118] sm:$0xff] %v13299_v1  ;;  %v3374_v35 = vpop.f32.mrb[59].mxu0  ;;  %9641 = vst [vmem:[%s16118_s12 + $0x158] sm:$0xff] %v16445_v25  ;;  %13665 = vmatmul.mubr.msk.f32.gmra.mrb[164].mxu0 %vm893_vm1, %v16455_v49  ;;  %v16461_v10 = vpop.f32.mrb[67].mxu1  ;;  %v16472_v50 = vld [vmem:[#allocation5 + $0x30] sm:$0xff] }
 0x48c   : > { %13679 = vmatmul.mubr.msk.f32.gmra.mrb[172].mxu1 %vm893_vm1, %v16455_v49  ;;  %v10145_v46 = vrot.slane %v10144_v44, 2  ;;  %v16466_v52 = vmax.f32 %v11213_v30, %v3374_v35  ;;  %9632 = vst [vmem:[%s16118_s12 + $0x110] sm:$0xff] %v3374_v35  ;;  %v10163_v6 = vmax.f32 %v10162_v48, %v3374_v35  ;;  %9640 = vst [vmem:[%s16118_s12 + $0x150] sm:$0xff] %v16461_v10  ;;  %13667 = vmatprep.mubr.msk.f32.mxu0 %vm893_vm1, %v16472_v50 }
 0x48d   : > { %v10176_v57 = vmax.f32 %v10175_v22, %v16461_v10  ;;  %13681 = vmatprep.mubr.msk.f32.mxu1 %vm893_vm1, %v16472_v50  ;;  %v10158_v42 = vrot.slane %v10157_v16, 2  ;;  %v20392_v30 = vmax.f32 %v16366_v47, %v16361_v24  ;;  %v20393_v24 = vmax.f32 %v16387_v34, %v16377_v12 }
 0x48e   : > { %v10146_v43 = vmax.f32 %v10144_v44, %v10145_v46  ;;  %v13302_v35 = vpop.f32.mrb[60].mxu0  ;;  %v10164_v48 = vmax.f32 %v10163_v6, %v13299_v1  ;;  %v16482_v22 = vpop.f32.mrb[68].mxu1  ;;  %v16493_v44 = vld [vmem:[#allocation5 + $0x38] sm:$0xff] }
 0x48f   : > { %v10177_v61 = vmax.f32 %v10176_v57, %v16445_v25  ;;  %v10159_v45 = vmax.f32 %v10157_v16, %v10158_v42  ;;  %v16488_v55 = vmax.f32 %v11402_v40, %v13302_v35  ;;  %9635 = vst [vmem:[%s16118_s12 + $0x128] sm:$0xff] %v13302_v35  ;;  %v3384_v8 = vpop.f32.mrb[61].mxu0  ;;  %9643 = vst [vmem:[%s16118_s12 + $0x168] sm:$0xff] %v16482_v22  ;;  %13668 = vmatmul.mubr.msk.f32.gmra.mrb[166].mxu0 %vm893_vm1, %v16493_v44  ;;  %v16499_v1 = vpop.f32.mrb[69].mxu1 }
 0x490   : > { %13682 = vmatmul.mubr.msk.f32.gmra.mrb[174].mxu1 %vm893_vm1, %v16493_v44  ;;  %v10147_v16 = vrot.slane %v10146_v43, 1  ;;  %v16504_v56 = vmax.f32 %v20391_v3, %v3384_v8  ;;  %9634 = vst [vmem:[%s16118_s12 + $0x120] sm:$0xff] %v3384_v8  ;;  %v10165_v40 = vmax.f32 %v10164_v48, %v3384_v8  ;;  %9642 = vst [vmem:[%s16118_s12 + $0x160] sm:$0xff] %v16499_v1  ;;  %13686 = vmatprep.mubr.msk.f32.mxu0 %vm893_vm1, %v15848_v2 }
 0x491   : > { %v10178_v46 = vmax.f32 %v10177_v61, %v16499_v1  ;;  %13700 = vmatprep.mubr.msk.f32.mxu1 %vm893_vm1, %v15848_v2  ;;  %v10160_v6 = vrot.slane %v10159_v45, 1 }
 0x492   : > { %v10148_v0 = vmax.f32 %v10146_v43, %v10147_v16  ;;  %v11341_v57 = vmax.f32 %v16504_v56, %v16499_v1  ;;  %v13305_v42 = vpop.f32.mrb[62].mxu0  ;;  %v10166_v61 = vmax.f32 %v10165_v40, %v13302_v35  ;;  %v16518_v8 = vpop.f32.mrb[70].mxu1 }
 0x493   : > { %v10179_v48 = vmax.f32 %v10178_v46, %v16482_v22  ;;  %v10161_v3 = vmax.f32 %v10159_v45, %v10160_v6  ;;  %v16524_v9 = vmax.f32 %v20392_v30, %v13305_v42  ;;  %9637 = vst [vmem:[%s16118_s12 + $0x138] sm:$0xff] %v13305_v42  ;;  %v3394_v11 = vpop.f32.mrb[63].mxu0  ;;  %9645 = vst [vmem:[%s16118_s12 + $0x178] sm:$0xff] %v16518_v8  ;;  %13687 = vmatmul.mubr.msk.f32.vlgmr.msra.gmra.mrb[168].mxu0 %vm893_vm1, %v16371_v27  ;;  %v16533_v43 = vpop.f32.mrb[71].mxu1 }
 0x494   : > { %13701 = vmatmul.mubr.msk.f32.vlgmr.msra.gmra.mrb[176].mxu1 %vm893_vm1, %v16371_v27  ;;  %v11009_v45 = vsel %vm11008_vm3, %v10148_v0, %v16381_v14  ;;  %v16540_v47 = vmax.f32 %v20393_v24, %v3394_v11  ;;  %9636 = vst [vmem:[%s16118_s12 + $0x130] sm:$0xff] %v3394_v11  ;;  %v10167_v30 = vmax.f32 %v10166_v61, %v3394_v11  ;;  %9644 = vst [vmem:[%s16118_s12 + $0x170] sm:$0xff] %v16533_v43 }
 0x495   : > { %13713 = vmatpush3.msra.mxu0 %v15562_v15  ;;  %13727 = vmatpush3.msra.mxu1 %v15565_v23  ;;  %v16548_v35 = vsel %vm11010_vm4, %v10161_v3, %v11009_v45  ;;  %v11530_v14 = vmax.f32 %v16524_v9, %v16518_v8  ;;  %v10180_v12 = vmax.f32 %v10179_v48, %v16533_v43 }
 0x496   : > { %13740 = vmatprep.subr.mxu0 %v15574_v37  ;;  %13754 = vmatprep.subr.mxu1 %v15577_v17  ;;  %v10168_v34 = vmax.f32 %v10167_v30, %v13305_v42  ;;  %v13324_v23 = vpop.f32.mrb[64].mxu0  ;;  %v16561_v16 = vpop.f32.mrb[72].mxu1  ;;  %v20394_v46 = vmax.f32 %v16412_v39, %v16406_v4  ;;  %v20395_v61 = vmax.f32 %v16428_v29, %v16423_v41 }
 0x497   : > { %13689 = vmatprep.mubr.msk.f32.mxu0 %vm893_vm1, %v16400_v36  ;;  %13703 = vmatprep.mubr.msk.f32.mxu1 %vm893_vm1, %v16400_v36  ;;  %v10181_v40 = vmax.f32 %v10180_v12, %v16518_v8  ;;  %9647 = vst [vmem:[%s16118_s12 + $0x188] sm:$0xff] %v13324_v23  ;;  %v3574_v11 = vpop.f32.mrb[65].mxu0  ;;  %9655 = vst [vmem:[%s16118_s12 + $0x1c8] sm:$0xff] %v16561_v16  ;;  %v16576_v0 = vpop.f32.mrb[73].mxu1  ;;  %v20398_v41 = vmax.f32 %v16488_v55, %v16482_v22 }
 0x498   : > { %v16567_v6 = vmax.f32 %v20394_v46, %v13324_v23  ;;  %13690 = vmatmul.mubr.msk.f32.gmra.mrb[170].mxu0 %vm893_vm1, %v16415_v63  ;;  %13704 = vmatmul.mubr.msk.f32.gmra.mrb[178].mxu1 %vm893_vm1, %v16415_v63  ;;  %v10169_v42 = vrot.slane %v10168_v34, 4  ;;  %v16581_v4 = vmax.f32 %v20395_v61, %v3574_v11  ;;  %9646 = vst [vmem:[%s16118_s12 + $0x180] sm:$0xff] %v3574_v11  ;;  %9654 = vst [vmem:[%s16118_s12 + $0x1c0] sm:$0xff] %v16576_v0 }
 0x499   : > { %v10188_v39 = vmax.f32 %v3574_v11, %v13324_v23  ;;  %v10201_v48 = vmax.f32 %v16576_v0, %v16561_v16  ;;  %13692 = vmatprep.mubr.msk.f32.mxu0 %vm893_vm1, %v16435_v19  ;;  %13706 = vmatprep.mubr.msk.f32.mxu1 %vm893_vm1, %v16435_v19  ;;  %v10182_v3 = vrot.slane %v10181_v40, 4  ;;  %v20396_v23 = vmax.f32 %v16450_v31, %v16445_v25 }
 0x49a   : > { %v10170_v29 = vmax.f32 %v10168_v34, %v10169_v42  ;;  %v13327_v24 = vpop.f32.mrb[66].mxu0  ;;  %v16596_v30 = vpop.f32.mrb[74].mxu1  ;;  %v20399_v9 = vmax.f32 %v16540_v47, %v16533_v43 }
 0x49b   : > { %v10183_v12 = vmax.f32 %v10181_v40, %v10182_v3  ;;  %v16601_v46 = vmax.f32 %v20396_v23, %v13327_v24  ;;  %9649 = vst [vmem:[%s16118_s12 + $0x198] sm:$0xff] %v13327_v24  ;;  %v3584_v11 = vpop.f32.mrb[67].mxu0  ;;  %9657 = vst [vmem:[%s16118_s12 + $0x1d8] sm:$0xff] %v16596_v30  ;;  %v16610_v34 = vpop.f32.mrb[75].mxu1  ;;  %v20397_v40 = vmax.f32 %v16466_v52, %v16461_v10 }
 0x49c   : > { %13693 = vmatmul.mubr.msk.f32.gmra.mrb[172].mxu0 %vm893_vm1, %v16455_v49  ;;  %13707 = vmatmul.mubr.msk.f32.gmra.mrb[180].mxu1 %vm893_vm1, %v16455_v49  ;;  %v10171_v42 = vrot.slane %v10170_v29, 2  ;;  %9648 = vst [vmem:[%s16118_s12 + $0x190] sm:$0xff] %v3584_v11  ;;  %v10189_v31 = vmax.f32 %v10188_v39, %v3584_v11  ;;  %9656 = vst [vmem:[%s16118_s12 + $0x1d0] sm:$0xff] %v16610_v34  ;;  %v10202_v25 = vmax.f32 %v10201_v48, %v16610_v34 }
 0x49d   : > { %v16615_v61 = vmax.f32 %v20397_v40, %v3584_v11  ;;  %13695 = vmatprep.mubr.msk.f32.mxu0 %vm893_vm1, %v16472_v50  ;;  %13709 = vmatprep.mubr.msk.f32.mxu1 %vm893_vm1, %v16472_v50  ;;  %v10184_v3 = vrot.slane %v10183_v12, 2 }
 0x49e   : > { %v10172_v52 = vmax.f32 %v10170_v29, %v10171_v42  ;;  %v13330_v23 = vpop.f32.mrb[68].mxu0  ;;  %v10190_v11 = vmax.f32 %v10189_v31, %v13327_v24  ;;  %v16629_v40 = vpop.f32.mrb[76].mxu1  ;;  %v10203_v48 = vmax.f32 %v10202_v25, %v16596_v30 }
 0x49f   : > { %v11217_v39 = vmax.f32 %v16615_v61, %v16610_v34  ;;  %v10185_v45 = vmax.f32 %v10183_v12, %v10184_v3  ;;  %v16635_v15 = vmax.f32 %v20398_v41, %v13330_v23  ;;  %9651 = vst [vmem:[%s16118_s12 + $0x1a8] sm:$0xff] %v13330_v23  ;;  %v3594_v10 = vpop.f32.mrb[69].mxu0  ;;  %9659 = vst [vmem:[%s16118_s12 + $0x1e8] sm:$0xff] %v16629_v40  ;;  %v16644_v29 = vpop.f32.mrb[77].mxu1 }
 0x4a0   : > { %13696 = vmatmul.mubr.msk.f32.gmra.mrb[174].mxu0 %vm893_vm1, %v16493_v44  ;;  %13710 = vmatmul.mubr.msk.f32.gmra.mrb[182].mxu1 %vm893_vm1, %v16493_v44  ;;  %v10173_v24 = vrot.slane %v10172_v52, 1  ;;  %v16649_v12 = vmax.f32 %v11341_v57, %v3594_v10  ;;  %9650 = vst [vmem:[%s16118_s12 + $0x1a0] sm:$0xff] %v3594_v10  ;;  %v10191_v55 = vmax.f32 %v10190_v11, %v3594_v10  ;;  %9658 = vst [vmem:[%s16118_s12 + $0x1e0] sm:$0xff] %v16644_v29 }
 0x4a1   : > { %v10204_v22 = vmax.f32 %v10203_v48, %v16644_v29  ;;  %13714 = vmatprep.mubr.msk.f32.mxu0 %vm893_vm1, %v15848_v2  ;;  %13728 = vmatprep.mubr.msk.f32.mxu1 %vm893_vm1, %v15848_v2  ;;  %v10186_v41 = vrot.slane %v10185_v45, 1  ;;  %v11406_v1 = vmax.f32 %v16635_v15, %v16629_v40 }
 0x4a2   : > { %v10174_v56 = vmax.f32 %v10172_v52, %v10173_v24  ;;  %v11343_v57 = vmax.f32 %v16649_v12, %v16644_v29  ;;  %v13333_v42 = vpop.f32.mrb[70].mxu0  ;;  %v10192_v31 = vmax.f32 %v10191_v55, %v13330_v23  ;;  %v16663_v25 = vpop.f32.mrb[78].mxu1  ;;  %v20400_v55 = vmax.f32 %v16567_v6, %v16561_v16 }
 0x4a3   : > { %v10205_v3 = vmax.f32 %v10204_v22, %v16629_v40  ;;  %v10187_v10 = vmax.f32 %v10185_v45, %v10186_v41  ;;  %v16669_v2 = vmax.f32 %v11530_v14, %v13333_v42  ;;  %9653 = vst [vmem:[%s16118_s12 + $0x1b8] sm:$0xff] %v13333_v42  ;;  %v3604_v11 = vpop.f32.mrb[71].mxu0  ;;  %9661 = vst [vmem:[%s16118_s12 + $0x1f8] sm:$0xff] %v16663_v25  ;;  %v16678_v52 = vpop.f32.mrb[79].mxu1 }
 0x4a4   : > { %13715 = vmatmul.mubr.msk.f32.vlgmr.msra.gmra.mrb[176].mxu0 %vm893_vm1, %v16371_v27  ;;  %13729 = vmatmul.mubr.msk.f32.vlgmr.msra.gmra.mrb[184].mxu1 %vm893_vm1, %v16371_v27  ;;  %v11013_v45 = vsel %vm11012_vm5, %v10174_v56, %v16548_v35  ;;  %v16685_v8 = vmax.f32 %v20399_v9, %v3604_v11  ;;  %9652 = vst [vmem:[%s16118_s12 + $0x1b0] sm:$0xff] %v3604_v11  ;;  %9660 = vst [vmem:[%s16118_s12 + $0x1f0] sm:$0xff] %v16678_v52 }
 0x4a5   : > { %v10193_v14 = vmax.f32 %v10192_v31, %v3604_v11  ;;  %13741 = vmatpush3.msra.mxu0 %v15574_v37  ;;  %13755 = vmatpush3.msra.mxu1 %v15577_v17  ;;  %v16693_v23 = vsel %vm11014_vm6, %v10187_v10, %v11013_v45  ;;  %v11532_v35 = vmax.f32 %v16669_v2, %v16663_v25 }
 0x4a6   : > { %v10206_v43 = vmax.f32 %v10205_v3, %v16678_v52  ;;  %13768 = vmatprep.subr.mxu0 %v15580_v62  ;;  %13782 = vmatprep.subr.mxu1 %v15587_v53  ;;  %v11469_v37 = vmax.f32 %v16685_v8, %v16678_v52  ;;  %v13352_v17 = vpop.f32.mrb[72].mxu0  ;;  %v16706_v48 = vpop.f32.mrb[80].mxu1  ;;  %v20401_v31 = vmax.f32 %v16581_v4, %v16576_v0 }
 0x4a7   : > { %v10194_v47 = vmax.f32 %v10193_v14, %v13333_v42  ;;  %13717 = vmatprep.mubr.msk.f32.mxu0 %vm893_vm1, %v16400_v36  ;;  %13731 = vmatprep.mubr.msk.f32.mxu1 %vm893_vm1, %v16400_v36  ;;  %v16712_v22 = vmax.f32 %v20400_v55, %v13352_v17  ;;  %9663 = vst [vmem:[%s16118_s12 + $0x208] sm:$0xff] %v13352_v17  ;;  %v3784_v41 = vpop.f32.mrb[73].mxu0  ;;  %9671 = vst [vmem:[%s16118_s12 + $0x248] sm:$0xff] %v16706_v48  ;;  %v16721_v56 = vpop.f32.mrb[81].mxu1 }
 0x4a8   : > { %v10207_v24 = vmax.f32 %v10206_v43, %v16663_v25  ;;  %13718 = vmatmul.mubr.msk.f32.gmra.mrb[178].mxu0 %vm893_vm1, %v16415_v63  ;;  %13732 = vmatmul.mubr.msk.f32.gmra.mrb[186].mxu1 %vm893_vm1, %v16415_v63  ;;  %v16726_v16 = vmax.f32 %v20401_v31, %v3784_v41  ;;  %9662 = vst [vmem:[%s16118_s12 + $0x200] sm:$0xff] %v3784_v41  ;;  %9670 = vst [vmem:[%s16118_s12 + $0x240] sm:$0xff] %v16721_v56 }
 0x4a9   : > { %v10195_v42 = vrot.slane %v10194_v47, 4  ;;  %v10214_v6 = vmax.f32 %v3784_v41, %v13352_v17  ;;  %v10227_v3 = vmax.f32 %v16721_v56, %v16706_v48  ;;  %13720 = vmatprep.mubr.msk.f32.mxu0 %vm893_vm1, %v16435_v19  ;;  %13734 = vmatprep.mubr.msk.f32.mxu1 %vm893_vm1, %v16435_v19  ;;  %v11156_v0 = vmax.f32 %v16712_v22, %v16706_v48 }
 0x4aa   : > { %v10208_v10 = vrot.slane %v10207_v24, 4  ;;  %v11093_v11 = vmax.f32 %v16726_v16, %v16721_v56  ;;  %v13355_v45 = vpop.f32.mrb[74].mxu0  ;;  %v16741_v9 = vpop.f32.mrb[82].mxu1  ;;  %v20402_v43 = vmax.f32 %v16601_v46, %v16596_v30 }
 0x4ab   : > { %v10196_v4 = vmax.f32 %v10194_v47, %v10195_v42  ;;  %9665 = vst [vmem:[%s16118_s12 + $0x218] sm:$0xff] %v13355_v45  ;;  %v3794_v55 = vpop.f32.mrb[75].mxu0  ;;  %9673 = vst [vmem:[%s16118_s12 + $0x258] sm:$0xff] %v16741_v9  ;;  %v16755_v47 = vpop.f32.mrb[83].mxu1 }
 0x4ac   : > { %v10209_v14 = vmax.f32 %v10207_v24, %v10208_v10  ;;  %v16746_v17 = vmax.f32 %v20402_v43, %v13355_v45  ;;  %13721 = vmatmul.mubr.msk.f32.gmra.mrb[180].mxu0 %vm893_vm1, %v16455_v49  ;;  %13735 = vmatmul.mubr.msk.f32.gmra.mrb[188].mxu1 %vm893_vm1, %v16455_v49  ;;  %v16760_v24 = vmax.f32 %v11217_v39, %v3794_v55 }
 0x4ad   : > { %v10197_v41 = vrot.slane %v10196_v4, 2  ;;  %9664 = vst [vmem:[%s16118_s12 + $0x210] sm:$0xff] %v3794_v55  ;;  %v10215_v30 = vmax.f32 %v10214_v6, %v3794_v55  ;;  %9672 = vst [vmem:[%s16118_s12 + $0x250] sm:$0xff] %v16755_v47  ;;  %v10228_v46 = vmax.f32 %v10227_v3, %v16755_v47  ;;  %13723 = vmatprep.mubr.msk.f32.mxu0 %vm893_vm1, %v16472_v50  ;;  %13737 = vmatprep.mubr.msk.f32.mxu1 %vm893_vm1, %v16472_v50 }
 0x4ae   : > { %v10210_v42 = vrot.slane %v10209_v14, 2  ;;  %v11219_v39 = vmax.f32 %v16760_v24, %v16755_v47  ;;  %v13358_v31 = vpop.f32.mrb[76].mxu0  ;;  %v16774_v3 = vpop.f32.mrb[84].mxu1 }
 0x4af   : > { %v10198_v61 = vmax.f32 %v10196_v4, %v10197_v41  ;;  %v10216_v6 = vmax.f32 %v10215_v30, %v13355_v45  ;;  %v10229_v10 = vmax.f32 %v10228_v46, %v16741_v9  ;;  %v16780_v55 = vmax.f32 %v11406_v1, %v13358_v31  ;;  %9667 = vst [vmem:[%s16118_s12 + $0x228] sm:$0xff] %v13358_v31  ;;  %v3804_v34 = vpop.f32.mrb[77].mxu0  ;;  %v16789_v4 = vpop.f32.mrb[85].mxu1 }
 0x4b0   : > { %v10211_v43 = vmax.f32 %v10209_v14, %v10210_v42  ;;  %13724 = vmatmul.mubr.msk.f32.gmra.mrb[182].mxu0 %vm893_vm1, %v16493_v44  ;;  %13738 = vmatmul.mubr.msk.f32.gmra.mrb[190].mxu1 %vm893_vm1, %v16493_v44  ;;  %9675 = vst [vmem:[%s16118_s12 + $0x268] sm:$0xff] %v16774_v3  ;;  %v16795_v15 = vmax.f32 %v11343_v57, %v3804_v34  ;;  %9666 = vst [vmem:[%s16118_s12 + $0x220] sm:$0xff] %v3804_v34  ;;  %v16801_v14 = vld [vmem:[#allocation5] sm:$0xff] }
 0x4b1   : > { %v10199_v45 = vrot.slane %v10198_v61, 1  ;;  %v10217_v40 = vmax.f32 %v10216_v6, %v3804_v34  ;;  %9674 = vst [vmem:[%s16118_s12 + $0x260] sm:$0xff] %v16789_v4  ;;  %v10230_v1 = vmax.f32 %v10229_v10, %v16789_v4  ;;  %13742 = vmatprep.mubr.msk.f32.mxu0 %vm893_vm1, %v16801_v14  ;;  %13756 = vmatprep.mubr.msk.f32.mxu1 %vm893_vm1, %v16801_v14 }
 0x4b2   : > { %v10212_v29 = vrot.slane %v10211_v43, 1  ;;  %v11408_v12 = vmax.f32 %v16780_v55, %v16774_v3  ;;  %v11345_v41 = vmax.f32 %v16795_v15, %v16789_v4  ;;  %v13361_v30 = vpop.f32.mrb[78].mxu0  ;;  %v16811_v42 = vpop.f32.mrb[86].mxu1 }
 0x4b3   : > { %v10200_v57 = vmax.f32 %v10198_v61, %v10199_v45  ;;  %v10218_v46 = vmax.f32 %v10217_v40, %v13358_v31  ;;  %v10231_v34 = vmax.f32 %v10230_v1, %v16774_v3  ;;  %v16824_v61 = vmax.f32 %v11532_v35, %v13361_v30  ;;  %9669 = vst [vmem:[%s16118_s12 + $0x238] sm:$0xff] %v13361_v30  ;;  %v3814_v10 = vpop.f32.mrb[79].mxu0  ;;  %v16833_v31 = vpop.f32.mrb[87].mxu1 }
 0x4b4   : > { %v10213_v6 = vmax.f32 %v10211_v43, %v10212_v29  ;;  %13743 = vmatmul.mubr.msk.f32.vlgmr.msra.gmra.mrb[184].mxu0 %vm893_vm1, %v16371_v27  ;;  %13757 = vmatmul.mubr.msk.f32.vlgmr.msra.gmra.mrb[192].mxu1 %vm893_vm1, %v16371_v27  ;;  %9677 = vst [vmem:[%s16118_s12 + $0x278] sm:$0xff] %v16811_v42  ;;  %v16840_v25 = vmax.f32 %v11469_v37, %v3814_v10  ;;  %9668 = vst [vmem:[%s16118_s12 + $0x230] sm:$0xff] %v3814_v10 }
 0x4b5   : > { %v11017_v43 = vsel %vm11016_vm7, %v10200_v57, %v16693_v23  ;;  %v10219_v2 = vmax.f32 %v10218_v46, %v3814_v10  ;;  %13769 = vmatpush3.msra.mxu0 %v15580_v62  ;;  %13783 = vmatpush3.msra.mxu1 %v15587_v53  ;;  %9676 = vst [vmem:[%s16118_s12 + $0x270] sm:$0xff] %v16833_v31 }
 0x4b6   : > { %v11019_v35 = vsel %vm11018_vm8, %v10213_v6, %v11017_v43  ;;  %v11534_v45 = vmax.f32 %v16824_v61, %v16811_v42  ;;  %13796 = vmatprep.subr.mxu0 %v15590_v21  ;;  %13810 = vmatprep.subr.mxu1 %v15593_v26  ;;  %v10232_v52 = vmax.f32 %v10231_v34, %v16833_v31  ;;  %v13380_v53 = vpop.f32.mrb[80].mxu0  ;;  %v16860_v23 = vpop.f32.mrb[88].mxu1 }
 0x4b7   : > { %11077 = vst [vmem:[%s16819_s24] sm:$0xff] %v11019_v35  ;;  %v10220_v8 = vmax.f32 %v10219_v2, %v13361_v30  ;;  %v11471_v62 = vmax.f32 %v16840_v25, %v16833_v31  ;;  %13745 = vmatprep.mubr.msk.f32.mxu0 %vm893_vm1, %v16400_v36  ;;  %13759 = vmatprep.mubr.msk.f32.mxu1 %vm893_vm1, %v16400_v36  ;;  %9679 = vst [vmem:[%s16118_s12 + $0x288] sm:$0xff] %v13380_v53  ;;  %v3994_v1 = vpop.f32.mrb[81].mxu0  ;;  %v16875_v29 = vpop.f32.mrb[89].mxu1  ;;  %v20404_v25 = vld [vmem:[#allocation20_spill] sm:$0xff] }
 0x4b8   : > { %v10233_v37 = vmax.f32 %v10232_v52, %v16811_v42  ;;  %v16866_v40 = vmax.f32 %v11156_v0, %v13380_v53  ;;  %13746 = vmatmul.mubr.msk.f32.gmra.mrb[186].mxu0 %vm893_vm1, %v16415_v63  ;;  %13760 = vmatmul.mubr.msk.f32.gmra.mrb[194].mxu1 %vm893_vm1, %v16415_v63  ;;  %9687 = vst [vmem:[%s16118_s12 + $0x2c8] sm:$0xff] %v16860_v23  ;;  %9678 = vst [vmem:[%s16118_s12 + $0x280] sm:$0xff] %v3994_v1 }
 0x4b9   : > { %v10221_v57 = vrot.slane %v10220_v8, 4  ;;  %v16880_v48 = vmax.f32 %v11093_v11, %v3994_v1  ;;  %v10240_v22 = vmax.f32 %v3994_v1, %v13380_v53  ;;  %9686 = vst [vmem:[%s16118_s12 + $0x2c0] sm:$0xff] %v16875_v29  ;;  %v10253_v0 = vmax.f32 %v16875_v29, %v16860_v23  ;;  %13748 = vmatprep.mubr.msk.f32.mxu0 %vm893_vm1, %v16435_v19 }
 0x4ba   : > { %13762 = vmatprep.mubr.msk.f32.mxu1 %vm893_vm1, %v16435_v19  ;;  %v10234_v30 = vrot.slane %v10233_v37, 4  ;;  %v11158_v56 = vmax.f32 %v16866_v40, %v16860_v23  ;;  %v13383_v46 = vpop.f32.mrb[82].mxu0  ;;  %v16895_v34 = vpop.f32.mrb[90].mxu1  ;;  %v20403_v10 = vmax.f32 %v16746_v17, %v16741_v9 }
 0x4bb   : > { %v10222_v16 = vmax.f32 %v10220_v8, %v10221_v57  ;;  %v11095_v11 = vmax.f32 %v16880_v48, %v16875_v29  ;;  %9681 = vst [vmem:[%s16118_s12 + $0x298] sm:$0xff] %v13383_v46  ;;  %v4004_v2 = vpop.f32.mrb[83].mxu0  ;;  %9689 = vst [vmem:[%s16118_s12 + $0x2d8] sm:$0xff] %v16895_v34  ;;  %v16909_v35 = vpop.f32.mrb[91].mxu1 }
 0x4bc   : > { %v10235_v6 = vmax.f32 %v10233_v37, %v10234_v30  ;;  %v16900_v43 = vmax.f32 %v20403_v10, %v13383_v46  ;;  %13749 = vmatmul.mubr.msk.f32.gmra.mrb[188].mxu0 %vm893_vm1, %v16455_v49  ;;  %13763 = vmatmul.mubr.msk.f32.gmra.mrb[196].mxu1 %vm893_vm1, %v16455_v49  ;;  %v16914_v8 = vmax.f32 %v11219_v39, %v4004_v2 }
 0x4bd   : > { %v10223_v52 = vrot.slane %v10222_v16, 2  ;;  %9680 = vst [vmem:[%s16118_s12 + $0x290] sm:$0xff] %v4004_v2  ;;  %v10241_v9 = vmax.f32 %v10240_v22, %v4004_v2  ;;  %9688 = vst [vmem:[%s16118_s12 + $0x2d0] sm:$0xff] %v16909_v35  ;;  %v10254_v17 = vmax.f32 %v10253_v0, %v16909_v35  ;;  %13751 = vmatprep.mubr.msk.f32.mxu0 %vm893_vm1, %v16472_v50  ;;  %13765 = vmatprep.mubr.msk.f32.mxu1 %vm893_vm1, %v16472_v50 }
 0x4be   : > { %v10236_v53 = vrot.slane %v10235_v6, 2  ;;  %v11284_v47 = vmax.f32 %v16900_v43, %v16895_v34  ;;  %v11221_v39 = vmax.f32 %v16914_v8, %v16909_v35  ;;  %v13386_v37 = vpop.f32.mrb[84].mxu0  ;;  %v16928_v57 = vpop.f32.mrb[92].mxu1 }
 0x4bf   : > { %v10224_v24 = vmax.f32 %v10222_v16, %v10223_v52  ;;  %v10242_v1 = vmax.f32 %v10241_v9, %v13383_v46  ;;  %v10255_v22 = vmax.f32 %v10254_v17, %v16895_v34  ;;  %v16934_v30 = vmax.f32 %v11408_v12, %v13386_v37  ;;  %9683 = vst [vmem:[%s16118_s12 + $0x2a8] sm:$0xff] %v13386_v37  ;;  %v4014_v10 = vpop.f32.mrb[85].mxu0  ;;  %v16943_v16 = vpop.f32.mrb[93].mxu1 }
 0x4c0   : > { %v10237_v0 = vmax.f32 %v10235_v6, %v10236_v53  ;;  %9691 = vst [vmem:[%s16118_s12 + $0x2e8] sm:$0xff] %v16928_v57  ;;  %13752 = vmatmul.mubr.msk.f32.gmra.mrb[190].mxu0 %vm893_vm1, %v16493_v44  ;;  %13766 = vmatmul.mubr.msk.f32.gmra.mrb[198].mxu1 %vm893_vm1, %v16493_v44  ;;  %v16948_v6 = vmax.f32 %v11345_v41, %v4014_v10  ;;  %9682 = vst [vmem:[%s16118_s12 + $0x2a0] sm:$0xff] %v4014_v10 }
 0x4c1   : > { %v10225_v46 = vrot.slane %v10224_v24, 1  ;;  %v10243_v3 = vmax.f32 %v10242_v1, %v4014_v10  ;;  %9690 = vst [vmem:[%s16118_s12 + $0x2e0] sm:$0xff] %v16943_v16  ;;  %v10256_v55 = vmax.f32 %v10255_v22, %v16943_v16  ;;  %13770 = vmatprep.mubr.msk.f32.mxu0 %vm893_vm1, %v16801_v14  ;;  %13784 = vmatprep.mubr.msk.f32.mxu1 %vm893_vm1, %v16801_v14 }
 0x4c2   : > { %v10238_v12 = vrot.slane %v10237_v0, 1  ;;  %v11410_v4 = vmax.f32 %v16934_v30, %v16928_v57  ;;  %v11347_v41 = vmax.f32 %v16948_v6, %v16943_v16  ;;  %v13389_v2 = vpop.f32.mrb[86].mxu0  ;;  %v16962_v9 = vpop.f32.mrb[94].mxu1 }
 0x4c3   : > { %v10226_v15 = vmax.f32 %v10224_v24, %v10225_v46  ;;  %v10244_v52 = vmax.f32 %v10243_v3, %v13386_v37  ;;  %v10257_v17 = vmax.f32 %v10256_v55, %v16928_v57  ;;  %v16968_v1 = vmax.f32 %v11534_v45, %v13389_v2  ;;  %9685 = vst [vmem:[%s16118_s12 + $0x2b8] sm:$0xff] %v13389_v2  ;;  %v4024_v22 = vpop.f32.mrb[87].mxu0  ;;  %v16977_v24 = vpop.f32.mrb[95].mxu1 }
 0x4c4   : > { %v10239_v53 = vmax.f32 %v10237_v0, %v10238_v12  ;;  %9693 = vst [vmem:[%s16118_s12 + $0x2f8] sm:$0xff] %v16962_v9  ;;  %13771 = vmatmul.mubr.msk.f32.vlgmr.msra.gmra.mrb[192].mxu0 %vm893_vm1, %v16371_v27  ;;  %13785 = vmatmul.mubr.msk.f32.vlgmr.msra.gmra.mrb[200].mxu1 %vm893_vm1, %v16371_v27  ;;  %v16982_v37 = vmax.f32 %v11471_v62, %v4024_v22  ;;  %9684 = vst [vmem:[%s16118_s12 + $0x2b0] sm:$0xff] %v4024_v22  ;;  %v20405_v62 = vld [vmem:[#allocation18_spill] sm:$0xff] }
 0x4c5   : > { %v10245_v42 = vmax.f32 %v10244_v52, %v4024_v22  ;;  %13797 = vmatpush3.msra.mxu0 %v15590_v21  ;;  %13811 = vmatpush3.msra.mxu1 %v15593_v26  ;;  %9692 = vst [vmem:[%s16118_s12 + $0x2f0] sm:$0xff] %v16977_v24  ;;  %v10258_v61 = vmax.f32 %v10257_v17, %v16977_v24 }
 0x4c6   : > { %v16991_v45 = vsel %vm11006_vm2, %v10239_v53, %v10226_v15  ;;  %v11536_v31 = vmax.f32 %v16968_v1, %v16962_v9  ;;  %13824 = vmatprep.subr.mxu0 %v20404_v25  ;;  %13838 = vmatprep.subr.mxu1 %v20405_v62  ;;  %v11473_v21 = vmax.f32 %v16982_v37, %v16977_v24  ;;  %v13408_v10 = vpop.f32.mrb[88].mxu0  ;;  %v17004_v46 = vpop.f32.mrb[96].mxu1 }
 0x4c7   : > { %v10246_v0 = vmax.f32 %v10245_v42, %v13389_v2  ;;  %v10259_v26 = vmax.f32 %v10258_v61, %v16962_v9  ;;  %13773 = vmatprep.mubr.msk.f32.mxu0 %vm893_vm1, %v16400_v36  ;;  %13787 = vmatprep.mubr.msk.f32.mxu1 %vm893_vm1, %v16400_v36  ;;  %v17009_v3 = vmax.f32 %v11158_v56, %v13408_v10  ;;  %v4204_v55 = vpop.f32.mrb[89].mxu0  ;;  %v17018_v12 = vpop.f32.mrb[97].mxu1 }
 0x4c8   : > { %9695 = vst [vmem:[%s16118_s12 + $0x308] sm:$0xff] %v13408_v10  ;;  %13774 = vmatmul.mubr.msk.f32.gmra.mrb[194].mxu0 %vm893_vm1, %v16415_v63  ;;  %13788 = vmatmul.mubr.msk.f32.gmra.mrb[202].mxu1 %vm893_vm1, %v16415_v63  ;;  %9703 = vst [vmem:[%s16118_s12 + $0x348] sm:$0xff] %v17004_v46  ;;  %v17023_v23 = vmax.f32 %v11095_v11, %v4204_v55  ;;  %v10266_v40 = vmax.f32 %v4204_v55, %v13408_v10 }
 0x4c9   : > { %v10247_v15 = vrot.slane %v10246_v0, 4  ;;  %v10260_v2 = vrot.slane %v10259_v26, 4  ;;  %9694 = vst [vmem:[%s16118_s12 + $0x300] sm:$0xff] %v4204_v55  ;;  %9702 = vst [vmem:[%s16118_s12 + $0x340] sm:$0xff] %v17018_v12  ;;  %13776 = vmatprep.mubr.msk.f32.mxu0 %vm893_vm1, %v16435_v19  ;;  %13790 = vmatprep.mubr.msk.f32.mxu1 %vm893_vm1, %v16435_v19  ;;  %v11160_v56 = vmax.f32 %v17009_v3, %v17004_v46 }
 0x4ca   : > { %v10279_v52 = vmax.f32 %v17018_v12, %v17004_v46  ;;  %v11097_v11 = vmax.f32 %v17023_v23, %v17018_v12  ;;  %v13411_v17 = vpop.f32.mrb[90].mxu0  ;;  %v17038_v53 = vpop.f32.mrb[98].mxu1 }
 0x4cb   : > { %v10248_v29 = vmax.f32 %v10246_v0, %v10247_v15  ;;  %v10261_v48 = vmax.f32 %v10259_v26, %v10260_v2  ;;  %v17043_v22 = vmax.f32 %v11284_v47, %v13411_v17  ;;  %9697 = vst [vmem:[%s16118_s12 + $0x318] sm:$0xff] %v13411_v17  ;;  %v4214_v42 = vpop.f32.mrb[91].mxu0  ;;  %9705 = vst [vmem:[%s16118_s12 + $0x358] sm:$0xff] %v17038_v53  ;;  %v17052_v61 = vpop.f32.mrb[99].mxu1 }
 0x4cc   : > { %13777 = vmatmul.mubr.msk.f32.gmra.mrb[196].mxu0 %vm893_vm1, %v16455_v49  ;;  %13791 = vmatmul.mubr.msk.f32.gmra.mrb[204].mxu1 %vm893_vm1, %v16455_v49  ;;  %v17057_v34 = vmax.f32 %v11221_v39, %v4214_v42  ;;  %9696 = vst [vmem:[%s16118_s12 + $0x310] sm:$0xff] %v4214_v42  ;;  %v10267_v43 = vmax.f32 %v10266_v40, %v4214_v42  ;;  %9704 = vst [vmem:[%s16118_s12 + $0x350] sm:$0xff] %v17052_v61 }
 0x4cd   : > { %v10249_v0 = vrot.slane %v10248_v29, 2  ;;  %v10262_v26 = vrot.slane %v10261_v48, 2  ;;  %13779 = vmatprep.mubr.msk.f32.mxu0 %vm893_vm1, %v16472_v50  ;;  %13793 = vmatprep.mubr.msk.f32.mxu1 %vm893_vm1, %v16472_v50  ;;  %v11286_v47 = vmax.f32 %v17043_v22, %v17038_v53  ;;  %v10280_v10 = vmax.f32 %v10279_v52, %v17052_v61 }
 0x4ce   : > { %v11223_v39 = vmax.f32 %v17057_v34, %v17052_v61  ;;  %v13414_v55 = vpop.f32.mrb[92].mxu0  ;;  %v10268_v15 = vmax.f32 %v10267_v43, %v13411_v17  ;;  %v17071_v2 = vpop.f32.mrb[100].mxu1 }
 0x4cf   : > { %v10250_v35 = vmax.f32 %v10248_v29, %v10249_v0  ;;  %v10263_v8 = vmax.f32 %v10261_v48, %v10262_v26  ;;  %v17076_v40 = vmax.f32 %v11410_v4, %v13414_v55  ;;  %9699 = vst [vmem:[%s16118_s12 + $0x328] sm:$0xff] %v13414_v55  ;;  %v4224_v42 = vpop.f32.mrb[93].mxu0  ;;  %9707 = vst [vmem:[%s16118_s12 + $0x368] sm:$0xff] %v17071_v2  ;;  %v17085_v52 = vpop.f32.mrb[101].mxu1 }
 0x4d0   : > { %13780 = vmatmul.mubr.msk.f32.gmra.mrb[198].mxu0 %vm893_vm1, %v16493_v44  ;;  %13794 = vmatmul.mubr.msk.f32.gmra.mrb[206].mxu1 %vm893_vm1, %v16493_v44  ;;  %v10281_v29 = vmax.f32 %v10280_v10, %v17038_v53  ;;  %v17091_v57 = vmax.f32 %v11347_v41, %v4224_v42  ;;  %9698 = vst [vmem:[%s16118_s12 + $0x320] sm:$0xff] %v4224_v42  ;;  %9706 = vst [vmem:[%s16118_s12 + $0x360] sm:$0xff] %v17085_v52 }
 0x4d1   : > { %v10251_v48 = vrot.slane %v10250_v35, 1  ;;  %v10264_v17 = vrot.slane %v10263_v8, 1  ;;  %v10269_v30 = vmax.f32 %v10268_v15, %v4224_v42  ;;  %13798 = vmatprep.mubr.msk.f32.mxu0 %vm893_vm1, %v16801_v14  ;;  %13812 = vmatprep.mubr.msk.f32.mxu1 %vm893_vm1, %v16801_v14  ;;  %v11412_v4 = vmax.f32 %v17076_v40, %v17071_v2 }
 0x4d2   : > { %v10282_v0 = vmax.f32 %v10281_v29, %v17085_v52  ;;  %v11349_v41 = vmax.f32 %v17091_v57, %v17085_v52  ;;  %v13417_v26 = vpop.f32.mrb[94].mxu0  ;;  %v17105_v10 = vpop.f32.mrb[102].mxu1 }
 0x4d3   : > { %v10252_v16 = vmax.f32 %v10250_v35, %v10251_v48  ;;  %v10265_v6 = vmax.f32 %v10263_v8, %v10264_v17  ;;  %v10270_v43 = vmax.f32 %v10269_v30, %v13414_v55  ;;  %v17110_v15 = vmax.f32 %v11536_v31, %v13417_v26  ;;  %9701 = vst [vmem:[%s16118_s12 + $0x338] sm:$0xff] %v13417_v26  ;;  %v4234_v42 = vpop.f32.mrb[95].mxu0  ;;  %v17119_v35 = vpop.f32.mrb[103].mxu1 }
 0x4d4   : > { %9709 = vst [vmem:[%s16118_s12 + $0x378] sm:$0xff] %v17105_v10  ;;  %13799 = vmatmul.mubr.msk.f32.vlgmr.msra.gmra.mrb[200].mxu0 %vm893_vm1, %v16371_v27  ;;  %13813 = vmatmul.mubr.msk.f32.vlgmr.msra.gmra.mrb[208].mxu1 %vm893_vm1, %v16371_v27  ;;  %v10283_v8 = vmax.f32 %v10282_v0, %v17071_v2  ;;  %v17127_v9 = vmax.f32 %v11473_v21, %v4234_v42  ;;  %9700 = vst [vmem:[%s16118_s12 + $0x330] sm:$0xff] %v4234_v42 }
 0x4d5   : > { %v11021_v55 = vsel %vm11008_vm3, %v10252_v16, %v16991_v45  ;;  %v10271_v1 = vmax.f32 %v10270_v43, %v4234_v42  ;;  %13825 = vmatpush3.msra.mxu0 %v20404_v25  ;;  %13839 = vmatpush3.msra.mxu1 %v20405_v62  ;;  %9708 = vst [vmem:[%s16118_s12 + $0x370] sm:$0xff] %v17119_v35 }
 0x4d6   : > { %v17135_v27 = vsel %vm11010_vm4, %v10265_v6, %v11021_v55  ;;  %v11538_v45 = vmax.f32 %v17110_v15, %v17105_v10  ;;  %v10284_v24 = vmax.f32 %v10283_v8, %v17119_v35  ;;  %13852 = vmatprep.subr.mxu0 %v15629_v58  ;;  %13866 = vmatprep.subr.mxu1 %v15632_v18  ;;  %v13436_v25 = vpop.f32.mrb[96].mxu0  ;;  %v17148_v62 = vpop.f32.mrb[104].mxu1 }
 0x4d7   : > { %v10272_v37 = vmax.f32 %v10271_v1, %v13417_v26  ;;  %v11475_v31 = vmax.f32 %v17127_v9, %v17119_v35  ;;  %13801 = vmatprep.mubr.msk.f32.mxu0 %vm893_vm1, %v16400_v36  ;;  %13815 = vmatprep.mubr.msk.f32.mxu1 %vm893_vm1, %v16400_v36  ;;  %v17154_v29 = vmax.f32 %v11160_v56, %v13436_v25  ;;  %v4414_v48 = vpop.f32.mrb[97].mxu0  ;;  %v17163_v36 = vpop.f32.mrb[105].mxu1  ;;  %v17291_v9 = vld [vmem:[#allocation5 + $0x10] sm:$0xff] }
 0x4d8   : > { %v10285_v21 = vmax.f32 %v10284_v24, %v17105_v10  ;;  %9711 = vst [vmem:[%s16118_s12 + $0x388] sm:$0xff] %v13436_v25  ;;  %13802 = vmatmul.mubr.msk.f32.gmra.mrb[202].mxu0 %vm893_vm1, %v16415_v63  ;;  %13816 = vmatmul.mubr.msk.f32.gmra.mrb[210].mxu1 %vm893_vm1, %v16415_v63  ;;  %9719 = vst [vmem:[%s16118_s12 + $0x3c8] sm:$0xff] %v17148_v62  ;;  %v17168_v46 = vmax.f32 %v11097_v11, %v4414_v48 }
 0x4d9   : > { %v10273_v17 = vrot.slane %v10272_v37, 4  ;;  %9710 = vst [vmem:[%s16118_s12 + $0x380] sm:$0xff] %v4414_v48  ;;  %v10292_v3 = vmax.f32 %v4414_v48, %v13436_v25  ;;  %9718 = vst [vmem:[%s16118_s12 + $0x3c0] sm:$0xff] %v17163_v36  ;;  %v10305_v56 = vmax.f32 %v17163_v36, %v17148_v62  ;;  %13804 = vmatprep.mubr.msk.f32.mxu0 %vm893_vm1, %v16435_v19  ;;  %13818 = vmatprep.mubr.msk.f32.mxu1 %vm893_vm1, %v16435_v19 }
 0x4da   : > { %v10286_v63 = vrot.slane %v10285_v21, 4  ;;  %v11162_v12 = vmax.f32 %v17154_v29, %v17148_v62  ;;  %v11099_v11 = vmax.f32 %v17168_v46, %v17163_v36  ;;  %v13439_v30 = vpop.f32.mrb[98].mxu0  ;;  %v17183_v0 = vpop.f32.mrb[106].mxu1 }
 0x4db   : > { %v10274_v23 = vmax.f32 %v10272_v37, %v10273_v17  ;;  %v17188_v6 = vmax.f32 %v11286_v47, %v13439_v30  ;;  %9713 = vst [vmem:[%s16118_s12 + $0x398] sm:$0xff] %v13439_v30  ;;  %v4424_v19 = vpop.f32.mrb[99].mxu0  ;;  %9721 = vst [vmem:[%s16118_s12 + $0x3d8] sm:$0xff] %v17183_v0  ;;  %v17197_v26 = vpop.f32.mrb[107].mxu1 }
 0x4dc   : > { %v10287_v16 = vmax.f32 %v10285_v21, %v10286_v63  ;;  %13805 = vmatmul.mubr.msk.f32.gmra.mrb[204].mxu0 %vm893_vm1, %v16455_v49  ;;  %13819 = vmatmul.mubr.msk.f32.gmra.mrb[212].mxu1 %vm893_vm1, %v16455_v49  ;;  %v17202_v42 = vmax.f32 %v11223_v39, %v4424_v19  ;;  %9712 = vst [vmem:[%s16118_s12 + $0x390] sm:$0xff] %v4424_v19  ;;  %9720 = vst [vmem:[%s16118_s12 + $0x3d0] sm:$0xff] %v17197_v26 }
 0x4dd   : > { %v10275_v43 = vrot.slane %v10274_v23, 2  ;;  %v10293_v53 = vmax.f32 %v10292_v3, %v4424_v19  ;;  %v10306_v22 = vmax.f32 %v10305_v56, %v17197_v26  ;;  %13807 = vmatprep.mubr.msk.f32.mxu0 %vm893_vm1, %v16472_v50  ;;  %13821 = vmatprep.mubr.msk.f32.mxu1 %vm893_vm1, %v16472_v50  ;;  %v11288_v61 = vmax.f32 %v17188_v6, %v17183_v0 }
 0x4de   : > { %v10288_v49 = vrot.slane %v10287_v16, 2  ;;  %v11225_v47 = vmax.f32 %v17202_v42, %v17197_v26  ;;  %v13442_v39 = vpop.f32.mrb[100].mxu0  ;;  %v17216_v55 = vpop.f32.mrb[108].mxu1 }
 0x4df   : > { %v10276_v34 = vmax.f32 %v10274_v23, %v10275_v43  ;;  %v10294_v8 = vmax.f32 %v10293_v53, %v13439_v30  ;;  %v10307_v1 = vmax.f32 %v10306_v22, %v17183_v0  ;;  %v17222_v50 = vmax.f32 %v11412_v4, %v13442_v39  ;;  %9715 = vst [vmem:[%s16118_s12 + $0x3a8] sm:$0xff] %v13442_v39  ;;  %v4434_v37 = vpop.f32.mrb[101].mxu0  ;;  %v17231_v25 = vpop.f32.mrb[109].mxu1 }
 0x4e0   : > { %v10289_v24 = vmax.f32 %v10287_v16, %v10288_v49  ;;  %9723 = vst [vmem:[%s16118_s12 + $0x3e8] sm:$0xff] %v17216_v55  ;;  %13808 = vmatmul.mubr.msk.f32.gmra.mrb[206].mxu0 %vm893_vm1, %v16493_v44  ;;  %13822 = vmatmul.mubr.msk.f32.gmra.mrb[214].mxu1 %vm893_vm1, %v16493_v44  ;;  %v17236_v48 = vmax.f32 %v11349_v41, %v4434_v37  ;;  %9714 = vst [vmem:[%s16118_s12 + $0x3a0] sm:$0xff] %v4434_v37  ;;  %v17261_v16 = vld [vmem:[#allocation5 + $0x8] sm:$0xff] }
 0x4e1   : > { %v10277_v21 = vrot.slane %v10276_v34, 1  ;;  %v10295_v2 = vmax.f32 %v10294_v8, %v4434_v37  ;;  %9722 = vst [vmem:[%s16118_s12 + $0x3e0] sm:$0xff] %v17231_v25  ;;  %v10308_v40 = vmax.f32 %v10307_v1, %v17231_v25  ;;  %13826 = vmatprep.mubr.msk.f32.mxu0 %vm893_vm1, %v16801_v14  ;;  %13840 = vmatprep.mubr.msk.f32.mxu1 %vm893_vm1, %v16801_v14 }
 0x4e2   : > { %v10290_v44 = vrot.slane %v10289_v24, 1  ;;  %v11414_v52 = vmax.f32 %v17222_v50, %v17216_v55  ;;  %v11351_v4 = vmax.f32 %v17236_v48, %v17231_v25  ;;  %v13445_v41 = vpop.f32.mrb[102].mxu0  ;;  %v17250_v3 = vpop.f32.mrb[110].mxu1 }
 0x4e3   : > { %v10278_v57 = vmax.f32 %v10276_v34, %v10277_v21  ;;  %v10296_v17 = vmax.f32 %v10295_v2, %v13442_v39  ;;  %v10309_v56 = vmax.f32 %v10308_v40, %v17216_v55  ;;  %v17256_v23 = vmax.f32 %v11538_v45, %v13445_v41  ;;  %9717 = vst [vmem:[%s16118_s12 + $0x3b8] sm:$0xff] %v13445_v41  ;;  %v4444_v30 = vpop.f32.mrb[103].mxu0  ;;  %v17267_v19 = vpop.f32.mrb[111].mxu1  ;;  %v17306_v39 = vld [vmem:[#allocation5 + $0x18] sm:$0xff] }
 0x4e4   : > { %v10291_v63 = vmax.f32 %v10289_v24, %v10290_v44  ;;  %9725 = vst [vmem:[%s16118_s12 + $0x3f8] sm:$0xff] %v17250_v3  ;;  %13827 = vmatmul.mubr.msk.f32.vlgmr.msra.gmra.mrb[208].mxu0 %vm893_vm1, %v17261_v16  ;;  %13841 = vmatmul.mubr.msk.f32.vlgmr.msra.gmra.mrb[216].mxu1 %vm893_vm1, %v17261_v16  ;;  %v17274_v10 = vmax.f32 %v11475_v31, %v4444_v30  ;;  %9716 = vst [vmem:[%s16118_s12 + $0x3b0] sm:$0xff] %v4444_v30  ;;  %v17326_v24 = vld [vmem:[#allocation5 + $0x20] sm:$0xff] }
 0x4e5   : > { %v11023_v43 = vsel %vm11012_vm5, %v10278_v57, %v17135_v27  ;;  %v10297_v15 = vmax.f32 %v10296_v17, %v4444_v30  ;;  %13853 = vmatpush3.msra.mxu0 %v15629_v58  ;;  %13867 = vmatpush3.msra.mxu1 %v15632_v18  ;;  %9724 = vst [vmem:[%s16118_s12 + $0x3f0] sm:$0xff] %v17267_v19 }
 0x4e6   : > { %v17282_v45 = vsel %vm11014_vm6, %v10291_v63, %v11023_v43  ;;  %v11540_v27 = vmax.f32 %v17256_v23, %v17250_v3  ;;  %v10310_v53 = vmax.f32 %v10309_v56, %v17267_v19  ;;  %13880 = vmatprep.subr.mxu0 %v15637_v51  ;;  %13894 = vmatprep.subr.mxu1 %v15640_v54  ;;  %v13464_v18 = vpop.f32.mrb[104].mxu0  ;;  %v17297_v31 = vpop.f32.mrb[112].mxu1  ;;  %v17363_v63 = vld [vmem:[#allocation5 + $0x30] sm:$0xff] }
 0x4e7   : > { %v10298_v35 = vmax.f32 %v10297_v15, %v13445_v41  ;;  %v11477_v58 = vmax.f32 %v17274_v10, %v17267_v19  ;;  %13829 = vmatprep.mubr.msk.f32.mxu0 %vm893_vm1, %v17291_v9  ;;  %13843 = vmatprep.mubr.msk.f32.mxu1 %vm893_vm1, %v17291_v9  ;;  %v17303_v49 = vmax.f32 %v11162_v12, %v13464_v18  ;;  %v4624_v34 = vpop.f32.mrb[105].mxu0  ;;  %v17314_v8 = vpop.f32.mrb[113].mxu1  ;;  %v17344_v41 = vld [vmem:[#allocation5 + $0x28] sm:$0xff] }
 0x4e8   : > { %v10311_v22 = vmax.f32 %v10310_v53, %v17250_v3  ;;  %9727 = vst [vmem:[%s16118_s12 + $0x408] sm:$0xff] %v13464_v18  ;;  %13830 = vmatmul.mubr.msk.f32.gmra.mrb[210].mxu0 %vm893_vm1, %v17306_v39  ;;  %13844 = vmatmul.mubr.msk.f32.gmra.mrb[218].mxu1 %vm893_vm1, %v17306_v39  ;;  %9735 = vst [vmem:[%s16118_s12 + $0x448] sm:$0xff] %v17297_v31  ;;  %v17319_v62 = vmax.f32 %v11099_v11, %v4624_v34 }
 0x4e9   : > { %v10299_v1 = vrot.slane %v10298_v35, 4  ;;  %9726 = vst [vmem:[%s16118_s12 + $0x400] sm:$0xff] %v4624_v34  ;;  %v10318_v29 = vmax.f32 %v4624_v34, %v13464_v18  ;;  %9734 = vst [vmem:[%s16118_s12 + $0x440] sm:$0xff] %v17314_v8  ;;  %v10331_v12 = vmax.f32 %v17314_v8, %v17297_v31  ;;  %13832 = vmatprep.mubr.msk.f32.mxu0 %vm893_vm1, %v17326_v24  ;;  %13846 = vmatprep.mubr.msk.f32.mxu1 %vm893_vm1, %v17326_v24 }
 0x4ea   : > { %v10312_v36 = vrot.slane %v10311_v22, 4  ;;  %v11164_v46 = vmax.f32 %v17303_v49, %v17297_v31  ;;  %v11101_v37 = vmax.f32 %v17319_v62, %v17314_v8  ;;  %v13467_v21 = vpop.f32.mrb[106].mxu0  ;;  %v17336_v2 = vpop.f32.mrb[114].mxu1 }
 0x4eb   : > { %v10300_v11 = vmax.f32 %v10298_v35, %v10299_v1  ;;  %v17341_v44 = vmax.f32 %v11288_v61, %v13467_v21  ;;  %9729 = vst [vmem:[%s16118_s12 + $0x418] sm:$0xff] %v13467_v21  ;;  %v4634_v57 = vpop.f32.mrb[107].mxu0  ;;  %9737 = vst [vmem:[%s16118_s12 + $0x458] sm:$0xff] %v17336_v2  ;;  %v17352_v17 = vpop.f32.mrb[115].mxu1  ;;  %v17382_v1 = vld [vmem:[#allocation5 + $0x38] sm:$0xff] }
 0x4ec   : > { %v10313_v40 = vmax.f32 %v10311_v22, %v10312_v36  ;;  %13833 = vmatmul.mubr.msk.f32.gmra.mrb[212].mxu0 %vm893_vm1, %v17344_v41  ;;  %13847 = vmatmul.mubr.msk.f32.gmra.mrb[220].mxu1 %vm893_vm1, %v17344_v41  ;;  %v17357_v0 = vmax.f32 %v11225_v47, %v4634_v57  ;;  %9728 = vst [vmem:[%s16118_s12 + $0x410] sm:$0xff] %v4634_v57  ;;  %9736 = vst [vmem:[%s16118_s12 + $0x450] sm:$0xff] %v17352_v17 }
 0x4ed   : > { %v10301_v56 = vrot.slane %v10300_v11, 2  ;;  %v10319_v6 = vmax.f32 %v10318_v29, %v4634_v57  ;;  %v10332_v61 = vmax.f32 %v10331_v12, %v17352_v17  ;;  %13835 = vmatprep.mubr.msk.f32.mxu0 %vm893_vm1, %v17363_v63  ;;  %13849 = vmatprep.mubr.msk.f32.mxu1 %vm893_vm1, %v17363_v63  ;;  %v11290_v26 = vmax.f32 %v17341_v44, %v17336_v2 }
 0x4ee   : > { %v10314_v30 = vrot.slane %v10313_v40, 2  ;;  %v11227_v47 = vmax.f32 %v17357_v0, %v17352_v17  ;;  %v13470_v43 = vpop.f32.mrb[108].mxu0  ;;  %v17373_v53 = vpop.f32.mrb[116].mxu1 }
 0x4ef   : > { %v10302_v42 = vmax.f32 %v10300_v11, %v10301_v56  ;;  %v10320_v15 = vmax.f32 %v10319_v6, %v13467_v21  ;;  %v10333_v35 = vmax.f32 %v10332_v61, %v17336_v2  ;;  %v17379_v22 = vmax.f32 %v11414_v52, %v13470_v43  ;;  %9731 = vst [vmem:[%s16118_s12 + $0x428] sm:$0xff] %v13470_v43  ;;  %v4644_v34 = vpop.f32.mrb[109].mxu0  ;;  %v17390_v29 = vpop.f32.mrb[117].mxu1 }
 0x4f0   : > { %v10315_v18 = vmax.f32 %v10313_v40, %v10314_v30  ;;  %13836 = vmatmul.mubr.msk.f32.gmra.mrb[214].mxu0 %vm893_vm1, %v17382_v1  ;;  %13850 = vmatmul.mubr.msk.f32.gmra.mrb[222].mxu1 %vm893_vm1, %v17382_v1  ;;  %9739 = vst [vmem:[%s16118_s12 + $0x468] sm:$0xff] %v17373_v53  ;;  %v17395_v55 = vmax.f32 %v11351_v4, %v4644_v34  ;;  %9730 = vst [vmem:[%s16118_s12 + $0x420] sm:$0xff] %v4644_v34 }
 0x4f1   : > { %v10303_v12 = vrot.slane %v10302_v42, 1  ;;  %v10321_v50 = vmax.f32 %v10320_v15, %v4644_v34  ;;  %9738 = vst [vmem:[%s16118_s12 + $0x460] sm:$0xff] %v17390_v29  ;;  %v10334_v52 = vmax.f32 %v10333_v35, %v17390_v29  ;;  %13854 = vmatprep.mubr.msk.f32.mxu0 %vm893_vm1, %v16801_v14  ;;  %13868 = vmatprep.mubr.msk.f32.mxu1 %vm893_vm1, %v16801_v14 }
 0x4f2   : > { %v10316_v36 = vrot.slane %v10315_v18, 1  ;;  %v11416_v25 = vmax.f32 %v17379_v22, %v17373_v53  ;;  %v11353_v4 = vmax.f32 %v17395_v55, %v17390_v29  ;;  %v13473_v11 = vpop.f32.mrb[110].mxu0  ;;  %v17409_v40 = vpop.f32.mrb[118].mxu1 }
 0x4f3   : > { %v10304_v48 = vmax.f32 %v10302_v42, %v10303_v12  ;;  %v10322_v21 = vmax.f32 %v10321_v50, %v13470_v43  ;;  %v10335_v57 = vmax.f32 %v10334_v52, %v17373_v53  ;;  %v17415_v6 = vmax.f32 %v11540_v27, %v13473_v11  ;;  %9733 = vst [vmem:[%s16118_s12 + $0x438] sm:$0xff] %v13473_v11  ;;  %v4654_v61 = vpop.f32.mrb[111].mxu0  ;;  %v17424_v30 = vpop.f32.mrb[119].mxu1 }
 0x4f4   : > { %v10317_v56 = vmax.f32 %v10315_v18, %v10316_v36  ;;  %13855 = vmatmul.mubr.msk.f32.vlgmr.msra.gmra.mrb[216].mxu0 %vm893_vm1, %v17261_v16  ;;  %13869 = vmatmul.mubr.msk.f32.vlgmr.msra.gmra.mrb[224].mxu1 %vm893_vm1, %v17261_v16  ;;  %9741 = vst [vmem:[%s16118_s12 + $0x478] sm:$0xff] %v17409_v40  ;;  %v17431_v3 = vmax.f32 %v11477_v58, %v4654_v61  ;;  %9732 = vst [vmem:[%s16118_s12 + $0x430] sm:$0xff] %v4654_v61 }
 0x4f5   : > { %v11025_v42 = vsel %vm11016_vm7, %v10304_v48, %v17282_v45  ;;  %v10323_v23 = vmax.f32 %v10322_v21, %v4654_v61  ;;  %13881 = vmatpush3.msra.mxu0 %v15637_v51  ;;  %13895 = vmatpush3.msra.mxu1 %v15640_v54  ;;  %9740 = vst [vmem:[%s16118_s12 + $0x470] sm:$0xff] %v17424_v30  ;;  %v20406_v45 = vld [vmem:[#allocation21_spill] sm:$0xff] }
 0x4f6   : > { %v11026_v27 = vsel %vm11018_vm8, %v10317_v56, %v11025_v42  ;;  %v11542_v43 = vmax.f32 %v17415_v6, %v17409_v40  ;;  %13908 = vmatprep.subr.mxu0 %v15643_v13  ;;  %13922 = vmatprep.subr.mxu1 %v20406_v45  ;;  %v10336_v19 = vmax.f32 %v10335_v57, %v17424_v30  ;;  %v13492_v51 = vpop.f32.mrb[112].mxu0  ;;  %v17451_v58 = vpop.f32.mrb[120].mxu1 }
 0x4f7   : > { %11078 = vst [vmem:[%s16819_s24 + $0x8] sm:$0xff] %v11026_v27  ;;  %v10324_v10 = vmax.f32 %v10323_v23, %v13473_v11  ;;  %v11479_v54 = vmax.f32 %v17431_v3, %v17424_v30  ;;  %13857 = vmatprep.mubr.msk.f32.mxu0 %vm893_vm1, %v17291_v9  ;;  %13871 = vmatprep.mubr.msk.f32.mxu1 %vm893_vm1, %v17291_v9  ;;  %9743 = vst [vmem:[%s16118_s12 + $0x488] sm:$0xff] %v13492_v51  ;;  %v4834_v18 = vpop.f32.mrb[113].mxu0  ;;  %v17466_v34 = vpop.f32.mrb[121].mxu1  ;;  %v20407_v3 = vld [vmem:[#allocation22_spill] sm:$0xff] }
 0x4f8   : > { %v10337_v15 = vmax.f32 %v10336_v19, %v17409_v40  ;;  %v17457_v35 = vmax.f32 %v11164_v46, %v13492_v51  ;;  %13858 = vmatmul.mubr.msk.f32.gmra.mrb[218].mxu0 %vm893_vm1, %v17306_v39  ;;  %13872 = vmatmul.mubr.msk.f32.gmra.mrb[226].mxu1 %vm893_vm1, %v17306_v39  ;;  %9751 = vst [vmem:[%s16118_s12 + $0x4c8] sm:$0xff] %v17451_v58  ;;  %9742 = vst [vmem:[%s16118_s12 + $0x480] sm:$0xff] %v4834_v18 }
 0x4f9   : > { %v10325_v12 = vrot.slane %v10324_v10, 4  ;;  %v17471_v31 = vmax.f32 %v11101_v37, %v4834_v18  ;;  %v10344_v49 = vmax.f32 %v4834_v18, %v13492_v51  ;;  %9750 = vst [vmem:[%s16118_s12 + $0x4c0] sm:$0xff] %v17466_v34  ;;  %v10357_v46 = vmax.f32 %v17466_v34, %v17451_v58  ;;  %13860 = vmatprep.mubr.msk.f32.mxu0 %vm893_vm1, %v17326_v24 }
 0x4fa   : > { %13874 = vmatprep.mubr.msk.f32.mxu1 %vm893_vm1, %v17326_v24  ;;  %v10338_v50 = vrot.slane %v10337_v15, 4  ;;  %v11166_v8 = vmax.f32 %v17457_v35, %v17451_v58  ;;  %v13495_v52 = vpop.f32.mrb[114].mxu0  ;;  %v17486_v36 = vpop.f32.mrb[122].mxu1 }
 0x4fb   : > { %v10326_v62 = vmax.f32 %v10324_v10, %v10325_v12  ;;  %v11103_v37 = vmax.f32 %v17471_v31, %v17466_v34  ;;  %v17491_v11 = vmax.f32 %v11290_v26, %v13495_v52  ;;  %9745 = vst [vmem:[%s16118_s12 + $0x498] sm:$0xff] %v13495_v52  ;;  %v4844_v21 = vpop.f32.mrb[115].mxu0  ;;  %9753 = vst [vmem:[%s16118_s12 + $0x4d8] sm:$0xff] %v17486_v36  ;;  %v17500_v57 = vpop.f32.mrb[123].mxu1 }
 0x4fc   : > { %v10339_v48 = vmax.f32 %v10337_v15, %v10338_v50  ;;  %13861 = vmatmul.mubr.msk.f32.gmra.mrb[220].mxu0 %vm893_vm1, %v17344_v41  ;;  %13875 = vmatmul.mubr.msk.f32.gmra.mrb[228].mxu1 %vm893_vm1, %v17344_v41  ;;  %v17505_v61 = vmax.f32 %v11227_v47, %v4844_v21  ;;  %9744 = vst [vmem:[%s16118_s12 + $0x490] sm:$0xff] %v4844_v21  ;;  %9752 = vst [vmem:[%s16118_s12 + $0x4d0] sm:$0xff] %v17500_v57 }
 0x4fd   : > { %v10327_v56 = vrot.slane %v10326_v62, 2  ;;  %v10345_v2 = vmax.f32 %v10344_v49, %v4844_v21  ;;  %v10358_v44 = vmax.f32 %v10357_v46, %v17500_v57  ;;  %13863 = vmatprep.mubr.msk.f32.mxu0 %vm893_vm1, %v17363_v63  ;;  %13877 = vmatprep.mubr.msk.f32.mxu1 %vm893_vm1, %v17363_v63  ;;  %v11292_v17 = vmax.f32 %v17491_v11, %v17486_v36 }
 0x4fe   : > { %v10340_v26 = vrot.slane %v10339_v48, 2  ;;  %v11229_v47 = vmax.f32 %v17505_v61, %v17500_v57  ;;  %v13498_v42 = vpop.f32.mrb[116].mxu0  ;;  %v17519_v27 = vpop.f32.mrb[124].mxu1 }
 0x4ff   : > { %v10328_v0 = vmax.f32 %v10326_v62, %v10327_v56  ;;  %v10346_v23 = vmax.f32 %v10345_v2, %v13495_v52  ;;  %v10359_v19 = vmax.f32 %v10358_v44, %v17486_v36  ;;  %v17525_v51 = vmax.f32 %v11416_v25, %v13498_v42  ;;  %9747 = vst [vmem:[%s16118_s12 + $0x4a8] sm:$0xff] %v13498_v42  ;;  %v4854_v15 = vpop.f32.mrb[117].mxu0  ;;  %v17534_v18 = vpop.f32.mrb[125].mxu1 }
 0x500   : > { %v10341_v10 = vmax.f32 %v10339_v48, %v10340_v26  ;;  %9755 = vst [vmem:[%s16118_s12 + $0x4e8] sm:$0xff] %v17519_v27  ;;  %13864 = vmatmul.mubr.msk.f32.gmra.mrb[222].mxu0 %vm893_vm1, %v17382_v1  ;;  %13878 = vmatmul.mubr.msk.f32.gmra.mrb[230].mxu1 %vm893_vm1, %v17382_v1  ;;  %v17539_v49 = vmax.f32 %v11353_v4, %v4854_v15  ;;  %9746 = vst [vmem:[%s16118_s12 + $0x4a0] sm:$0xff] %v4854_v15 }
 0x501   : > { %v10329_v12 = vrot.slane %v10328_v0, 1  ;;  %v10347_v53 = vmax.f32 %v10346_v23, %v4854_v15  ;;  %9754 = vst [vmem:[%s16118_s12 + $0x4e0] sm:$0xff] %v17534_v18  ;;  %v10360_v22 = vmax.f32 %v10359_v19, %v17534_v18  ;;  %13882 = vmatprep.mubr.msk.f32.mxu0 %vm893_vm1, %v16801_v14  ;;  %13896 = vmatprep.mubr.msk.f32.mxu1 %vm893_vm1, %v16801_v14 }
 0x502   : > { %v10342_v25 = vrot.slane %v10341_v10, 1  ;;  %v11418_v29 = vmax.f32 %v17525_v51, %v17519_v27  ;;  %v11355_v4 = vmax.f32 %v17539_v49, %v17534_v18  ;;  %v13501_v46 = vpop.f32.mrb[118].mxu0  ;;  %v17553_v62 = vpop.f32.mrb[126].mxu1 }
 0x503   : > { %v10330_v55 = vmax.f32 %v10328_v0, %v10329_v12  ;;  %v10348_v50 = vmax.f32 %v10347_v53, %v13498_v42  ;;  %v10361_v52 = vmax.f32 %v10360_v22, %v17519_v27  ;;  %v17559_v14 = vmax.f32 %v11542_v43, %v13501_v46  ;;  %9749 = vst [vmem:[%s16118_s12 + $0x4b8] sm:$0xff] %v13501_v46  ;;  %v4864_v21 = vpop.f32.mrb[119].mxu0  ;;  %v17568_v56 = vpop.f32.mrb[127].mxu1 }
 0x504   : > { %v10343_v48 = vmax.f32 %v10341_v10, %v10342_v25  ;;  %9757 = vst [vmem:[%s16118_s12 + $0x4f8] sm:$0xff] %v17553_v62  ;;  %13883 = vmatmul.mubr.msk.f32.vlgmr.msra.gmra.mrb[224].mxu0 %vm893_vm1, %v17261_v16  ;;  %13897 = vmatmul.mubr.msk.f32.vlgmr.msra.gmra.mrb[232].mxu1 %vm893_vm1, %v17261_v16  ;;  %v17573_v2 = vmax.f32 %v11479_v54, %v4864_v21  ;;  %9748 = vst [vmem:[%s16118_s12 + $0x4b0] sm:$0xff] %v4864_v21  ;;  %v20408_v54 = vld [vmem:[#allocation23_spill] sm:$0xff] }
 0x505   : > { %v10349_v40 = vmax.f32 %v10348_v50, %v4864_v21  ;;  %13909 = vmatpush3.msra.mxu0 %v15643_v13  ;;  %13923 = vmatpush3.msra.mxu1 %v20406_v45  ;;  %9756 = vst [vmem:[%s16118_s12 + $0x4f0] sm:$0xff] %v17568_v56  ;;  %v10362_v6 = vmax.f32 %v10361_v52, %v17568_v56 }
 0x506   : > { %v17582_v43 = vsel %vm11006_vm2, %v10343_v48, %v10330_v55  ;;  %v11544_v30 = vmax.f32 %v17559_v14, %v17553_v62  ;;  %13936 = vmatprep.subr.mxu0 %v20407_v3  ;;  %13950 = vmatprep.subr.mxu1 %v20408_v54  ;;  %v11481_v13 = vmax.f32 %v17573_v2, %v17568_v56  ;;  %v13520_v26 = vpop.f32.mrb[120].mxu0  ;;  %v17595_v0 = vpop.f32.mrb[128].mxu1  ;;  %v20409_v2 = vld [vmem:[#allocation24_spill] sm:$0xff] }
 0x507   : > { %v10350_v44 = vmax.f32 %v10349_v40, %v13501_v46  ;;  %v10363_v45 = vmax.f32 %v10362_v6, %v17553_v62  ;;  %13885 = vmatprep.mubr.msk.f32.mxu0 %vm893_vm1, %v17291_v9  ;;  %13899 = vmatprep.mubr.msk.f32.mxu1 %vm893_vm1, %v17291_v9  ;;  %v17600_v42 = vmax.f32 %v11166_v8, %v13520_v26  ;;  %v5044_v23 = vpop.f32.mrb[121].mxu0  ;;  %v17609_v19 = vpop.f32.mrb[129].mxu1 }
 0x508   : > { %9759 = vst [vmem:[%s16118_s12 + $0x508] sm:$0xff] %v13520_v26  ;;  %13886 = vmatmul.mubr.msk.f32.gmra.mrb[226].mxu0 %vm893_vm1, %v17306_v39  ;;  %13900 = vmatmul.mubr.msk.f32.gmra.mrb[234].mxu1 %vm893_vm1, %v17306_v39  ;;  %9767 = vst [vmem:[%s16118_s12 + $0x548] sm:$0xff] %v17595_v0  ;;  %v17614_v58 = vmax.f32 %v11103_v37, %v5044_v23  ;;  %v10370_v35 = vmax.f32 %v5044_v23, %v13520_v26 }
 0x509   : > { %v10351_v10 = vrot.slane %v10350_v44, 4  ;;  %v10364_v15 = vrot.slane %v10363_v45, 4  ;;  %9758 = vst [vmem:[%s16118_s12 + $0x500] sm:$0xff] %v5044_v23  ;;  %9766 = vst [vmem:[%s16118_s12 + $0x540] sm:$0xff] %v17609_v19  ;;  %13888 = vmatprep.mubr.msk.f32.mxu0 %vm893_vm1, %v17326_v24  ;;  %13902 = vmatprep.mubr.msk.f32.mxu1 %vm893_vm1, %v17326_v24  ;;  %v11168_v8 = vmax.f32 %v17600_v42, %v17595_v0 }
 0x50a   : > { %v10383_v12 = vmax.f32 %v17609_v19, %v17595_v0  ;;  %v11105_v37 = vmax.f32 %v17614_v58, %v17609_v19  ;;  %v13523_v53 = vpop.f32.mrb[122].mxu0  ;;  %v17629_v22 = vpop.f32.mrb[130].mxu1 }
 0x50b   : > { %v10352_v34 = vmax.f32 %v10350_v44, %v10351_v10  ;;  %v10365_v31 = vmax.f32 %v10363_v45, %v10364_v15  ;;  %v17634_v25 = vmax.f32 %v11292_v17, %v13523_v53  ;;  %9761 = vst [vmem:[%s16118_s12 + $0x518] sm:$0xff] %v13523_v53  ;;  %v5054_v55 = vpop.f32.mrb[123].mxu0  ;;  %9769 = vst [vmem:[%s16118_s12 + $0x558] sm:$0xff] %v17629_v22  ;;  %v17643_v46 = vpop.f32.mrb[131].mxu1 }
 0x50c   : > { %13889 = vmatmul.mubr.msk.f32.gmra.mrb[228].mxu0 %vm893_vm1, %v17344_v41  ;;  %13903 = vmatmul.mubr.msk.f32.gmra.mrb[236].mxu1 %vm893_vm1, %v17344_v41  ;;  %v17648_v36 = vmax.f32 %v11229_v47, %v5054_v55  ;;  %9760 = vst [vmem:[%s16118_s12 + $0x510] sm:$0xff] %v5054_v55  ;;  %v10371_v11 = vmax.f32 %v10370_v35, %v5054_v55  ;;  %9768 = vst [vmem:[%s16118_s12 + $0x550] sm:$0xff] %v17643_v46 }
 0x50d   : > { %v10353_v50 = vrot.slane %v10352_v34, 2  ;;  %v10366_v52 = vrot.slane %v10365_v31, 2  ;;  %13891 = vmatprep.mubr.msk.f32.mxu0 %vm893_vm1, %v17363_v63  ;;  %13905 = vmatprep.mubr.msk.f32.mxu1 %vm893_vm1, %v17363_v63  ;;  %v11294_v17 = vmax.f32 %v17634_v25, %v17629_v22  ;;  %v10384_v48 = vmax.f32 %v10383_v12, %v17643_v46 }
 0x50e   : > { %v11231_v47 = vmax.f32 %v17648_v36, %v17643_v46  ;;  %v13526_v21 = vpop.f32.mrb[124].mxu0  ;;  %v10372_v40 = vmax.f32 %v10371_v11, %v13523_v53  ;;  %v17662_v6 = vpop.f32.mrb[132].mxu1 }
 0x50f   : > { %v10354_v57 = vmax.f32 %v10352_v34, %v10353_v50  ;;  %v10367_v61 = vmax.f32 %v10365_v31, %v10366_v52  ;;  %v17667_v44 = vmax.f32 %v11418_v29, %v13526_v21  ;;  %9763 = vst [vmem:[%s16118_s12 + $0x528] sm:$0xff] %v13526_v21  ;;  %v5064_v45 = vpop.f32.mrb[125].mxu0  ;;  %9771 = vst [vmem:[%s16118_s12 + $0x568] sm:$0xff] %v17662_v6  ;;  %v17676_v26 = vpop.f32.mrb[133].mxu1  ;;  %v17687_v29 = vld [vmem:[#allocation5] sm:$0xff] }
 0x510   : > { %13892 = vmatmul.mubr.msk.f32.gmra.mrb[230].mxu0 %vm893_vm1, %v17382_v1  ;;  %13906 = vmatmul.mubr.msk.f32.gmra.mrb[238].mxu1 %vm893_vm1, %v17382_v1  ;;  %v10385_v23 = vmax.f32 %v10384_v48, %v17629_v22  ;;  %v17682_v27 = vmax.f32 %v11355_v4, %v5064_v45  ;;  %9762 = vst [vmem:[%s16118_s12 + $0x520] sm:$0xff] %v5064_v45  ;;  %9770 = vst [vmem:[%s16118_s12 + $0x560] sm:$0xff] %v17676_v26 }
 0x511   : > { %v10355_v10 = vrot.slane %v10354_v57, 1  ;;  %v10368_v15 = vrot.slane %v10367_v61, 1  ;;  %v10373_v51 = vmax.f32 %v10372_v40, %v5064_v45  ;;  %13910 = vmatprep.mubr.msk.f32.mxu0 %vm893_vm1, %v17687_v29  ;;  %13924 = vmatprep.mubr.msk.f32.mxu1 %vm893_vm1, %v17687_v29  ;;  %v11420_v35 = vmax.f32 %v17667_v44, %v17662_v6 }
 0x512   : > { %v10386_v18 = vmax.f32 %v10385_v23, %v17676_v26  ;;  %v11357_v12 = vmax.f32 %v17682_v27, %v17676_v26  ;;  %v13529_v34 = vpop.f32.mrb[126].mxu0  ;;  %v17698_v53 = vpop.f32.mrb[134].mxu1 }
 0x513   : > { %v10356_v49 = vmax.f32 %v10354_v57, %v10355_v10  ;;  %v10369_v4 = vmax.f32 %v10367_v61, %v10368_v15  ;;  %v10374_v31 = vmax.f32 %v10373_v51, %v13526_v21  ;;  %v17703_v55 = vmax.f32 %v11544_v30, %v13529_v34  ;;  %9765 = vst [vmem:[%s16118_s12 + $0x538] sm:$0xff] %v13529_v34  ;;  %v5074_v50 = vpop.f32.mrb[127].mxu0  ;;  %v17712_v52 = vpop.f32.mrb[135].mxu1 }
 0x514   : > { %9773 = vst [vmem:[%s16118_s12 + $0x578] sm:$0xff] %v17698_v53  ;;  %13911 = vmatmul.mubr.msk.f32.vlgmr.msra.gmra.mrb[232].mxu0 %vm893_vm1, %v17261_v16  ;;  %13925 = vmatmul.mubr.msk.f32.vlgmr.msra.gmra.mrb[240].mxu1 %vm893_vm1, %v17261_v16  ;;  %v10387_v11 = vmax.f32 %v10386_v18, %v17662_v6  ;;  %v17720_v62 = vmax.f32 %v11481_v13, %v5074_v50  ;;  %9764 = vst [vmem:[%s16118_s12 + $0x530] sm:$0xff] %v5074_v50 }
 0x515   : > { %v11028_v48 = vsel %vm11008_vm3, %v10356_v49, %v17582_v43  ;;  %v10375_v14 = vmax.f32 %v10374_v31, %v5074_v50  ;;  %13937 = vmatpush3.msra.mxu0 %v20407_v3  ;;  %13951 = vmatpush3.msra.mxu1 %v20408_v54  ;;  %9772 = vst [vmem:[%s16118_s12 + $0x570] sm:$0xff] %v17712_v52 }
 0x516   : > { %v17728_v30 = vsel %vm11010_vm4, %v10369_v4, %v11028_v48  ;;  %v11546_v43 = vmax.f32 %v17703_v55, %v17698_v53  ;;  %v10388_v56 = vmax.f32 %v10387_v11, %v17712_v52  ;;  %13964 = vmatprep.subr.mxu0 %v20409_v2  ;;  %13978 = vmatprep.subr.mxu1 %v15666_v33  ;;  %v13548_v54 = vpop.f32.mrb[128].mxu0  ;;  %v17741_v57 = vpop.f32.mrb[136].mxu1 }
 0x517   : > { %v10376_v13 = vmax.f32 %v10375_v14, %v13529_v34  ;;  %v11483_v3 = vmax.f32 %v17720_v62, %v17712_v52  ;;  %13913 = vmatprep.mubr.msk.f32.mxu0 %vm893_vm1, %v17291_v9  ;;  %13927 = vmatprep.mubr.msk.f32.mxu1 %vm893_vm1, %v17291_v9  ;;  %v17747_v21 = vmax.f32 %v11168_v8, %v13548_v54  ;;  %v5254_v40 = vpop.f32.mrb[129].mxu0  ;;  %v17756_v45 = vpop.f32.mrb[137].mxu1 }
 0x518   : > { %v10389_v61 = vmax.f32 %v10388_v56, %v17698_v53  ;;  %9775 = vst [vmem:[%s16118_s12 + $0x588] sm:$0xff] %v13548_v54  ;;  %13914 = vmatmul.mubr.msk.f32.gmra.mrb[234].mxu0 %vm893_vm1, %v17306_v39  ;;  %13928 = vmatmul.mubr.msk.f32.gmra.mrb[242].mxu1 %vm893_vm1, %v17306_v39  ;;  %9783 = vst [vmem:[%s16118_s12 + $0x5c8] sm:$0xff] %v17741_v57  ;;  %v17761_v0 = vmax.f32 %v11105_v37, %v5254_v40 }
 0x519   : > { %v10377_v23 = vrot.slane %v10376_v13, 4  ;;  %9774 = vst [vmem:[%s16118_s12 + $0x580] sm:$0xff] %v5254_v40  ;;  %v10396_v42 = vmax.f32 %v5254_v40, %v13548_v54  ;;  %9782 = vst [vmem:[%s16118_s12 + $0x5c0] sm:$0xff] %v17756_v45  ;;  %v10409_v8 = vmax.f32 %v17756_v45, %v17741_v57  ;;  %13916 = vmatprep.mubr.msk.f32.mxu0 %vm893_vm1, %v17326_v24  ;;  %13930 = vmatprep.mubr.msk.f32.mxu1 %vm893_vm1, %v17326_v24 }
 0x51a   : > { %v10390_v10 = vrot.slane %v10389_v61, 4  ;;  %v11170_v19 = vmax.f32 %v17747_v21, %v17741_v57  ;;  %v11107_v37 = vmax.f32 %v17761_v0, %v17756_v45  ;;  %v13551_v15 = vpop.f32.mrb[130].mxu0  ;;  %v17776_v51 = vpop.f32.mrb[138].mxu1 }
 0x51b   : > { %v10378_v58 = vmax.f32 %v10376_v13, %v10377_v23  ;;  %v17781_v49 = vmax.f32 %v11294_v17, %v13551_v15  ;;  %9777 = vst [vmem:[%s16118_s12 + $0x598] sm:$0xff] %v13551_v15  ;;  %v5264_v4 = vpop.f32.mrb[131].mxu0  ;;  %9785 = vst [vmem:[%s16118_s12 + $0x5d8] sm:$0xff] %v17776_v51  ;;  %v17790_v34 = vpop.f32.mrb[139].mxu1 }
 0x51c   : > { %v10391_v18 = vmax.f32 %v10389_v61, %v10390_v10  ;;  %13917 = vmatmul.mubr.msk.f32.gmra.mrb[236].mxu0 %vm893_vm1, %v17344_v41  ;;  %13931 = vmatmul.mubr.msk.f32.gmra.mrb[244].mxu1 %vm893_vm1, %v17344_v41  ;;  %v17795_v50 = vmax.f32 %v11231_v47, %v5264_v4  ;;  %9776 = vst [vmem:[%s16118_s12 + $0x590] sm:$0xff] %v5264_v4  ;;  %9784 = vst [vmem:[%s16118_s12 + $0x5d0] sm:$0xff] %v17790_v34 }
 0x51d   : > { %v10379_v31 = vrot.slane %v10378_v58, 2  ;;  %v10397_v22 = vmax.f32 %v10396_v42, %v5264_v4  ;;  %v10410_v25 = vmax.f32 %v10409_v8, %v17790_v34  ;;  %13919 = vmatprep.mubr.msk.f32.mxu0 %vm893_vm1, %v17363_v63  ;;  %13933 = vmatprep.mubr.msk.f32.mxu1 %vm893_vm1, %v17363_v63  ;;  %v11296_v46 = vmax.f32 %v17781_v49, %v17776_v51 }
 0x51e   : > { %v10392_v17 = vrot.slane %v10391_v18, 2  ;;  %v11233_v47 = vmax.f32 %v17795_v50, %v17790_v34  ;;  %v13554_v11 = vpop.f32.mrb[132].mxu0  ;;  %v17809_v14 = vpop.f32.mrb[140].mxu1 }
 0x51f   : > { %v10380_v36 = vmax.f32 %v10378_v58, %v10379_v31  ;;  %v10398_v48 = vmax.f32 %v10397_v22, %v13551_v15  ;;  %v10411_v56 = vmax.f32 %v10410_v25, %v17776_v51  ;;  %v17815_v54 = vmax.f32 %v11420_v35, %v13554_v11  ;;  %9779 = vst [vmem:[%s16118_s12 + $0x5a8] sm:$0xff] %v13554_v11  ;;  %v5274_v61 = vpop.f32.mrb[133].mxu0  ;;  %v17824_v40 = vpop.f32.mrb[141].mxu1 }
 0x520   : > { %v10393_v13 = vmax.f32 %v10391_v18, %v10392_v17  ;;  %9787 = vst [vmem:[%s16118_s12 + $0x5e8] sm:$0xff] %v17809_v14  ;;  %13920 = vmatmul.mubr.msk.f32.gmra.mrb[238].mxu0 %vm893_vm1, %v17382_v1  ;;  %13934 = vmatmul.mubr.msk.f32.gmra.mrb[246].mxu1 %vm893_vm1, %v17382_v1  ;;  %v17829_v42 = vmax.f32 %v11357_v12, %v5274_v61  ;;  %9778 = vst [vmem:[%s16118_s12 + $0x5a0] sm:$0xff] %v5274_v61 }
 0x521   : > { %v10381_v23 = vrot.slane %v10380_v36, 1  ;;  %v10399_v6 = vmax.f32 %v10398_v48, %v5274_v61  ;;  %9786 = vst [vmem:[%s16118_s12 + $0x5e0] sm:$0xff] %v17824_v40  ;;  %v10412_v44 = vmax.f32 %v10411_v56, %v17824_v40  ;;  %13938 = vmatprep.mubr.msk.f32.mxu0 %vm893_vm1, %v17687_v29  ;;  %13952 = vmatprep.mubr.msk.f32.mxu1 %vm893_vm1, %v17687_v29 }
 0x522   : > { %v10394_v35 = vrot.slane %v10393_v13, 1  ;;  %v11422_v26 = vmax.f32 %v17815_v54, %v17809_v14  ;;  %v11359_v12 = vmax.f32 %v17829_v42, %v17824_v40  ;;  %v13557_v8 = vpop.f32.mrb[134].mxu0  ;;  %v17843_v58 = vpop.f32.mrb[142].mxu1 }
 0x523   : > { %v10382_v27 = vmax.f32 %v10380_v36, %v10381_v23  ;;  %v10400_v10 = vmax.f32 %v10399_v6, %v13554_v11  ;;  %v10413_v15 = vmax.f32 %v10412_v44, %v17809_v14  ;;  %v17849_v4 = vmax.f32 %v11546_v43, %v13557_v8  ;;  %9781 = vst [vmem:[%s16118_s12 + $0x5b8] sm:$0xff] %v13557_v8  ;;  %v5284_v31 = vpop.f32.mrb[135].mxu0  ;;  %v17858_v22 = vpop.f32.mrb[143].mxu1 }
 0x524   : > { %v10395_v18 = vmax.f32 %v10393_v13, %v10394_v35  ;;  %9789 = vst [vmem:[%s16118_s12 + $0x5f8] sm:$0xff] %v17843_v58  ;;  %13939 = vmatmul.mubr.msk.f32.vlgmr.msra.gmra.mrb[240].mxu0 %vm893_vm1, %v17261_v16  ;;  %13953 = vmatmul.mubr.msk.f32.vlgmr.msra.gmra.mrb[248].mxu1 %vm893_vm1, %v17261_v16  ;;  %v17865_v53 = vmax.f32 %v11483_v3, %v5284_v31  ;;  %9780 = vst [vmem:[%s16118_s12 + $0x5b0] sm:$0xff] %v5284_v31 }
 0x525   : > { %v11030_v25 = vsel %vm11012_vm5, %v10382_v27, %v17728_v30  ;;  %v10401_v55 = vmax.f32 %v10400_v10, %v5284_v31  ;;  %13965 = vmatpush3.msra.mxu0 %v20409_v2  ;;  %13979 = vmatpush3.msra.mxu1 %v15666_v33  ;;  %9788 = vst [vmem:[%s16118_s12 + $0x5f0] sm:$0xff] %v17858_v22 }
 0x526   : > { %v17873_v43 = vsel %vm11014_vm6, %v10395_v18, %v11030_v25  ;;  %v11548_v30 = vmax.f32 %v17849_v4, %v17843_v58  ;;  %v10414_v52 = vmax.f32 %v10413_v15, %v17858_v22  ;;  %13992 = vmatprep.subr.mxu0 %v15669_v38  ;;  %14006 = vmatprep.subr.mxu1 %v15672_v5  ;;  %v13576_v2 = vpop.f32.mrb[136].mxu0  ;;  %v17886_v3 = vpop.f32.mrb[144].mxu1 }
 0x527   : > { %v10402_v62 = vmax.f32 %v10401_v55, %v13557_v8  ;;  %v11485_v33 = vmax.f32 %v17865_v53, %v17858_v22  ;;  %13941 = vmatprep.mubr.msk.f32.mxu0 %vm893_vm1, %v17291_v9  ;;  %13955 = vmatprep.mubr.msk.f32.mxu1 %vm893_vm1, %v17291_v9  ;;  %v17892_v36 = vmax.f32 %v11170_v19, %v13576_v2  ;;  %v5464_v11 = vpop.f32.mrb[137].mxu0  ;;  %v17901_v48 = vpop.f32.mrb[145].mxu1 }
 0x528   : > { %v10415_v17 = vmax.f32 %v10414_v52, %v17843_v58  ;;  %9791 = vst [vmem:[%s16118_s12 + $0x608] sm:$0xff] %v13576_v2  ;;  %13942 = vmatmul.mubr.msk.f32.gmra.mrb[242].mxu0 %vm893_vm1, %v17306_v39  ;;  %13956 = vmatmul.mubr.msk.f32.gmra.mrb[250].mxu1 %vm893_vm1, %v17306_v39  ;;  %9799 = vst [vmem:[%s16118_s12 + $0x648] sm:$0xff] %v17886_v3  ;;  %v17906_v57 = vmax.f32 %v11107_v37, %v5464_v11 }
 0x529   : > { %v10403_v56 = vrot.slane %v10402_v62, 4  ;;  %9790 = vst [vmem:[%s16118_s12 + $0x600] sm:$0xff] %v5464_v11  ;;  %v10422_v21 = vmax.f32 %v5464_v11, %v13576_v2  ;;  %9798 = vst [vmem:[%s16118_s12 + $0x640] sm:$0xff] %v17901_v48  ;;  %v10435_v19 = vmax.f32 %v17901_v48, %v17886_v3  ;;  %13944 = vmatprep.mubr.msk.f32.mxu0 %vm893_vm1, %v17326_v24  ;;  %13958 = vmatprep.mubr.msk.f32.mxu1 %vm893_vm1, %v17326_v24 }
 0x52a   : > { %v10416_v13 = vrot.slane %v10415_v17, 4  ;;  %v11172_v45 = vmax.f32 %v17892_v36, %v17886_v3  ;;  %v11109_v37 = vmax.f32 %v17906_v57, %v17901_v48  ;;  %v13579_v61 = vpop.f32.mrb[138].mxu0  ;;  %v17921_v23 = vpop.f32.mrb[146].mxu1 }
 0x52b   : > { %v10404_v0 = vmax.f32 %v10402_v62, %v10403_v56  ;;  %v17926_v44 = vmax.f32 %v11296_v46, %v13579_v61  ;;  %9793 = vst [vmem:[%s16118_s12 + $0x618] sm:$0xff] %v13579_v61  ;;  %v5474_v35 = vpop.f32.mrb[139].mxu0  ;;  %9801 = vst [vmem:[%s16118_s12 + $0x658] sm:$0xff] %v17921_v23  ;;  %v17935_v27 = vpop.f32.mrb[147].mxu1 }
 0x52c   : > { %v10417_v6 = vmax.f32 %v10415_v17, %v10416_v13  ;;  %13945 = vmatmul.mubr.msk.f32.gmra.mrb[244].mxu0 %vm893_vm1, %v17344_v41  ;;  %13959 = vmatmul.mubr.msk.f32.gmra.mrb[252].mxu1 %vm893_vm1, %v17344_v41  ;;  %v17940_v10 = vmax.f32 %v11233_v47, %v5474_v35  ;;  %9792 = vst [vmem:[%s16118_s12 + $0x610] sm:$0xff] %v5474_v35  ;;  %9800 = vst [vmem:[%s16118_s12 + $0x650] sm:$0xff] %v17935_v27 }
 0x52d   : > { %v10405_v8 = vrot.slane %v10404_v0, 2  ;;  %v10423_v51 = vmax.f32 %v10422_v21, %v5474_v35  ;;  %v10436_v49 = vmax.f32 %v10435_v19, %v17935_v27  ;;  %13947 = vmatprep.mubr.msk.f32.mxu0 %vm893_vm1, %v17363_v63  ;;  %13961 = vmatprep.mubr.msk.f32.mxu1 %vm893_vm1, %v17363_v63  ;;  %v11298_v34 = vmax.f32 %v17926_v44, %v17921_v23 }
 0x52e   : > { %v10418_v46 = vrot.slane %v10417_v6, 2  ;;  %v11235_v47 = vmax.f32 %v17940_v10, %v17935_v27  ;;  %v13582_v15 = vpop.f32.mrb[140].mxu0  ;;  %v17954_v31 = vpop.f32.mrb[148].mxu1 }
 0x52f   : > { %v10406_v50 = vmax.f32 %v10404_v0, %v10405_v8  ;;  %v10424_v18 = vmax.f32 %v10423_v51, %v13579_v61  ;;  %v10437_v25 = vmax.f32 %v10436_v49, %v17921_v23  ;;  %v17960_v52 = vmax.f32 %v11422_v26, %v13582_v15  ;;  %9795 = vst [vmem:[%s16118_s12 + $0x628] sm:$0xff] %v13582_v15  ;;  %v5484_v62 = vpop.f32.mrb[141].mxu0  ;;  %v17969_v2 = vpop.f32.mrb[149].mxu1 }
 0x530   : > { %v10419_v55 = vmax.f32 %v10417_v6, %v10418_v46  ;;  %13948 = vmatmul.mubr.msk.f32.gmra.mrb[246].mxu0 %vm893_vm1, %v17382_v1  ;;  %13962 = vmatmul.mubr.msk.f32.gmra.mrb[254].mxu1 %vm893_vm1, %v17382_v1  ;;  %9803 = vst [vmem:[%s16118_s12 + $0x668] sm:$0xff] %v17954_v31  ;;  %v17974_v11 = vmax.f32 %v11359_v12, %v5484_v62  ;;  %9794 = vst [vmem:[%s16118_s12 + $0x620] sm:$0xff] %v5484_v62 }
 0x531   : > { %v10407_v17 = vrot.slane %v10406_v50, 1  ;;  %v10425_v14 = vmax.f32 %v10424_v18, %v5484_v62  ;;  %9802 = vst [vmem:[%s16118_s12 + $0x660] sm:$0xff] %v17969_v2  ;;  %v10438_v54 = vmax.f32 %v10437_v25, %v17969_v2  ;;  %13966 = vmatprep.mubr.msk.f32.mxu0 %vm893_vm1, %v17687_v29  ;;  %13980 = vmatprep.mubr.msk.f32.mxu1 %vm893_vm1, %v17687_v29 }
 0x532   : > { %v10420_v26 = vrot.slane %v10419_v55, 1  ;;  %v11424_v40 = vmax.f32 %v17960_v52, %v17954_v31  ;;  %v11361_v12 = vmax.f32 %v17974_v11, %v17969_v2  ;;  %v13585_v56 = vpop.f32.mrb[142].mxu0  ;;  %v17988_v19 = vpop.f32.mrb[150].mxu1 }
 0x533   : > { %v10408_v42 = vmax.f32 %v10406_v50, %v10407_v17  ;;  %v10426_v21 = vmax.f32 %v10425_v14, %v13582_v15  ;;  %v10439_v13 = vmax.f32 %v10438_v54, %v17954_v31  ;;  %v17994_v61 = vmax.f32 %v11548_v30, %v13585_v56  ;;  %9797 = vst [vmem:[%s16118_s12 + $0x638] sm:$0xff] %v13585_v56  ;;  %v5494_v6 = vpop.f32.mrb[143].mxu0  ;;  %v18003_v35 = vpop.f32.mrb[151].mxu1 }
 0x534   : > { %v10421_v0 = vmax.f32 %v10419_v55, %v10420_v26  ;;  %13967 = vmatmul.mubr.msk.f32.vlgmr.msra.gmra.mrb[248].mxu0 %vm893_vm1, %v17261_v16  ;;  %13981 = vmatmul.mubr.msk.f32.vlgmr.msra.gmra.mrb[0].mxu1 %vm893_vm1, %v17261_v16  ;;  %9805 = vst [vmem:[%s16118_s12 + $0x678] sm:$0xff] %v17988_v19  ;;  %v18010_v58 = vmax.f32 %v11485_v33, %v5494_v6  ;;  %9796 = vst [vmem:[%s16118_s12 + $0x630] sm:$0xff] %v5494_v6 }
 0x535   : > { %v11032_v8 = vsel %vm11016_vm7, %v10408_v42, %v17873_v43  ;;  %v10427_v4 = vmax.f32 %v10426_v21, %v5494_v6  ;;  %13993 = vmatpush3.msra.mxu0 %v15669_v38  ;;  %14007 = vmatpush3.msra.mxu1 %v15672_v5  ;;  %9804 = vst [vmem:[%s16118_s12 + $0x670] sm:$0xff] %v18003_v35 }
 0x536   : > { %v11033_v16 = vsel %vm11018_vm8, %v10421_v0, %v11032_v8  ;;  %v11550_v30 = vmax.f32 %v17994_v61, %v17988_v19  ;;  %14020 = vmatprep.subr.mxu0 %v15686_v60  ;;  %14034 = vmatprep.subr.mxu1 %v15689_v32  ;;  %v10440_v22 = vmax.f32 %v10439_v13, %v18003_v35  ;;  %v13604_v38 = vpop.f32.mrb[144].mxu0  ;;  %v18030_v43 = vpop.f32.mrb[152].mxu1 }
 0x537   : > { %11079 = vst [vmem:[%s16819_s24 + $0x10] sm:$0xff] %v11033_v16  ;;  %v10428_v53 = vmax.f32 %v10427_v4, %v13585_v56  ;;  %v11487_v5 = vmax.f32 %v18010_v58, %v18003_v35  ;;  %13969 = vmatprep.mubr.msk.f32.mxu0 %vm893_vm1, %v17291_v9  ;;  %13983 = vmatprep.mubr.msk.f32.mxu1 %vm893_vm1, %v17291_v9  ;;  %9807 = vst [vmem:[%s16118_s12 + $0x688] sm:$0xff] %v13604_v38  ;;  %v5674_v49 = vpop.f32.mrb[145].mxu0  ;;  %v18045_v9 = vpop.f32.mrb[153].mxu1 }
 0x538   : > { %v10441_v33 = vmax.f32 %v10440_v22, %v17988_v19  ;;  %v18036_v51 = vmax.f32 %v11172_v45, %v13604_v38  ;;  %13970 = vmatmul.mubr.msk.f32.gmra.mrb[250].mxu0 %vm893_vm1, %v17306_v39  ;;  %13984 = vmatmul.mubr.msk.f32.gmra.mrb[2].mxu1 %vm893_vm1, %v17306_v39  ;;  %9815 = vst [vmem:[%s16118_s12 + $0x6c8] sm:$0xff] %v18030_v43  ;;  %9806 = vst [vmem:[%s16118_s12 + $0x680] sm:$0xff] %v5674_v49 }
 0x539   : > { %v10429_v46 = vrot.slane %v10428_v53, 4  ;;  %v18050_v3 = vmax.f32 %v11109_v37, %v5674_v49  ;;  %v10448_v36 = vmax.f32 %v5674_v49, %v13604_v38  ;;  %9814 = vst [vmem:[%s16118_s12 + $0x6c0] sm:$0xff] %v18045_v9  ;;  %v10461_v45 = vmax.f32 %v18045_v9, %v18030_v43  ;;  %13972 = vmatprep.mubr.msk.f32.mxu0 %vm893_vm1, %v17326_v24  ;;  %v18143_v38 = vld [vmem:[#allocation5 + $0x8] sm:$0xff] }
 0x53a   : > { %13986 = vmatprep.mubr.msk.f32.mxu1 %vm893_vm1, %v17326_v24  ;;  %v10442_v39 = vrot.slane %v10441_v33, 4  ;;  %v11174_v48 = vmax.f32 %v18036_v51, %v18030_v43  ;;  %v13607_v50 = vpop.f32.mrb[146].mxu0  ;;  %v18065_v15 = vpop.f32.mrb[154].mxu1 }
 0x53b   : > { %v10430_v57 = vmax.f32 %v10428_v53, %v10429_v46  ;;  %v11111_v37 = vmax.f32 %v18050_v3, %v18045_v9  ;;  %v18070_v25 = vmax.f32 %v11298_v34, %v13607_v50  ;;  %9809 = vst [vmem:[%s16118_s12 + $0x698] sm:$0xff] %v13607_v50  ;;  %v5684_v24 = vpop.f32.mrb[147].mxu0  ;;  %9817 = vst [vmem:[%s16118_s12 + $0x6d8] sm:$0xff] %v18065_v15  ;;  %v18079_v55 = vpop.f32.mrb[155].mxu1 }
 0x53c   : > { %v10443_v18 = vmax.f32 %v10441_v33, %v10442_v39  ;;  %13973 = vmatmul.mubr.msk.f32.gmra.mrb[252].mxu0 %vm893_vm1, %v17344_v41  ;;  %13987 = vmatmul.mubr.msk.f32.gmra.mrb[4].mxu1 %vm893_vm1, %v17344_v41  ;;  %v18084_v17 = vmax.f32 %v11235_v47, %v5684_v24  ;;  %9808 = vst [vmem:[%s16118_s12 + $0x690] sm:$0xff] %v5684_v24  ;;  %9816 = vst [vmem:[%s16118_s12 + $0x6d0] sm:$0xff] %v18079_v55 }
 0x53d   : > { %v10431_v62 = vrot.slane %v10430_v57, 2  ;;  %v10449_v23 = vmax.f32 %v10448_v36, %v5684_v24  ;;  %v10462_v44 = vmax.f32 %v10461_v45, %v18079_v55  ;;  %13975 = vmatprep.mubr.msk.f32.mxu0 %vm893_vm1, %v17363_v63  ;;  %13989 = vmatprep.mubr.msk.f32.mxu1 %vm893_vm1, %v17363_v63  ;;  %v11300_v27 = vmax.f32 %v18070_v25, %v18065_v15 }
 0x53e   : > { %v10444_v41 = vrot.slane %v10443_v18, 2  ;;  %v11237_v34 = vmax.f32 %v18084_v17, %v18079_v55  ;;  %v13610_v47 = vpop.f32.mrb[148].mxu0  ;;  %v18098_v54 = vpop.f32.mrb[156].mxu1 }
 0x53f   : > { %v10432_v10 = vmax.f32 %v10430_v57, %v10431_v62  ;;  %v10450_v14 = vmax.f32 %v10449_v23, %v13607_v50  ;;  %v10463_v26 = vmax.f32 %v10462_v44, %v18065_v15  ;;  %v18104_v63 = vmax.f32 %v11424_v40, %v13610_v47  ;;  %9811 = vst [vmem:[%s16118_s12 + $0x6a8] sm:$0xff] %v13610_v47  ;;  %v5694_v56 = vpop.f32.mrb[149].mxu0  ;;  %v18113_v21 = vpop.f32.mrb[157].mxu1  ;;  %v18186_v57 = vld [vmem:[#allocation5 + $0x18] sm:$0xff] }
 0x540   : > { %v10445_v42 = vmax.f32 %v10443_v18, %v10444_v41  ;;  %9819 = vst [vmem:[%s16118_s12 + $0x6e8] sm:$0xff] %v18098_v54  ;;  %13976 = vmatmul.mubr.msk.f32.gmra.mrb[254].mxu0 %vm893_vm1, %v17382_v1  ;;  %13990 = vmatmul.mubr.msk.f32.gmra.mrb[6].mxu1 %vm893_vm1, %v17382_v1  ;;  %v18118_v0 = vmax.f32 %v11361_v12, %v5694_v56  ;;  %9810 = vst [vmem:[%s16118_s12 + $0x6a0] sm:$0xff] %v5694_v56 }
 0x541   : > { %v10433_v13 = vrot.slane %v10432_v10, 1  ;;  %v10451_v31 = vmax.f32 %v10450_v14, %v5694_v56  ;;  %9818 = vst [vmem:[%s16118_s12 + $0x6e0] sm:$0xff] %v18113_v21  ;;  %v10464_v52 = vmax.f32 %v10463_v26, %v18113_v21  ;;  %13994 = vmatprep.mubr.msk.f32.mxu0 %vm893_vm1, %v17687_v29  ;;  %14008 = vmatprep.mubr.msk.f32.mxu1 %vm893_vm1, %v17687_v29  ;;  %v18226_v14 = vld [vmem:[#allocation5 + $0x28] sm:$0xff] }
 0x542   : > { %v10446_v1 = vrot.slane %v10445_v42, 1  ;;  %v11426_v2 = vmax.f32 %v18104_v63, %v18098_v54  ;;  %v11363_v40 = vmax.f32 %v18118_v0, %v18113_v21  ;;  %v13613_v12 = vpop.f32.mrb[150].mxu0  ;;  %v18132_v8 = vpop.f32.mrb[158].mxu1 }
 0x543   : > { %v10434_v11 = vmax.f32 %v10432_v10, %v10433_v13  ;;  %v10452_v6 = vmax.f32 %v10451_v31, %v13610_v47  ;;  %v10465_v4 = vmax.f32 %v10464_v52, %v18098_v54  ;;  %v18138_v22 = vmax.f32 %v11550_v30, %v13613_v12  ;;  %9813 = vst [vmem:[%s16118_s12 + $0x6b8] sm:$0xff] %v13613_v12  ;;  %v5704_v53 = vpop.f32.mrb[151].mxu0  ;;  %v18149_v33 = vpop.f32.mrb[159].mxu1 }
 0x544   : > { %v10447_v16 = vmax.f32 %v10445_v42, %v10446_v1  ;;  %9821 = vst [vmem:[%s16118_s12 + $0x6f8] sm:$0xff] %v18132_v8  ;;  %13995 = vmatmul.mubr.msk.f32.vlgmr.msra.gmra.mrb[0].mxu0 %vm893_vm1, %v18143_v38  ;;  %14009 = vmatmul.mubr.msk.f32.vlgmr.msra.gmra.mrb[8].mxu1 %vm893_vm1, %v18143_v38  ;;  %v18154_v19 = vmax.f32 %v11487_v5, %v5704_v53  ;;  %9812 = vst [vmem:[%s16118_s12 + $0x6b0] sm:$0xff] %v5704_v53  ;;  %v18172_v5 = vld [vmem:[#allocation5 + $0x10] sm:$0xff] }
 0x545   : > { %v10453_v61 = vmax.f32 %v10452_v6, %v5704_v53  ;;  %14021 = vmatpush3.msra.mxu0 %v15686_v60  ;;  %14035 = vmatpush3.msra.mxu1 %v15689_v32  ;;  %9820 = vst [vmem:[%s16118_s12 + $0x6f0] sm:$0xff] %v18149_v33  ;;  %v10466_v30 = vmax.f32 %v10465_v4, %v18149_v33  ;;  %v18263_v4 = vld [vmem:[#allocation5 + $0x38] sm:$0xff] }
 0x546   : > { %v18163_v49 = vsel %vm11006_vm2, %v10447_v16, %v10434_v11  ;;  %v11552_v46 = vmax.f32 %v18138_v22, %v18132_v8  ;;  %14048 = vmatprep.subr.mxu0 %v15699_v59  ;;  %14062 = vmatprep.subr.mxu1 %v15702_v20  ;;  %v11489_v60 = vmax.f32 %v18154_v19, %v18149_v33  ;;  %v13632_v58 = vpop.f32.mrb[152].mxu0  ;;  %v18178_v36 = vpop.f32.mrb[160].mxu1 }
 0x547   : > { %v10454_v35 = vmax.f32 %v10453_v61, %v13613_v12  ;;  %v10467_v32 = vmax.f32 %v10466_v30, %v18132_v8  ;;  %13997 = vmatprep.mubr.msk.f32.mxu0 %vm893_vm1, %v18172_v5  ;;  %14011 = vmatprep.mubr.msk.f32.mxu1 %vm893_vm1, %v18172_v5  ;;  %v18183_v45 = vmax.f32 %v11174_v48, %v13632_v58  ;;  %v5884_v39 = vpop.f32.mrb[153].mxu0  ;;  %v18194_v50 = vpop.f32.mrb[161].mxu1  ;;  %v18204_v48 = vld [vmem:[#allocation5 + $0x20] sm:$0xff] }
 0x548   : > { %9823 = vst [vmem:[%s16118_s12 + $0x708] sm:$0xff] %v13632_v58  ;;  %13998 = vmatmul.mubr.msk.f32.gmra.mrb[2].mxu0 %vm893_vm1, %v18186_v57  ;;  %14012 = vmatmul.mubr.msk.f32.gmra.mrb[10].mxu1 %vm893_vm1, %v18186_v57  ;;  %9831 = vst [vmem:[%s16118_s12 + $0x748] sm:$0xff] %v18178_v36  ;;  %v18199_v43 = vmax.f32 %v11111_v37, %v5884_v39  ;;  %v10474_v51 = vmax.f32 %v5884_v39, %v13632_v58 }
 0x549   : > { %v10455_v18 = vrot.slane %v10454_v35, 4  ;;  %v10468_v24 = vrot.slane %v10467_v32, 4  ;;  %9822 = vst [vmem:[%s16118_s12 + $0x700] sm:$0xff] %v5884_v39  ;;  %9830 = vst [vmem:[%s16118_s12 + $0x740] sm:$0xff] %v18194_v50  ;;  %14000 = vmatprep.mubr.msk.f32.mxu0 %vm893_vm1, %v18204_v48  ;;  %14014 = vmatprep.mubr.msk.f32.mxu1 %vm893_vm1, %v18204_v48  ;;  %v11176_v62 = vmax.f32 %v18183_v45, %v18178_v36 }
 0x54a   : > { %v10487_v9 = vmax.f32 %v18194_v50, %v18178_v36  ;;  %v11113_v23 = vmax.f32 %v18199_v43, %v18194_v50  ;;  %v13635_v44 = vpop.f32.mrb[154].mxu0  ;;  %v18216_v41 = vpop.f32.mrb[162].mxu1 }
 0x54b   : > { %v10456_v3 = vmax.f32 %v10454_v35, %v10455_v18  ;;  %v10469_v37 = vmax.f32 %v10467_v32, %v10468_v24  ;;  %v18221_v10 = vmax.f32 %v11300_v27, %v13635_v44  ;;  %9825 = vst [vmem:[%s16118_s12 + $0x718] sm:$0xff] %v13635_v44  ;;  %v5894_v47 = vpop.f32.mrb[155].mxu0  ;;  %9833 = vst [vmem:[%s16118_s12 + $0x758] sm:$0xff] %v18216_v41  ;;  %v18232_v26 = vpop.f32.mrb[163].mxu1  ;;  %v18242_v27 = vld [vmem:[#allocation5 + $0x30] sm:$0xff] }
 0x54c   : > { %14001 = vmatmul.mubr.msk.f32.gmra.mrb[4].mxu0 %vm893_vm1, %v18226_v14  ;;  %14015 = vmatmul.mubr.msk.f32.gmra.mrb[12].mxu1 %vm893_vm1, %v18226_v14  ;;  %v18237_v15 = vmax.f32 %v11237_v34, %v5894_v47  ;;  %9824 = vst [vmem:[%s16118_s12 + $0x710] sm:$0xff] %v5894_v47  ;;  %v10475_v25 = vmax.f32 %v10474_v51, %v5894_v47  ;;  %9832 = vst [vmem:[%s16118_s12 + $0x750] sm:$0xff] %v18232_v26 }
 0x54d   : > { %v10457_v42 = vrot.slane %v10456_v3, 2  ;;  %v10470_v56 = vrot.slane %v10469_v37, 2  ;;  %14003 = vmatprep.mubr.msk.f32.mxu0 %vm893_vm1, %v18242_v27  ;;  %14017 = vmatprep.mubr.msk.f32.mxu1 %vm893_vm1, %v18242_v27  ;;  %v11302_v13 = vmax.f32 %v18221_v10, %v18216_v41  ;;  %v10488_v55 = vmax.f32 %v10487_v9, %v18232_v26 }
 0x54e   : > { %v11239_v31 = vmax.f32 %v18237_v15, %v18232_v26  ;;  %v13638_v52 = vpop.f32.mrb[156].mxu0  ;;  %v10476_v1 = vmax.f32 %v10475_v25, %v13635_v44  ;;  %v18253_v11 = vpop.f32.mrb[164].mxu1 }
 0x54f   : > { %v10458_v17 = vmax.f32 %v10456_v3, %v10457_v42  ;;  %v10471_v34 = vmax.f32 %v10469_v37, %v10470_v56  ;;  %v18258_v12 = vmax.f32 %v11426_v2, %v13638_v52  ;;  %9827 = vst [vmem:[%s16118_s12 + $0x728] sm:$0xff] %v13638_v52  ;;  %v5904_v6 = vpop.f32.mrb[157].mxu0  ;;  %9835 = vst [vmem:[%s16118_s12 + $0x768] sm:$0xff] %v18253_v11  ;;  %v18269_v16 = vpop.f32.mrb[165].mxu1 }
 0x550   : > { %14004 = vmatmul.mubr.msk.f32.gmra.mrb[6].mxu0 %vm893_vm1, %v18263_v4  ;;  %14018 = vmatmul.mubr.msk.f32.gmra.mrb[14].mxu1 %vm893_vm1, %v18263_v4  ;;  %v10489_v53 = vmax.f32 %v10488_v55, %v18216_v41  ;;  %v18275_v63 = vmax.f32 %v11363_v40, %v5904_v6  ;;  %9826 = vst [vmem:[%s16118_s12 + $0x720] sm:$0xff] %v5904_v6  ;;  %9834 = vst [vmem:[%s16118_s12 + $0x760] sm:$0xff] %v18269_v16 }
 0x551   : > { %v10459_v61 = vrot.slane %v10458_v17, 1  ;;  %v10472_v54 = vrot.slane %v10471_v34, 1  ;;  %v10477_v2 = vmax.f32 %v10476_v1, %v5904_v6  ;;  %14022 = vmatprep.mubr.msk.f32.mxu0 %vm893_vm1, %v17687_v29  ;;  %14036 = vmatprep.mubr.msk.f32.mxu1 %vm893_vm1, %v17687_v29  ;;  %v11428_v30 = vmax.f32 %v18258_v12, %v18253_v11 }
 0x552   : > { %v10490_v35 = vmax.f32 %v10489_v53, %v18269_v16  ;;  %v11365_v40 = vmax.f32 %v18275_v63, %v18269_v16  ;;  %v13641_v32 = vpop.f32.mrb[158].mxu0  ;;  %v18289_v39 = vpop.f32.mrb[166].mxu1 }
 0x553   : > { %v10460_v21 = vmax.f32 %v10458_v17, %v10459_v61  ;;  %v10473_v0 = vmax.f32 %v10471_v34, %v10472_v54  ;;  %v10478_v58 = vmax.f32 %v10477_v2, %v13638_v52  ;;  %v18294_v18 = vmax.f32 %v11552_v46, %v13641_v32  ;;  %9829 = vst [vmem:[%s16118_s12 + $0x738] sm:$0xff] %v13641_v32  ;;  %v5914_v24 = vpop.f32.mrb[159].mxu0  ;;  %v18303_v51 = vpop.f32.mrb[167].mxu1 }
 0x554   : > { %9837 = vst [vmem:[%s16118_s12 + $0x778] sm:$0xff] %v18289_v39  ;;  %14023 = vmatmul.mubr.msk.f32.vlgmr.msra.gmra.mrb[8].mxu0 %vm893_vm1, %v18143_v38  ;;  %14037 = vmatmul.mubr.msk.f32.vlgmr.msra.gmra.mrb[16].mxu1 %vm893_vm1, %v18143_v38  ;;  %v10491_v9 = vmax.f32 %v10490_v35, %v18253_v11  ;;  %v18311_v8 = vmax.f32 %v11489_v60, %v5914_v24  ;;  %9828 = vst [vmem:[%s16118_s12 + $0x730] sm:$0xff] %v5914_v24 }
 0x555   : > { %v11035_v3 = vsel %vm11008_vm3, %v10460_v21, %v18163_v49  ;;  %v10479_v22 = vmax.f32 %v10478_v58, %v5914_v24  ;;  %14049 = vmatpush3.msra.mxu0 %v15699_v59  ;;  %14063 = vmatpush3.msra.mxu1 %v15702_v20  ;;  %9836 = vst [vmem:[%s16118_s12 + $0x770] sm:$0xff] %v18303_v51 }
 0x556   : > { %v18319_v46 = vsel %vm11010_vm4, %v10473_v0, %v11035_v3  ;;  %v11554_v49 = vmax.f32 %v18294_v18, %v18289_v39  ;;  %v10492_v33 = vmax.f32 %v10491_v9, %v18303_v51  ;;  %14076 = vmatprep.subr.mxu0 %v15709_v28  ;;  %14090 = vmatprep.subr.mxu1 %v15712_v7  ;;  %v13660_v20 = vpop.f32.mrb[160].mxu0  ;;  %v18332_v60 = vpop.f32.mrb[168].mxu1 }
 0x557   : > { %v10480_v19 = vmax.f32 %v10479_v22, %v13641_v32  ;;  %v11491_v59 = vmax.f32 %v18311_v8, %v18303_v51  ;;  %14025 = vmatprep.mubr.msk.f32.mxu0 %vm893_vm1, %v18172_v5  ;;  %14039 = vmatprep.mubr.msk.f32.mxu1 %vm893_vm1, %v18172_v5  ;;  %v18338_v44 = vmax.f32 %v11176_v62, %v13660_v20  ;;  %v6094_v47 = vpop.f32.mrb[161].mxu0  ;;  %v18347_v42 = vpop.f32.mrb[169].mxu1  ;;  %v20410_v8 = vld [vmem:[#allocation25_spill] sm:$0xff] }
 0x558   : > { %v10493_v37 = vmax.f32 %v10492_v33, %v18289_v39  ;;  %9839 = vst [vmem:[%s16118_s12 + $0x788] sm:$0xff] %v13660_v20  ;;  %14026 = vmatmul.mubr.msk.f32.gmra.mrb[10].mxu0 %vm893_vm1, %v18186_v57  ;;  %14040 = vmatmul.mubr.msk.f32.gmra.mrb[18].mxu1 %vm893_vm1, %v18186_v57  ;;  %9847 = vst [vmem:[%s16118_s12 + $0x7c8] sm:$0xff] %v18332_v60  ;;  %v18352_v36 = vmax.f32 %v11113_v23, %v6094_v47 }
 0x559   : > { %v10481_v56 = vrot.slane %v10480_v19, 4  ;;  %9838 = vst [vmem:[%s16118_s12 + $0x780] sm:$0xff] %v6094_v47  ;;  %v10500_v45 = vmax.f32 %v6094_v47, %v13660_v20  ;;  %9846 = vst [vmem:[%s16118_s12 + $0x7c0] sm:$0xff] %v18347_v42  ;;  %v10513_v62 = vmax.f32 %v18347_v42, %v18332_v60  ;;  %14028 = vmatprep.mubr.msk.f32.mxu0 %vm893_vm1, %v18204_v48  ;;  %14042 = vmatprep.mubr.msk.f32.mxu1 %vm893_vm1, %v18204_v48 }
 0x55a   : > { %v10494_v25 = vrot.slane %v10493_v37, 4  ;;  %v11178_v50 = vmax.f32 %v18338_v44, %v18332_v60  ;;  %v11115_v23 = vmax.f32 %v18352_v36, %v18347_v42  ;;  %v13663_v55 = vpop.f32.mrb[162].mxu0 }
 0x55b   : > { %v10482_v43 = vmax.f32 %v10480_v19, %v10481_v56  ;;  %v18367_v17 = vpop.f32.mrb[170].mxu1  ;;  %v18372_v52 = vmax.f32 %v11302_v13, %v13663_v55  ;;  %9841 = vst [vmem:[%s16118_s12 + $0x798] sm:$0xff] %v13663_v55  ;;  %v6104_v1 = vpop.f32.mrb[163].mxu0 }
 0x55c   : > { %v10495_v34 = vmax.f32 %v10493_v37, %v10494_v25  ;;  %9849 = vst [vmem:[%s16118_s12 + $0x7d8] sm:$0xff] %v18367_v17  ;;  %14029 = vmatmul.mubr.msk.f32.gmra.mrb[12].mxu0 %vm893_vm1, %v18226_v14  ;;  %14043 = vmatmul.mubr.msk.f32.gmra.mrb[20].mxu1 %vm893_vm1, %v18226_v14  ;;  %v18381_v6 = vpop.f32.mrb[171].mxu1  ;;  %v18386_v61 = vmax.f32 %v11239_v31, %v6104_v1  ;;  %9840 = vst [vmem:[%s16118_s12 + $0x790] sm:$0xff] %v6104_v1 }
 0x55d   : > { %v10483_v53 = vrot.slane %v10482_v43, 2  ;;  %v10501_v41 = vmax.f32 %v10500_v45, %v6104_v1  ;;  %9848 = vst [vmem:[%s16118_s12 + $0x7d0] sm:$0xff] %v18381_v6  ;;  %v10514_v10 = vmax.f32 %v10513_v62, %v18381_v6  ;;  %14031 = vmatprep.mubr.msk.f32.mxu0 %vm893_vm1, %v18242_v27  ;;  %14045 = vmatprep.mubr.msk.f32.mxu1 %vm893_vm1, %v18242_v27 }
 0x55e   : > { %v10496_v13 = vrot.slane %v10495_v34, 2  ;;  %v11304_v26 = vmax.f32 %v18372_v52, %v18367_v17  ;;  %v11241_v31 = vmax.f32 %v18386_v61, %v18381_v6  ;;  %v13666_v54 = vpop.f32.mrb[164].mxu0 }
 0x55f   : > { %v10484_v15 = vmax.f32 %v10482_v43, %v10483_v53  ;;  %v10502_v2 = vmax.f32 %v10501_v41, %v13663_v55  ;;  %v18400_v35 = vpop.f32.mrb[172].mxu1  ;;  %v10515_v21 = vmax.f32 %v10514_v10, %v18367_v17  ;;  %v18406_v32 = vmax.f32 %v11428_v30, %v13666_v54  ;;  %9843 = vst [vmem:[%s16118_s12 + $0x7a8] sm:$0xff] %v13666_v54  ;;  %v6114_v58 = vpop.f32.mrb[165].mxu0 }
 0x560   : > { %v10497_v0 = vmax.f32 %v10495_v34, %v10496_v13  ;;  %9851 = vst [vmem:[%s16118_s12 + $0x7e8] sm:$0xff] %v18400_v35  ;;  %14032 = vmatmul.mubr.msk.f32.gmra.mrb[14].mxu0 %vm893_vm1, %v18263_v4  ;;  %14046 = vmatmul.mubr.msk.f32.gmra.mrb[22].mxu1 %vm893_vm1, %v18263_v4  ;;  %v18415_v24 = vpop.f32.mrb[173].mxu1  ;;  %v18420_v3 = vmax.f32 %v11365_v40, %v6114_v58  ;;  %9842 = vst [vmem:[%s16118_s12 + $0x7a0] sm:$0xff] %v6114_v58 }
 0x561   : > { %v10485_v9 = vrot.slane %v10484_v15, 1  ;;  %v10503_v11 = vmax.f32 %v10502_v2, %v6114_v58  ;;  %9850 = vst [vmem:[%s16118_s12 + $0x7e0] sm:$0xff] %v18415_v24  ;;  %v10516_v12 = vmax.f32 %v10515_v21, %v18415_v24  ;;  %14050 = vmatprep.mubr.msk.f32.mxu0 %vm893_vm1, %v17687_v29  ;;  %14064 = vmatprep.mubr.msk.f32.mxu1 %vm893_vm1, %v17687_v29 }
 0x562   : > { %v10498_v30 = vrot.slane %v10497_v0, 1  ;;  %v11430_v16 = vmax.f32 %v18406_v32, %v18400_v35  ;;  %v11367_v40 = vmax.f32 %v18420_v3, %v18415_v24  ;;  %v13669_v22 = vpop.f32.mrb[166].mxu0 }
 0x563   : > { %v10486_v63 = vmax.f32 %v10484_v15, %v10485_v9  ;;  %v10504_v33 = vmax.f32 %v10503_v11, %v13666_v54  ;;  %v18434_v19 = vpop.f32.mrb[174].mxu1  ;;  %v10517_v20 = vmax.f32 %v10516_v12, %v18400_v35  ;;  %v18440_v29 = vmax.f32 %v11554_v49, %v13669_v22  ;;  %9845 = vst [vmem:[%s16118_s12 + $0x7b8] sm:$0xff] %v13669_v22  ;;  %v6124_v47 = vpop.f32.mrb[167].mxu0 }
 0x564   : > { %v10499_v37 = vmax.f32 %v10497_v0, %v10498_v30  ;;  %9853 = vst [vmem:[%s16118_s12 + $0x7f8] sm:$0xff] %v18434_v19  ;;  %14051 = vmatmul.mubr.msk.f32.vlgmr.msra.gmra.mrb[16].mxu0 %vm893_vm1, %v18143_v38  ;;  %14065 = vmatmul.mubr.msk.f32.vlgmr.msra.gmra.mrb[24].mxu1 %vm893_vm1, %v18143_v38  ;;  %v18449_v56 = vpop.f32.mrb[175].mxu1  ;;  %v18456_v39 = vmax.f32 %v11491_v59, %v6124_v47  ;;  %9844 = vst [vmem:[%s16118_s12 + $0x7b0] sm:$0xff] %v6124_v47  ;;  %v20411_v59 = vld [vmem:[#allocation19_spill] sm:$0xff] }
 0x565   : > { %v11037_v45 = vsel %vm11012_vm5, %v10486_v63, %v18319_v46  ;;  %v10505_v18 = vmax.f32 %v10504_v33, %v6124_v47  ;;  %14077 = vmatpush3.msra.mxu0 %v15709_v28  ;;  %14091 = vmatpush3.msra.mxu1 %v15712_v7  ;;  %9852 = vst [vmem:[%s16118_s12 + $0x7f0] sm:$0xff] %v18449_v56 }
 0x566   : > { %v18464_v49 = vsel %vm11014_vm6, %v10499_v37, %v11037_v45  ;;  %v11556_v46 = vmax.f32 %v18440_v29, %v18434_v19  ;;  %v10518_v51 = vmax.f32 %v10517_v20, %v18449_v56  ;;  %14104 = vmatprep.subr.mxu0 %v20410_v8  ;;  %14118 = vmatprep.subr.mxu1 %v20411_v59  ;;  %v13688_v7 = vpop.f32.mrb[168].mxu0 }
 0x567   : > { %v10506_v62 = vmax.f32 %v10505_v18, %v13669_v22  ;;  %v11493_v28 = vmax.f32 %v18456_v39, %v18449_v56  ;;  %14053 = vmatprep.mubr.msk.f32.mxu0 %vm893_vm1, %v18172_v5  ;;  %14067 = vmatprep.mubr.msk.f32.mxu1 %vm893_vm1, %v18172_v5  ;;  %v18477_v25 = vpop.f32.mrb[176].mxu1  ;;  %v18483_v55 = vmax.f32 %v11178_v50, %v13688_v7  ;;  %v6304_v34 = vpop.f32.mrb[169].mxu0 }
 0x568   : > { %v10519_v43 = vmax.f32 %v10518_v51, %v18434_v19  ;;  %9855 = vst [vmem:[%s16118_s12 + $0x808] sm:$0xff] %v13688_v7  ;;  %14054 = vmatmul.mubr.msk.f32.gmra.mrb[18].mxu0 %vm893_vm1, %v18186_v57  ;;  %14068 = vmatmul.mubr.msk.f32.gmra.mrb[26].mxu1 %vm893_vm1, %v18186_v57  ;;  %9863 = vst [vmem:[%s16118_s12 + $0x848] sm:$0xff] %v18477_v25  ;;  %v18492_v1 = vpop.f32.mrb[177].mxu1  ;;  %v18497_v60 = vmax.f32 %v11115_v23, %v6304_v34 }
 0x569   : > { %v10507_v53 = vrot.slane %v10506_v62, 4  ;;  %9854 = vst [vmem:[%s16118_s12 + $0x800] sm:$0xff] %v6304_v34  ;;  %v10526_v44 = vmax.f32 %v6304_v34, %v13688_v7  ;;  %9862 = vst [vmem:[%s16118_s12 + $0x840] sm:$0xff] %v18492_v1  ;;  %v10539_v50 = vmax.f32 %v18492_v1, %v18477_v25  ;;  %14056 = vmatprep.mubr.msk.f32.mxu0 %vm893_vm1, %v18204_v48  ;;  %14070 = vmatprep.mubr.msk.f32.mxu1 %vm893_vm1, %v18204_v48 }
 0x56a   : > { %v10520_v41 = vrot.slane %v10519_v43, 4  ;;  %v11180_v42 = vmax.f32 %v18483_v55, %v18477_v25  ;;  %v11117_v23 = vmax.f32 %v18497_v60, %v18492_v1 }
 0x56b   : > { %v10508_v36 = vmax.f32 %v10506_v62, %v10507_v53  ;;  %v13691_v10 = vpop.f32.mrb[170].mxu0  ;;  %v18512_v13 = vpop.f32.mrb[178].mxu1 }
 0x56c   : > { %v10521_v15 = vmax.f32 %v10519_v43, %v10520_v41  ;;  %v18517_v54 = vmax.f32 %v11304_v26, %v13691_v10  ;;  %9857 = vst [vmem:[%s16118_s12 + $0x818] sm:$0xff] %v13691_v10  ;;  %v6314_v2 = vpop.f32.mrb[171].mxu0  ;;  %14057 = vmatmul.mubr.msk.f32.gmra.mrb[20].mxu0 %vm893_vm1, %v18226_v14  ;;  %14071 = vmatmul.mubr.msk.f32.gmra.mrb[28].mxu1 %vm893_vm1, %v18226_v14  ;;  %9865 = vst [vmem:[%s16118_s12 + $0x858] sm:$0xff] %v18512_v13  ;;  %v18526_v21 = vpop.f32.mrb[179].mxu1 }
 0x56d   : > { %v10509_v0 = vrot.slane %v10508_v36, 2  ;;  %v18531_v58 = vmax.f32 %v11241_v31, %v6314_v2  ;;  %9856 = vst [vmem:[%s16118_s12 + $0x810] sm:$0xff] %v6314_v2  ;;  %v10527_v17 = vmax.f32 %v10526_v44, %v6314_v2  ;;  %9864 = vst [vmem:[%s16118_s12 + $0x850] sm:$0xff] %v18526_v21  ;;  %v10540_v52 = vmax.f32 %v10539_v50, %v18526_v21 }
 0x56e   : > { %14059 = vmatprep.mubr.msk.f32.mxu0 %vm893_vm1, %v18242_v27  ;;  %14073 = vmatprep.mubr.msk.f32.mxu1 %vm893_vm1, %v18242_v27  ;;  %v10522_v26 = vrot.slane %v10521_v15, 2  ;;  %v11306_v6 = vmax.f32 %v18517_v54, %v18512_v13 }
 0x56f   : > { %v10510_v61 = vmax.f32 %v10508_v36, %v10509_v0  ;;  %v11243_v31 = vmax.f32 %v18531_v58, %v18526_v21  ;;  %v13694_v9 = vpop.f32.mrb[172].mxu0  ;;  %v10528_v11 = vmax.f32 %v10527_v17, %v13691_v10  ;;  %v18545_v12 = vpop.f32.mrb[180].mxu1  ;;  %v10541_v30 = vmax.f32 %v10540_v52, %v18512_v13 }
 0x570   : > { %v10523_v63 = vmax.f32 %v10521_v15, %v10522_v26  ;;  %v18551_v22 = vmax.f32 %v11430_v16, %v13694_v9  ;;  %9859 = vst [vmem:[%s16118_s12 + $0x828] sm:$0xff] %v13694_v9  ;;  %v6324_v33 = vpop.f32.mrb[173].mxu0  ;;  %14060 = vmatmul.mubr.msk.f32.gmra.mrb[22].mxu0 %vm893_vm1, %v18263_v4  ;;  %14074 = vmatmul.mubr.msk.f32.gmra.mrb[30].mxu1 %vm893_vm1, %v18263_v4  ;;  %9867 = vst [vmem:[%s16118_s12 + $0x868] sm:$0xff] %v18545_v12  ;;  %v18560_v20 = vpop.f32.mrb[181].mxu1  ;;  %v18571_v16 = vld [vmem:[#allocation5] sm:$0xff] }
 0x571   : > { %v10511_v37 = vrot.slane %v10510_v61, 1  ;;  %v18565_v47 = vmax.f32 %v11367_v40, %v6324_v33  ;;  %9858 = vst [vmem:[%s16118_s12 + $0x820] sm:$0xff] %v6324_v33  ;;  %v10529_v35 = vmax.f32 %v10528_v11, %v6324_v33  ;;  %9866 = vst [vmem:[%s16118_s12 + $0x860] sm:$0xff] %v18560_v20  ;;  %v10542_v32 = vmax.f32 %v10541_v30, %v18560_v20 }
 0x572   : > { %14078 = vmatprep.mubr.msk.f32.mxu0 %vm893_vm1, %v18571_v16  ;;  %14092 = vmatprep.mubr.msk.f32.mxu1 %vm893_vm1, %v18571_v16  ;;  %v10524_v45 = vrot.slane %v10523_v63, 1  ;;  %v11432_v24 = vmax.f32 %v18551_v22, %v18545_v12 }
 0x573   : > { %v10512_v3 = vmax.f32 %v10510_v61, %v10511_v37  ;;  %v11369_v40 = vmax.f32 %v18565_v47, %v18560_v20  ;;  %v13697_v18 = vpop.f32.mrb[174].mxu0  ;;  %v10530_v51 = vmax.f32 %v10529_v35, %v13694_v9  ;;  %v18581_v62 = vpop.f32.mrb[182].mxu1  ;;  %v10543_v7 = vmax.f32 %v10542_v32, %v18545_v12 }
 0x574   : > { %v10525_v43 = vmax.f32 %v10523_v63, %v10524_v45  ;;  %v18587_v34 = vmax.f32 %v11556_v46, %v13697_v18  ;;  %9861 = vst [vmem:[%s16118_s12 + $0x838] sm:$0xff] %v13697_v18  ;;  %v6334_v53 = vpop.f32.mrb[175].mxu0  ;;  %14079 = vmatmul.mubr.msk.f32.vlgmr.msra.gmra.mrb[24].mxu0 %vm893_vm1, %v18143_v38  ;;  %14093 = vmatmul.mubr.msk.f32.vlgmr.msra.gmra.mrb[32].mxu1 %vm893_vm1, %v18143_v38  ;;  %9869 = vst [vmem:[%s16118_s12 + $0x878] sm:$0xff] %v18581_v62  ;;  %v18596_v44 = vpop.f32.mrb[183].mxu1 }
 0x575   : > { %v11039_v50 = vsel %vm11016_vm7, %v10512_v3, %v18464_v49  ;;  %v18603_v19 = vmax.f32 %v11493_v28, %v6334_v53  ;;  %9860 = vst [vmem:[%s16118_s12 + $0x830] sm:$0xff] %v6334_v53  ;;  %v10531_v29 = vmax.f32 %v10530_v51, %v6334_v53  ;;  %14105 = vmatpush3.msra.mxu0 %v20410_v8  ;;  %9868 = vst [vmem:[%s16118_s12 + $0x870] sm:$0xff] %v18596_v44 }
 0x576   : > { %14119 = vmatpush3.msra.mxu1 %v20411_v59  ;;  %v11040_v46 = vsel %vm11018_vm8, %v10525_v43, %v11039_v50  ;;  %v11558_v49 = vmax.f32 %v18587_v34, %v18581_v62  ;;  %v10544_v41 = vmax.f32 %v10543_v7, %v18596_v44  ;;  %14081 = vmatprep.mubr.msk.f32.mxu0 %vm893_vm1, %v18172_v5 }
 0x577   : > { %14095 = vmatprep.mubr.msk.f32.mxu1 %vm893_vm1, %v18172_v5  ;;  %11080 = vst [vmem:[%s16819_s24 + $0x18] sm:$0xff] %v11040_v46  ;;  %v10532_v56 = vmax.f32 %v10531_v29, %v13697_v18  ;;  %v11495_v39 = vmax.f32 %v18603_v19, %v18596_v44  ;;  %v13716_v8 = vpop.f32.mrb[176].mxu0  ;;  %v18621_v59 = vpop.f32.mrb[184].mxu1 }
 0x578   : > { %v10545_v28 = vmax.f32 %v10544_v41, %v18581_v62  ;;  %v18627_v36 = vmax.f32 %v11180_v42, %v13716_v8  ;;  %9871 = vst [vmem:[%s16118_s12 + $0x888] sm:$0xff] %v13716_v8  ;;  %v6514_v10 = vpop.f32.mrb[177].mxu0  ;;  %14082 = vmatmul.mubr.msk.f32.gmra.mrb[26].mxu0 %vm893_vm1, %v18186_v57  ;;  %9879 = vst [vmem:[%s16118_s12 + $0x8c8] sm:$0xff] %v18621_v59  ;;  %14096 = vmatmul.mubr.msk.f32.gmra.mrb[34].mxu1 %vm893_vm1, %v18186_v57  ;;  %v18636_v15 = vpop.f32.mrb[185].mxu1 }
 0x579   : > { %v10533_v2 = vrot.slane %v10532_v56, 4  ;;  %v18641_v25 = vmax.f32 %v11117_v23, %v6514_v10  ;;  %9870 = vst [vmem:[%s16118_s12 + $0x880] sm:$0xff] %v6514_v10  ;;  %v10552_v55 = vmax.f32 %v6514_v10, %v13716_v8  ;;  %9878 = vst [vmem:[%s16118_s12 + $0x8c0] sm:$0xff] %v18636_v15  ;;  %v10565_v42 = vmax.f32 %v18636_v15, %v18621_v59 }
 0x57a   : > { %14084 = vmatprep.mubr.msk.f32.mxu0 %vm893_vm1, %v18204_v48  ;;  %14098 = vmatprep.mubr.msk.f32.mxu1 %vm893_vm1, %v18204_v48  ;;  %v10546_v0 = vrot.slane %v10545_v28, 4  ;;  %v11182_v1 = vmax.f32 %v18627_v36, %v18621_v59 }
 0x57b   : > { %v10534_v60 = vmax.f32 %v10532_v56, %v10533_v2  ;;  %v11119_v23 = vmax.f32 %v18641_v25, %v18636_v15  ;;  %v13719_v17 = vpop.f32.mrb[178].mxu0  ;;  %v18656_v52 = vpop.f32.mrb[186].mxu1 }
 0x57c   : > { %v10547_v26 = vmax.f32 %v10545_v28, %v10546_v0  ;;  %v18661_v61 = vmax.f32 %v11306_v6, %v13719_v17  ;;  %9873 = vst [vmem:[%s16118_s12 + $0x898] sm:$0xff] %v13719_v17  ;;  %v6524_v9 = vpop.f32.mrb[179].mxu0  ;;  %9881 = vst [vmem:[%s16118_s12 + $0x8d8] sm:$0xff] %v18656_v52  ;;  %14085 = vmatmul.mubr.msk.f32.gmra.mrb[28].mxu0 %vm893_vm1, %v18226_v14  ;;  %v18668_v11 = vpop.f32.mrb[187].mxu1  ;;  %14099 = vmatmul.mubr.msk.f32.gmra.mrb[36].mxu1 %vm893_vm1, %v18226_v14 }
 0x57d   : > { %v10535_v30 = vrot.slane %v10534_v60, 2  ;;  %v18675_v63 = vmax.f32 %v11243_v31, %v6524_v9  ;;  %9872 = vst [vmem:[%s16118_s12 + $0x890] sm:$0xff] %v6524_v9  ;;  %v10553_v13 = vmax.f32 %v10552_v55, %v6524_v9  ;;  %9880 = vst [vmem:[%s16118_s12 + $0x8d0] sm:$0xff] %v18668_v11  ;;  %v10566_v54 = vmax.f32 %v10565_v42, %v18668_v11 }
 0x57e   : > { %14087 = vmatprep.mubr.msk.f32.mxu0 %vm893_vm1, %v18242_v27  ;;  %14101 = vmatprep.mubr.msk.f32.mxu1 %vm893_vm1, %v18242_v27  ;;  %v10548_v6 = vrot.slane %v10547_v26, 2  ;;  %v11308_v21 = vmax.f32 %v18661_v61, %v18656_v52 }
 0x57f   : > { %v10536_v58 = vmax.f32 %v10534_v60, %v10535_v30  ;;  %v11245_v31 = vmax.f32 %v18675_v63, %v18668_v11  ;;  %v13722_v33 = vpop.f32.mrb[180].mxu0  ;;  %v10554_v37 = vmax.f32 %v10553_v13, %v13719_v17  ;;  %v18689_v35 = vpop.f32.mrb[188].mxu1  ;;  %v10567_v32 = vmax.f32 %v10566_v54, %v18656_v52 }
 0x580   : > { %v10549_v45 = vmax.f32 %v10547_v26, %v10548_v6  ;;  %v18695_v3 = vmax.f32 %v11432_v24, %v13722_v33  ;;  %9875 = vst [vmem:[%s16118_s12 + $0x8a8] sm:$0xff] %v13722_v33  ;;  %v6534_v18 = vpop.f32.mrb[181].mxu0  ;;  %9883 = vst [vmem:[%s16118_s12 + $0x8e8] sm:$0xff] %v18689_v35  ;;  %14088 = vmatmul.mubr.msk.f32.gmra.mrb[30].mxu0 %vm893_vm1, %v18263_v4  ;;  %v18702_v51 = vpop.f32.mrb[189].mxu1  ;;  %14102 = vmatmul.mubr.msk.f32.gmra.mrb[38].mxu1 %vm893_vm1, %v18263_v4 }
 0x581   : > { %v10537_v7 = vrot.slane %v10536_v58, 1  ;;  %v18709_v43 = vmax.f32 %v11369_v40, %v6534_v18  ;;  %9874 = vst [vmem:[%s16118_s12 + $0x8a0] sm:$0xff] %v6534_v18  ;;  %v10555_v12 = vmax.f32 %v10554_v37, %v6534_v18  ;;  %9882 = vst [vmem:[%s16118_s12 + $0x8e0] sm:$0xff] %v18702_v51  ;;  %v10568_v22 = vmax.f32 %v10567_v32, %v18702_v51 }
 0x582   : > { %14106 = vmatprep.mubr.msk.f32.mxu0 %vm893_vm1, %v18571_v16  ;;  %14120 = vmatprep.mubr.msk.f32.mxu1 %vm893_vm1, %v18571_v16  ;;  %v10550_v24 = vrot.slane %v10549_v45, 1  ;;  %v11434_v20 = vmax.f32 %v18695_v3, %v18689_v35 }
 0x583   : > { %v10538_v47 = vmax.f32 %v10536_v58, %v10537_v7  ;;  %v11371_v40 = vmax.f32 %v18709_v43, %v18702_v51  ;;  %v13725_v53 = vpop.f32.mrb[182].mxu0  ;;  %v10556_v50 = vmax.f32 %v10555_v12, %v13722_v33  ;;  %v18723_v29 = vpop.f32.mrb[190].mxu1  ;;  %v10569_v46 = vmax.f32 %v10568_v22, %v18689_v35 }
 0x584   : > { %v10551_v41 = vmax.f32 %v10549_v45, %v10550_v24  ;;  %v18729_v16 = vmax.f32 %v11558_v49, %v13725_v53  ;;  %9877 = vst [vmem:[%s16118_s12 + $0x8b8] sm:$0xff] %v13725_v53  ;;  %v6544_v56 = vpop.f32.mrb[183].mxu0  ;;  %9885 = vst [vmem:[%s16118_s12 + $0x8f8] sm:$0xff] %v18723_v29  ;;  %14107 = vmatmul.mubr.msk.f32.vlgmr.msra.gmra.mrb[32].mxu0 %vm893_vm1, %v18143_v38  ;;  %v18736_v8 = vpop.f32.mrb[191].mxu1  ;;  %14121 = vmatmul.mubr.msk.f32.vlgmr.msra.gmra.mrb[40].mxu1 %vm893_vm1, %v18143_v38 }
 0x585   : > { %v18743_v28 = vmax.f32 %v11495_v39, %v6544_v56  ;;  %9876 = vst [vmem:[%s16118_s12 + $0x8b0] sm:$0xff] %v6544_v56  ;;  %v10557_v62 = vmax.f32 %v10556_v50, %v6544_v56  ;;  %9884 = vst [vmem:[%s16118_s12 + $0x8f0] sm:$0xff] %v18736_v8  ;;  %v10570_v34 = vmax.f32 %v10569_v46, %v18736_v8  ;;  %14109 = vmatprep.mubr.msk.f32.mxu0 %vm893_vm1, %v18172_v5 }
 0x586   : > { %14123 = vmatprep.mubr.msk.f32.mxu1 %vm893_vm1, %v18172_v5  ;;  %v18754_v38 = vsel %vm11006_vm2, %v10551_v41, %v10538_v47  ;;  %v11560_v44 = vmax.f32 %v18729_v16, %v18723_v29 }
 0x587   : > { %v10558_v19 = vmax.f32 %v10557_v62, %v13725_v53  ;;  %v11497_v49 = vmax.f32 %v18743_v28, %v18736_v8  ;;  %v10571_v39 = vmax.f32 %v10570_v34, %v18723_v29  ;;  %v13744_v10 = vpop.f32.mrb[184].mxu0  ;;  %v18761_v2 = vpop.f32.mrb[192].mxu1 }
 0x588   : > { %v18766_v5 = vmax.f32 %v11182_v1, %v13744_v10  ;;  %9887 = vst [vmem:[%s16118_s12 + $0x908] sm:$0xff] %v13744_v10  ;;  %v6724_v55 = vpop.f32.mrb[185].mxu0  ;;  %14110 = vmatmul.mubr.msk.f32.gmra.mrb[34].mxu0 %vm893_vm1, %v18186_v57  ;;  %9895 = vst [vmem:[%s16118_s12 + $0x948] sm:$0xff] %v18761_v2  ;;  %14124 = vmatmul.mubr.msk.f32.gmra.mrb[42].mxu1 %vm893_vm1, %v18186_v57  ;;  %v18775_v42 = vpop.f32.mrb[193].mxu1 }
 0x589   : > { %v10559_v0 = vrot.slane %v10558_v19, 4  ;;  %v10572_v60 = vrot.slane %v10571_v39, 4  ;;  %v18780_v59 = vmax.f32 %v11119_v23, %v6724_v55  ;;  %9886 = vst [vmem:[%s16118_s12 + $0x900] sm:$0xff] %v6724_v55  ;;  %v10578_v36 = vmax.f32 %v6724_v55, %v13744_v10  ;;  %9894 = vst [vmem:[%s16118_s12 + $0x940] sm:$0xff] %v18775_v42  ;;  %14112 = vmatprep.mubr.msk.f32.mxu0 %vm893_vm1, %v18204_v48 }
 0x58a   : > { %14126 = vmatprep.mubr.msk.f32.mxu1 %vm893_vm1, %v18204_v48  ;;  %v11184_v57 = vmax.f32 %v18766_v5, %v18761_v2  ;;  %v10591_v1 = vmax.f32 %v18775_v42, %v18761_v2 }
 0x58b   : > { %v10560_v15 = vmax.f32 %v10558_v19, %v10559_v0  ;;  %v10573_v25 = vmax.f32 %v10571_v39, %v10572_v60  ;;  %v11121_v23 = vmax.f32 %v18780_v59, %v18775_v42  ;;  %v13747_v17 = vpop.f32.mrb[186].mxu0  ;;  %v18795_v26 = vpop.f32.mrb[194].mxu1 }
 0x58c   : > { %v18800_v48 = vmax.f32 %v11308_v21, %v13747_v17  ;;  %9889 = vst [vmem:[%s16118_s12 + $0x918] sm:$0xff] %v13747_v17  ;;  %v6734_v9 = vpop.f32.mrb[187].mxu0  ;;  %9897 = vst [vmem:[%s16118_s12 + $0x958] sm:$0xff] %v18795_v26  ;;  %14113 = vmatmul.mubr.msk.f32.gmra.mrb[36].mxu0 %vm893_vm1, %v18226_v14  ;;  %v18807_v30 = vpop.f32.mrb[195].mxu1  ;;  %14127 = vmatmul.mubr.msk.f32.gmra.mrb[44].mxu1 %vm893_vm1, %v18226_v14 }
 0x58d   : > { %v10561_v13 = vrot.slane %v10560_v15, 2  ;;  %v10574_v54 = vrot.slane %v10573_v25, 2  ;;  %v18814_v52 = vmax.f32 %v11245_v31, %v6734_v9  ;;  %9888 = vst [vmem:[%s16118_s12 + $0x910] sm:$0xff] %v6734_v9  ;;  %v10579_v61 = vmax.f32 %v10578_v36, %v6734_v9  ;;  %9896 = vst [vmem:[%s16118_s12 + $0x950] sm:$0xff] %v18807_v30  ;;  %14115 = vmatprep.mubr.msk.f32.mxu0 %vm893_vm1, %v18242_v27 }
 0x58e   : > { %14129 = vmatprep.mubr.msk.f32.mxu1 %vm893_vm1, %v18242_v27  ;;  %v11310_v14 = vmax.f32 %v18800_v48, %v18795_v26  ;;  %v10592_v6 = vmax.f32 %v10591_v1, %v18807_v30 }
 0x58f   : > { %v10562_v11 = vmax.f32 %v10560_v15, %v10561_v13  ;;  %v10575_v63 = vmax.f32 %v10573_v25, %v10574_v54  ;;  %v11247_v21 = vmax.f32 %v18814_v52, %v18807_v30  ;;  %v13750_v58 = vpop.f32.mrb[188].mxu0  ;;  %v10580_v31 = vmax.f32 %v10579_v61, %v13747_v17  ;;  %v18828_v33 = vpop.f32.mrb[196].mxu1 }
 0x590   : > { %v18833_v27 = vmax.f32 %v11434_v20, %v13750_v58  ;;  %9891 = vst [vmem:[%s16118_s12 + $0x928] sm:$0xff] %v13750_v58  ;;  %v6744_v37 = vpop.f32.mrb[189].mxu0  ;;  %9899 = vst [vmem:[%s16118_s12 + $0x968] sm:$0xff] %v18828_v33  ;;  %14116 = vmatmul.mubr.msk.f32.gmra.mrb[38].mxu0 %vm893_vm1, %v18263_v4  ;;  %v18840_v32 = vpop.f32.mrb[197].mxu1  ;;  %v10593_v45 = vmax.f32 %v10592_v6, %v18795_v26  ;;  %14130 = vmatmul.mubr.msk.f32.gmra.mrb[46].mxu1 %vm893_vm1, %v18263_v4 }
 0x591   : > { %v10563_v18 = vrot.slane %v10562_v11, 1  ;;  %v10576_v7 = vrot.slane %v10575_v63, 1  ;;  %v18848_v35 = vmax.f32 %v11371_v40, %v6744_v37  ;;  %9890 = vst [vmem:[%s16118_s12 + $0x920] sm:$0xff] %v6744_v37  ;;  %v10581_v3 = vmax.f32 %v10580_v31, %v6744_v37  ;;  %9898 = vst [vmem:[%s16118_s12 + $0x960] sm:$0xff] %v18840_v32 }
 0x592   : > { %v11436_v12 = vmax.f32 %v18833_v27, %v18828_v33  ;;  %v10594_v22 = vmax.f32 %v10593_v45, %v18840_v32 }
 0x593   : > { %v10564_v4 = vmax.f32 %v10562_v11, %v10563_v18  ;;  %v10577_v24 = vmax.f32 %v10575_v63, %v10576_v7  ;;  %v11373_v20 = vmax.f32 %v18848_v35, %v18840_v32  ;;  %v13753_v51 = vpop.f32.mrb[190].mxu0  ;;  %v10582_v43 = vmax.f32 %v10581_v3, %v13750_v58  ;;  %v18858_v47 = vpop.f32.mrb[198].mxu1 }
 0x594   : > { %v18863_v40 = vmax.f32 %v11560_v44, %v13753_v51  ;;  %9893 = vst [vmem:[%s16118_s12 + $0x938] sm:$0xff] %v13753_v51  ;;  %v6754_v53 = vpop.f32.mrb[191].mxu0  ;;  %9901 = vst [vmem:[%s16118_s12 + $0x978] sm:$0xff] %v18858_v47  ;;  %v18868_v50 = vpop.f32.mrb[199].mxu1  ;;  %v10595_v46 = vmax.f32 %v10594_v22, %v18828_v33 }
 0x595   : > { %v11042_v41 = vsel %vm11008_vm3, %v10564_v4, %v18754_v38  ;;  %v18876_v56 = vmax.f32 %v11497_v49, %v6754_v53  ;;  %9892 = vst [vmem:[%s16118_s12 + $0x930] sm:$0xff] %v6754_v53  ;;  %v10583_v29 = vmax.f32 %v10582_v43, %v6754_v53  ;;  %9900 = vst [vmem:[%s16118_s12 + $0x970] sm:$0xff] %v18868_v50 }
 0x596   : > { %v18882_v16 = vsel %vm11010_vm4, %v10577_v24, %v11042_v41  ;;  %v11562_v62 = vmax.f32 %v18863_v40, %v18858_v47  ;;  %v10596_v34 = vmax.f32 %v10595_v46, %v18868_v50 }
 0x597   : > { %v10584_v38 = vmax.f32 %v10583_v29, %v13753_v51  ;;  %v11499_v8 = vmax.f32 %v18876_v56, %v18868_v50  ;;  %v13772_v28 = vpop.f32.mrb[192].mxu0  ;;  %v18889_v44 = vpop.f32.mrb[200].mxu1 }
 0x598   : > { %v10597_v19 = vmax.f32 %v10596_v34, %v18858_v47  ;;  %v18895_v49 = vmax.f32 %v11184_v57, %v13772_v28  ;;  %9903 = vst [vmem:[%s16118_s12 + $0x988] sm:$0xff] %v13772_v28  ;;  %v6934_v39 = vpop.f32.mrb[193].mxu0  ;;  %9911 = vst [vmem:[%s16118_s12 + $0x9c8] sm:$0xff] %v18889_v44  ;;  %v18900_v10 = vpop.f32.mrb[201].mxu1 }
 0x599   : > { %v10585_v55 = vrot.slane %v10584_v38, 4  ;;  %v18905_v0 = vmax.f32 %v11121_v23, %v6934_v39  ;;  %9902 = vst [vmem:[%s16118_s12 + $0x980] sm:$0xff] %v6934_v39  ;;  %v10604_v60 = vmax.f32 %v6934_v39, %v13772_v28  ;;  %9910 = vst [vmem:[%s16118_s12 + $0x9c0] sm:$0xff] %v18900_v10  ;;  %v10617_v2 = vmax.f32 %v18900_v10, %v18889_v44 }
 0x59a   : > { %v10598_v5 = vrot.slane %v10597_v19, 4  ;;  %v11186_v36 = vmax.f32 %v18895_v49, %v18889_v44 }
 0x59b   : > { %v10586_v57 = vmax.f32 %v10584_v38, %v10585_v55  ;;  %v11123_v42 = vmax.f32 %v18905_v0, %v18900_v10  ;;  %v13775_v59 = vpop.f32.mrb[194].mxu0  ;;  %v18916_v1 = vpop.f32.mrb[202].mxu1 }
 0x59c   : > { %v10599_v15 = vmax.f32 %v10597_v19, %v10598_v5  ;;  %v18921_v25 = vmax.f32 %v11310_v14, %v13775_v59  ;;  %9905 = vst [vmem:[%s16118_s12 + $0x998] sm:$0xff] %v13775_v59  ;;  %v6944_v23 = vpop.f32.mrb[195].mxu0  ;;  %9913 = vst [vmem:[%s16118_s12 + $0x9d8] sm:$0xff] %v18916_v1  ;;  %v18926_v17 = vpop.f32.mrb[203].mxu1 }
 0x59d   : > { %v10587_v9 = vrot.slane %v10586_v57, 2  ;;  %v18931_v13 = vmax.f32 %v11247_v21, %v6944_v23  ;;  %9904 = vst [vmem:[%s16118_s12 + $0x990] sm:$0xff] %v6944_v23  ;;  %v10605_v54 = vmax.f32 %v10604_v60, %v6944_v23  ;;  %9912 = vst [vmem:[%s16118_s12 + $0x9d0] sm:$0xff] %v18926_v17  ;;  %v10618_v26 = vmax.f32 %v10617_v2, %v18926_v17 }
 0x59e   : > { %v10600_v48 = vrot.slane %v10599_v15, 2  ;;  %v11312_v61 = vmax.f32 %v18921_v25, %v18916_v1 }
 0x59f   : > { %v10588_v14 = vmax.f32 %v10586_v57, %v10587_v9  ;;  %v11249_v30 = vmax.f32 %v18931_v13, %v18926_v17  ;;  %v13778_v52 = vpop.f32.mrb[196].mxu0  ;;  %v10606_v6 = vmax.f32 %v10605_v54, %v13775_v59  ;;  %v18941_v11 = vpop.f32.mrb[204].mxu1  ;;  %v10619_v63 = vmax.f32 %v10618_v26, %v18916_v1 }
 0x5a0   : > { %v10601_v21 = vmax.f32 %v10599_v15, %v10600_v48  ;;  %v18947_v58 = vmax.f32 %v11436_v12, %v13778_v52  ;;  %9907 = vst [vmem:[%s16118_s12 + $0x9a8] sm:$0xff] %v13778_v52  ;;  %v6954_v31 = vpop.f32.mrb[197].mxu0  ;;  %9915 = vst [vmem:[%s16118_s12 + $0x9e8] sm:$0xff] %v18941_v11  ;;  %v18952_v37 = vpop.f32.mrb[205].mxu1 }
 0x5a1   : > { %v10589_v45 = vrot.slane %v10588_v14, 1  ;;  %v18957_v18 = vmax.f32 %v11373_v20, %v6954_v31  ;;  %9906 = vst [vmem:[%s16118_s12 + $0x9a0] sm:$0xff] %v6954_v31  ;;  %v10607_v7 = vmax.f32 %v10606_v6, %v6954_v31  ;;  %9914 = vst [vmem:[%s16118_s12 + $0x9e0] sm:$0xff] %v18952_v37  ;;  %v10620_v33 = vmax.f32 %v10619_v63, %v18952_v37 }
 0x5a2   : > { %v10602_v27 = vrot.slane %v10601_v21, 1  ;;  %v11438_v3 = vmax.f32 %v18947_v58, %v18941_v11 }
 0x5a3   : > { %v10590_v12 = vmax.f32 %v10588_v14, %v10589_v45  ;;  %v11375_v32 = vmax.f32 %v18957_v18, %v18952_v37  ;;  %v13781_v35 = vpop.f32.mrb[198].mxu0  ;;  %v10608_v22 = vmax.f32 %v10607_v7, %v13778_v52  ;;  %v18967_v4 = vpop.f32.mrb[206].mxu1  ;;  %v10621_v24 = vmax.f32 %v10620_v33, %v18941_v11 }
 0x5a4   : > { %v10603_v20 = vmax.f32 %v10601_v21, %v10602_v27  ;;  %v18973_v51 = vmax.f32 %v11562_v62, %v13781_v35  ;;  %9909 = vst [vmem:[%s16118_s12 + $0x9b8] sm:$0xff] %v13781_v35  ;;  %v6964_v43 = vpop.f32.mrb[199].mxu0  ;;  %9917 = vst [vmem:[%s16118_s12 + $0x9f8] sm:$0xff] %v18967_v4  ;;  %v18978_v53 = vpop.f32.mrb[207].mxu1 }
 0x5a5   : > { %v11044_v46 = vsel %vm11012_vm5, %v10590_v12, %v18882_v16  ;;  %v18985_v41 = vmax.f32 %v11499_v8, %v6964_v43  ;;  %9908 = vst [vmem:[%s16118_s12 + $0x9b0] sm:$0xff] %v6964_v43  ;;  %v10609_v47 = vmax.f32 %v10608_v22, %v6964_v43  ;;  %9916 = vst [vmem:[%s16118_s12 + $0x9f0] sm:$0xff] %v18978_v53 }
 0x5a6   : > { %v10622_v40 = vmax.f32 %v10621_v24, %v18978_v53  ;;  %v18992_v29 = vsel %vm11014_vm6, %v10603_v20, %v11044_v46  ;;  %v11564_v62 = vmax.f32 %v18973_v51, %v18967_v4 }
 0x5a7   : > { %v10610_v16 = vmax.f32 %v10609_v47, %v13781_v35  ;;  %v11501_v50 = vmax.f32 %v18985_v41, %v18978_v53  ;;  %v13800_v34 = vpop.f32.mrb[200].mxu0  ;;  %v18999_v38 = vpop.f32.mrb[208].mxu1 }
 0x5a8   : > { %v10623_v56 = vmax.f32 %v10622_v40, %v18967_v4  ;;  %v19004_v8 = vmax.f32 %v11186_v36, %v13800_v34  ;;  %9919 = vst [vmem:[%s16118_s12 + $0xa08] sm:$0xff] %v13800_v34  ;;  %v7144_v28 = vpop.f32.mrb[201].mxu0  ;;  %9927 = vst [vmem:[%s16118_s12 + $0xa48] sm:$0xff] %v18999_v38  ;;  %v19009_v19 = vpop.f32.mrb[209].mxu1 }
 0x5a9   : > { %v10611_v39 = vrot.slane %v10610_v16, 4  ;;  %v19014_v60 = vmax.f32 %v11123_v42, %v7144_v28  ;;  %9918 = vst [vmem:[%s16118_s12 + $0xa00] sm:$0xff] %v7144_v28  ;;  %v10630_v2 = vmax.f32 %v7144_v28, %v13800_v34  ;;  %9926 = vst [vmem:[%s16118_s12 + $0xa40] sm:$0xff] %v19009_v19  ;;  %v10643_v49 = vmax.f32 %v19009_v19, %v18999_v38 }
 0x5aa   : > { %v10624_v55 = vrot.slane %v10623_v56, 4  ;;  %v11188_v44 = vmax.f32 %v19004_v8, %v18999_v38 }
 0x5ab   : > { %v10612_v5 = vmax.f32 %v10610_v16, %v10611_v39  ;;  %v11125_v57 = vmax.f32 %v19014_v60, %v19009_v19  ;;  %v13803_v10 = vpop.f32.mrb[202].mxu0  ;;  %v19025_v0 = vpop.f32.mrb[210].mxu1 }
 0x5ac   : > { %v10625_v36 = vmax.f32 %v10623_v56, %v10624_v55  ;;  %v19030_v42 = vmax.f32 %v11312_v61, %v13803_v10  ;;  %9921 = vst [vmem:[%s16118_s12 + $0xa18] sm:$0xff] %v13803_v10  ;;  %v7154_v59 = vpop.f32.mrb[203].mxu0  ;;  %9929 = vst [vmem:[%s16118_s12 + $0xa58] sm:$0xff] %v19025_v0  ;;  %v19035_v15 = vpop.f32.mrb[211].mxu1 }
 0x5ad   : > { %v10613_v23 = vrot.slane %v10612_v5, 2  ;;  %v19040_v54 = vmax.f32 %v11249_v30, %v7154_v59  ;;  %9920 = vst [vmem:[%s16118_s12 + $0xa10] sm:$0xff] %v7154_v59  ;;  %v10631_v26 = vmax.f32 %v10630_v2, %v7154_v59  ;;  %9928 = vst [vmem:[%s16118_s12 + $0xa50] sm:$0xff] %v19035_v15  ;;  %v10644_v25 = vmax.f32 %v10643_v49, %v19035_v15 }
 0x5ae   : > { %v10626_v9 = vrot.slane %v10625_v36, 2  ;;  %v11314_v1 = vmax.f32 %v19030_v42, %v19025_v0 }
 0x5af   : > { %v10614_v48 = vmax.f32 %v10612_v5, %v10613_v23  ;;  %v11251_v14 = vmax.f32 %v19040_v54, %v19035_v15  ;;  %v13806_v17 = vpop.f32.mrb[204].mxu0  ;;  %v10632_v13 = vmax.f32 %v10631_v26, %v13803_v10  ;;  %v19050_v30 = vpop.f32.mrb[212].mxu1  ;;  %v10645_v21 = vmax.f32 %v10644_v25, %v19025_v0 }
 0x5b0   : > { %v10627_v61 = vmax.f32 %v10625_v36, %v10626_v9  ;;  %v19055_v52 = vmax.f32 %v11438_v3, %v13806_v17  ;;  %9923 = vst [vmem:[%s16118_s12 + $0xa28] sm:$0xff] %v13806_v17  ;;  %v7164_v6 = vpop.f32.mrb[205].mxu0  ;;  %9931 = vst [vmem:[%s16118_s12 + $0xa68] sm:$0xff] %v19050_v30  ;;  %v19060_v63 = vpop.f32.mrb[213].mxu1 }
 0x5b1   : > { %v10615_v31 = vrot.slane %v10614_v48, 1  ;;  %v19066_v7 = vmax.f32 %v11375_v32, %v7164_v6  ;;  %9922 = vst [vmem:[%s16118_s12 + $0xa20] sm:$0xff] %v7164_v6  ;;  %v10633_v11 = vmax.f32 %v10632_v13, %v7164_v6  ;;  %9930 = vst [vmem:[%s16118_s12 + $0xa60] sm:$0xff] %v19060_v63  ;;  %v10646_v33 = vmax.f32 %v10645_v21, %v19060_v63 }
 0x5b2   : > { %v10628_v45 = vrot.slane %v10627_v61, 1  ;;  %v11440_v58 = vmax.f32 %v19055_v52, %v19050_v30 }
 0x5b3   : > { %v10616_v27 = vmax.f32 %v10614_v48, %v10615_v31  ;;  %v11377_v12 = vmax.f32 %v19066_v7, %v19060_v63  ;;  %v13809_v37 = vpop.f32.mrb[206].mxu0  ;;  %v10634_v18 = vmax.f32 %v10633_v11, %v13806_v17  ;;  %v19076_v32 = vpop.f32.mrb[214].mxu1  ;;  %v10647_v20 = vmax.f32 %v10646_v33, %v19050_v30 }
 0x5b4   : > { %v10629_v3 = vmax.f32 %v10627_v61, %v10628_v45  ;;  %v19081_v35 = vmax.f32 %v11564_v62, %v13809_v37  ;;  %9925 = vst [vmem:[%s16118_s12 + $0xa38] sm:$0xff] %v13809_v37  ;;  %v7174_v22 = vpop.f32.mrb[207].mxu0  ;;  %9933 = vst [vmem:[%s16118_s12 + $0xa78] sm:$0xff] %v19076_v32  ;;  %v19086_v24 = vpop.f32.mrb[215].mxu1 }
 0x5b5   : > { %v11046_v43 = vsel %vm11016_vm7, %v10616_v27, %v18992_v29  ;;  %v19094_v46 = vmax.f32 %v11501_v50, %v7174_v22  ;;  %9924 = vst [vmem:[%s16118_s12 + $0xa30] sm:$0xff] %v7174_v22  ;;  %v10635_v4 = vmax.f32 %v10634_v18, %v7174_v22  ;;  %9932 = vst [vmem:[%s16118_s12 + $0xa70] sm:$0xff] %v19086_v24 }
 0x5b6   : > { %v11047_v51 = vsel %vm11018_vm8, %v10629_v3, %v11046_v43  ;;  %v11566_v47 = vmax.f32 %v19081_v35, %v19076_v32  ;;  %v10648_v40 = vmax.f32 %v10647_v20, %v19086_v24 }
 0x5b7   : > { %11081 = vst [vmem:[%s16819_s24 + $0x20] sm:$0xff] %v11047_v51  ;;  %v10636_v29 = vmax.f32 %v10635_v4, %v13809_v37  ;;  %v11503_v53 = vmax.f32 %v19094_v46, %v19086_v24  ;;  %v13828_v41 = vpop.f32.mrb[208].mxu0  ;;  %v19106_v62 = vpop.f32.mrb[216].mxu1 }
 0x5b8   : > { %v10649_v16 = vmax.f32 %v10648_v40, %v19076_v32  ;;  %v19112_v50 = vmax.f32 %v11188_v44, %v13828_v41  ;;  %9935 = vst [vmem:[%s16118_s12 + $0xa88] sm:$0xff] %v13828_v41  ;;  %v7354_v56 = vpop.f32.mrb[209].mxu0  ;;  %9943 = vst [vmem:[%s16118_s12 + $0xac8] sm:$0xff] %v19106_v62  ;;  %v19117_v34 = vpop.f32.mrb[217].mxu1 }
 0x5b9   : > { %v10637_v28 = vrot.slane %v10636_v29, 4  ;;  %v19122_v39 = vmax.f32 %v11125_v57, %v7354_v56  ;;  %9934 = vst [vmem:[%s16118_s12 + $0xa80] sm:$0xff] %v7354_v56  ;;  %v10656_v55 = vmax.f32 %v7354_v56, %v13828_v41  ;;  %9942 = vst [vmem:[%s16118_s12 + $0xac0] sm:$0xff] %v19117_v34  ;;  %v10669_v38 = vmax.f32 %v19117_v34, %v19106_v62 }
 0x5ba   : > { %v10650_v8 = vrot.slane %v10649_v16, 4  ;;  %v11190_v2 = vmax.f32 %v19112_v50, %v19106_v62 }
 0x5bb   : > { %v10638_v44 = vmax.f32 %v10636_v29, %v10637_v28  ;;  %v11127_v19 = vmax.f32 %v19122_v39, %v19117_v34  ;;  %v13831_v60 = vpop.f32.mrb[210].mxu0  ;;  %v19133_v49 = vpop.f32.mrb[218].mxu1 }
 0x5bc   : > { %v10651_v5 = vmax.f32 %v10649_v16, %v10650_v8  ;;  %v19138_v36 = vmax.f32 %v11314_v1, %v13831_v60  ;;  %9937 = vst [vmem:[%s16118_s12 + $0xa98] sm:$0xff] %v13831_v60  ;;  %v7364_v57 = vpop.f32.mrb[211].mxu0  ;;  %9945 = vst [vmem:[%s16118_s12 + $0xad8] sm:$0xff] %v19133_v49  ;;  %v19143_v10 = vpop.f32.mrb[219].mxu1 }
 0x5bd   : > { %v10639_v59 = vrot.slane %v10638_v44, 2  ;;  %v19148_v23 = vmax.f32 %v11251_v14, %v7364_v57  ;;  %9936 = vst [vmem:[%s16118_s12 + $0xa90] sm:$0xff] %v7364_v57  ;;  %v10657_v9 = vmax.f32 %v10656_v55, %v7364_v57  ;;  %9944 = vst [vmem:[%s16118_s12 + $0xad0] sm:$0xff] %v19143_v10  ;;  %v10670_v0 = vmax.f32 %v10669_v38, %v19143_v10 }
 0x5be   : > { %v10652_v42 = vrot.slane %v10651_v5, 2  ;;  %v11316_v26 = vmax.f32 %v19138_v36, %v19133_v49 }
 0x5bf   : > { %v10640_v1 = vmax.f32 %v10638_v44, %v10639_v59  ;;  %v11253_v15 = vmax.f32 %v19148_v23, %v19143_v10  ;;  %v13834_v54 = vpop.f32.mrb[212].mxu0  ;;  %v10658_v25 = vmax.f32 %v10657_v9, %v13831_v60  ;;  %v19158_v48 = vpop.f32.mrb[220].mxu1  ;;  %v10671_v61 = vmax.f32 %v10670_v0, %v19133_v49 }
 0x5c0   : > { %v10653_v14 = vmax.f32 %v10651_v5, %v10652_v42  ;;  %v19164_v17 = vmax.f32 %v11440_v58, %v13834_v54  ;;  %9939 = vst [vmem:[%s16118_s12 + $0xaa8] sm:$0xff] %v13834_v54  ;;  %v7374_v13 = vpop.f32.mrb[213].mxu0  ;;  %9947 = vst [vmem:[%s16118_s12 + $0xae8] sm:$0xff] %v19158_v48  ;;  %v19169_v6 = vpop.f32.mrb[221].mxu1 }
 0x5c1   : > { %v10641_v21 = vrot.slane %v10640_v1, 1  ;;  %v19174_v31 = vmax.f32 %v11377_v12, %v7374_v13  ;;  %9938 = vst [vmem:[%s16118_s12 + $0xaa0] sm:$0xff] %v7374_v13  ;;  %v10659_v45 = vmax.f32 %v10658_v25, %v7374_v13  ;;  %9946 = vst [vmem:[%s16118_s12 + $0xae0] sm:$0xff] %v19169_v6  ;;  %v10672_v30 = vmax.f32 %v10671_v61, %v19169_v6 }
 0x5c2   : > { %v10654_v52 = vrot.slane %v10653_v14, 1  ;;  %v11442_v11 = vmax.f32 %v19164_v17, %v19158_v48 }
 0x5c3   : > { %v10642_v58 = vmax.f32 %v10640_v1, %v10641_v21  ;;  %v11379_v63 = vmax.f32 %v19174_v31, %v19169_v6  ;;  %v13837_v7 = vpop.f32.mrb[214].mxu0  ;;  %v10660_v33 = vmax.f32 %v10659_v45, %v13834_v54  ;;  %v19184_v27 = vpop.f32.mrb[222].mxu1  ;;  %v10673_v3 = vmax.f32 %v10672_v30, %v19158_v48 }
 0x5c4   : > { %v10655_v12 = vmax.f32 %v10653_v14, %v10654_v52  ;;  %v19190_v37 = vmax.f32 %v11566_v47, %v13837_v7  ;;  %9941 = vst [vmem:[%s16118_s12 + $0xab8] sm:$0xff] %v13837_v7  ;;  %v7384_v18 = vpop.f32.mrb[215].mxu0  ;;  %9949 = vst [vmem:[%s16118_s12 + $0xaf8] sm:$0xff] %v19184_v27  ;;  %v19195_v22 = vpop.f32.mrb[223].mxu1 }
 0x5c5   : > { %v19200_v20 = vmax.f32 %v11503_v53, %v7384_v18  ;;  %9940 = vst [vmem:[%s16118_s12 + $0xab0] sm:$0xff] %v7384_v18  ;;  %v10661_v43 = vmax.f32 %v10660_v33, %v7384_v18  ;;  %9948 = vst [vmem:[%s16118_s12 + $0xaf0] sm:$0xff] %v19195_v22  ;;  %v10674_v32 = vmax.f32 %v10673_v3, %v19195_v22 }
 0x5c6   : > { %v19207_v35 = vsel %vm11006_vm2, %v10655_v12, %v10642_v58  ;;  %v11568_v4 = vmax.f32 %v19190_v37, %v19184_v27 }
 0x5c7   : > { %v10662_v51 = vmax.f32 %v10661_v43, %v13837_v7  ;;  %v11505_v24 = vmax.f32 %v19200_v20, %v19195_v22  ;;  %v10675_v46 = vmax.f32 %v10674_v32, %v19184_v27  ;;  %v13856_v47 = vpop.f32.mrb[216].mxu0  ;;  %v19214_v40 = vpop.f32.mrb[224].mxu1 }
 0x5c8   : > { %v19219_v29 = vmax.f32 %v11190_v2, %v13856_v47  ;;  %9951 = vst [vmem:[%s16118_s12 + $0xb08] sm:$0xff] %v13856_v47  ;;  %v7564_v53 = vpop.f32.mrb[217].mxu0  ;;  %9959 = vst [vmem:[%s16118_s12 + $0xb48] sm:$0xff] %v19214_v40  ;;  %v19224_v41 = vpop.f32.mrb[225].mxu1 }
 0x5c9   : > { %v10663_v16 = vrot.slane %v10662_v51, 4  ;;  %v10676_v56 = vrot.slane %v10675_v46, 4  ;;  %v19229_v28 = vmax.f32 %v11127_v19, %v7564_v53  ;;  %9950 = vst [vmem:[%s16118_s12 + $0xb00] sm:$0xff] %v7564_v53  ;;  %v10682_v55 = vmax.f32 %v7564_v53, %v13856_v47  ;;  %9958 = vst [vmem:[%s16118_s12 + $0xb40] sm:$0xff] %v19224_v41 }
 0x5ca   : > { %v11192_v62 = vmax.f32 %v19219_v29, %v19214_v40  ;;  %v10695_v50 = vmax.f32 %v19224_v41, %v19214_v40 }
 0x5cb   : > { %v10664_v38 = vmax.f32 %v10662_v51, %v10663_v16  ;;  %v10677_v8 = vmax.f32 %v10675_v46, %v10676_v56  ;;  %v11129_v2 = vmax.f32 %v19229_v28, %v19224_v41  ;;  %v13859_v34 = vpop.f32.mrb[218].mxu0  ;;  %v19240_v39 = vpop.f32.mrb[226].mxu1 }
 0x5cc   : > { %v19245_v44 = vmax.f32 %v11316_v26, %v13859_v34  ;;  %9953 = vst [vmem:[%s16118_s12 + $0xb18] sm:$0xff] %v13859_v34  ;;  %v7574_v19 = vpop.f32.mrb[219].mxu0  ;;  %9961 = vst [vmem:[%s16118_s12 + $0xb58] sm:$0xff] %v19240_v39  ;;  %v19250_v60 = vpop.f32.mrb[227].mxu1 }
 0x5cd   : > { %v10665_v5 = vrot.slane %v10664_v38, 2  ;;  %v10678_v57 = vrot.slane %v10677_v8, 2  ;;  %v19255_v59 = vmax.f32 %v11253_v15, %v7574_v19  ;;  %9952 = vst [vmem:[%s16118_s12 + $0xb10] sm:$0xff] %v7574_v19  ;;  %v10683_v9 = vmax.f32 %v10682_v55, %v7574_v19  ;;  %9960 = vst [vmem:[%s16118_s12 + $0xb50] sm:$0xff] %v19250_v60 }
 0x5ce   : > { %v11318_v49 = vmax.f32 %v19245_v44, %v19240_v39  ;;  %v10696_v36 = vmax.f32 %v10695_v50, %v19250_v60 }
 0x5cf   : > { %v10666_v0 = vmax.f32 %v10664_v38, %v10665_v5  ;;  %v10679_v42 = vmax.f32 %v10677_v8, %v10678_v57  ;;  %v11255_v26 = vmax.f32 %v19255_v59, %v19250_v60  ;;  %v13862_v10 = vpop.f32.mrb[220].mxu0  ;;  %v10684_v23 = vmax.f32 %v10683_v9, %v13859_v34  ;;  %v19265_v1 = vpop.f32.mrb[228].mxu1 }
 0x5d0   : > { %v19267_v15 = vmax.f32 %v11442_v11, %v13862_v10  ;;  %9955 = vst [vmem:[%s16118_s12 + $0xb28] sm:$0xff] %v13862_v10  ;;  %v7584_v54 = vpop.f32.mrb[221].mxu0  ;;  %9963 = vst [vmem:[%s16118_s12 + $0xb68] sm:$0xff] %v19265_v1  ;;  %v19272_v25 = vpop.f32.mrb[229].mxu1  ;;  %v10697_v48 = vmax.f32 %v10696_v36, %v19240_v39 }
 0x5d1   : > { %v10667_v61 = vrot.slane %v10666_v0, 1  ;;  %v10680_v14 = vrot.slane %v10679_v42, 1  ;;  %v19278_v17 = vmax.f32 %v11379_v63, %v7584_v54  ;;  %9954 = vst [vmem:[%s16118_s12 + $0xb20] sm:$0xff] %v7584_v54  ;;  %v10685_v13 = vmax.f32 %v10684_v23, %v7584_v54  ;;  %9962 = vst [vmem:[%s16118_s12 + $0xb60] sm:$0xff] %v19272_v25 }
 0x5d2   : > { %v11444_v21 = vmax.f32 %v19267_v15, %v19265_v1  ;;  %v10698_v45 = vmax.f32 %v10697_v48, %v19272_v25 }
 0x5d3   : > { %v10668_v30 = vmax.f32 %v10666_v0, %v10667_v61  ;;  %v10681_v52 = vmax.f32 %v10679_v42, %v10680_v14  ;;  %v11381_v11 = vmax.f32 %v19278_v17, %v19272_v25  ;;  %v13865_v6 = vpop.f32.mrb[222].mxu0  ;;  %v10686_v31 = vmax.f32 %v10685_v13, %v13862_v10  ;;  %v19288_v58 = vpop.f32.mrb[230].mxu1 }
 0x5d4   : > { %v19293_v63 = vmax.f32 %v11568_v4, %v13865_v6  ;;  %9957 = vst [vmem:[%s16118_s12 + $0xb38] sm:$0xff] %v13865_v6  ;;  %v7594_v7 = vpop.f32.mrb[223].mxu0  ;;  %9965 = vst [vmem:[%s16118_s12 + $0xb78] sm:$0xff] %v19288_v58  ;;  %v19298_v33 = vpop.f32.mrb[231].mxu1  ;;  %v10699_v3 = vmax.f32 %v10698_v45, %v19265_v1 }
 0x5d5   : > { %v11049_v12 = vsel %vm11008_vm3, %v10668_v30, %v19207_v35  ;;  %v19306_v18 = vmax.f32 %v11505_v24, %v7594_v7  ;;  %9956 = vst [vmem:[%s16118_s12 + $0xb30] sm:$0xff] %v7594_v7  ;;  %v10687_v27 = vmax.f32 %v10686_v31, %v7594_v7  ;;  %9964 = vst [vmem:[%s16118_s12 + $0xb70] sm:$0xff] %v19298_v33 }
 0x5d6   : > { %v19312_v37 = vsel %vm11010_vm4, %v10681_v52, %v11049_v12  ;;  %v11570_v43 = vmax.f32 %v19293_v63, %v19288_v58  ;;  %v10700_v32 = vmax.f32 %v10699_v3, %v19298_v33 }
 0x5d7   : > { %v10688_v35 = vmax.f32 %v10687_v27, %v13865_v6  ;;  %v11507_v22 = vmax.f32 %v19306_v18, %v19298_v33  ;;  %v13884_v20 = vpop.f32.mrb[224].mxu0  ;;  %v19319_v4 = vpop.f32.mrb[232].mxu1 }
 0x5d8   : > { %v10701_v51 = vmax.f32 %v10700_v32, %v19288_v58  ;;  %v19325_v24 = vmax.f32 %v11192_v62, %v13884_v20  ;;  %9967 = vst [vmem:[%s16118_s12 + $0xb88] sm:$0xff] %v13884_v20  ;;  %v7774_v46 = vpop.f32.mrb[225].mxu0  ;;  %9975 = vst [vmem:[%s16118_s12 + $0xbc8] sm:$0xff] %v19319_v4  ;;  %v19330_v47 = vpop.f32.mrb[233].mxu1 }
 0x5d9   : > { %v10689_v53 = vrot.slane %v10688_v35, 4  ;;  %v19335_v16 = vmax.f32 %v11129_v2, %v7774_v46  ;;  %9966 = vst [vmem:[%s16118_s12 + $0xb80] sm:$0xff] %v7774_v46  ;;  %v10708_v56 = vmax.f32 %v7774_v46, %v13884_v20  ;;  %9974 = vst [vmem:[%s16118_s12 + $0xbc0] sm:$0xff] %v19330_v47  ;;  %v10721_v40 = vmax.f32 %v19330_v47, %v19319_v4 }
 0x5da   : > { %v10702_v29 = vrot.slane %v10701_v51, 4  ;;  %v11194_v55 = vmax.f32 %v19325_v24, %v19319_v4 }
 0x5db   : > { %v10690_v62 = vmax.f32 %v10688_v35, %v10689_v53  ;;  %v11131_v41 = vmax.f32 %v19335_v16, %v19330_v47  ;;  %v13887_v28 = vpop.f32.mrb[226].mxu0  ;;  %v19346_v50 = vpop.f32.mrb[234].mxu1 }
 0x5dc   : > { %v10703_v38 = vmax.f32 %v10701_v51, %v10702_v29  ;;  %v19351_v8 = vmax.f32 %v11318_v49, %v13887_v28  ;;  %9969 = vst [vmem:[%s16118_s12 + $0xb98] sm:$0xff] %v13887_v28  ;;  %v7784_v2 = vpop.f32.mrb[227].mxu0  ;;  %9977 = vst [vmem:[%s16118_s12 + $0xbd8] sm:$0xff] %v19346_v50  ;;  %v19356_v34 = vpop.f32.mrb[235].mxu1 }
 0x5dd   : > { %v10691_v19 = vrot.slane %v10690_v62, 2  ;;  %v19361_v5 = vmax.f32 %v11255_v26, %v7784_v2  ;;  %9968 = vst [vmem:[%s16118_s12 + $0xb90] sm:$0xff] %v7784_v2  ;;  %v10709_v57 = vmax.f32 %v10708_v56, %v7784_v2  ;;  %9976 = vst [vmem:[%s16118_s12 + $0xbd0] sm:$0xff] %v19356_v34  ;;  %v10722_v39 = vmax.f32 %v10721_v40, %v19356_v34 }
 0x5de   : > { %v10704_v44 = vrot.slane %v10703_v38, 2  ;;  %v11320_v9 = vmax.f32 %v19351_v8, %v19346_v50 }
 0x5df   : > { %v10692_v49 = vmax.f32 %v10690_v62, %v10691_v19  ;;  %v11257_v60 = vmax.f32 %v19361_v5, %v19356_v34  ;;  %v13890_v59 = vpop.f32.mrb[228].mxu0  ;;  %v10710_v36 = vmax.f32 %v10709_v57, %v13887_v28  ;;  %v19371_v0 = vpop.f32.mrb[236].mxu1  ;;  %v10723_v42 = vmax.f32 %v10722_v39, %v19346_v50 }
 0x5e0   : > { %v10705_v26 = vmax.f32 %v10703_v38, %v10704_v44  ;;  %v19377_v10 = vmax.f32 %v11444_v21, %v13890_v59  ;;  %9971 = vst [vmem:[%s16118_s12 + $0xba8] sm:$0xff] %v13890_v59  ;;  %v7794_v23 = vpop.f32.mrb[229].mxu0  ;;  %9979 = vst [vmem:[%s16118_s12 + $0xbe8] sm:$0xff] %v19371_v0  ;;  %v19382_v54 = vpop.f32.mrb[237].mxu1 }
 0x5e1   : > { %v10693_v48 = vrot.slane %v10692_v49, 1  ;;  %v19387_v61 = vmax.f32 %v11381_v11, %v7794_v23  ;;  %9970 = vst [vmem:[%s16118_s12 + $0xba0] sm:$0xff] %v7794_v23  ;;  %v10711_v14 = vmax.f32 %v10710_v36, %v7794_v23  ;;  %9978 = vst [vmem:[%s16118_s12 + $0xbe0] sm:$0xff] %v19382_v54  ;;  %v10724_v1 = vmax.f32 %v10723_v42, %v19382_v54 }
 0x5e2   : > { %v10706_v15 = vrot.slane %v10705_v26, 1  ;;  %v11446_v13 = vmax.f32 %v19377_v10, %v19371_v0 }
 0x5e3   : > { %v10694_v21 = vmax.f32 %v10692_v49, %v10693_v48  ;;  %v11383_v25 = vmax.f32 %v19387_v61, %v19382_v54  ;;  %v13893_v17 = vpop.f32.mrb[230].mxu0  ;;  %v10712_v45 = vmax.f32 %v10711_v14, %v13890_v59  ;;  %v19397_v30 = vpop.f32.mrb[238].mxu1  ;;  %v10725_v52 = vmax.f32 %v10724_v1, %v19371_v0 }
 0x5e4   : > { %v10707_v11 = vmax.f32 %v10705_v26, %v10706_v15  ;;  %v19403_v6 = vmax.f32 %v11570_v43, %v13893_v17  ;;  %9973 = vst [vmem:[%s16118_s12 + $0xbb8] sm:$0xff] %v13893_v17  ;;  %v7804_v31 = vpop.f32.mrb[231].mxu0  ;;  %9981 = vst [vmem:[%s16118_s12 + $0xbf8] sm:$0xff] %v19397_v30  ;;  %v19408_v7 = vpop.f32.mrb[239].mxu1 }
 0x5e5   : > { %v11051_v3 = vsel %vm11012_vm5, %v10694_v21, %v19312_v37  ;;  %v19415_v12 = vmax.f32 %v11507_v22, %v7804_v31  ;;  %9972 = vst [vmem:[%s16118_s12 + $0xbb0] sm:$0xff] %v7804_v31  ;;  %v10713_v58 = vmax.f32 %v10712_v45, %v7804_v31  ;;  %9980 = vst [vmem:[%s16118_s12 + $0xbf0] sm:$0xff] %v19408_v7 }
 0x5e6   : > { %v10726_v63 = vmax.f32 %v10725_v52, %v19408_v7  ;;  %v19422_v27 = vsel %vm11014_vm6, %v10707_v11, %v11051_v3  ;;  %v11572_v43 = vmax.f32 %v19403_v6, %v19397_v30 }
 0x5e7   : > { %v10714_v37 = vmax.f32 %v10713_v58, %v13893_v17  ;;  %v11509_v33 = vmax.f32 %v19415_v12, %v19408_v7  ;;  %v13912_v32 = vpop.f32.mrb[232].mxu0  ;;  %v19429_v35 = vpop.f32.mrb[240].mxu1 }
 0x5e8   : > { %v10727_v18 = vmax.f32 %v10726_v63, %v19397_v30  ;;  %v19434_v22 = vmax.f32 %v11194_v55, %v13912_v32  ;;  %9983 = vst [vmem:[%s16118_s12 + $0xc08] sm:$0xff] %v13912_v32  ;;  %v7984_v20 = vpop.f32.mrb[233].mxu0  ;;  %9991 = vst [vmem:[%s16118_s12 + $0xc48] sm:$0xff] %v19429_v35  ;;  %v19439_v51 = vpop.f32.mrb[241].mxu1 }
 0x5e9   : > { %v10715_v46 = vrot.slane %v10714_v37, 4  ;;  %v19444_v56 = vmax.f32 %v11131_v41, %v7984_v20  ;;  %9982 = vst [vmem:[%s16118_s12 + $0xc00] sm:$0xff] %v7984_v20  ;;  %v10734_v40 = vmax.f32 %v7984_v20, %v13912_v32  ;;  %9990 = vst [vmem:[%s16118_s12 + $0xc40] sm:$0xff] %v19439_v51  ;;  %v10747_v24 = vmax.f32 %v19439_v51, %v19429_v35 }
 0x5ea   : > { %v10728_v53 = vrot.slane %v10727_v18, 4  ;;  %v11196_v4 = vmax.f32 %v19434_v22, %v19429_v35 }
 0x5eb   : > { %v10716_v29 = vmax.f32 %v10714_v37, %v10715_v46  ;;  %v11133_v62 = vmax.f32 %v19444_v56, %v19439_v51  ;;  %v13915_v47 = vpop.f32.mrb[234].mxu0  ;;  %v19455_v16 = vpop.f32.mrb[242].mxu1 }
 0x5ec   : > { %v10729_v55 = vmax.f32 %v10727_v18, %v10728_v53  ;;  %v19460_v41 = vmax.f32 %v11320_v9, %v13915_v47  ;;  %9985 = vst [vmem:[%s16118_s12 + $0xc18] sm:$0xff] %v13915_v47  ;;  %v7994_v28 = vpop.f32.mrb[235].mxu0  ;;  %9993 = vst [vmem:[%s16118_s12 + $0xc58] sm:$0xff] %v19455_v16  ;;  %v19465_v38 = vpop.f32.mrb[243].mxu1 }
 0x5ed   : > { %v10717_v2 = vrot.slane %v10716_v29, 2  ;;  %v19470_v57 = vmax.f32 %v11257_v60, %v7994_v28  ;;  %9984 = vst [vmem:[%s16118_s12 + $0xc10] sm:$0xff] %v7994_v28  ;;  %v10735_v39 = vmax.f32 %v10734_v40, %v7994_v28  ;;  %9992 = vst [vmem:[%s16118_s12 + $0xc50] sm:$0xff] %v19465_v38  ;;  %v10748_v8 = vmax.f32 %v10747_v24, %v19465_v38 }
 0x5ee   : > { %v10730_v19 = vrot.slane %v10729_v55, 2  ;;  %v11322_v50 = vmax.f32 %v19460_v41, %v19455_v16 }
 0x5ef   : > { %v10718_v44 = vmax.f32 %v10716_v29, %v10717_v2  ;;  %v11259_v49 = vmax.f32 %v19470_v57, %v19465_v38  ;;  %v13918_v34 = vpop.f32.mrb[236].mxu0  ;;  %v10736_v5 = vmax.f32 %v10735_v39, %v13915_v47  ;;  %v19480_v60 = vpop.f32.mrb[244].mxu1  ;;  %v10749_v26 = vmax.f32 %v10748_v8, %v19455_v16 }
 0x5f0   : > { %v10731_v9 = vmax.f32 %v10729_v55, %v10730_v19  ;;  %v19485_v59 = vmax.f32 %v11446_v13, %v13918_v34  ;;  %9987 = vst [vmem:[%s16118_s12 + $0xc28] sm:$0xff] %v13918_v34  ;;  %v8004_v36 = vpop.f32.mrb[237].mxu0  ;;  %9995 = vst [vmem:[%s16118_s12 + $0xc68] sm:$0xff] %v19480_v60  ;;  %v19490_v42 = vpop.f32.mrb[245].mxu1 }
 0x5f1   : > { %v10719_v23 = vrot.slane %v10718_v44, 1  ;;  %v19496_v14 = vmax.f32 %v11383_v25, %v8004_v36  ;;  %9986 = vst [vmem:[%s16118_s12 + $0xc20] sm:$0xff] %v8004_v36  ;;  %v10737_v0 = vmax.f32 %v10736_v5, %v8004_v36  ;;  %9994 = vst [vmem:[%s16118_s12 + $0xc60] sm:$0xff] %v19490_v42  ;;  %v10750_v1 = vmax.f32 %v10749_v26, %v19490_v42 }
 0x5f2   : > { %v10732_v48 = vrot.slane %v10731_v9, 1  ;;  %v11448_v10 = vmax.f32 %v19485_v59, %v19480_v60 }
 0x5f3   : > { %v10720_v15 = vmax.f32 %v10718_v44, %v10719_v23  ;;  %v11385_v21 = vmax.f32 %v19496_v14, %v19490_v42  ;;  %v13921_v54 = vpop.f32.mrb[238].mxu0  ;;  %v10738_v61 = vmax.f32 %v10737_v0, %v13918_v34  ;;  %v19506_v25 = vpop.f32.mrb[246].mxu1  ;;  %v10751_v11 = vmax.f32 %v10750_v1, %v19480_v60 }
 0x5f4   : > { %v10733_v13 = vmax.f32 %v10731_v9, %v10732_v48  ;;  %v19511_v17 = vmax.f32 %v11572_v43, %v13921_v54  ;;  %9989 = vst [vmem:[%s16118_s12 + $0xc38] sm:$0xff] %v13921_v54  ;;  %v8014_v45 = vpop.f32.mrb[239].mxu0  ;;  %9997 = vst [vmem:[%s16118_s12 + $0xc78] sm:$0xff] %v19506_v25  ;;  %v19516_v52 = vpop.f32.mrb[247].mxu1 }
 0x5f5   : > { %v11053_v31 = vsel %vm11016_vm7, %v10720_v15, %v19422_v27  ;;  %v19524_v3 = vmax.f32 %v11509_v33, %v8014_v45  ;;  %9988 = vst [vmem:[%s16118_s12 + $0xc30] sm:$0xff] %v8014_v45  ;;  %v10739_v30 = vmax.f32 %v10738_v61, %v8014_v45  ;;  %9996 = vst [vmem:[%s16118_s12 + $0xc70] sm:$0xff] %v19516_v52 }
 0x5f6   : > { %v11054_v6 = vsel %vm11018_vm8, %v10733_v13, %v11053_v31  ;;  %v11574_v58 = vmax.f32 %v19511_v17, %v19506_v25  ;;  %v10752_v63 = vmax.f32 %v10751_v11, %v19516_v52 }
 0x5f7   : > { %11082 = vst [vmem:[%s16819_s24 + $0x28] sm:$0xff] %v11054_v6  ;;  %v10740_v27 = vmax.f32 %v10739_v30, %v13921_v54  ;;  %v11511_v7 = vmax.f32 %v19524_v3, %v19516_v52  ;;  %v13940_v12 = vpop.f32.mrb[240].mxu0  ;;  %v19536_v43 = vpop.f32.mrb[248].mxu1 }
 0x5f8   : > { %v10753_v37 = vmax.f32 %v10752_v63, %v19506_v25  ;;  %v19543_v33 = vmax.f32 %v11196_v4, %v13940_v12  ;;  %9999 = vst [vmem:[%s16118_s12 + $0xc88] sm:$0xff] %v13940_v12  ;;  %v8194_v18 = vpop.f32.mrb[241].mxu0  ;;  %10007 = vst [vmem:[%s16118_s12 + $0xcc8] sm:$0xff] %v19536_v43  ;;  %v19548_v32 = vpop.f32.mrb[249].mxu1 }
 0x5f9   : > { %v10741_v20 = vrot.slane %v10740_v27, 4  ;;  %v19559_v35 = vmax.f32 %v11133_v62, %v8194_v18  ;;  %9998 = vst [vmem:[%s16118_s12 + $0xc80] sm:$0xff] %v8194_v18  ;;  %v10760_v22 = vmax.f32 %v8194_v18, %v13940_v12  ;;  %10006 = vst [vmem:[%s16118_s12 + $0xcc0] sm:$0xff] %v19548_v32  ;;  %v10773_v46 = vmax.f32 %v19548_v32, %v19536_v43 }
 0x5fa   : > { %v10754_v53 = vrot.slane %v10753_v37, 4  ;;  %v11198_v40 = vmax.f32 %v19543_v33, %v19536_v43 }
 0x5fb   : > { %14397 = shalt.err (!%p14394_p2)
}
 0x5fc   : > { %s14398_s19 = scalar_lea.hbm %s19553_s29, 16  ;;  %s14402_s16 = scalar_lea.hbm %s20297_s7, 32 }
 0x5fd   : > { %p14399_p0 = scmp.ne.s32.totalorder %s19553_s29, %s14398_s19  ;;  %p14403_p10 = scmp.lt.u32.totalorder %s19553_s29, %s20297_s7 }
 0x5fe   : > { %p14404_p12 = scmp.lt.u32.totalorder %s14402_s16, %s14398_s19  ;;  %p14406_p7 = scmp.lt.u32.totalorder %s14398_s19, %s19553_s29 }
 0x5ff   : > { %p14400_p3 = pnand %p14399_p0, %p20412_p8 }
 0x600   : > { %p14405_p4 = por %p14404_p12, %p14403_p10 }
 0x601   : > { %p14401_p5 = pneg %p14400_p3 }
 0x602   : > { %p14407_p11 = por %p14406_p7, %p14405_p4 }
 0x604   : > { %p14408_p13 = pnand %p14407_p11, %p14401_p5 }
 0x606   : > { %14411 = shalt.err (!%p14408_p13)
}
 0x607   : > { %14144 = dma.vmem_to_hbm [thread:$0]  (%p20412_p8), %s19566_s17, 16, %s19553_s29, %s11598_s11   ;;  %v10742_v51 = vmax.f32 %v10740_v27, %v10741_v20  ;;  %v11135_v56 = vmax.f32 %v19559_v35, %v19548_v32  ;;  %v13943_v4 = vpop.f32.mrb[242].mxu0  ;;  %v19595_v24 = vpop.f32.mrb[250].mxu1  ;;  %v10755_v29 = vmax.f32 %v10753_v37, %v10754_v53 }
 0x608   : > { %v19600_v55 = vmax.f32 %v11322_v50, %v13943_v4  ;;  %10001 = vst [vmem:[%s16118_s12 + $0xc98] sm:$0xff] %v13943_v4  ;;  %v8204_v62 = vpop.f32.mrb[243].mxu0  ;;  %10009 = vst [vmem:[%s16118_s12 + $0xcd8] sm:$0xff] %v19595_v24  ;;  %v19605_v47 = vpop.f32.mrb[251].mxu1  ;;  %s20226_s29 = scalar_lea.vmem %s20300_s10, %s12438_s18 }
 0x609   : > { %v10743_v28 = vrot.slane %v10742_v51, 2  ;;  %v19610_v2 = vmax.f32 %v11259_v49, %v8204_v62  ;;  %10000 = vst [vmem:[%s16118_s12 + $0xc90] sm:$0xff] %v8204_v62  ;;  %v10761_v19 = vmax.f32 %v10760_v22, %v8204_v62  ;;  %10008 = vst [vmem:[%s16118_s12 + $0xcd0] sm:$0xff] %v19605_v47  ;;  %v10774_v16 = vmax.f32 %v10773_v46, %v19605_v47  ;;  %v13946_v57 = vpop.f32.mrb[244].mxu0  ;;  %v19620_v44 = vpop.f32.mrb[252].mxu1 }
 0x60a   : > { %v10756_v41 = vrot.slane %v10755_v29, 2  ;;  %v11324_v39 = vmax.f32 %v19600_v55, %v19595_v24  ;;  %v19626_v34 = vmax.f32 %v11448_v10, %v13946_v57  ;;  %10003 = vst [vmem:[%s16118_s12 + $0xca8] sm:$0xff] %v13946_v57  ;;  %v8214_v5 = vpop.f32.mrb[245].mxu0  ;;  %10011 = vst [vmem:[%s16118_s12 + $0xce8] sm:$0xff] %v19620_v44  ;;  %v19631_v36 = vpop.f32.mrb[253].mxu1 }
 0x60b   : > { %v10744_v50 = vmax.f32 %v10742_v51, %v10743_v28  ;;  %v11261_v38 = vmax.f32 %v19610_v2, %v19605_v47  ;;  %v10762_v8 = vmax.f32 %v10761_v19, %v13943_v4  ;;  %v10775_v9 = vmax.f32 %v10774_v16, %v19595_v24  ;;  %10002 = vst [vmem:[%s16118_s12 + $0xca0] sm:$0xff] %v8214_v5  ;;  %v13949_v14 = vpop.f32.mrb[246].mxu0  ;;  %v19646_v15 = vpop.f32.mrb[254].mxu1 }
 0x60c   : > { %v10757_v49 = vmax.f32 %v10755_v29, %v10756_v41  ;;  %v19636_v23 = vmax.f32 %v11385_v21, %v8214_v5  ;;  %10010 = vst [vmem:[%s16118_s12 + $0xce0] sm:$0xff] %v19631_v36  ;;  %v11450_v0 = vmax.f32 %v19626_v34, %v19620_v44  ;;  %v19652_v54 = vmax.f32 %v11574_v58, %v13949_v14  ;;  %v8224_v61 = vpop.f32.mrb[247].mxu0  ;;  %v19657_v45 = vpop.f32.mrb[255].mxu1 }
 0x60d   : > { %v10745_v26 = vrot.slane %v10744_v50, 1  ;;  %v10763_v48 = vmax.f32 %v10762_v8, %v8214_v5  ;;  %v10776_v60 = vmax.f32 %v10775_v9, %v19631_v36  ;;  %10005 = vst [vmem:[%s16118_s12 + $0xcb8] sm:$0xff] %v13949_v14  ;;  %10013 = vst [vmem:[%s16118_s12 + $0xcf8] sm:$0xff] %v19646_v15  ;;  %v19662_v11 = vmax.f32 %v11511_v7, %v8224_v61  ;;  %v13968_v58 = vpop.f32.mrb[248].mxu0  ;;  %v19676_v63 = vpop.f32.mrb[0].mxu1 }
 0x60e   : > { %v10758_v59 = vrot.slane %v10757_v49, 1  ;;  %v11387_v42 = vmax.f32 %v19636_v23, %v19631_v36  ;;  %10004 = vst [vmem:[%s16118_s12 + $0xcb0] sm:$0xff] %v8224_v61  ;;  %10012 = vst [vmem:[%s16118_s12 + $0xcf0] sm:$0xff] %v19657_v45  ;;  %v11576_v30 = vmax.f32 %v19652_v54, %v19646_v15  ;;  %v19681_v27 = vmax.f32 %v11198_v40, %v13968_v58  ;;  %v8404_v7 = vpop.f32.mrb[249].mxu0  ;;  %v19686_v12 = vpop.f32.mrb[1].mxu1 }
 0x60f   : > { %v10746_v10 = vmax.f32 %v10744_v50, %v10745_v26  ;;  %v10764_v1 = vmax.f32 %v10763_v48, %v13946_v57  ;;  %v10777_v13 = vmax.f32 %v10776_v60, %v19620_v44  ;;  %v11513_v52 = vmax.f32 %v19662_v11, %v19657_v45  ;;  %10015 = vst [vmem:[%s16118_s12 + $0xd08] sm:$0xff] %v13968_v58  ;;  %v13971_v32 = vpop.f32.mrb[250].mxu0  ;;  %v19702_v35 = vpop.f32.mrb[2].mxu1 }
 0x610   : > { %v10759_v21 = vmax.f32 %v10757_v49, %v10758_v59  ;;  %10023 = vst [vmem:[%s16118_s12 + $0xd48] sm:$0xff] %v19676_v63  ;;  %v19691_v20 = vmax.f32 %v11135_v56, %v8404_v7  ;;  %10014 = vst [vmem:[%s16118_s12 + $0xd00] sm:$0xff] %v8404_v7  ;;  %v10786_v22 = vmax.f32 %v8404_v7, %v13968_v58  ;;  %v8414_v56 = vpop.f32.mrb[251].mxu0  ;;  %v19712_v4 = vpop.f32.mrb[3].mxu1 }
 0x611   : > { %v10765_v31 = vmax.f32 %v10764_v1, %v8224_v61  ;;  %v10778_v25 = vmax.f32 %v10777_v13, %v19657_v45  ;;  %10022 = vst [vmem:[%s16118_s12 + $0xd40] sm:$0xff] %v19686_v12  ;;  %v11200_v43 = vmax.f32 %v19681_v27, %v19676_v63  ;;  %v10799_v33 = vmax.f32 %v19686_v12, %v19676_v63  ;;  %v13974_v47 = vpop.f32.mrb[252].mxu0  ;;  %v19727_v50 = vpop.f32.mrb[4].mxu1 }
 0x612   : > { %v19669_v17 = vsel %vm11006_vm2, %v10759_v21, %v10746_v10  ;;  %v11137_v40 = vmax.f32 %v19691_v20, %v19686_v12  ;;  %v19707_v51 = vmax.f32 %v11324_v39, %v13971_v32  ;;  %10017 = vst [vmem:[%s16118_s12 + $0xd18] sm:$0xff] %v13971_v32  ;;  %10025 = vst [vmem:[%s16118_s12 + $0xd58] sm:$0xff] %v19702_v35  ;;  %v8424_v57 = vpop.f32.mrb[253].mxu0  ;;  %v19734_v8 = vpop.f32.mrb[5].mxu1 }
 0x613   : > { %v10766_v6 = vmax.f32 %v10765_v31, %v13949_v14  ;;  %v10779_v3 = vmax.f32 %v10778_v25, %v19646_v15  ;;  %v19717_v28 = vmax.f32 %v11261_v38, %v8414_v56  ;;  %10016 = vst [vmem:[%s16118_s12 + $0xd10] sm:$0xff] %v8414_v56  ;;  %v10787_v19 = vmax.f32 %v10786_v22, %v8414_v56  ;;  %v13977_v36 = vpop.f32.mrb[254].mxu0  ;;  %v19750_v10 = vpop.f32.mrb[6].mxu1 }
 0x614   : > { %10024 = vst [vmem:[%s16118_s12 + $0xd50] sm:$0xff] %v19712_v4  ;;  %v11326_v24 = vmax.f32 %v19707_v51, %v19702_v35  ;;  %v10800_v55 = vmax.f32 %v10799_v33, %v19712_v4  ;;  %v19729_v38 = vmax.f32 %v11450_v0, %v13974_v47  ;;  %10019 = vst [vmem:[%s16118_s12 + $0xd28] sm:$0xff] %v13974_v47  ;;  %v8434_v14 = vpop.f32.mrb[255].mxu0  ;;  %v19760_v1 = vpop.f32.mrb[7].mxu1 }
 0x615   : > { %v10767_v37 = vrot.slane %v10766_v6, 4  ;;  %v10780_v18 = vrot.slane %v10779_v3, 4  ;;  %v11263_v39 = vmax.f32 %v19717_v28, %v19712_v4  ;;  %v10788_v2 = vmax.f32 %v10787_v19, %v13971_v32  ;;  %10027 = vst [vmem:[%s16118_s12 + $0xd68] sm:$0xff] %v19727_v50  ;;  %10018 = vst [vmem:[%s16118_s12 + $0xd20] sm:$0xff] %v8424_v57 }
 0x616   : > { %v10801_v44 = vmax.f32 %v10800_v55, %v19702_v35  ;;  %v19740_v34 = vmax.f32 %v11387_v42, %v8424_v57  ;;  %10026 = vst [vmem:[%s16118_s12 + $0xd60] sm:$0xff] %v19734_v8  ;;  %v11452_v26 = vmax.f32 %v19729_v38, %v19727_v50  ;;  %v19755_v42 = vmax.f32 %v11576_v30, %v13977_v36 }
 0x617   : > { %v10768_v46 = vmax.f32 %v10766_v6, %v10767_v37  ;;  %v10781_v53 = vmax.f32 %v10779_v3, %v10780_v18  ;;  %v10789_v5 = vmax.f32 %v10788_v2, %v8424_v57  ;;  %10021 = vst [vmem:[%s16118_s12 + $0xd38] sm:$0xff] %v13977_v36  ;;  %10029 = vst [vmem:[%s16118_s12 + $0xd78] sm:$0xff] %v19750_v10  ;;  %v13996_v11 = vpop.f32.mrb[0].mxu0  ;;  %v19781_v30 = vpop.f32.mrb[8].mxu1 }
 0x618   : > { %v10802_v48 = vmax.f32 %v10801_v44, %v19734_v8  ;;  %v11389_v0 = vmax.f32 %v19740_v34, %v19734_v8  ;;  %v19768_v61 = vmax.f32 %v11513_v52, %v8434_v14  ;;  %10020 = vst [vmem:[%s16118_s12 + $0xd30] sm:$0xff] %v8434_v14  ;;  %10028 = vst [vmem:[%s16118_s12 + $0xd70] sm:$0xff] %v19760_v1  ;;  %v8614_v3 = vpop.f32.mrb[1].mxu0  ;;  %v19792_v58 = vpop.f32.mrb[9].mxu1 }
 0x619   : > { %v10769_v29 = vrot.slane %v10768_v46, 2  ;;  %v10782_v62 = vrot.slane %v10781_v53, 2  ;;  %v10790_v23 = vmax.f32 %v10789_v5, %v13974_v47  ;;  %v11578_v31 = vmax.f32 %v19755_v42, %v19750_v10  ;;  %10031 = vst [vmem:[%s16118_s12 + $0xd88] sm:$0xff] %v13996_v11  ;;  %10039 = vst [vmem:[%s16118_s12 + $0xdc8] sm:$0xff] %v19781_v30 }
 0x61a   : > { %v10803_v13 = vmax.f32 %v10802_v48, %v19727_v50  ;;  %v11515_v45 = vmax.f32 %v19768_v61, %v19760_v1  ;;  %v19787_v52 = vmax.f32 %v11200_v43, %v13996_v11  ;;  %v19797_v37 = vmax.f32 %v11137_v40, %v8614_v3  ;;  %10030 = vst [vmem:[%s16118_s12 + $0xd80] sm:$0xff] %v8614_v3 }
 0x61b   : > { %v10770_v16 = vmax.f32 %v10768_v46, %v10769_v29  ;;  %v10783_v41 = vmax.f32 %v10781_v53, %v10782_v62  ;;  %v10791_v15 = vmax.f32 %v10790_v23, %v8434_v14  ;;  %v10812_v18 = vmax.f32 %v8614_v3, %v13996_v11  ;;  %10038 = vst [vmem:[%s16118_s12 + $0xdc0] sm:$0xff] %v19792_v58  ;;  %v13999_v20 = vpop.f32.mrb[2].mxu0  ;;  %v19808_v33 = vpop.f32.mrb[10].mxu1 }
 0x61c   : > { %v10804_v25 = vmax.f32 %v10803_v13, %v19760_v1  ;;  %v10825_v63 = vmax.f32 %v19792_v58, %v19781_v30  ;;  %v11202_v22 = vmax.f32 %v19787_v52, %v19781_v30  ;;  %v11139_v12 = vmax.f32 %v19797_v37, %v19792_v58  ;;  %10033 = vst [vmem:[%s16118_s12 + $0xd98] sm:$0xff] %v13999_v20  ;;  %v8624_v40 = vpop.f32.mrb[3].mxu0  ;;  %v19818_v32 = vpop.f32.mrb[11].mxu1 }
 0x61d   : > { %v10771_v9 = vrot.slane %v10770_v16, 1  ;;  %v10784_v49 = vrot.slane %v10783_v41, 1  ;;  %v19813_v53 = vmax.f32 %v11326_v24, %v13999_v20  ;;  %10041 = vst [vmem:[%s16118_s12 + $0xdd8] sm:$0xff] %v19808_v33  ;;  %v19823_v29 = vmax.f32 %v11263_v39, %v8624_v40  ;;  %10032 = vst [vmem:[%s16118_s12 + $0xd90] sm:$0xff] %v8624_v40 }
 0x61e   : > { %v10805_v6 = vmax.f32 %v10804_v25, %v19750_v10  ;;  %v10813_v62 = vmax.f32 %v10812_v18, %v8624_v40  ;;  %10040 = vst [vmem:[%s16118_s12 + $0xdd0] sm:$0xff] %v19818_v32  ;;  %v10826_v35 = vmax.f32 %v10825_v63, %v19818_v32 }
 0x61f   : > { %v10772_v60 = vmax.f32 %v10770_v16, %v10771_v9  ;;  %v10785_v59 = vmax.f32 %v10783_v41, %v10784_v49  ;;  %v11328_v19 = vmax.f32 %v19813_v53, %v19808_v33  ;;  %v11265_v4 = vmax.f32 %v19823_v29, %v19818_v32  ;;  %v14002_v28 = vpop.f32.mrb[4].mxu0  ;;  %v19833_v16 = vpop.f32.mrb[12].mxu1 }
 0x620   : > { %v10806_v27 = vrot.slane %v10805_v6, 4  ;;  %v10814_v55 = vmax.f32 %v10813_v62, %v13999_v20  ;;  %v10827_v41 = vmax.f32 %v10826_v35, %v19808_v33  ;;  %v19839_v47 = vmax.f32 %v11452_v26, %v14002_v28  ;;  %10035 = vst [vmem:[%s16118_s12 + $0xda8] sm:$0xff] %v14002_v28  ;;  %v8634_v2 = vpop.f32.mrb[5].mxu0  ;;  %10043 = vst [vmem:[%s16118_s12 + $0xde8] sm:$0xff] %v19833_v16  ;;  %v19844_v57 = vpop.f32.mrb[13].mxu1 }
 0x621   : > { %v11056_v21 = vsel %vm11008_vm3, %v10772_v60, %v19669_v17  ;;  %v10792_v17 = vmax.f32 %v10791_v15, %v13977_v36  ;;  %v19849_v9 = vmax.f32 %v11389_v0, %v8634_v2  ;;  %10034 = vst [vmem:[%s16118_s12 + $0xda0] sm:$0xff] %v8634_v2  ;;  %10042 = vst [vmem:[%s16118_s12 + $0xde0] sm:$0xff] %v19844_v57 }
 0x622   : > { %v19774_v54 = vsel %vm11010_vm4, %v10785_v59, %v11056_v21  ;;  %v10807_v46 = vmax.f32 %v10805_v6, %v10806_v27  ;;  %v10815_v49 = vmax.f32 %v10814_v55, %v8634_v2  ;;  %v10828_v50 = vmax.f32 %v10827_v41, %v19844_v57 }
 0x623   : > { %v10793_v7 = vrot.slane %v10792_v17, 4  ;;  %v11454_v5 = vmax.f32 %v19839_v47, %v19833_v16  ;;  %v11391_v8 = vmax.f32 %v19849_v9, %v19844_v57  ;;  %v14005_v34 = vpop.f32.mrb[6].mxu0  ;;  %v19859_v60 = vpop.f32.mrb[14].mxu1 }
 0x624   : > { %v10808_v51 = vrot.slane %v10807_v46, 2  ;;  %v10816_v48 = vmax.f32 %v10815_v49, %v14002_v28  ;;  %v10829_v59 = vmax.f32 %v10828_v50, %v19833_v16  ;;  %v19865_v36 = vmax.f32 %v11578_v31, %v14005_v34  ;;  %10037 = vst [vmem:[%s16118_s12 + $0xdb8] sm:$0xff] %v14005_v34  ;;  %v8644_v23 = vpop.f32.mrb[7].mxu0  ;;  %10045 = vst [vmem:[%s16118_s12 + $0xdf8] sm:$0xff] %v19859_v60  ;;  %v19870_v14 = vpop.f32.mrb[15].mxu1 }
 0x625   : > { %v10794_v43 = vmax.f32 %v10792_v17, %v10793_v7  ;;  %v19877_v21 = vmax.f32 %v11515_v45, %v8644_v23  ;;  %10036 = vst [vmem:[%s16118_s12 + $0xdb0] sm:$0xff] %v8644_v23  ;;  %10044 = vst [vmem:[%s16118_s12 + $0xdf0] sm:$0xff] %v19870_v14 }
 0x626   : > { %v10809_v39 = vmax.f32 %v10807_v46, %v10808_v51  ;;  %v10817_v10 = vmax.f32 %v10816_v48, %v8644_v23  ;;  %v10830_v42 = vmax.f32 %v10829_v59, %v19870_v14  ;;  %v11580_v31 = vmax.f32 %v19865_v36, %v19859_v60 }
 0x627   : > { %v10795_v56 = vrot.slane %v10794_v43, 2  ;;  %v11517_v1 = vmax.f32 %v19877_v21, %v19870_v14  ;;  %v14024_v25 = vpop.f32.mrb[8].mxu0  ;;  %v19891_v17 = vpop.f32.mrb[16].mxu1 }
 0x628   : > { %v10810_v38 = vrot.slane %v10809_v39, 1  ;;  %v10831_v61 = vmax.f32 %v10830_v42, %v19859_v60  ;;  %v19896_v45 = vmax.f32 %v11202_v22, %v14024_v25  ;;  %10047 = vst [vmem:[%s16118_s12 + $0xe08] sm:$0xff] %v14024_v25  ;;  %v8824_v11 = vpop.f32.mrb[9].mxu0  ;;  %10055 = vst [vmem:[%s16118_s12 + $0xe48] sm:$0xff] %v19891_v17  ;;  %v19901_v6 = vpop.f32.mrb[17].mxu1 }
 0x629   : > { %v10796_v24 = vmax.f32 %v10794_v43, %v10795_v56  ;;  %v19906_v18 = vmax.f32 %v11139_v12, %v8824_v11  ;;  %10046 = vst [vmem:[%s16118_s12 + $0xe00] sm:$0xff] %v8824_v11  ;;  %v10838_v63 = vmax.f32 %v8824_v11, %v14024_v25  ;;  %10054 = vst [vmem:[%s16118_s12 + $0xe40] sm:$0xff] %v19901_v6 }
 0x62a   : > { %v10811_v0 = vmax.f32 %v10809_v39, %v10810_v38  ;;  %v10832_v7 = vrot.slane %v10831_v61, 4  ;;  %v11204_v30 = vmax.f32 %v19896_v45, %v19891_v17  ;;  %v10851_v52 = vmax.f32 %v19901_v6, %v19891_v17 }
 0x62b   : > { %v10797_v44 = vrot.slane %v10796_v24, 1  ;;  %v11141_v43 = vmax.f32 %v19906_v18, %v19901_v6  ;;  %v14027_v58 = vpop.f32.mrb[10].mxu0  ;;  %v19917_v37 = vpop.f32.mrb[18].mxu1 }
 0x62c   : > { %v10833_v22 = vmax.f32 %v10831_v61, %v10832_v7  ;;  %v19922_v12 = vmax.f32 %v11328_v19, %v14027_v58  ;;  %10049 = vst [vmem:[%s16118_s12 + $0xe18] sm:$0xff] %v14027_v58  ;;  %v8834_v20 = vpop.f32.mrb[11].mxu0  ;;  %10057 = vst [vmem:[%s16118_s12 + $0xe58] sm:$0xff] %v19917_v37  ;;  %v19927_v46 = vpop.f32.mrb[19].mxu1 }
 0x62d   : > { %v10798_v26 = vmax.f32 %v10796_v24, %v10797_v44  ;;  %v19932_v62 = vmax.f32 %v11265_v4, %v8834_v20  ;;  %10048 = vst [vmem:[%s16118_s12 + $0xe10] sm:$0xff] %v8834_v20  ;;  %v10839_v35 = vmax.f32 %v10838_v63, %v8834_v20  ;;  %10056 = vst [vmem:[%s16118_s12 + $0xe50] sm:$0xff] %v19927_v46 }
 0x62e   : > { %v10834_v56 = vrot.slane %v10833_v22, 2  ;;  %v11330_v33 = vmax.f32 %v19922_v12, %v19917_v37  ;;  %v10852_v53 = vmax.f32 %v10851_v52, %v19927_v46 }
 0x62f   : > { %v11058_v13 = vsel %vm11012_vm5, %v10798_v26, %v19774_v54  ;;  %v10818_v54 = vmax.f32 %v10817_v10, %v14005_v34  ;;  %v11267_v24 = vmax.f32 %v19932_v62, %v19927_v46  ;;  %v14030_v32 = vpop.f32.mrb[12].mxu0  ;;  %v10840_v29 = vmax.f32 %v10839_v35, %v14027_v58  ;;  %v19942_v4 = vpop.f32.mrb[20].mxu1 }
 0x630   : > { %v19884_v15 = vsel %vm11014_vm6, %v10811_v0, %v11058_v13  ;;  %v10835_v19 = vmax.f32 %v10833_v22, %v10834_v56  ;;  %v19947_v28 = vmax.f32 %v11454_v5, %v14030_v32  ;;  %10051 = vst [vmem:[%s16118_s12 + $0xe28] sm:$0xff] %v14030_v32  ;;  %v8844_v55 = vpop.f32.mrb[13].mxu0  ;;  %10059 = vst [vmem:[%s16118_s12 + $0xe68] sm:$0xff] %v19942_v4  ;;  %v19952_v41 = vpop.f32.mrb[21].mxu1 }
 0x631   : > { %v10819_v3 = vrot.slane %v10818_v54, 4  ;;  %v10853_v39 = vmax.f32 %v10852_v53, %v19917_v37  ;;  %v19958_v49 = vmax.f32 %v11391_v8, %v8844_v55  ;;  %10050 = vst [vmem:[%s16118_s12 + $0xe20] sm:$0xff] %v8844_v55  ;;  %v10841_v16 = vmax.f32 %v10840_v29, %v8844_v55  ;;  %10058 = vst [vmem:[%s16118_s12 + $0xe60] sm:$0xff] %v19952_v41 }
 0x632   : > { %v10836_v44 = vrot.slane %v10835_v19, 1  ;;  %v11456_v47 = vmax.f32 %v19947_v28, %v19942_v4 }
 0x633   : > { %v10820_v27 = vmax.f32 %v10818_v54, %v10819_v3  ;;  %v10854_v50 = vmax.f32 %v10853_v39, %v19952_v41  ;;  %v11393_v26 = vmax.f32 %v19958_v49, %v19952_v41  ;;  %v14033_v57 = vpop.f32.mrb[14].mxu0  ;;  %v10842_v9 = vmax.f32 %v10841_v16, %v14030_v32  ;;  %v19968_v8 = vpop.f32.mrb[22].mxu1 }
 0x634   : > { %v10837_v5 = vmax.f32 %v10835_v19, %v10836_v44  ;;  %v19973_v34 = vmax.f32 %v11580_v31, %v14033_v57  ;;  %10053 = vst [vmem:[%s16118_s12 + $0xe38] sm:$0xff] %v14033_v57  ;;  %v8854_v48 = vpop.f32.mrb[15].mxu0  ;;  %10061 = vst [vmem:[%s16118_s12 + $0xe78] sm:$0xff] %v19968_v8  ;;  %v19978_v59 = vpop.f32.mrb[23].mxu1 }
 0x635   : > { %v10821_v40 = vrot.slane %v10820_v27, 2  ;;  %v10855_v0 = vmax.f32 %v10854_v50, %v19942_v4  ;;  %v19986_v13 = vmax.f32 %v11517_v1, %v8854_v48  ;;  %10052 = vst [vmem:[%s16118_s12 + $0xe30] sm:$0xff] %v8854_v48  ;;  %v10843_v60 = vmax.f32 %v10842_v9, %v8854_v48  ;;  %10060 = vst [vmem:[%s16118_s12 + $0xe70] sm:$0xff] %v19978_v59 }
 0x636   : > { %v11582_v10 = vmax.f32 %v19973_v34, %v19968_v8 }
 0x637   : > { %v10822_v51 = vmax.f32 %v10820_v27, %v10821_v40  ;;  %v10856_v42 = vmax.f32 %v10855_v0, %v19978_v59  ;;  %v11519_v14 = vmax.f32 %v19986_v13, %v19978_v59  ;;  %v14052_v21 = vpop.f32.mrb[16].mxu0  ;;  %v19998_v31 = vpop.f32.mrb[24].mxu1 }
 0x638   : > { %v20004_v1 = vmax.f32 %v11204_v30, %v14052_v21  ;;  %10063 = vst [vmem:[%s16118_s12 + $0xe88] sm:$0xff] %v14052_v21  ;;  %v9034_v61 = vpop.f32.mrb[17].mxu0  ;;  %10071 = vst [vmem:[%s16118_s12 + $0xec8] sm:$0xff] %v19998_v31  ;;  %v20009_v25 = vpop.f32.mrb[25].mxu1 }
 0x639   : > { %v10823_v2 = vrot.slane %v10822_v51, 1  ;;  %v10857_v54 = vmax.f32 %v10856_v42, %v19968_v8  ;;  %v20014_v3 = vmax.f32 %v11141_v43, %v9034_v61  ;;  %10062 = vst [vmem:[%s16118_s12 + $0xe80] sm:$0xff] %v9034_v61  ;;  %v10864_v7 = vmax.f32 %v9034_v61, %v14052_v21  ;;  %10070 = vst [vmem:[%s16118_s12 + $0xec0] sm:$0xff] %v20009_v25 }
 0x63a   : > { %v10877_v17 = vmax.f32 %v20009_v25, %v19998_v31  ;;  %v11206_v63 = vmax.f32 %v20004_v1, %v19998_v31 }
 0x63b   : > { %v10824_v38 = vmax.f32 %v10822_v51, %v10823_v2  ;;  %v10858_v45 = vrot.slane %v10857_v54, 4  ;;  %v11143_v6 = vmax.f32 %v20014_v3, %v20009_v25  ;;  %v14055_v18 = vpop.f32.mrb[18].mxu0  ;;  %v20025_v52 = vpop.f32.mrb[26].mxu1 }
 0x63c   : > { %v20030_v22 = vmax.f32 %v11330_v33, %v14055_v18  ;;  %10065 = vst [vmem:[%s16118_s12 + $0xe98] sm:$0xff] %v14055_v18  ;;  %v9044_v43 = vpop.f32.mrb[19].mxu0  ;;  %10073 = vst [vmem:[%s16118_s12 + $0xed8] sm:$0xff] %v20025_v52  ;;  %v20035_v58 = vpop.f32.mrb[27].mxu1 }
 0x63d   : > { %v11060_v23 = vsel %vm11016_vm7, %v10824_v38, %v19884_v15  ;;  %v10844_v15 = vmax.f32 %v10843_v60, %v14033_v57  ;;  %v10859_v27 = vmax.f32 %v10857_v54, %v10858_v45  ;;  %v20040_v40 = vmax.f32 %v11267_v24, %v9044_v43  ;;  %10064 = vst [vmem:[%s16118_s12 + $0xe90] sm:$0xff] %v9044_v43 }
 0x63e   : > { %v11061_v36 = vsel %vm11018_vm8, %v10837_v5, %v11060_v23  ;;  %v10865_v56 = vmax.f32 %v10864_v7, %v9044_v43  ;;  %10072 = vst [vmem:[%s16118_s12 + $0xed0] sm:$0xff] %v20035_v58  ;;  %v10878_v37 = vmax.f32 %v10877_v17, %v20035_v58  ;;  %v11332_v35 = vmax.f32 %v20030_v22, %v20025_v52 }
 0x63f   : > { %11083 = vst [vmem:[%s16819_s24 + $0x30] sm:$0xff] %v11061_v36  ;;  %v10845_v11 = vrot.slane %v10844_v15, 4  ;;  %v10860_v12 = vrot.slane %v10859_v27, 2  ;;  %v11269_v46 = vmax.f32 %v20040_v40, %v20035_v58  ;;  %v14058_v62 = vpop.f32.mrb[20].mxu0  ;;  %v20050_v51 = vpop.f32.mrb[28].mxu1 }
 0x640   : > { %v10866_v53 = vmax.f32 %v10865_v56, %v14055_v18  ;;  %v10879_v19 = vmax.f32 %v10878_v37, %v20025_v52  ;;  %v20056_v32 = vmax.f32 %v11456_v47, %v14058_v62  ;;  %10067 = vst [vmem:[%s16118_s12 + $0xea8] sm:$0xff] %v14058_v62  ;;  %v9054_v29 = vpop.f32.mrb[21].mxu0  ;;  %10075 = vst [vmem:[%s16118_s12 + $0xee8] sm:$0xff] %v20050_v51  ;;  %v20061_v55 = vpop.f32.mrb[29].mxu1 }
 0x641   : > { %v10846_v30 = vmax.f32 %v10844_v15, %v10845_v11  ;;  %v10861_v24 = vmax.f32 %v10859_v27, %v10860_v12  ;;  %v20066_v2 = vmax.f32 %v11393_v26, %v9054_v29  ;;  %10066 = vst [vmem:[%s16118_s12 + $0xea0] sm:$0xff] %v9054_v29  ;;  %10074 = vst [vmem:[%s16118_s12 + $0xee0] sm:$0xff] %v20061_v55 }
 0x642   : > { %v10867_v44 = vmax.f32 %v10866_v53, %v9054_v29  ;;  %v10880_v4 = vmax.f32 %v10879_v19, %v20061_v55  ;;  %v11458_v16 = vmax.f32 %v20056_v32, %v20050_v51 }
 0x643   : > { %v10847_v20 = vrot.slane %v10846_v30, 2  ;;  %v10862_v28 = vrot.slane %v10861_v24, 1  ;;  %v11395_v41 = vmax.f32 %v20066_v2, %v20061_v55  ;;  %v14061_v49 = vpop.f32.mrb[22].mxu0  ;;  %v20076_v38 = vpop.f32.mrb[30].mxu1 }
 0x644   : > { %v10868_v50 = vmax.f32 %v10867_v44, %v14058_v62  ;;  %v10881_v5 = vmax.f32 %v10880_v4, %v20050_v51  ;;  %v20082_v57 = vmax.f32 %v11582_v10, %v14061_v49  ;;  %10069 = vst [vmem:[%s16118_s12 + $0xeb8] sm:$0xff] %v14061_v49  ;;  %v9064_v9 = vpop.f32.mrb[23].mxu0  ;;  %10077 = vst [vmem:[%s16118_s12 + $0xef8] sm:$0xff] %v20076_v38  ;;  %v20087_v48 = vpop.f32.mrb[31].mxu1 }
 0x645   : > { %v10848_v33 = vmax.f32 %v10846_v30, %v10847_v20  ;;  %v10863_v26 = vmax.f32 %v10861_v24, %v10862_v28  ;;  %v20092_v0 = vmax.f32 %v11519_v14, %v9064_v9  ;;  %10068 = vst [vmem:[%s16118_s12 + $0xeb0] sm:$0xff] %v9064_v9  ;;  %10076 = vst [vmem:[%s16118_s12 + $0xef0] sm:$0xff] %v20087_v48 }
 0x646   : > { %v10869_v23 = vmax.f32 %v10868_v50, %v9064_v9  ;;  %v10882_v8 = vmax.f32 %v10881_v5, %v20087_v48  ;;  %v11584_v60 = vmax.f32 %v20082_v57, %v20076_v38 }
 0x647   : > { %v10849_v39 = vrot.slane %v10848_v33, 1  ;;  %v11521_v59 = vmax.f32 %v20092_v0, %v20087_v48  ;;  %v14080_v10 = vpop.f32.mrb[24].mxu0  ;;  %v20106_v42 = vpop.f32.mrb[32].mxu1 }
 0x648   : > { %v10870_v36 = vmax.f32 %v10869_v23, %v14061_v49  ;;  %v10883_v13 = vmax.f32 %v10882_v8, %v20076_v38  ;;  %v20111_v15 = vmax.f32 %v11206_v63, %v14080_v10  ;;  %10079 = vst [vmem:[%s16118_s12 + $0xf08] sm:$0xff] %v14080_v10  ;;  %v9244_v14 = vpop.f32.mrb[25].mxu0  ;;  %10087 = vst [vmem:[%s16118_s12 + $0xf48] sm:$0xff] %v20106_v42  ;;  %v20116_v21 = vpop.f32.mrb[33].mxu1 }
 0x649   : > { %v10850_v47 = vmax.f32 %v10848_v33, %v10849_v39  ;;  %v20121_v11 = vmax.f32 %v11143_v6, %v9244_v14  ;;  %10078 = vst [vmem:[%s16118_s12 + $0xf00] sm:$0xff] %v9244_v14  ;;  %v10890_v7 = vmax.f32 %v9244_v14, %v14080_v10  ;;  %10086 = vst [vmem:[%s16118_s12 + $0xf40] sm:$0xff] %v20116_v21 }
 0x64a   : > { %v10871_v54 = vrot.slane %v10870_v36, 4  ;;  %v10884_v61 = vrot.slane %v10883_v13, 4  ;;  %v11208_v31 = vmax.f32 %v20111_v15, %v20106_v42  ;;  %v10903_v1 = vmax.f32 %v20116_v21, %v20106_v42 }
 0x64b   : > { %v20099_v34 = vsel %vm11006_vm2, %v10863_v26, %v10850_v47  ;;  %v11145_v63 = vmax.f32 %v20121_v11, %v20116_v21  ;;  %v14083_v25 = vpop.f32.mrb[26].mxu0  ;;  %v20132_v3 = vpop.f32.mrb[34].mxu1 }
 0x64c   : > { %v10872_v17 = vmax.f32 %v10870_v36, %v10871_v54  ;;  %v10885_v45 = vmax.f32 %v10883_v13, %v10884_v61  ;;  %v20137_v30 = vmax.f32 %v11332_v35, %v14083_v25  ;;  %10081 = vst [vmem:[%s16118_s12 + $0xf18] sm:$0xff] %v14083_v25  ;;  %v9254_v6 = vpop.f32.mrb[27].mxu0  ;;  %10089 = vst [vmem:[%s16118_s12 + $0xf58] sm:$0xff] %v20132_v3  ;;  %v20142_v18 = vpop.f32.mrb[35].mxu1 }
 0x64d   : > { %v20147_v20 = vmax.f32 %v11269_v46, %v9254_v6  ;;  %10080 = vst [vmem:[%s16118_s12 + $0xf10] sm:$0xff] %v9254_v6  ;;  %v10891_v56 = vmax.f32 %v10890_v7, %v9254_v6  ;;  %10088 = vst [vmem:[%s16118_s12 + $0xf50] sm:$0xff] %v20142_v18  ;;  %v10904_v22 = vmax.f32 %v10903_v1, %v20142_v18 }
 0x64e   : > { %v10873_v27 = vrot.slane %v10872_v17, 2  ;;  %v10886_v43 = vrot.slane %v10885_v45, 2  ;;  %v11334_v52 = vmax.f32 %v20137_v30, %v20132_v3 }
 0x64f   : > { %v11271_v35 = vmax.f32 %v20147_v20, %v20142_v18  ;;  %v14086_v58 = vpop.f32.mrb[28].mxu0  ;;  %v10892_v40 = vmax.f32 %v10891_v56, %v14083_v25  ;;  %v20157_v33 = vpop.f32.mrb[36].mxu1  ;;  %v10905_v51 = vmax.f32 %v10904_v22, %v20132_v3 }
 0x650   : > { %v10874_v37 = vmax.f32 %v10872_v17, %v10873_v27  ;;  %v10887_v12 = vmax.f32 %v10885_v45, %v10886_v43  ;;  %v20159_v46 = vmax.f32 %v11458_v16, %v14086_v58  ;;  %10083 = vst [vmem:[%s16118_s12 + $0xf28] sm:$0xff] %v14086_v58  ;;  %v9264_v62 = vpop.f32.mrb[29].mxu0  ;;  %10091 = vst [vmem:[%s16118_s12 + $0xf68] sm:$0xff] %v20157_v33  ;;  %v20164_v53 = vpop.f32.mrb[37].mxu1 }
 0x651   : > { %v20170_v32 = vmax.f32 %v11395_v41, %v9264_v62  ;;  %10082 = vst [vmem:[%s16118_s12 + $0xf20] sm:$0xff] %v9264_v62  ;;  %v10893_v29 = vmax.f32 %v10892_v40, %v9264_v62  ;;  %10090 = vst [vmem:[%s16118_s12 + $0xf60] sm:$0xff] %v20164_v53  ;;  %v10906_v44 = vmax.f32 %v10905_v51, %v20164_v53 }
 0x652   : > { %v10875_v19 = vrot.slane %v10874_v37, 1  ;;  %v10888_v24 = vrot.slane %v10887_v12, 1  ;;  %v11460_v39 = vmax.f32 %v20159_v46, %v20157_v33 }
 0x653   : > { %v11397_v16 = vmax.f32 %v20170_v32, %v20164_v53  ;;  %v14089_v55 = vpop.f32.mrb[30].mxu0  ;;  %v10894_v2 = vmax.f32 %v10893_v29, %v14086_v58  ;;  %v20180_v47 = vpop.f32.mrb[38].mxu1  ;;  %v10907_v5 = vmax.f32 %v10906_v44, %v20157_v33 }
 0x654   : > { %v10876_v4 = vmax.f32 %v10874_v37, %v10875_v19  ;;  %v10889_v28 = vmax.f32 %v10887_v12, %v10888_v24  ;;  %v20185_v41 = vmax.f32 %v11584_v60, %v14089_v55  ;;  %10085 = vst [vmem:[%s16118_s12 + $0xf38] sm:$0xff] %v14089_v55  ;;  %v9274_v49 = vpop.f32.mrb[31].mxu0  ;;  %10093 = vst [vmem:[%s16118_s12 + $0xf78] sm:$0xff] %v20180_v47  ;;  %v20190_v50 = vpop.f32.mrb[39].mxu1 }
 0x655   : > { %v20198_v9 = vmax.f32 %v11521_v59, %v9274_v49  ;;  %10084 = vst [vmem:[%s16118_s12 + $0xf30] sm:$0xff] %v9274_v49  ;;  %v10895_v38 = vmax.f32 %v10894_v2, %v9274_v49  ;;  %10092 = vst [vmem:[%s16118_s12 + $0xf70] sm:$0xff] %v20190_v50  ;;  %v10908_v8 = vmax.f32 %v10907_v5, %v20190_v50 }
 0x656   : > { %v11063_v26 = vsel %vm11008_vm3, %v10876_v4, %v20099_v34  ;;  %v11586_v23 = vmax.f32 %v20185_v41, %v20180_v47 }
 0x657   : > { %v20204_v57 = vsel %vm11010_vm4, %v10889_v28, %v11063_v26  ;;  %v10896_v34 = vmax.f32 %v10895_v38, %v14089_v55  ;;  %v11523_v48 = vmax.f32 %v20198_v9, %v20190_v50  ;;  %v14108_v0 = vpop.f32.mrb[32].mxu0  ;;  %v14122_v60 = vpop.f32.mrb[40].mxu1  ;;  %v10909_v36 = vmax.f32 %v10908_v8, %v20180_v47 }
 0x658   : > { %v11209_v59 = vmax.f32 %v11208_v31, %v14108_v0  ;;  %10095 = vst [vmem:[%s16118_s12 + $0xf88] sm:$0xff] %v14108_v0  ;;  %v9454_v13 = vpop.f32.mrb[33].mxu0  ;;  %10103 = vst [vmem:[%s16118_s12 + $0xfc8] sm:$0xff] %v14122_v60  ;;  %v9559_v10 = vpop.f32.mrb[41].mxu1 }
 0x659   : > { %v10897_v14 = vrot.slane %v10896_v34, 4  ;;  %v11146_v54 = vmax.f32 %v11145_v63, %v9454_v13  ;;  %10094 = vst [vmem:[%s16118_s12 + $0xf80] sm:$0xff] %v9454_v13  ;;  %v10916_v61 = vmax.f32 %v9454_v13, %v14108_v0  ;;  %10102 = vst [vmem:[%s16118_s12 + $0xfc0] sm:$0xff] %v9559_v10  ;;  %v10929_v42 = vmax.f32 %v9559_v10, %v14122_v60 }
 0x65a   : > { %v10910_v15 = vrot.slane %v10909_v36, 4  ;;  %v11210_v7 = vmax.f32 %v11209_v59, %v14122_v60 }
 0x65b   : > { %v10898_v31 = vmax.f32 %v10896_v34, %v10897_v14  ;;  %v11147_v21 = vmax.f32 %v11146_v54, %v9559_v10  ;;  %v14111_v11 = vpop.f32.mrb[34].mxu0  ;;  %v14125_v1 = vpop.f32.mrb[42].mxu1 }
 0x65c   : > { %v10911_v17 = vmax.f32 %v10909_v36, %v10910_v15  ;;  %11590 = vst [vmem:[%s20226_s29 + $0x8] sm:$0xff] %v11210_v7  ;;  %v11335_v45 = vmax.f32 %v11334_v52, %v14111_v11  ;;  %10097 = vst [vmem:[%s16118_s12 + $0xf98] sm:$0xff] %v14111_v11  ;;  %v9464_v63 = vpop.f32.mrb[35].mxu0  ;;  %v9569_v25 = vpop.f32.mrb[43].mxu1 }
 0x65d   : > { %10105 = vst [vmem:[%s16118_s12 + $0xfd8] sm:$0xff] %v14125_v1  ;;  %v10899_v6 = vrot.slane %v10898_v31, 2  ;;  %11589 = vst [vmem:[%s20226_s29] sm:$0xff] %v11147_v21  ;;  %v11272_v27 = vmax.f32 %v11271_v35, %v9464_v63  ;;  %v10917_v43 = vmax.f32 %v10916_v61, %v9464_v63  ;;  %v10930_v56 = vmax.f32 %v10929_v42, %v9569_v25 }
 0x65e   : > { %10096 = vst [vmem:[%s16118_s12 + $0xf90] sm:$0xff] %v9464_v63  ;;  %10104 = vst [vmem:[%s16118_s12 + $0xfd0] sm:$0xff] %v9569_v25  ;;  %v10912_v22 = vrot.slane %v10911_v17, 2  ;;  %v11336_v3 = vmax.f32 %v11335_v45, %v14125_v1 }
 0x65f   : > { %v10900_v30 = vmax.f32 %v10898_v31, %v10899_v6  ;;  %v11273_v52 = vmax.f32 %v11272_v27, %v9569_v25  ;;  %v14114_v37 = vpop.f32.mrb[36].mxu0  ;;  %v10918_v12 = vmax.f32 %v10917_v43, %v14111_v11  ;;  %v14128_v58 = vpop.f32.mrb[44].mxu1  ;;  %v10931_v40 = vmax.f32 %v10930_v56, %v14125_v1 }
 0x660   : > { %v10913_v62 = vmax.f32 %v10911_v17, %v10912_v22  ;;  %11592 = vst [vmem:[%s20226_s29 + $0x18] sm:$0xff] %v11336_v3  ;;  %v11461_v18 = vmax.f32 %v11460_v39, %v14114_v37  ;;  %10099 = vst [vmem:[%s16118_s12 + $0xfa8] sm:$0xff] %v14114_v37  ;;  %v9474_v20 = vpop.f32.mrb[37].mxu0  ;;  %v9579_v35 = vpop.f32.mrb[45].mxu1 }
 0x661   : > { %10107 = vst [vmem:[%s16118_s12 + $0xfe8] sm:$0xff] %v14128_v58  ;;  %v10901_v51 = vrot.slane %v10900_v30, 1  ;;  %11591 = vst [vmem:[%s20226_s29 + $0x10] sm:$0xff] %v11273_v52  ;;  %v11398_v19 = vmax.f32 %v11397_v16, %v9474_v20  ;;  %v10919_v24 = vmax.f32 %v10918_v12, %v9474_v20  ;;  %v10932_v29 = vmax.f32 %v10931_v40, %v9579_v35 }
 0x662   : > { %10098 = vst [vmem:[%s16118_s12 + $0xfa0] sm:$0xff] %v9474_v20  ;;  %10106 = vst [vmem:[%s16118_s12 + $0xfe0] sm:$0xff] %v9579_v35  ;;  %v10914_v44 = vrot.slane %v10913_v62, 1  ;;  %v11462_v33 = vmax.f32 %v11461_v18, %v14128_v58 }
 0x663   : > { %v10902_v46 = vmax.f32 %v10900_v30, %v10901_v51  ;;  %v11399_v39 = vmax.f32 %v11398_v19, %v9579_v35  ;;  %v14117_v4 = vpop.f32.mrb[38].mxu0  ;;  %v10920_v28 = vmax.f32 %v10919_v24, %v14114_v37  ;;  %v14131_v55 = vpop.f32.mrb[46].mxu1  ;;  %v10933_v2 = vmax.f32 %v10932_v29, %v14128_v58 }
 0x664   : > { %v10915_v49 = vmax.f32 %v10913_v62, %v10914_v44  ;;  %11594 = vst [vmem:[%s20226_s29 + $0x28] sm:$0xff] %v11462_v33  ;;  %v11587_v53 = vmax.f32 %v11586_v23, %v14117_v4  ;;  %10101 = vst [vmem:[%s16118_s12 + $0xfb8] sm:$0xff] %v14117_v4  ;;  %v9484_v32 = vpop.f32.mrb[39].mxu0  ;;  %v9589_v16 = vpop.f32.mrb[47].mxu1 }
 0x665   : > { %10109 = vst [vmem:[%s16118_s12 + $0xff8] sm:$0xff] %v14131_v55  ;;  %v11065_v5 = vsel %vm11012_vm5, %v10902_v46, %v20204_v57  ;;  %11593 = vst [vmem:[%s20226_s29 + $0x20] sm:$0xff] %v11399_v39  ;;  %v11524_v26 = vmax.f32 %v11523_v48, %v9484_v32  ;;  %v10921_v38 = vmax.f32 %v10920_v28, %v9484_v32 }
 0x666   : > { %10100 = vst [vmem:[%s16118_s12 + $0xfb0] sm:$0xff] %v9484_v32  ;;  %10108 = vst [vmem:[%s16118_s12 + $0xff0] sm:$0xff] %v9589_v16  ;;  %v10934_v8 = vmax.f32 %v10933_v2, %v9589_v16  ;;  %v11066_v47 = vsel %vm11014_vm6, %v10915_v49, %v11065_v5  ;;  %v11588_v41 = vmax.f32 %v11587_v53, %v14131_v55 }
 0x667   : > { %v10922_v23 = vmax.f32 %v10921_v38, %v14117_v4  ;;  %v11525_v34 = vmax.f32 %v11524_v26, %v9589_v16 }
 0x668   : > { %v10935_v0 = vmax.f32 %v10934_v8, %v14131_v55  ;;  %11596 = vst [vmem:[%s20226_s29 + $0x38] sm:$0xff] %v11588_v41 }
 0x669   : > { %v10923_v60 = vrot.slane %v10922_v23, 4  ;;  %11595 = vst [vmem:[%s20226_s29 + $0x30] sm:$0xff] %v11525_v34 }
 0x66a   : > { %v10936_v36 = vrot.slane %v10935_v0, 4 }
 0x66b   : > { %v10924_v57 = vmax.f32 %v10922_v23, %v10923_v60 }
 0x66c   : > { %v10937_v59 = vmax.f32 %v10935_v0, %v10936_v36 }
 0x66d   : > { %v10925_v13 = vrot.slane %v10924_v57, 2 }
 0x66e   : > { %v10938_v50 = vrot.slane %v10937_v59, 2 }
 0x66f   : > { %v10926_v9 = vmax.f32 %v10924_v57, %v10925_v13 }
 0x670   : > { %v10939_v48 = vmax.f32 %v10937_v59, %v10938_v50 }
 0x671   : > { %v10927_v10 = vrot.slane %v10926_v9, 1 }
 0x672   : > { %v10940_v14 = vrot.slane %v10939_v48, 1 }
 0x673   : > { %v10928_v54 = vmax.f32 %v10926_v9, %v10927_v10 }
 0x674   : > { %v10941_v61 = vmax.f32 %v10939_v48, %v10940_v14 }
 0x675   : > { %v11067_v42 = vsel %vm11016_vm7, %v10928_v54, %v11066_v47 }
 0x676   : > { %v11068_v15 = vsel %vm11018_vm8, %v10941_v61, %v11067_v42 }
 0x677   : > { %11084 = vst [vmem:[%s16819_s24 + $0x38] sm:$0xff] %v11068_v15 }
 0x678 PF: > { %s20413_s13 = sld [smem:[#allocation14_spill]]  ;;  %s20414_s12 = sld [smem:[#allocation12_spill]] }
 0x679   : > { %s20415_s18 = sld [smem:[#allocation17_spill]] }
 0x67e   : > { %p14166_p8 = scmp.ge.s32.totalorder %s20413_s13, 2  ;;  %s11646_s17 = sand.u32 1, %s20414_s12  }
 0x67f   : > { %p20416_p1 = scmp.ne.s32.totalorder %s20415_s18, 0  ;;  %s11647_s11 = scalar_lea.sflag [#allocation4], %s11646_s17 }
 0x681   : > { %p14157_p6 = pnand %p14166_p8, %p20416_p1 }
 0x683   : > { %14437 = dma.done.wait (!%p14157_p6), %s11647_s11, 16  }
 0x684   : > { %14439 = vsyncadd (!%p14157_p6), %s11647_s11, 4294967280  ;;  %s20417_s16 = sld [smem:[#allocation15_spill]]  ;;  %s20418_s27 = sld [smem:[#allocation13_spill]] }
 0x685   : > { %s20419_s15 = sld [smem:[#allocation16_spill]]  ;;  %s20420_s13 = smov %s14446_s14 }
 0x68a   : > { %p23_p9 = scmp.ge.s32.totalorder %s20417_s16, 4   ;;  %s20421_s14 = smov %s20418_s27 }
 0x68c   :  { %25 = sbr.rel (!%p23_p9) target bundleno = 5 (0x5), region = 132 }
 0x693   :  { %11675 = vsyncpa [#allocation3], 1 }
 0x694   :  { %11677 = vsyncpa [#allocation3 + $0x1], 1 }
 0x695   :  { %11678 = vsyncpa [#allocation6], 1 }
 0x696   :  { %11679 = vsyncpa [#allocation4], 1 }
 0x697   :  { %11681 = vsyncpa [#allocation4 + $0x1], 1 }

</bundles_post_ra>
